<compile_context>
chip_gen: v5e
topology: v5e:2x2
jax: 0.10.0
libtpu: 0.0.40
codegen_flags: <defaults>
</compile_context>

<pallas_src>
import jax
import jax.numpy as jnp
from jax.experimental import pallas as pl
from jax.experimental.pallas import tpu as pltpu

# Module dimensions from DAE_Adv.py
Z_DIM = 2
N0 = 150
N = 600
X_DIM = 784
LEAKY_SLOPE = 0.2

# Lane-padded (multiple of 128) widths used inside the kernel.
N0_PAD = 256
N_PAD = 640
X_PAD = 896

# Padded [in, out] shapes for each of the 6 Linear layers.
PAD_DIMS = [
    (Z_DIM, N0_PAD),
    (N0_PAD, N_PAD),
    (N_PAD, N_PAD),
    (N_PAD, N_PAD),
    (N_PAD, N_PAD),
    (N_PAD, X_PAD),
]


def _round_up(x, m):
    return ((x + m - 1) // m) * m


def _leaky_relu(h):
    return jnp.where(h >= 0, h, LEAKY_SLOPE * h)


def decoder_kernel(x_ref,
                   w1_ref, b1_ref,
                   w2_ref, b2_ref,
                   w3_ref, b3_ref,
                   w4_ref, b4_ref,
                   w5_ref, b5_ref,
                   w6_ref, b6_ref,
                   o_ref):
    x = x_ref[...].astype(jnp.float32)                    # [bm, 2]

    # Layer 1: K=2 matmul done as two broadcast FMAs on the VPU
    # (an MXU pass would pad K from 2 to 128 -> ~98% wasted systolic work).
    w1 = w1_ref[...].astype(jnp.float32)                  # [2, N0_PAD]
    h = x[:, 0:1] * w1[0:1, :] + x[:, 1:2] * w1[1:2, :] + b1_ref[...]
    h = _leaky_relu(h)                                    # Dropout = identity (eval)

    def dense(h, w_ref, b_ref):
        # bf16 x bf16 MXU matmul with f32 accumulation.
        return jnp.dot(h.astype(jnp.bfloat16), w_ref[...],
                       preferred_element_type=jnp.float32) + b_ref[...]

    h = _leaky_relu(dense(h, w2_ref, b2_ref))
    h = _leaky_relu(dense(h, w3_ref, b3_ref))
    h = _leaky_relu(dense(h, w4_ref, b4_ref))
    h = _leaky_relu(dense(h, w5_ref, b5_ref))
    h = dense(h, w6_ref, b6_ref)

    # Sigmoid: exp on the EUP, approx reciprocal on the EUP -> frees VALU slots.
    o_ref[...] = pl.reciprocal(1.0 + jnp.exp(-h), approx=True).astype(o_ref.dtype)


def _pad_to(arr, shape):
    pads = [(0, s - d) for d, s in zip(arr.shape, shape)]
    return jnp.pad(arr, pads)


def pack_params(params):
    """Pad to lane-aligned widths; weights -> bf16, biases -> f32 [1, out_pad]."""
    packed = []
    for (w, b), (din, dout) in zip(params, PAD_DIMS):
        wp = _pad_to(w, (din, dout)).astype(jnp.bfloat16)
        bp = _pad_to(b, (1, dout)).astype(jnp.float32)
        packed.append((wp, bp))
    return packed


def decoder_net_forward(x, params, *, bm=256):
    """x: [B, Z_DIM] float32.  params: list of (W [in,out], b [1,out]) f32 tuples."""
    B = x.shape[0]
    packed = pack_params(params)

    # Batch tile: big (256) for MXU occupancy, shrunk (to a multiple of 8) for
    # small batches so we don't over-pad.  Batch is zero-padded to a multiple
    # of the tile; padded rows are sliced off at the end.
    bm = min(bm, _round_up(B, 8))
    B_pad = _round_up(B, bm)
    if B_pad != B:
        x = jnp.pad(x, ((0, B_pad - B), (0, 0)))

    flat = []
    in_specs = [pl.BlockSpec((bm, Z_DIM), lambda i: (i, 0))]
    for (w, b) in packed:
        flat.append(w)
        flat.append(b)
        in_specs.append(pl.BlockSpec(w.shape, lambda i: (0, 0)))   # resident weights
        in_specs.append(pl.BlockSpec(b.shape, lambda i: (0, 0)))

    out_spec = pl.BlockSpec((bm, X_PAD), lambda i: (i, 0))          # lane-dense output

    out = pl.pallas_call(
        decoder_kernel,
        out_shape=jax.ShapeDtypeStruct((B_pad, X_PAD), jnp.float32),
        grid_spec=pltpu.PrefetchScalarGridSpec(
            num_scalar_prefetch=0,
            grid=(B_pad // bm,),
            in_specs=in_specs,
            out_specs=out_spec,
        ),
        compiler_params=pltpu.CompilerParams(
            dimension_semantics=("parallel",),   # megacore / v7x 2-TC sharding
            vmem_limit_bytes=48 << 20,           # < v7x 64 MiB physical; > v5e 16 MiB default
        ),
    )(x, *flat)

    return out[:B, :X_DIM]


def init_params(key):
    """Deterministic init mimicking nn.Linear default (uniform +/- 1/sqrt(fan_in)).

    Stored as (W [in, out], b [1, out]) in float32 (transpose of PyTorch layout).
    """
    dims = [(Z_DIM, N0), (N0, N), (N, N), (N, N), (N, N), (N, X_DIM)]
    params = []
    for (fan_in, fan_out) in dims:
        key, kw, kb = jax.random.split(key, 3)
        bound = 1.0 / (fan_in ** 0.5)
        w = jax.random.uniform(kw, (fan_in, fan_out), jnp.float32, -bound, bound)
        b = jax.random.uniform(kb, (1, fan_out), jnp.float32, -bound, bound)
        params.append((w, b))
    return params


def reference_forward(x, params):
    """Pure-JAX reference mirroring the kernel's precision choices."""
    h = x.astype(jnp.float32)

    # Layer 1: same VPU-style broadcast FMA with bf16-rounded weights.
    w1, b1 = params[0]
    w1f = w1.astype(jnp.bfloat16).astype(jnp.float32)
    h = h[:, 0:1] * w1f[0:1, :] + h[:, 1:2] * w1f[1:2, :] + b1
    h = jnp.where(h >= 0, h, LEAKY_SLOPE * h)

    for i, (w, b) in enumerate(params[1:], start=1):
        h = jnp.dot(h.astype(jnp.bfloat16), w.astype(jnp.bfloat16),
                    preferred_element_type=jnp.float32) + b
        if i < len(params) - 1:
            h = jnp.where(h >= 0, h, LEAKY_SLOPE * h)
        else:
            h = jax.nn.sigmoid(h)
    return h


if __name__ == "__main__":
    key = jax.random.PRNGKey(0)
    key, kx = jax.random.split(key)

    B = 16  # small batch for the smoke test
    x = jax.random.normal(kx, (B, Z_DIM), jnp.float32)
    params = init_params(key)

    out = decoder_net_forward(x, params)
    out = jax.block_until_ready(out)

    ref = reference_forward(x, params)
    assert out.shape == (B, X_DIM), out.shape
    assert jnp.allclose(out, ref, atol=2e-2, rtol=2e-2), "mismatch vs reference"

    print("KERNEL_OK")
</pallas_src>

<mosaic_0001>
module attributes {stable_mosaic.version = 11 : i64} {
  func.func @decoder_kernel(%arg0: i32, %arg1: memref<16x2xf32, #tpu.memory_space<vmem>>, %arg2: memref<2x256xbf16, #tpu.memory_space<vmem>>, %arg3: memref<1x256xf32, #tpu.memory_space<vmem>>, %arg4: memref<256x640xbf16, #tpu.memory_space<vmem>>, %arg5: memref<1x640xf32, #tpu.memory_space<vmem>>, %arg6: memref<640x640xbf16, #tpu.memory_space<vmem>>, %arg7: memref<1x640xf32, #tpu.memory_space<vmem>>, %arg8: memref<640x640xbf16, #tpu.memory_space<vmem>>, %arg9: memref<1x640xf32, #tpu.memory_space<vmem>>, %arg10: memref<640x640xbf16, #tpu.memory_space<vmem>>, %arg11: memref<1x640xf32, #tpu.memory_space<vmem>>, %arg12: memref<640x896xbf16, #tpu.memory_space<vmem>>, %arg13: memref<1x896xf32, #tpu.memory_space<vmem>>, %arg14: memref<16x896xf32, #tpu.memory_space<vmem>>) attributes {dimension_semantics = [#tpu.dimension_semantics<parallel>], iteration_bounds = array<i64: 1>, scalar_prefetch = 0 : i64, scratch_operands = 0 : i64, tpu.core_type = #tpu.core_type<tc>, window_params = [{transform_indices = @transform_0, window_bounds = array<i64: 16, 2>}, {pipeline_mode = #tpu.pipeline_mode<synchronous>, transform_indices = @transform_1, window_bounds = array<i64: 2, 256>}, {pipeline_mode = #tpu.pipeline_mode<synchronous>, transform_indices = @transform_2, window_bounds = array<i64: 1, 256>}, {pipeline_mode = #tpu.pipeline_mode<synchronous>, transform_indices = @transform_3, window_bounds = array<i64: 256, 640>}, {pipeline_mode = #tpu.pipeline_mode<synchronous>, transform_indices = @transform_4, window_bounds = array<i64: 1, 640>}, {pipeline_mode = #tpu.pipeline_mode<synchronous>, transform_indices = @transform_5, window_bounds = array<i64: 640, 640>}, {pipeline_mode = #tpu.pipeline_mode<synchronous>, transform_indices = @transform_6, window_bounds = array<i64: 1, 640>}, {pipeline_mode = #tpu.pipeline_mode<synchronous>, transform_indices = @transform_7, window_bounds = array<i64: 640, 640>}, {pipeline_mode = #tpu.pipeline_mode<synchronous>, transform_indices = @transform_8, window_bounds = array<i64: 1, 640>}, {pipeline_mode = #tpu.pipeline_mode<synchronous>, transform_indices = @transform_9, window_bounds = array<i64: 640, 640>}, {pipeline_mode = #tpu.pipeline_mode<synchronous>, transform_indices = @transform_10, window_bounds = array<i64: 1, 640>}, {pipeline_mode = #tpu.pipeline_mode<synchronous>, transform_indices = @transform_11, window_bounds = array<i64: 640, 896>}, {pipeline_mode = #tpu.pipeline_mode<synchronous>, transform_indices = @transform_12, window_bounds = array<i64: 1, 896>}, {transform_indices = @transform_13, window_bounds = array<i64: 16, 896>}]} {
    %c0 = arith.constant 0 : index
    %c0_0 = arith.constant 0 : index
    %0 = vector.load %arg1[%c0, %c0_0] : memref<16x2xf32, #tpu.memory_space<vmem>>, vector<16x2xf32>
    %c0_1 = arith.constant 0 : index
    %c0_2 = arith.constant 0 : index
    %1 = vector.load %arg2[%c0_1, %c0_2] : memref<2x256xbf16, #tpu.memory_space<vmem>>, vector<2x256xbf16>
    %2 = arith.extf %1 : vector<2x256xbf16> to vector<2x256xf32>
    %3 = vector.extract_strided_slice %0 {offsets = [0, 0], sizes = [16, 1], strides = [1, 1]} : vector<16x2xf32> to vector<16x1xf32>
    %4 = vector.extract_strided_slice %2 {offsets = [0, 0], sizes = [1, 256], strides = [1, 1]} : vector<2x256xf32> to vector<1x256xf32>
    %5 = vector.broadcast %3 : vector<16x1xf32> to vector<16x256xf32>
    %6 = vector.broadcast %4 : vector<1x256xf32> to vector<16x256xf32>
    %7 = arith.mulf %5, %6 : vector<16x256xf32>
    %8 = vector.extract_strided_slice %0 {offsets = [0, 1], sizes = [16, 1], strides = [1, 1]} : vector<16x2xf32> to vector<16x1xf32>
    %9 = vector.extract_strided_slice %2 {offsets = [1, 0], sizes = [1, 256], strides = [1, 1]} : vector<2x256xf32> to vector<1x256xf32>
    %10 = vector.broadcast %8 : vector<16x1xf32> to vector<16x256xf32>
    %11 = vector.broadcast %9 : vector<1x256xf32> to vector<16x256xf32>
    %12 = arith.mulf %10, %11 : vector<16x256xf32>
    %13 = arith.addf %7, %12 : vector<16x256xf32>
    %c0_3 = arith.constant 0 : index
    %c0_4 = arith.constant 0 : index
    %14 = vector.load %arg3[%c0_3, %c0_4] : memref<1x256xf32, #tpu.memory_space<vmem>>, vector<1x256xf32>
    %15 = vector.broadcast %14 : vector<1x256xf32> to vector<16x256xf32>
    %16 = arith.addf %13, %15 : vector<16x256xf32>
    %cst = arith.constant 0.000000e+00 : f32
    %17 = vector.broadcast %cst : f32 to vector<16x256xf32>
    %18 = arith.cmpf oge, %16, %17 : vector<16x256xf32>
    %cst_5 = arith.constant 2.000000e-01 : f32
    %19 = vector.broadcast %cst_5 : f32 to vector<16x256xf32>
    %20 = arith.mulf %19, %16 : vector<16x256xf32>
    %21 = arith.select %18, %16, %20 : vector<16x256xi1>, vector<16x256xf32>
    %22 = arith.truncf %21 : vector<16x256xf32> to vector<16x256xbf16>
    %c0_6 = arith.constant 0 : index
    %c0_7 = arith.constant 0 : index
    %23 = vector.load %arg4[%c0_6, %c0_7] : memref<256x640xbf16, #tpu.memory_space<vmem>>, vector<256x640xbf16>
    %cst_8 = arith.constant dense<0.000000e+00> : vector<16x640xf32>
    %24 = tpu.matmul %22, %23, %cst_8 {dimension_numbers = #tpu.dot_dimension_numbers<[1], [0], [0], [1], [0, 0, 1, 1], [], []>} : vector<16x256xbf16>, vector<256x640xbf16>, vector<16x640xf32> -> vector<16x640xf32>
    %c0_9 = arith.constant 0 : index
    %c0_10 = arith.constant 0 : index
    %25 = vector.load %arg5[%c0_9, %c0_10] : memref<1x640xf32, #tpu.memory_space<vmem>>, vector<1x640xf32>
    %26 = vector.broadcast %25 : vector<1x640xf32> to vector<16x640xf32>
    %27 = arith.addf %24, %26 : vector<16x640xf32>
    %cst_11 = arith.constant 0.000000e+00 : f32
    %28 = vector.broadcast %cst_11 : f32 to vector<16x640xf32>
    %29 = arith.cmpf oge, %27, %28 : vector<16x640xf32>
    %cst_12 = arith.constant 2.000000e-01 : f32
    %30 = vector.broadcast %cst_12 : f32 to vector<16x640xf32>
    %31 = arith.mulf %30, %27 : vector<16x640xf32>
    %32 = arith.select %29, %27, %31 : vector<16x640xi1>, vector<16x640xf32>
    %33 = arith.truncf %32 : vector<16x640xf32> to vector<16x640xbf16>
    %c0_13 = arith.constant 0 : index
    %c0_14 = arith.constant 0 : index
    %34 = vector.load %arg6[%c0_13, %c0_14] : memref<640x640xbf16, #tpu.memory_space<vmem>>, vector<640x640xbf16>
    %cst_15 = arith.constant dense<0.000000e+00> : vector<16x640xf32>
    %35 = tpu.matmul %33, %34, %cst_15 {dimension_numbers = #tpu.dot_dimension_numbers<[1], [0], [0], [1], [0, 0, 1, 1], [], []>} : vector<16x640xbf16>, vector<640x640xbf16>, vector<16x640xf32> -> vector<16x640xf32>
    %c0_16 = arith.constant 0 : index
    %c0_17 = arith.constant 0 : index
    %36 = vector.load %arg7[%c0_16, %c0_17] : memref<1x640xf32, #tpu.memory_space<vmem>>, vector<1x640xf32>
    %37 = vector.broadcast %36 : vector<1x640xf32> to vector<16x640xf32>
    %38 = arith.addf %35, %37 : vector<16x640xf32>
    %cst_18 = arith.constant 0.000000e+00 : f32
    %39 = vector.broadcast %cst_18 : f32 to vector<16x640xf32>
    %40 = arith.cmpf oge, %38, %39 : vector<16x640xf32>
    %cst_19 = arith.constant 2.000000e-01 : f32
    %41 = vector.broadcast %cst_19 : f32 to vector<16x640xf32>
    %42 = arith.mulf %41, %38 : vector<16x640xf32>
    %43 = arith.select %40, %38, %42 : vector<16x640xi1>, vector<16x640xf32>
    %44 = arith.truncf %43 : vector<16x640xf32> to vector<16x640xbf16>
    %c0_20 = arith.constant 0 : index
    %c0_21 = arith.constant 0 : index
    %45 = vector.load %arg8[%c0_20, %c0_21] : memref<640x640xbf16, #tpu.memory_space<vmem>>, vector<640x640xbf16>
    %cst_22 = arith.constant dense<0.000000e+00> : vector<16x640xf32>
    %46 = tpu.matmul %44, %45, %cst_22 {dimension_numbers = #tpu.dot_dimension_numbers<[1], [0], [0], [1], [0, 0, 1, 1], [], []>} : vector<16x640xbf16>, vector<640x640xbf16>, vector<16x640xf32> -> vector<16x640xf32>
    %c0_23 = arith.constant 0 : index
    %c0_24 = arith.constant 0 : index
    %47 = vector.load %arg9[%c0_23, %c0_24] : memref<1x640xf32, #tpu.memory_space<vmem>>, vector<1x640xf32>
    %48 = vector.broadcast %47 : vector<1x640xf32> to vector<16x640xf32>
    %49 = arith.addf %46, %48 : vector<16x640xf32>
    %cst_25 = arith.constant 0.000000e+00 : f32
    %50 = vector.broadcast %cst_25 : f32 to vector<16x640xf32>
    %51 = arith.cmpf oge, %49, %50 : vector<16x640xf32>
    %cst_26 = arith.constant 2.000000e-01 : f32
    %52 = vector.broadcast %cst_26 : f32 to vector<16x640xf32>
    %53 = arith.mulf %52, %49 : vector<16x640xf32>
    %54 = arith.select %51, %49, %53 : vector<16x640xi1>, vector<16x640xf32>
    %55 = arith.truncf %54 : vector<16x640xf32> to vector<16x640xbf16>
    %c0_27 = arith.constant 0 : index
    %c0_28 = arith.constant 0 : index
    %56 = vector.load %arg10[%c0_27, %c0_28] : memref<640x640xbf16, #tpu.memory_space<vmem>>, vector<640x640xbf16>
    %cst_29 = arith.constant dense<0.000000e+00> : vector<16x640xf32>
    %57 = tpu.matmul %55, %56, %cst_29 {dimension_numbers = #tpu.dot_dimension_numbers<[1], [0], [0], [1], [0, 0, 1, 1], [], []>} : vector<16x640xbf16>, vector<640x640xbf16>, vector<16x640xf32> -> vector<16x640xf32>
    %c0_30 = arith.constant 0 : index
    %c0_31 = arith.constant 0 : index
    %58 = vector.load %arg11[%c0_30, %c0_31] : memref<1x640xf32, #tpu.memory_space<vmem>>, vector<1x640xf32>
    %59 = vector.broadcast %58 : vector<1x640xf32> to vector<16x640xf32>
    %60 = arith.addf %57, %59 : vector<16x640xf32>
    %cst_32 = arith.constant 0.000000e+00 : f32
    %61 = vector.broadcast %cst_32 : f32 to vector<16x640xf32>
    %62 = arith.cmpf oge, %60, %61 : vector<16x640xf32>
    %cst_33 = arith.constant 2.000000e-01 : f32
    %63 = vector.broadcast %cst_33 : f32 to vector<16x640xf32>
    %64 = arith.mulf %63, %60 : vector<16x640xf32>
    %65 = arith.select %62, %60, %64 : vector<16x640xi1>, vector<16x640xf32>
    %66 = arith.truncf %65 : vector<16x640xf32> to vector<16x640xbf16>
    %c0_34 = arith.constant 0 : index
    %c0_35 = arith.constant 0 : index
    %67 = vector.load %arg12[%c0_34, %c0_35] : memref<640x896xbf16, #tpu.memory_space<vmem>>, vector<640x896xbf16>
    %cst_36 = arith.constant dense<0.000000e+00> : vector<16x896xf32>
    %68 = tpu.matmul %66, %67, %cst_36 {dimension_numbers = #tpu.dot_dimension_numbers<[1], [0], [0], [1], [0, 0, 1, 1], [], []>} : vector<16x640xbf16>, vector<640x896xbf16>, vector<16x896xf32> -> vector<16x896xf32>
    %c0_37 = arith.constant 0 : index
    %c0_38 = arith.constant 0 : index
    %69 = vector.load %arg13[%c0_37, %c0_38] : memref<1x896xf32, #tpu.memory_space<vmem>>, vector<1x896xf32>
    %70 = vector.broadcast %69 : vector<1x896xf32> to vector<16x896xf32>
    %71 = arith.addf %68, %70 : vector<16x896xf32>
    %cst_39 = arith.constant 0.000000e+00 : f32
    %72 = vector.broadcast %cst_39 : f32 to vector<16x896xf32>
    %73 = arith.subf %72, %71 : vector<16x896xf32>
    %74 = math.exp %73 : vector<16x896xf32>
    %cst_40 = arith.constant 1.000000e+00 : f32
    %75 = vector.broadcast %cst_40 : f32 to vector<16x896xf32>
    %76 = arith.addf %75, %74 : vector<16x896xf32>
    %77 = tpu.reciprocal %76 {approx = true} : vector<16x896xf32> -> vector<16x896xf32>
    %c0_41 = arith.constant 0 : index
    %c0_42 = arith.constant 0 : index
    %78 = vector.load %arg14[%c0_41, %c0_42] : memref<16x896xf32, #tpu.memory_space<vmem>>, vector<16x896xf32>
    tpu.vector_store %arg14[%c0_41, %c0_42], %77 {strides = array<i32>} : memref<16x896xf32, #tpu.memory_space<vmem>>, vector<16x896xf32>,
    return
  }
  func.func @transform_0(%arg0: i32) -> (i32, i32) {
    %c0_i32 = arith.constant 0 : i32
    %c0_i32_0 = arith.constant 0 : i32
    return %arg0, %c0_i32 : i32, i32
  }
  func.func @transform_1(%arg0: i32) -> (i32, i32) {
    %c0_i32 = arith.constant 0 : i32
    %c0_i32_0 = arith.constant 0 : i32
    %c0_i32_1 = arith.constant 0 : i32
    return %c0_i32, %c0_i32_0 : i32, i32
  }
  func.func @transform_2(%arg0: i32) -> (i32, i32) {
    %c0_i32 = arith.constant 0 : i32
    %c0_i32_0 = arith.constant 0 : i32
    %c0_i32_1 = arith.constant 0 : i32
    return %c0_i32, %c0_i32_0 : i32, i32
  }
  func.func @transform_3(%arg0: i32) -> (i32, i32) {
    %c0_i32 = arith.constant 0 : i32
    %c0_i32_0 = arith.constant 0 : i32
    %c0_i32_1 = arith.constant 0 : i32
    return %c0_i32, %c0_i32_0 : i32, i32
  }
  func.func @transform_4(%arg0: i32) -> (i32, i32) {
    %c0_i32 = arith.constant 0 : i32
    %c0_i32_0 = arith.constant 0 : i32
    %c0_i32_1 = arith.constant 0 : i32
    return %c0_i32, %c0_i32_0 : i32, i32
  }
  func.func @transform_5(%arg0: i32) -> (i32, i32) {
    %c0_i32 = arith.constant 0 : i32
    %c0_i32_0 = arith.constant 0 : i32
    %c0_i32_1 = arith.constant 0 : i32
    return %c0_i32, %c0_i32_0 : i32, i32
  }
  func.func @transform_6(%arg0: i32) -> (i32, i32) {
    %c0_i32 = arith.constant 0 : i32
    %c0_i32_0 = arith.constant 0 : i32
    %c0_i32_1 = arith.constant 0 : i32
    return %c0_i32, %c0_i32_0 : i32, i32
  }
  func.func @transform_7(%arg0: i32) -> (i32, i32) {
    %c0_i32 = arith.constant 0 : i32
    %c0_i32_0 = arith.constant 0 : i32
    %c0_i32_1 = arith.constant 0 : i32
    return %c0_i32, %c0_i32_0 : i32, i32
  }
  func.func @transform_8(%arg0: i32) -> (i32, i32) {
    %c0_i32 = arith.constant 0 : i32
    %c0_i32_0 = arith.constant 0 : i32
    %c0_i32_1 = arith.constant 0 : i32
    return %c0_i32, %c0_i32_0 : i32, i32
  }
  func.func @transform_9(%arg0: i32) -> (i32, i32) {
    %c0_i32 = arith.constant 0 : i32
    %c0_i32_0 = arith.constant 0 : i32
    %c0_i32_1 = arith.constant 0 : i32
    return %c0_i32, %c0_i32_0 : i32, i32
  }
  func.func @transform_10(%arg0: i32) -> (i32, i32) {
    %c0_i32 = arith.constant 0 : i32
    %c0_i32_0 = arith.constant 0 : i32
    %c0_i32_1 = arith.constant 0 : i32
    return %c0_i32, %c0_i32_0 : i32, i32
  }
  func.func @transform_11(%arg0: i32) -> (i32, i32) {
    %c0_i32 = arith.constant 0 : i32
    %c0_i32_0 = arith.constant 0 : i32
    %c0_i32_1 = arith.constant 0 : i32
    return %c0_i32, %c0_i32_0 : i32, i32
  }
  func.func @transform_12(%arg0: i32) -> (i32, i32) {
    %c0_i32 = arith.constant 0 : i32
    %c0_i32_0 = arith.constant 0 : i32
    %c0_i32_1 = arith.constant 0 : i32
    return %c0_i32, %c0_i32_0 : i32, i32
  }
  func.func @transform_13(%arg0: i32) -> (i32, i32) {
    %c0_i32 = arith.constant 0 : i32
    %c0_i32_0 = arith.constant 0 : i32
    return %arg0, %c0_i32 : i32, i32
  }
}

</mosaic_0001>

<bundles_post_ra>
// kernel: tpu_custom_call.1
= control target key start
LH: loop header
LB: loop body
LE: loop exit
PB: predicated region body
PF: predicated region fallthrough
CT: control target
= control target key end

     0   :  { %18 = vsyncpa [#allocation3], 0  ;;  %s14026_s0 = inlined_call_operand.vmem [shape: f32[16,2], index: 0, kind: input, shape index: {}]   ;;  %s14027_s1 = inlined_call_operand.hbm [shape: bf16[2,256], index: 1, kind: input, shape index: {}]   ;;  %s14028_s2 = inlined_call_operand.hbm [shape: f32[1,256], index: 2, kind: input, shape index: {}]   ;;  %s14029_s3 = inlined_call_operand.hbm [shape: bf16[256,640], index: 3, kind: input, shape index: {}]   ;;  %s14030_s4 = inlined_call_operand.hbm [shape: f32[1,640], index: 4, kind: input, shape index: {}]   ;;  %s14031_s5 = inlined_call_operand.hbm [shape: bf16[640,640], index: 5, kind: input, shape index: {}]   ;;  %s14032_s6 = inlined_call_operand.hbm [shape: f32[1,640], index: 6, kind: input, shape index: {}]   ;;  %s14033_s7 = inlined_call_operand.hbm [shape: bf16[640,640], index: 7, kind: input, shape index: {}]   ;;  %s14034_s8 = inlined_call_operand.hbm [shape: f32[1,640], index: 8, kind: input, shape index: {}]   ;;  %s14035_s9 = inlined_call_operand.hbm [shape: bf16[640,640], index: 9, kind: input, shape index: {}]   ;;  %s14036_s10 = inlined_call_operand.hbm [shape: f32[1,640], index: 10, kind: input, shape index: {}]   ;;  %s14037_s11 = inlined_call_operand.hbm [shape: bf16[640,896], index: 11, kind: input, shape index: {}]   ;;  %s14038_s12 = inlined_call_operand.hbm [shape: f32[1,896], index: 12, kind: input, shape index: {}]   ;;  %s14039_s13 = inlined_call_operand.hbm [shape: f32[16,896], index: 13, kind: output, shape index: {}]  }
   0x1   :  { %19 = vsyncpa [#allocation6], 0 }
   0x2   :  { %20 = vsyncpa [#allocation9], 0 }
   0x3   :  { %21 = vsyncpa [#allocation12], 0 }
   0x4   :  { %22 = vsyncpa [#allocation15], 0 }
   0x5   :  { %23 = vsyncpa [#allocation18], 0 }
   0x6   :  { %24 = vsyncpa [#allocation21], 0  ;;  %s44_s27 = sshll.u32 %s14028_s2, 4  ;;  %s45_s27 = int_to_ptr.hbm [resolvable:$true] %s44_s27 }
   0x7   :  { %25 = vsyncpa [#allocation4], 0  ;;  %s13602_s28 = smov [#allocation5]   ;;  %s68_s15 = sshll.u32 %s14030_s4, 4  ;;  %s69_s15 = int_to_ptr.hbm [resolvable:$true] %s68_s15 }
   0x8   :  { %s46_s29 = sshll.u32 %s13602_s28, 4  ;;  %s13603_s16 = smov [#allocation8]   ;;  %s47_s29 = int_to_ptr.vmem [resolvable:$true] %s46_s29 }
   0x9   :  { %49 = dma.hbm_to_vmem [thread:$0]  %s45_s27, 32, %s47_s29, [#allocation6]  }
   0xa   :  { %s70_s17 = sshll.u32 %s13603_s16, 4  ;;  %s92_s20 = sshll.u32 %s14032_s6, 4  ;;  %s71_s17 = int_to_ptr.vmem [resolvable:$true] %s70_s17  ;;  %s93_s20 = int_to_ptr.hbm [resolvable:$true] %s92_s20 }
   0xb   :  { %73 = dma.hbm_to_vmem [thread:$0]  %s69_s15, 80, %s71_s17, [#allocation9]  }
   0xc   :  { %s116_s22 = sshll.u32 %s14034_s8, 4  ;;  %s13604_s23 = smov [#allocation11]   ;;  %s117_s22 = int_to_ptr.hbm [resolvable:$true] %s116_s22 }
   0xd   :  { %s94_s24 = sshll.u32 %s13604_s23, 4  ;;  %s13605_s4 = smov [#allocation14]   ;;  %s95_s24 = int_to_ptr.vmem [resolvable:$true] %s94_s24 }
   0xe   :  { %97 = dma.hbm_to_vmem [thread:$0]  %s93_s20, 80, %s95_s24, [#allocation12]  }
   0xf   :  { %s118_s25 = sshll.u32 %s13605_s4, 4  ;;  %s140_s28 = sshll.u32 %s14036_s10, 4  ;;  %s119_s25 = int_to_ptr.vmem [resolvable:$true] %s118_s25  ;;  %s141_s28 = int_to_ptr.hbm [resolvable:$true] %s140_s28 }
  0x10   :  { %121 = dma.hbm_to_vmem [thread:$0]  %s117_s22, 80, %s119_s25, [#allocation15]  }
  0x11   :  { %s33_s30 = sshll.u32 %s14027_s1, 4  ;;  %s13606_s14 = smov [#allocation17]   ;;  %s34_s30 = int_to_ptr.hbm [resolvable:$true] %s33_s30 }
  0x12   :  { %s142_s8 = sshll.u32 %s13606_s14, 4  ;;  %s13607_s15 = smov [#allocation2]   ;;  %s143_s8 = int_to_ptr.vmem [resolvable:$true] %s142_s8 }
  0x13   :  { %145 = dma.hbm_to_vmem [thread:$0]  %s141_s28, 80, %s143_s8, [#allocation18]  }
  0x14   :  { %s35_s16 = sshll.u32 %s13607_s15, 4  ;;  %s54_s19 = sshll.u32 %s14029_s3, 4  ;;  %s36_s16 = int_to_ptr.vmem [resolvable:$true] %s35_s16  ;;  %s55_s19 = int_to_ptr.hbm [resolvable:$true] %s54_s19 }
  0x15   :  { %38 = dma.hbm_to_vmem [thread:$0]  %s34_s30, 32, %s36_s16, [#allocation3]  }
  0x16   :  { %s13608_s10 = smov [#allocation7]   ;;  %s78_s1 = sshll.u32 %s14031_s5, 4  ;;  %s79_s1 = int_to_ptr.hbm [resolvable:$true] %s78_s1 }
  0x17   :  { %s56_s20 = sshll.u32 %s13608_s10, 4  ;;  %s13609_s22 = smov 320   ;;  %s57_s20 = int_to_ptr.vmem [resolvable:$true] %s56_s20 }
  0x18   :  { %s13610_s23 = smov 20   ;;  %s13611_s24 = smov [#allocation10]  }
  0x19   :  { %62 = dma.hbm_to_vmem [thread:$0]  %s55_s19, 10240, %s57_s20, [#allocation6], %s13609_s22, %s13609_s22, %s13610_s23  }
  0x1a   :  { %s80_s4 = sshll.u32 %s13611_s24, 4  ;;  %s102_s3 = sshll.u32 %s14033_s7, 4  ;;  %s81_s4 = int_to_ptr.vmem [resolvable:$true] %s80_s4  ;;  %s103_s3 = int_to_ptr.hbm [resolvable:$true] %s102_s3 }
  0x1b   :  { %86 = dma.hbm_to_vmem [thread:$0]  %s79_s1, 25600, %s81_s4, [#allocation9], %s13609_s22, %s13609_s22, %s13610_s23  }
  0x1c   :  { %s126_s6 = sshll.u32 %s14035_s9, 4  ;;  %s13612_s29 = smov [#allocation13]   ;;  %s127_s6 = int_to_ptr.hbm [resolvable:$true] %s126_s6 }
  0x1d   :  { %s104_s30 = sshll.u32 %s13612_s29, 4  ;;  %s13613_s5 = smov [#allocation16]   ;;  %s105_s30 = int_to_ptr.vmem [resolvable:$true] %s104_s30 }
  0x1e   :  { %110 = dma.hbm_to_vmem [thread:$0]  %s103_s3, 25600, %s105_s30, [#allocation12], %s13609_s22, %s13609_s22, %s13610_s23  }
  0x1f   :  { %s128_s14 = sshll.u32 %s13613_s5, 4  ;;  %s150_s16 = sshll.u32 %s14037_s11, 4  ;;  %s129_s14 = int_to_ptr.vmem [resolvable:$true] %s128_s14  ;;  %s151_s16 = int_to_ptr.hbm [resolvable:$true] %s150_s16 }
  0x20   :  { %134 = dma.hbm_to_vmem [thread:$0]  %s127_s6, 25600, %s129_s14, [#allocation15], %s13609_s22, %s13609_s22, %s13610_s23  }
  0x21   :  { %s13614_s7 = smov [#allocation19]   ;;  %s164_s9 = sshll.u32 %s14038_s12, 4  ;;  %s165_s9 = int_to_ptr.hbm [resolvable:$true] %s164_s9 }
  0x22   :  { %s152_s17 = sshll.u32 %s13614_s7, 4  ;;  %s13615_s10 = smov 448   ;;  %s153_s17 = int_to_ptr.vmem [resolvable:$true] %s152_s17 }
  0x23   :  { %s13616_s20 = smov 28   ;;  %s13617_s2 = smov [#allocation20]  }
  0x24   :  { %158 = dma.hbm_to_vmem [thread:$0]  %s151_s16, 35840, %s153_s17, [#allocation18], %s13615_s10, %s13615_s10, %s13616_s20  }
  0x25   :  { %s166_s21 = sshll.u32 %s13617_s2, 4  ;;  %s167_s21 = int_to_ptr.vmem [resolvable:$true] %s166_s21 }
  0x26   :  { %169 = dma.hbm_to_vmem [thread:$0]  %s165_s9, 112, %s167_s21, [#allocation21]  }
  0x27   :  { %13586 = dma.done.wait [#allocation3], 32  }
  0x28   :  { %13587 = vsyncadd [#allocation3], 4294967264 }
  0x29   :  { %13588 = dma.done.wait [#allocation6], 10272  }
  0x2a   :  { %13589 = vsyncadd [#allocation6], 4294957024 }
  0x2b   :  { %13590 = dma.done.wait [#allocation9], 25680  }
  0x2c   :  { %13591 = vsyncadd [#allocation9], 4294941616 }
  0x2d   :  { %13592 = dma.done.wait [#allocation12], 25680  }
  0x2e   :  { %13593 = vsyncadd [#allocation12], 4294941616 }
  0x2f   :  { %13594 = dma.done.wait [#allocation15], 25680  }
  0x30   :  { %13595 = vsyncadd [#allocation15], 4294941616 }
  0x31   :  { %13596 = dma.done.wait [#allocation18], 35920  }
  0x32   :  { %13597 = vsyncadd [#allocation18], 4294931376 }
  0x33   :  { %13598 = dma.done.wait [#allocation21], 112  }
  0x34   :  { %13599 = vsyncadd [#allocation21], 4294967184  ;;  %v13618_v0 = vmov 1   ;;  %v13619_v1 = vmov 0   ;;  %v218_v2 = vld [vmem:[%s14026_s0] sm:$0xff]  ;;  %v219_v13 = vld [vmem:[%s14026_s0 + $0x8] sm:$0xff] }
  0x35   :  { %13216 = vset.pattern.permute.xlu1 %v13618_v0  ;;  %13215 = vset.pattern.permute.xlu0 %v13619_v1  ;;  %v8536_v3 = vld [vmem:[#allocation7 + $0x118] sm:$0xf]  ;;  %v12271_v4 = vld [vmem:[#allocation7 + $0x128] sm:$0xf0]  ;;  %v8516_v9 = vld [vmem:[#allocation7 + $0xf0] sm:$0xf] }
  0x36   :  { %244 = vperm.xlu1 %13216, %v218_v2   ;;  %224 = vperm.xlu0 %13215, %v218_v2   ;;  %v8696_v5 = vld [vmem:[#allocation7 + $0x258] sm:$0xf]  ;;  %v12311_v6 = vld [vmem:[#allocation7 + $0x268] sm:$0xf0]  ;;  %v8537_v7 = vor.u32 %v12271_v4, %v8536_v3  ;;  %v12266_v10 = vld [vmem:[#allocation7 + $0x100] sm:$0xf0] }
  0x37   :  { %v8697_v8 = vor.u32 %v12311_v6, %v8696_v5  ;;  %v8676_v11 = vld [vmem:[#allocation7 + $0x230] sm:$0xf]  ;;  %v12306_v12 = vld [vmem:[#allocation7 + $0x240] sm:$0xf0]  ;;  %v8517_v14 = vor.u32 %v12266_v10, %v8516_v9  ;;  %v8496_v16 = vld [vmem:[#allocation7 + $0xc8] sm:$0xf] }
  0x38   :  { %813 = vmatpush.bf16.msra.mxu0 %v8537_v7  ;;  %v8677_v15 = vor.u32 %v12306_v12, %v8676_v11  ;;  %v12261_v17 = vld [vmem:[#allocation7 + $0xd8] sm:$0xf0]  ;;  %v8656_v18 = vld [vmem:[#allocation7 + $0x208] sm:$0xf]  ;;  %v8538_v21 = vld [vmem:[#allocation7 + $0x12c] sm:$0xf0] }
  0x39   :  { %827 = vmatpush.bf16.msra.mxu1 %v8697_v8  ;;  %v12301_v19 = vld [vmem:[#allocation7 + $0x218] sm:$0xf0]  ;;  %v8476_v23 = vld [vmem:[#allocation7 + $0xa0] sm:$0xf]  ;;  %v12256_v24 = vld [vmem:[#allocation7 + $0xb0] sm:$0xf0]  ;;  %v8497_v27 = vor.u32 %v12261_v17, %v8496_v16 }
  0x3a   :  { %v12269_v20 = vld [vmem:[#allocation7 + $0x11c] sm:$0xf]  ;;  %v8698_v26 = vld [vmem:[#allocation7 + $0x26c] sm:$0xf0]  ;;  %v8657_v28 = vor.u32 %v12301_v19, %v8656_v18  ;;  %v8636_v29 = vld [vmem:[#allocation7 + $0x1e0] sm:$0xf]  ;;  %v8477_v40 = vor.u32 %v12256_v24, %v8476_v23 }
  0x3b   :  { %v12309_v22 = vld [vmem:[#allocation7 + $0x25c] sm:$0xf]  ;;  %v8541_v25 = vor.u32 %v12269_v20, %v8538_v21  ;;  %v12296_v30 = vld [vmem:[#allocation7 + $0x1f0] sm:$0xf0]  ;;  %v8518_v33 = vld [vmem:[#allocation7 + $0x104] sm:$0xf0] }
  0x3c   :  { %814 = vmatpush.bf16.msra.mxu0 %v8517_v14  ;;  %v8701_v31 = vor.u32 %v12309_v22, %v8698_v26  ;;  %v12264_v32 = vld [vmem:[#allocation7 + $0xf4] sm:$0xf]  ;;  %v8678_v35 = vld [vmem:[#allocation7 + $0x244] sm:$0xf0]  ;;  %v12259_v38 = vld [vmem:[#allocation7 + $0xcc] sm:$0xf]  ;;  %v8637_v41 = vor.u32 %v12296_v30, %v8636_v29 }
  0x3d   :  { %828 = vmatpush.bf16.msra.mxu1 %v8677_v15  ;;  %v12304_v34 = vld [vmem:[#allocation7 + $0x234] sm:$0xf]  ;;  %841 = vmatpush.bf16.msra.mxu2 %v8541_v25  ;;  %v8521_v36 = vor.u32 %v12264_v32, %v8518_v33  ;;  %v8498_v39 = vld [vmem:[#allocation7 + $0xdc] sm:$0xf0]  ;;  %v8456_v42 = vld [vmem:[#allocation7 + $0x78] sm:$0xf] }
  0x3e   :  { %248 = vperm.xlu1 %13216, %v219_v13   ;;  %229 = vperm.xlu0 %13215, %v219_v13   ;;  %v8681_v37 = vor.u32 %v12304_v34, %v8678_v35  ;;  %v12299_v43 = vld [vmem:[#allocation7 + $0x20c] sm:$0xf]  ;;  %v8658_v44 = vld [vmem:[#allocation7 + $0x21c] sm:$0xf0]  ;;  %v8616_v46 = vld [vmem:[#allocation7 + $0x1b8] sm:$0xf]  ;;  %v8501_v48 = vor.u32 %v12259_v38, %v8498_v39 }
  0x3f   :  { %855 = vmatpush.bf16.msra.mxu3 %v8701_v31  ;;  %v12251_v45 = vld [vmem:[#allocation7 + $0x88] sm:$0xf0]  ;;  %v8661_v49 = vor.u32 %v12299_v43, %v8658_v44  ;;  %v12254_v50 = vld [vmem:[#allocation7 + $0xa4] sm:$0xf]  ;;  %v8478_v51 = vld [vmem:[#allocation7 + $0xb4] sm:$0xf0] }
  0x40   :  { %815 = vmatpush.bf16.msra.mxu0 %v8497_v27  ;;  %v12291_v47 = vld [vmem:[#allocation7 + $0x1c8] sm:$0xf0]  ;;  %v12294_v52 = vld [vmem:[#allocation7 + $0x1e4] sm:$0xf]  ;;  %v8638_v53 = vld [vmem:[#allocation7 + $0x1f4] sm:$0xf0]  ;;  %v8457_v54 = vor.u32 %v12251_v45, %v8456_v42  ;;  %v8481_v60 = vor.u32 %v12254_v50, %v8478_v51 }
  0x41   :  { %829 = vmatpush.bf16.msra.mxu1 %v8657_v28  ;;  %842 = vmatpush.bf16.msra.mxu2 %v8521_v36  ;;  %v8617_v55 = vor.u32 %v12291_v47, %v8616_v46  ;;  %v8436_v56 = vld [vmem:[#allocation7 + $0x50] sm:$0xf]  ;;  %v12246_v57 = vld [vmem:[#allocation7 + $0x60] sm:$0xf0]  ;;  %v8641_v61 = vor.u32 %v12294_v52, %v8638_v53  ;;  %v12249_v62 = vld [vmem:[#allocation7 + $0x7c] sm:$0xf] }
  0x42   :  { %v8596_v58 = vld [vmem:[#allocation7 + $0x190] sm:$0xf]  ;;  %v12286_v59 = vld [vmem:[#allocation7 + $0x1a0] sm:$0xf0]  ;;  %v12289_v1 = vld [vmem:[#allocation7 + $0x1bc] sm:$0xf]  ;;  %v8437_v3 = vor.u32 %v12246_v57, %v8436_v56 }
  0x43   :  { %856 = vmatpush.bf16.msra.mxu3 %v8681_v37  ;;  %v8458_v63 = vld [vmem:[#allocation7 + $0x8c] sm:$0xf0]  ;;  %v8597_v4 = vor.u32 %v12286_v59, %v8596_v58  ;;  %v8416_v5 = vld [vmem:[#allocation7 + $0x28] sm:$0xf]  ;;  %v12241_v6 = vld [vmem:[#allocation7 + $0x38] sm:$0xf0] }
  0x44   :  { %816 = vmatpush.bf16.msra.mxu0 %v8477_v40  ;;  %v8618_v2 = vld [vmem:[#allocation7 + $0x1cc] sm:$0xf0]  ;;  %v8576_v7 = vld [vmem:[#allocation7 + $0x168] sm:$0xf]  ;;  %v12281_v8 = vld [vmem:[#allocation7 + $0x178] sm:$0xf0]  ;;  %v8461_v9 = vor.u32 %v12249_v62, %v8458_v63  ;;  %v8417_v14 = vor.u32 %v12241_v6, %v8416_v5 }
  0x45   :  { %830 = vmatpush.bf16.msra.mxu1 %v8637_v41  ;;  %843 = vmatpush.bf16.msra.mxu2 %v8501_v48  ;;  %v12244_v10 = vld [vmem:[#allocation7 + $0x54] sm:$0xf]  ;;  %v8438_v11 = vld [vmem:[#allocation7 + $0x64] sm:$0xf0]  ;;  %v8577_v15 = vor.u32 %v12281_v8, %v8576_v7  ;;  %v8396_v16 = vld [vmem:[#allocation7] sm:$0xf] }
  0x46   :  { %13217 = vset.pattern.permute.xlu0 %v13618_v0  ;;  %v8621_v0 = vor.u32 %v12289_v1, %v8618_v2  ;;  %v12284_v12 = vld [vmem:[#allocation7 + $0x194] sm:$0xf]  ;;  %v8598_v13 = vld [vmem:[#allocation7 + $0x1a4] sm:$0xf0]  ;;  %v8556_v18 = vld [vmem:[#allocation7 + $0x140] sm:$0xf]  ;;  %v8441_v24 = vor.u32 %v12244_v10, %v8438_v11 }
  0x47   :  { %857 = vmatpush.bf16.msra.mxu3 %v8661_v49  ;;  %v12236_v17 = vld [vmem:[#allocation7 + $0x10] sm:$0xf0]  ;;  %v8544_v20 = vld [vmem:[#allocation7 + $0x120] sm:$0xf]  ;;  %v8601_v25 = vor.u32 %v12284_v12, %v8598_v13  ;;  %v12239_v26 = vld [vmem:[#allocation7 + $0x2c] sm:$0xf] }
  0x48   :  { %817 = vmatpush.bf16.msra.mxu0 %v8457_v54  ;;  %v12276_v19 = vld [vmem:[#allocation7 + $0x150] sm:$0xf0]  ;;  %v8704_v22 = vld [vmem:[#allocation7 + $0x260] sm:$0xf]  ;;  %v12279_v28 = vld [vmem:[#allocation7 + $0x16c] sm:$0xf]  ;;  %v8397_v30 = vor.u32 %v12236_v17, %v8396_v16 }
  0x49   :  { %831 = vmatpush.bf16.msra.mxu1 %v8617_v55  ;;  %844 = vmatpush.bf16.msra.mxu2 %v8481_v60  ;;  %v12272_v21 = vld [vmem:[#allocation7 + $0x130] sm:$0xf0]  ;;  %v8418_v27 = vld [vmem:[#allocation7 + $0x3c] sm:$0xf0]  ;;  %v8557_v31 = vor.u32 %v12276_v19, %v8556_v18  ;;  %v8524_v34 = vld [vmem:[#allocation7 + $0xf8] sm:$0xf] }
  0x4a   :  { %v12312_v23 = vld [vmem:[#allocation7 + $0x270] sm:$0xf0]  ;;  %v8578_v29 = vld [vmem:[#allocation7 + $0x17c] sm:$0xf0]  ;;  %v8545_v32 = vor.u32 %v12272_v21, %v8544_v20  ;;  %v12267_v35 = vld [vmem:[#allocation7 + $0x108] sm:$0xf0]  ;;  %v8421_v38 = vor.u32 %v12239_v26, %v8418_v27 }
  0x4b   :  { %858 = vmatpush.bf16.msra.mxu3 %v8641_v61  ;;  %v8705_v33 = vor.u32 %v12312_v23, %v8704_v22  ;;  %v8684_v36 = vld [vmem:[#allocation7 + $0x238] sm:$0xf]  ;;  %v12307_v37 = vld [vmem:[#allocation7 + $0x248] sm:$0xf0]  ;;  %v8581_v39 = vor.u32 %v12279_v28, %v8578_v29  ;;  %v8525_v40 = vor.u32 %v12267_v35, %v8524_v34  ;;  %v8504_v42 = vld [vmem:[#allocation7 + $0xd0] sm:$0xf] }
  0x4c   :  { %818 = vmatpush.bf16.msra.mxu0 %v8437_v3  ;;  %v8685_v41 = vor.u32 %v12307_v37, %v8684_v36  ;;  %v12262_v43 = vld [vmem:[#allocation7 + $0xe0] sm:$0xf0]  ;;  %v8664_v44 = vld [vmem:[#allocation7 + $0x210] sm:$0xf]  ;;  %v8398_v49 = vld [vmem:[#allocation7 + $0x14] sm:$0xf0] }
  0x4d   :  { %832 = vmatpush.bf16.msra.mxu1 %v8597_v4  ;;  %845 = vmatpush.bf16.msra.mxu2 %v8461_v9  ;;  %v12302_v45 = vld [vmem:[#allocation7 + $0x220] sm:$0xf0]  ;;  %v8505_v46 = vor.u32 %v12262_v43, %v8504_v42  ;;  %v8558_v52 = vld [vmem:[#allocation7 + $0x154] sm:$0xf0]  ;;  %v8484_v54 = vld [vmem:[#allocation7 + $0xa8] sm:$0xf] }
  0x4e   :  { %v8665_v47 = vor.u32 %v12302_v45, %v8664_v44  ;;  %v12234_v48 = vld [vmem:[#allocation7 + $0x4] sm:$0xf]  ;;  %v12257_v55 = vld [vmem:[#allocation7 + $0xb8] sm:$0xf0]  ;;  %v8644_v56 = vld [vmem:[#allocation7 + $0x1e8] sm:$0xf] }
  0x4f   :  { %859 = vmatpush.bf16.msra.mxu3 %v8621_v0  ;;  %v8401_v50 = vor.u32 %v12234_v48, %v8398_v49  ;;  %v12274_v51 = vld [vmem:[#allocation7 + $0x144] sm:$0xf]  ;;  %v8485_v57 = vor.u32 %v12257_v55, %v8484_v54  ;;  %v12297_v58 = vld [vmem:[#allocation7 + $0x1f8] sm:$0xf0]  ;;  %v8546_v60 = vld [vmem:[#allocation7 + $0x134] sm:$0xf0] }
  0x50   :  { %819 = vmatpush.bf16.msra.mxu0 %v8417_v14  ;;  %v8561_v53 = vor.u32 %v12274_v51, %v8558_v52  ;;  %v12270_v59 = vld [vmem:[#allocation7 + $0x124] sm:$0xf]  ;;  %v8645_v61 = vor.u32 %v12297_v58, %v8644_v56  ;;  %v8706_v1 = vld [vmem:[#allocation7 + $0x274] sm:$0xf0]  ;;  %v8464_v2 = vld [vmem:[#allocation7 + $0x80] sm:$0xf] }
  0x51   :  { %833 = vmatpush.bf16.msra.mxu1 %v8577_v15  ;;  %846 = vmatpush.bf16.msra.mxu2 %v8441_v24  ;;  %v8549_v62 = vor.u32 %v12270_v59, %v8546_v60  ;;  %v12310_v63 = vld [vmem:[#allocation7 + $0x264] sm:$0xf]  ;;  %v12252_v4 = vld [vmem:[#allocation7 + $0x90] sm:$0xf0]  ;;  %v8624_v5 = vld [vmem:[#allocation7 + $0x1c0] sm:$0xf] }
  0x52   :  { %v8709_v3 = vor.u32 %v12310_v63, %v8706_v1  ;;  %v12292_v6 = vld [vmem:[#allocation7 + $0x1d0] sm:$0xf0]  ;;  %v8465_v7 = vor.u32 %v12252_v4, %v8464_v2  ;;  %v12265_v9 = vld [vmem:[#allocation7 + $0xfc] sm:$0xf]  ;;  %v8526_v0 = vld [vmem:[#allocation7 + $0x10c] sm:$0xf0] }
  0x53   :  { %860 = vmatpush.bf16.msra.mxu3 %v8601_v25  ;;  %v8625_v8 = vor.u32 %v12292_v6, %v8624_v5  ;;  %v12305_v10 = vld [vmem:[#allocation7 + $0x23c] sm:$0xf]  ;;  %v8529_v11 = vor.u32 %v12265_v9, %v8526_v0  ;;  %v8686_v12 = vld [vmem:[#allocation7 + $0x24c] sm:$0xf0]  ;;  %v8444_v14 = vld [vmem:[#allocation7 + $0x58] sm:$0xf] }
  0x54   :  { %820 = vmatpush.bf16.msra.mxu0 %v8397_v30  ;;  %v8689_v13 = vor.u32 %v12305_v10, %v8686_v12  ;;  %v12247_v15 = vld [vmem:[#allocation7 + $0x68] sm:$0xf0]  ;;  %v8604_v16 = vld [vmem:[#allocation7 + $0x198] sm:$0xf]  ;;  %v12260_v19 = vld [vmem:[#allocation7 + $0xd4] sm:$0xf] }
  0x55   :  { %834 = vmatpush.bf16.msra.mxu1 %v8557_v31  ;;  %847 = vmatpush.bf16.msra.mxu2 %v8421_v38  ;;  %v8445_v17 = vor.u32 %v12247_v15, %v8444_v14  ;;  %v12287_v18 = vld [vmem:[#allocation7 + $0x1a8] sm:$0xf0]  ;;  %v8506_v20 = vld [vmem:[#allocation7 + $0xe4] sm:$0xf0]  ;;  %v12300_v23 = vld [vmem:[#allocation7 + $0x214] sm:$0xf] }
  0x56   :  { %v8605_v21 = vor.u32 %v12287_v18, %v8604_v16  ;;  %v8509_v22 = vor.u32 %v12260_v19, %v8506_v20  ;;  %v8666_v24 = vld [vmem:[#allocation7 + $0x224] sm:$0xf0]  ;;  %v8424_v26 = vld [vmem:[#allocation7 + $0x30] sm:$0xf]  ;;  %v12242_v27 = vld [vmem:[#allocation7 + $0x40] sm:$0xf0] }
  0x57   :  { %861 = vmatpush.bf16.msra.mxu3 %v8581_v39  ;;  %v8669_v25 = vor.u32 %v12300_v23, %v8666_v24  ;;  %v8584_v28 = vld [vmem:[#allocation7 + $0x170] sm:$0xf]  ;;  %v8425_v29 = vor.u32 %v12242_v27, %v8424_v26  ;;  %v12282_v30 = vld [vmem:[#allocation7 + $0x180] sm:$0xf0]  ;;  %v12255_v31 = vld [vmem:[#allocation7 + $0xac] sm:$0xf] }
  0x58   :  { %869 = vmatpush.bf16.msrb.mxu0 %v8545_v32  ;;  %v8486_v32 = vld [vmem:[#allocation7 + $0xbc] sm:$0xf0]  ;;  %v12295_v35 = vld [vmem:[#allocation7 + $0x1ec] sm:$0xf]  ;;  %v220_v38 = vld [vmem:[#allocation2] sm:$0x3] }
  0x59   :  { %883 = vmatpush.bf16.msrb.mxu1 %v8705_v33  ;;  %848 = vmatpush.bf16.msra.mxu2 %v8401_v50  ;;  %v8585_v33 = vor.u32 %v12282_v30, %v8584_v28  ;;  %v8489_v34 = vor.u32 %v12255_v31, %v8486_v32  ;;  %v8646_v36 = vld [vmem:[#allocation7 + $0x1fc] sm:$0xf0]  ;;  %v8404_v39 = vld [vmem:[#allocation7 + $0x8] sm:$0xf]  ;;  %v12277_v43 = vld [vmem:[#allocation7 + $0x158] sm:$0xf0] }
  0x5a   :  { %v8649_v37 = vor.u32 %v12295_v35, %v8646_v36  ;;  %v12250_v44 = vld [vmem:[#allocation7 + $0x84] sm:$0xf]  ;;  %v8466_v45 = vld [vmem:[#allocation7 + $0x94] sm:$0xf0]  ;;  %v12245_v52 = vld [vmem:[#allocation7 + $0x5c] sm:$0xf] }
  0x5b   :  { %862 = vmatpush.bf16.msra.mxu3 %v8561_v53  ;;  %v8469_v48 = vor.u32 %v12250_v44, %v8466_v45  ;;  %v12290_v49 = vld [vmem:[#allocation7 + $0x1c4] sm:$0xf]  ;;  %v8626_v50 = vld [vmem:[#allocation7 + $0x1d4] sm:$0xf0]  ;;  %v8446_v53 = vld [vmem:[#allocation7 + $0x6c] sm:$0xf0] }
  0x5c   :  { %870 = vmatpush.bf16.msrb.mxu0 %v8525_v40  ;;  %v12237_v40 = vld [vmem:[#allocation7 + $0x18] sm:$0xf0]  ;;  %v8629_v51 = vor.u32 %v12290_v49, %v8626_v50  ;;  %v8449_v55 = vor.u32 %v12245_v52, %v8446_v53  ;;  %v8606_v56 = vld [vmem:[#allocation7 + $0x1ac] sm:$0xf0]  ;;  %v8426_v63 = vld [vmem:[#allocation7 + $0x44] sm:$0xf0] }
  0x5d   :  { %884 = vmatpush.bf16.msrb.mxu1 %v8685_v41  ;;  %897 = vmatpush.bf16.msrb.mxu2 %v8549_v62  ;;  %v8564_v41 = vld [vmem:[#allocation7 + $0x148] sm:$0xf]  ;;  %v8405_v42 = vor.u32 %v12237_v40, %v8404_v39  ;;  %v12285_v54 = vld [vmem:[#allocation7 + $0x19c] sm:$0xf]  ;;  %v12240_v62 = vld [vmem:[#allocation7 + $0x34] sm:$0xf] }
  0x5e   :  { %v8609_v58 = vor.u32 %v12285_v54, %v8606_v56  ;;  %v12280_v1 = vld [vmem:[#allocation7 + $0x174] sm:$0xf]  ;;  %v8429_v2 = vor.u32 %v12240_v62, %v8426_v63  ;;  %v12235_v9 = vld [vmem:[#allocation7 + $0xc] sm:$0xf]  ;;  %v8406_v0 = vld [vmem:[#allocation7 + $0x1c] sm:$0xf0] }
  0x5f   :  { %911 = vmatpush.bf16.msrb.mxu3 %v8709_v3  ;;  %v8586_v3 = vld [vmem:[#allocation7 + $0x184] sm:$0xf0]  ;;  %v12275_v10 = vld [vmem:[#allocation7 + $0x14c] sm:$0xf]  ;;  %v8566_v14 = vld [vmem:[#allocation7 + $0x15c] sm:$0xf0] }
  0x60   :  { %871 = vmatpush.bf16.msrb.mxu0 %v8505_v46  ;;  %v221_v46 = vunpack.c.l.bf16 %v220_v38  ;;  %v8589_v5 = vor.u32 %v12280_v1, %v8586_v3  ;;  %v8569_v19 = vor.u32 %v12275_v10, %v8566_v14  ;;  %v265_v20 = vld [vmem:[#allocation5] sm:$0x3]  ;;  %v8552_v39 = vld [vmem:[#allocation7 + $0x128] sm:$0xf]  ;;  %v8532_v53 = vld [vmem:[#allocation7 + $0x100] sm:$0xf] }
  0x61   :  { %885 = vmatpush.bf16.msrb.mxu1 %v8665_v47  ;;  %898 = vmatpush.bf16.msrb.mxu2 %v8529_v11  ;;  %v8565_v47 = vor.u32 %v12277_v43, %v8564_v41  ;;  %v12273_v40 = vld [vmem:[#allocation7 + $0x138] sm:$0xf0]  ;;  %v8712_v41 = vld [vmem:[#allocation7 + $0x268] sm:$0xf]  ;;  %v12268_v54 = vld [vmem:[#allocation7 + $0x110] sm:$0xf0] }
  0x62   :  { %v252_v59 = vperm.slane %v221_v46, 3  ;;  %v233_v60 = vperm.slane %v221_v46, 0  ;;  %v12308_v56 = vld [vmem:[#allocation7 + $0x250] sm:$0xf0]  ;;  %v9016_v62 = vld [vmem:[#allocation10 + $0x258] sm:$0xf]  ;;  %v8533_v63 = vor.u32 %v12268_v54, %v8532_v53 }
  0x63   :  { %912 = vmatpush.bf16.msrb.mxu3 %v8689_v13  ;;  %v8409_v13 = vor.u32 %v12235_v9, %v8406_v0  ;;  %v12391_v3 = vld [vmem:[#allocation10 + $0x268] sm:$0xf0]  ;;  %v12386_v9 = vld [vmem:[#allocation10 + $0x240] sm:$0xf0]  ;;  %s13620_s0 = smov [#allocation22]   ;;  %s8375_s25 = sshll.u32 %s14039_s13, 4  ;;  %s8376_s25 = int_to_ptr.hbm [resolvable:$true] %s8375_s25 }
  0x64   :  { %872 = vmatpush.bf16.msrb.mxu0 %v8485_v57  ;;  %v251_v57 = vperm.slane %v221_v46, 1  ;;  %v256_v6 = vperm.slane %v252_v59, 1  ;;  %v8672_v59 = vld [vmem:[#allocation7 + $0x218] sm:$0xf]  ;;  %s8373_s23 = sshll.u32 %s13620_s0, 4  ;;  %s13621_s26 = smov 896   ;;  %s8374_s23 = int_to_ptr.vmem [resolvable:$true] %s8373_s23 }
  0x65   :  { %886 = vmatpush.bf16.msrb.mxu1 %v8645_v61  ;;  %899 = vmatpush.bf16.msrb.mxu2 %v8509_v22  ;;  %v234_v61 = vperm.slane %v221_v46, 2  ;;  %v268_v22 = vperm.slane %v265_v20, 1  ;;  %s13622_s3 = smov 56  }
  0x66   :  { %v255_v4 = vperm.slane %v251_v57, 1  ;;  %v8512_v57 = vld [vmem:[#allocation7 + $0xd8] sm:$0xf] }
  0x67   :  { %913 = vmatpush.bf16.msrb.mxu3 %v8669_v25 }
  0x68   :  { %873 = vmatpush.bf16.msrb.mxu0 %v8465_v7  ;;  %v237_v7 = vperm.slane %v233_v60, 0  ;;  %v8856_v60 = vld [vmem:[#allocation10 + $0x118] sm:$0xf] }
  0x69   :  { %887 = vmatpush.bf16.msrb.mxu1 %v8625_v8  ;;  %900 = vmatpush.bf16.msrb.mxu2 %v8489_v34  ;;  %v238_v8 = vperm.slane %v234_v61, 0  ;;  %v12351_v61 = vld [vmem:[#allocation10 + $0x128] sm:$0xf0] }
  0x6b   :  { %914 = vmatpush.bf16.msrb.mxu3 %v8649_v37 }
  0x6c   :  { %874 = vmatpush.bf16.msrb.mxu0 %v8445_v17 }
  0x6d   :  { %888 = vmatpush.bf16.msrb.mxu1 %v8605_v21  ;;  %901 = vmatpush.bf16.msrb.mxu2 %v8469_v48  ;;  %v267_v21 = vperm.slane %v265_v20, 0  ;;  %v12298_v20 = vld [vmem:[#allocation7 + $0x200] sm:$0xf0] }
  0x6f   :  { %915 = vmatpush.bf16.msrb.mxu3 %v8629_v51  ;;  %v8553_v51 = vor.u32 %v12273_v40, %v8552_v39 }
  0x70   :  { %875 = vmatpush.bf16.msrb.mxu0 %v8425_v29 }
  0x71   :  { %889 = vmatpush.bf16.msrb.mxu1 %v8585_v33  ;;  %902 = vmatpush.bf16.msrb.mxu2 %v8449_v55  ;;  %v8692_v55 = vld [vmem:[#allocation7 + $0x240] sm:$0xf] }
  0x72   :  { %v8693_v1 = vor.u32 %v12308_v56, %v8692_v55  ;;  %v8756_v55 = vld [vmem:[#allocation10 + $0x50] sm:$0xf]  ;;  %v12326_v56 = vld [vmem:[#allocation10 + $0x60] sm:$0xf0] }
  0x73   :  { %916 = vmatpush.bf16.msrb.mxu3 %v8609_v58  ;;  %v12263_v58 = vld [vmem:[#allocation7 + $0xe8] sm:$0xf0] }
  0x74   :  { %876 = vmatpush.bf16.msrb.mxu0 %v8405_v42  ;;  %v12313_v42 = vld [vmem:[#allocation7 + $0x278] sm:$0xf0] }
  0x75   :  { %890 = vmatpush.bf16.msrb.mxu1 %v8565_v47  ;;  %903 = vmatpush.bf16.msrb.mxu2 %v8429_v2  ;;  %v8713_v52 = vor.u32 %v12313_v42, %v8712_v41  ;;  %v8857_v2 = vor.u32 %v12351_v61, %v8856_v60  ;;  %v8776_v41 = vld [vmem:[#allocation10 + $0x78] sm:$0xf]  ;;  %v12331_v42 = vld [vmem:[#allocation10 + $0x88] sm:$0xf0] }
  0x76   :  { %v8777_v53 = vor.u32 %v12331_v42, %v8776_v41  ;;  %v8412_v61 = vld [vmem:[#allocation7 + $0x10] sm:$0xf]  ;;  %v12344_v41 = vld [vmem:[#allocation10 + $0xf4] sm:$0xf] }
  0x77   :  { %917 = vmatpush.bf16.msrb.mxu3 %v8589_v5  ;;  %v12346_v5 = vld [vmem:[#allocation10 + $0x100] sm:$0xf0]  ;;  %v8838_v42 = vld [vmem:[#allocation10 + $0x104] sm:$0xf0] }
  0x79   :  { %904 = vmatpush.bf16.msrb.mxu2 %v8409_v13  ;;  %v8513_v13 = vor.u32 %v12263_v58, %v8512_v57  ;;  %v8916_v57 = vld [vmem:[#allocation10 + $0x190] sm:$0xf]  ;;  %v12366_v58 = vld [vmem:[#allocation10 + $0x1a0] sm:$0xf0] }
  0x7b   :  { %918 = vmatpush.bf16.msrb.mxu3 %v8569_v19  ;;  %v8652_v19 = vld [vmem:[#allocation7 + $0x1f0] sm:$0xf] }
  0xa8   :  { %v245_v11 = vpop.permute.xlu1 %244  ;;  %v225_v12 = vpop.permute.xlu0 %224 }
  0xa9   :  { %v257_v15 = vmul.f32 %v255_v4, %v245_v11  ;;  %v258_v16 = vmul.f32 %v256_v6, %v245_v11  ;;  %v239_v17 = vmul.f32 %v237_v7, %v225_v12  ;;  %v240_v18 = vmul.f32 %v238_v8, %v225_v12  ;;  %v8816_v11 = vld [vmem:[#allocation10 + $0xc8] sm:$0xf]  ;;  %v12341_v12 = vld [vmem:[#allocation10 + $0xd8] sm:$0xf0] }
  0xab   :  { %v261_v23 = vadd.f32 %v257_v15, %v239_v17  ;;  %v262_v24 = vadd.f32 %v258_v16, %v240_v18  ;;  %v8492_v15 = vld [vmem:[#allocation7 + $0xb0] sm:$0xf]  ;;  %v12381_v17 = vld [vmem:[#allocation10 + $0x218] sm:$0xf0] }
  0xac   :  { %v8976_v16 = vld [vmem:[#allocation10 + $0x208] sm:$0xf]  ;;  %v12258_v18 = vld [vmem:[#allocation7 + $0xc0] sm:$0xf0] }
  0xad   :  { %v271_v29 = vadd.f32 %v267_v21, %v261_v23  ;;  %v272_v30 = vadd.f32 %v268_v22, %v262_v24  ;;  %v8493_v23 = vor.u32 %v12258_v18, %v8492_v15  ;;  %v8653_v24 = vor.u32 %v12298_v20, %v8652_v19  ;;  %v12426_v15 = vld [vmem:[#allocation10 + $0x380] sm:$0xf0] }
  0xae   :  { %v12466_v18 = vld [vmem:[#allocation10 + $0x4c0] sm:$0xf0] }
  0xaf   :  { %v279_v35 = vmul.f32 0.2, %v271_v29  ;;  %v280_v36 = vmul.f32 0.2, %v272_v30  ;;  %vm275_vm0 = vcmp.ge.f32.partialorder %v271_v29, 0.0  ;;  %vm276_vm1 = vcmp.ge.f32.partialorder %v272_v30, 0.0 }
  0xb0   :  { %v249_v25 = vpop.permute.xlu1 %248  ;;  %v230_v26 = vpop.permute.xlu0 %229 }
  0xb1   :  { %v259_v27 = vmul.f32 %v255_v4, %v249_v25  ;;  %v260_v28 = vmul.f32 %v256_v6, %v249_v25  ;;  %v241_v31 = vmul.f32 %v237_v7, %v230_v26  ;;  %v242_v32 = vmul.f32 %v238_v8, %v230_v26  ;;  %v8836_v4 = vld [vmem:[#allocation10 + $0xf0] sm:$0xf]  ;;  %v12303_v6 = vld [vmem:[#allocation7 + $0x228] sm:$0xf0]  ;;  %v8472_v25 = vld [vmem:[#allocation7 + $0x88] sm:$0xf] }
  0xb2   :  { %v283_v45 = vsel %vm275_vm0, %v271_v29, %v279_v35  ;;  %v284_v46 = vsel %vm276_vm1, %v272_v30, %v280_v36  ;;  %v9017_v7 = vor.u32 %v12391_v3, %v9016_v62  ;;  %v8996_v8 = vld [vmem:[#allocation10 + $0x230] sm:$0xf]  ;;  %v8837_v0 = vor.u32 %v12346_v5, %v8836_v4  ;;  %v12253_v26 = vld [vmem:[#allocation7 + $0x98] sm:$0xf0]  ;;  %v8796_v29 = vld [vmem:[#allocation10 + $0xa0] sm:$0xf] }
  0xb3   :  { %v263_v33 = vadd.f32 %v259_v27, %v241_v31  ;;  %v264_v34 = vadd.f32 %v260_v28, %v242_v32  ;;  %v8997_v10 = vor.u32 %v12386_v9, %v8996_v8  ;;  %v8673_v14 = vor.u32 %v12303_v6, %v8672_v59  ;;  %v8632_v27 = vld [vmem:[#allocation7 + $0x1c8] sm:$0xf]  ;;  %v12293_v28 = vld [vmem:[#allocation7 + $0x1d8] sm:$0xf0]  ;;  %v8452_v35 = vld [vmem:[#allocation7 + $0x60] sm:$0xf] }
  0xb4   :  { %v12336_v30 = vld [vmem:[#allocation10 + $0xb0] sm:$0xf0]  ;;  %v8956_v31 = vld [vmem:[#allocation10 + $0x1e0] sm:$0xf]  ;;  %v12248_v36 = vld [vmem:[#allocation7 + $0x70] sm:$0xf0]  ;;  %v8757_v4 = vor.u32 %v12326_v56, %v8756_v55  ;;  %v8917_v5 = vor.u32 %v12366_v58, %v8916_v57 }
  0xb5   :  { %v273_v37 = vadd.f32 %v267_v21, %v263_v33  ;;  %v274_v38 = vadd.f32 %v268_v22, %v264_v34  ;;  %v8817_v21 = vor.u32 %v12341_v12, %v8816_v11  ;;  %v8977_v22 = vor.u32 %v12381_v17, %v8976_v16  ;;  %v12376_v32 = vld [vmem:[#allocation10 + $0x1f0] sm:$0xf0]  ;;  %v12238_v62 = vld [vmem:[#allocation7 + $0x20] sm:$0xf0]  ;;  %v12431_v3 = vld [vmem:[#allocation10 + $0x3a8] sm:$0xf0] }
  0xb6   :  { %v8473_v33 = vor.u32 %v12253_v26, %v8472_v25  ;;  %v8633_v34 = vor.u32 %v12293_v28, %v8632_v27  ;;  %v8797_v39 = vor.u32 %v12336_v30, %v8796_v29  ;;  %v8957_v40 = vor.u32 %v12376_v32, %v8956_v31  ;;  %v9336_v6 = vld [vmem:[#allocation10 + $0x4d8] sm:$0xf]  ;;  %v8736_v8 = vld [vmem:[#allocation10 + $0x28] sm:$0xf]  ;;  %v12321_v9 = vld [vmem:[#allocation10 + $0x38] sm:$0xf0] }
  0xb7   :  { %vm277_vm2 = vcmp.ge.f32.partialorder %v273_v37, 0.0  ;;  %vm278_vm3 = vcmp.ge.f32.partialorder %v274_v38, 0.0  ;;  %v281_v43 = vmul.f32 0.2, %v273_v37  ;;  %v282_v44 = vmul.f32 0.2, %v274_v38 }
  0xb8   :  { %v8413_v11 = vor.u32 %v12238_v62, %v8412_v61  ;;  %v9316_v17 = vld [vmem:[#allocation10 + $0x4b0] sm:$0xf]  ;;  %v8737_v19 = vor.u32 %v12321_v9, %v8736_v8  ;;  %v12356_v25 = vld [vmem:[#allocation10 + $0x150] sm:$0xf0]  ;;  %v12511_v26 = vld [vmem:[#allocation10 + $0x628] sm:$0xf0] }
  0xb9   :  { %v285_v47 = vsel %vm277_vm2, %v273_v37, %v281_v43  ;;  %v286_v48 = vsel %vm278_vm3, %v274_v38, %v282_v44  ;;  %v8612_v37 = vld [vmem:[#allocation7 + $0x1a0] sm:$0xf]  ;;  %v12288_v38 = vld [vmem:[#allocation7 + $0x1b0] sm:$0xf0]  ;;  %v9136_v30 = vld [vmem:[#allocation10 + $0x348] sm:$0xf]  ;;  %v9317_v31 = vor.u32 %v12466_v18, %v9316_v17 }
  0xba   :  { %v13737_v49 = vpack.c.bf16 %v285_v47, %v283_v45  ;;  %v13739_v50 = vpack.c.bf16 %v286_v48, %v284_v46  ;;  %v8936_v43 = vld [vmem:[#allocation10 + $0x1b8] sm:$0xf]  ;;  %v12371_v44 = vld [vmem:[#allocation10 + $0x1c8] sm:$0xf0]  ;;  %v8453_v45 = vor.u32 %v12248_v36, %v8452_v35  ;;  %v8613_v46 = vor.u32 %v12288_v38, %v8612_v37  ;;  %v8432_v47 = vld [vmem:[#allocation7 + $0x38] sm:$0xf] }
  0xbb   :  { %v12243_v48 = vld [vmem:[#allocation7 + $0x48] sm:$0xf0]  ;;  %v8937_v54 = vor.u32 %v12371_v44, %v8936_v43  ;;  %v12349_v27 = vld [vmem:[#allocation10 + $0x11c] sm:$0xf]  ;;  %v8858_v28 = vld [vmem:[#allocation10 + $0x12c] sm:$0xf0] }
  0xbc   :  { %821 = vmatmul.bf16.vlgmr.msra.gmra.mxu0 %v13737_v49  ;;  %835 = vmatmul.bf16.vlgmr.msra.gmra.mxu1 %v13739_v50  ;;  %v8433_v59 = vor.u32 %v12243_v48, %v8432_v47  ;;  %v12421_v32 = vld [vmem:[#allocation10 + $0x358] sm:$0xf0]  ;;  %v8861_v38 = vor.u32 %v12349_v27, %v8858_v28  ;;  %v9116_v44 = vld [vmem:[#allocation10 + $0x320] sm:$0xf]  ;;  %v12456_v48 = vld [vmem:[#allocation10 + $0x470] sm:$0xf0] }
  0xbd   :  { %849 = vmatmul.bf16.vlgmr.msra.gmra.mxu2 %v13737_v49  ;;  %863 = vmatmul.bf16.vlgmr.msra.gmra.mxu3 %v13739_v50  ;;  %v9137_v43 = vor.u32 %v12421_v32, %v9136_v30  ;;  %v9276_v47 = vld [vmem:[#allocation10 + $0x460] sm:$0xf]  ;;  %v9256_v55 = vld [vmem:[#allocation10 + $0x438] sm:$0xf]  ;;  %v12451_v56 = vld [vmem:[#allocation10 + $0x448] sm:$0xf0] }
  0xbe   :  { %925 = vmatpush.bf16.msra.mxu0 %v8553_v51  ;;  %939 = vmatpush.bf16.msra.mxu1 %v8713_v52  ;;  %v8592_v51 = vld [vmem:[#allocation7 + $0x178] sm:$0xf]  ;;  %v12283_v52 = vld [vmem:[#allocation7 + $0x188] sm:$0xf0]  ;;  %v9257_v58 = vor.u32 %v12451_v56, %v9256_v55  ;;  %v12339_v8 = vld [vmem:[#allocation10 + $0xcc] sm:$0xf] }
  0xbf   :  { %2280 = vmatpush.bf16.msra.mxu2 %v8857_v2  ;;  %2294 = vmatpush.bf16.msra.mxu3 %v9017_v7  ;;  %v8593_v60 = vor.u32 %v12283_v52, %v8592_v51  ;;  %v9176_v2 = vld [vmem:[#allocation10 + $0x398] sm:$0xf]  ;;  %v12471_v7 = vld [vmem:[#allocation10 + $0x4e8] sm:$0xf0]  ;;  %v9056_v62 = vld [vmem:[#allocation10 + $0x2a8] sm:$0xf] }
  0xc0   :  { %v9337_v16 = vor.u32 %v12471_v7, %v9336_v6  ;;  %v9096_v52 = vld [vmem:[#allocation10 + $0x2f8] sm:$0xf]  ;;  %v12446_v6 = vld [vmem:[#allocation10 + $0x420] sm:$0xf0]  ;;  %v8818_v9 = vld [vmem:[#allocation10 + $0xdc] sm:$0xf0] }
  0xc1   :  { %v12384_v28 = vld [vmem:[#allocation10 + $0x234] sm:$0xf]  ;;  %v12374_v55 = vld [vmem:[#allocation10 + $0x1e4] sm:$0xf]  ;;  %v8958_v56 = vld [vmem:[#allocation10 + $0x1f4] sm:$0xf0] }
  0xc2   :  { %926 = vmatpush.bf16.msra.mxu0 %v8533_v63  ;;  %940 = vmatpush.bf16.msra.mxu1 %v8693_v1  ;;  %v8572_v63 = vld [vmem:[#allocation7 + $0x150] sm:$0xf]  ;;  %v12278_v1 = vld [vmem:[#allocation7 + $0x160] sm:$0xf0]  ;;  %v12436_v32 = vld [vmem:[#allocation10 + $0x3d0] sm:$0xf0] }
  0xc3   :  { %2281 = vmatpush.bf16.msra.mxu2 %v8837_v0  ;;  %2295 = vmatpush.bf16.msra.mxu3 %v8997_v10  ;;  %v8896_v0 = vld [vmem:[#allocation10 + $0x168] sm:$0xf]  ;;  %v12361_v10 = vld [vmem:[#allocation10 + $0x178] sm:$0xf0]  ;;  %v8573_v12 = vor.u32 %v12278_v1, %v8572_v63 }
  0xc4   :  { %v8897_v20 = vor.u32 %v12361_v10, %v8896_v0  ;;  %v12401_v63 = vld [vmem:[#allocation10 + $0x2b8] sm:$0xf0]  ;;  %v9456_v1 = vld [vmem:[#allocation10 + $0x5c8] sm:$0xf]  ;;  %v8821_v0 = vor.u32 %v12339_v8, %v8818_v9  ;;  %v9036_v10 = vld [vmem:[#allocation10 + $0x280] sm:$0xf] }
  0xc5   :  { %v8718_v8 = vld [vmem:[#allocation10 + $0x14] sm:$0xf0]  ;;  %v12414_v9 = vld [vmem:[#allocation10 + $0x324] sm:$0xf] }
  0xc6   :  { %927 = vmatpush.bf16.msra.mxu0 %v8513_v13  ;;  %941 = vmatpush.bf16.msra.mxu1 %v8673_v14  ;;  %v9177_v13 = vor.u32 %v12431_v3, %v9176_v2  ;;  %v9156_v14 = vld [vmem:[#allocation10 + $0x370] sm:$0xf]  ;;  %v9057_v2 = vor.u32 %v12401_v63, %v9056_v62  ;;  %v12501_v3 = vld [vmem:[#allocation10 + $0x5d8] sm:$0xf0]  ;;  %v9138_v62 = vld [vmem:[#allocation10 + $0x35c] sm:$0xf0] }
  0xc7   :  { %2282 = vmatpush.bf16.msra.mxu2 %v8817_v21  ;;  %2296 = vmatpush.bf16.msra.mxu3 %v8977_v22  ;;  %v8716_v21 = vld [vmem:[#allocation10] sm:$0xf]  ;;  %v12316_v22 = vld [vmem:[#allocation10 + $0x10] sm:$0xf0]  ;;  %v9157_v29 = vor.u32 %v12426_v15, %v9156_v14  ;;  %v12389_v15 = vld [vmem:[#allocation10 + $0x25c] sm:$0xf] }
  0xc8   :  { %v8717_v35 = vor.u32 %v12316_v22, %v8716_v21  ;;  %v12496_v14 = vld [vmem:[#allocation10 + $0x5b0] sm:$0xf0]  ;;  %v12334_v22 = vld [vmem:[#allocation10 + $0xa4] sm:$0xf]  ;;  %v9356_v63 = vld [vmem:[#allocation10 + $0x500] sm:$0xf] }
  0xca   :  { %928 = vmatpush.bf16.msra.mxu0 %v8493_v23  ;;  %942 = vmatpush.bf16.msra.mxu1 %v8653_v24  ;;  %v9496_v23 = vld [vmem:[#allocation10 + $0x618] sm:$0xf]  ;;  %v8876_v24 = vld [vmem:[#allocation10 + $0x140] sm:$0xf] }
  0xcb   :  { %2283 = vmatpush.bf16.msra.mxu2 %v8797_v39  ;;  %2297 = vmatpush.bf16.msra.mxu3 %v8957_v40  ;;  %v8877_v36 = vor.u32 %v12356_v25, %v8876_v24  ;;  %v9497_v37 = vor.u32 %v12511_v26, %v9496_v23  ;;  %v9476_v39 = vld [vmem:[#allocation10 + $0x5f0] sm:$0xf]  ;;  %v12506_v40 = vld [vmem:[#allocation10 + $0x600] sm:$0xf0]  ;;  %v8798_v23 = vld [vmem:[#allocation10 + $0xb4] sm:$0xf0] }
  0xcc   :  { %877 = vmatmul.bf16.vlgmr.msrb.gmra.mxu0 %v13737_v49  ;;  %891 = vmatmul.bf16.vlgmr.msrb.gmra.mxu1 %v13739_v50  ;;  %v8801_v24 = vor.u32 %v12334_v22, %v8798_v23  ;;  %v9416_v25 = vld [vmem:[#allocation10 + $0x578] sm:$0xf]  ;;  %v12491_v26 = vld [vmem:[#allocation10 + $0x588] sm:$0xf0]  ;;  %v12404_v22 = vld [vmem:[#allocation10 + $0x2d4] sm:$0xf] }
  0xcd   :  { %905 = vmatmul.bf16.vlgmr.msrb.gmra.mxu2 %v13737_v49  ;;  %919 = vmatmul.bf16.vlgmr.msrb.gmra.mxu3 %v13739_v50  ;;  %v9417_v27 = vor.u32 %v12491_v26, %v9416_v25  ;;  %v9078_v23 = vld [vmem:[#allocation10 + $0x2e4] sm:$0xf0] }
  0xce   :  { %929 = vmatpush.bf16.msra.mxu0 %v8473_v33  ;;  %943 = vmatpush.bf16.msra.mxu1 %v8633_v34  ;;  %v9296_v33 = vld [vmem:[#allocation10 + $0x488] sm:$0xf]  ;;  %v12461_v34 = vld [vmem:[#allocation10 + $0x498] sm:$0xf0]  ;;  %v9081_v25 = vor.u32 %v12404_v22, %v9078_v23  ;;  %v12454_v23 = vld [vmem:[#allocation10 + $0x464] sm:$0xf] }
  0xcf   :  { %2284 = vmatpush.bf16.msra.mxu2 %v8777_v53  ;;  %2298 = vmatpush.bf16.msra.mxu3 %v8937_v54  ;;  %v9277_v53 = vor.u32 %v12456_v48, %v9276_v47  ;;  %v12411_v54 = vld [vmem:[#allocation10 + $0x308] sm:$0xf0]  ;;  %v8758_v47 = vld [vmem:[#allocation10 + $0x64] sm:$0xf0]  ;;  %v12424_v48 = vld [vmem:[#allocation10 + $0x374] sm:$0xf] }
  0xd0   :  { %v9097_v57 = vor.u32 %v12411_v54, %v9096_v52  ;;  %v12481_v52 = vld [vmem:[#allocation10 + $0x538] sm:$0xf0] }
  0xd2   :  { %930 = vmatpush.bf16.msra.mxu0 %v8453_v45  ;;  %944 = vmatpush.bf16.msra.mxu1 %v8613_v46  ;;  %v9297_v45 = vor.u32 %v12461_v34, %v9296_v33  ;;  %v12416_v46 = vld [vmem:[#allocation10 + $0x330] sm:$0xf0]  ;;  %v12329_v34 = vld [vmem:[#allocation10 + $0x7c] sm:$0xf] }
  0xd3   :  { %2285 = vmatpush.bf16.msra.mxu2 %v8757_v4  ;;  %2299 = vmatpush.bf16.msra.mxu3 %v8917_v5  ;;  %v9117_v51 = vor.u32 %v12416_v46, %v9116_v44  ;;  %v9457_v4 = vor.u32 %v12501_v3, %v9456_v1  ;;  %v9236_v5 = vld [vmem:[#allocation10 + $0x410] sm:$0xf]  ;;  %v8978_v44 = vld [vmem:[#allocation10 + $0x21c] sm:$0xf0]  ;;  %v12324_v46 = vld [vmem:[#allocation10 + $0x54] sm:$0xf] }
  0xd4   :  { %v9237_v7 = vor.u32 %v12446_v6, %v9236_v5  ;;  %v12476_v1 = vld [vmem:[#allocation10 + $0x510] sm:$0xf0]  ;;  %v8938_v5 = vld [vmem:[#allocation10 + $0x1cc] sm:$0xf0] }
  0xd5   :  { %v9357_v3 = vor.u32 %v12476_v1, %v9356_v63  ;;  %v9318_v63 = vld [vmem:[#allocation10 + $0x4c4] sm:$0xf0] }
  0xd6   :  { %931 = vmatpush.bf16.msra.mxu0 %v8433_v59  ;;  %945 = vmatpush.bf16.msra.mxu1 %v8593_v60  ;;  %v9076_v59 = vld [vmem:[#allocation10 + $0x2d0] sm:$0xf]  ;;  %v12406_v60 = vld [vmem:[#allocation10 + $0x2e0] sm:$0xf0] }
  0xd7   :  { %2286 = vmatpush.bf16.msra.mxu2 %v8737_v19  ;;  %2300 = vmatpush.bf16.msra.mxu3 %v8897_v20  ;;  %v9077_v61 = vor.u32 %v12406_v60, %v9076_v59  ;;  %v9216_v19 = vld [vmem:[#allocation10 + $0x3e8] sm:$0xf]  ;;  %v12441_v20 = vld [vmem:[#allocation10 + $0x3f8] sm:$0xf0]  ;;  %v8738_v59 = vld [vmem:[#allocation10 + $0x3c] sm:$0xf0] }
  0xd8   :  { %v9217_v21 = vor.u32 %v12441_v20, %v9216_v19  ;;  %v12419_v60 = vld [vmem:[#allocation10 + $0x34c] sm:$0xf]  ;;  %v8898_v20 = vld [vmem:[#allocation10 + $0x17c] sm:$0xf0] }
  0xd9   :  { %v12359_v19 = vld [vmem:[#allocation10 + $0x16c] sm:$0xf] }
  0xda   :  { %932 = vmatpush.bf16.msra.mxu0 %v8413_v11  ;;  %946 = vmatpush.bf16.msra.mxu1 %v8573_v12  ;;  %v12396_v11 = vld [vmem:[#allocation10 + $0x290] sm:$0xf0]  ;;  %v9436_v12 = vld [vmem:[#allocation10 + $0x5a0] sm:$0xf] }
  0xdb   :  { %2287 = vmatpush.bf16.msra.mxu2 %v8717_v35  ;;  %2301 = vmatpush.bf16.msra.mxu3 %v8877_v36  ;;  %v9437_v17 = vor.u32 %v12496_v14, %v9436_v12  ;;  %v8778_v35 = vld [vmem:[#allocation10 + $0x8c] sm:$0xf0]  ;;  %v12429_v36 = vld [vmem:[#allocation10 + $0x39c] sm:$0xf]  ;;  %v12364_v12 = vld [vmem:[#allocation10 + $0x194] sm:$0xf] }
  0xdd   :  { %933 = vmatmul.bf16.vlgmr.msra.gmra.mxu0 %v13737_v49  ;;  %947 = vmatmul.bf16.vlgmr.msra.gmra.mxu1 %v13739_v50  ;;  %v9477_v49 = vor.u32 %v12506_v40, %v9476_v39  ;;  %v8841_v50 = vor.u32 %v12344_v41, %v8838_v42  ;;  %v9396_v39 = vld [vmem:[#allocation10 + $0x550] sm:$0xf]  ;;  %v12486_v40 = vld [vmem:[#allocation10 + $0x560] sm:$0xf0] }
  0xde   :  { %2308 = vmatpush.bf16.msrb.mxu0 %v9177_v13  ;;  %2322 = vmatpush.bf16.msrb.mxu1 %v9337_v16  ;;  %v9037_v13 = vor.u32 %v12396_v11, %v9036_v10  ;;  %v9018_v16 = vld [vmem:[#allocation10 + $0x26c] sm:$0xf0]  ;;  %v9397_v42 = vor.u32 %v12486_v40, %v9396_v39  ;;  %v9118_v10 = vld [vmem:[#allocation10 + $0x334] sm:$0xf0] }
  0xdf   :  { %2336 = vmatpush.bf16.msrb.mxu2 %v9497_v37  ;;  %2350 = vmatpush.bf16.msrb.mxu3 %v8861_v38  ;;  %v9021_v18 = vor.u32 %v12389_v15, %v9018_v16  ;;  %v8781_v37 = vor.u32 %v12329_v34, %v8778_v35  ;;  %v9178_v38 = vld [vmem:[#allocation10 + $0x3ac] sm:$0xf0]  ;;  %v9121_v11 = vor.u32 %v12414_v9, %v9118_v10  ;;  %v12409_v15 = vld [vmem:[#allocation10 + $0x2fc] sm:$0xf]  ;;  %v9298_v9 = vld [vmem:[#allocation10 + $0x49c] sm:$0xf0] }
  0xe0   :  { %v9181_v41 = vor.u32 %v12429_v36, %v9178_v38  ;;  %v9098_v16 = vld [vmem:[#allocation10 + $0x30c] sm:$0xf0]  ;;  %v12394_v36 = vld [vmem:[#allocation10 + $0x284] sm:$0xf] }
  0xe2   :  { %2309 = vmatpush.bf16.msrb.mxu0 %v9157_v29  ;;  %2323 = vmatpush.bf16.msrb.mxu1 %v9317_v31  ;;  %v8998_v29 = vld [vmem:[#allocation10 + $0x244] sm:$0xf0]  ;;  %v9196_v31 = vld [vmem:[#allocation10 + $0x3c0] sm:$0xf] }
  0xe3   :  { %2337 = vmatpush.bf16.msrb.mxu2 %v9477_v49  ;;  %2351 = vmatpush.bf16.msrb.mxu3 %v8841_v50  ;;  %v9001_v30 = vor.u32 %v12384_v28, %v8998_v29  ;;  %v9197_v33 = vor.u32 %v12436_v32, %v9196_v31  ;;  %v8761_v49 = vor.u32 %v12324_v46, %v8758_v47  ;;  %v9158_v50 = vld [vmem:[#allocation10 + $0x384] sm:$0xf0]  ;;  %v12354_v28 = vld [vmem:[#allocation10 + $0x144] sm:$0xf]  ;;  %v8878_v29 = vld [vmem:[#allocation10 + $0x154] sm:$0xf0] }
  0xe4   :  { %v12399_v31 = vld [vmem:[#allocation10 + $0x2ac] sm:$0xf]  ;;  %v9058_v32 = vld [vmem:[#allocation10 + $0x2bc] sm:$0xf0] }
  0xe5   :  { %v9061_v34 = vor.u32 %v12399_v31, %v9058_v32 }
  0xe6   :  { %2310 = vmatpush.bf16.msrb.mxu0 %v9137_v43  ;;  %2324 = vmatpush.bf16.msrb.mxu1 %v9297_v45  ;;  %v12379_v43 = vld [vmem:[#allocation10 + $0x20c] sm:$0xf] }
  0xe7   :  { %2338 = vmatpush.bf16.msrb.mxu2 %v9457_v4  ;;  %2352 = vmatpush.bf16.msrb.mxu3 %v8821_v0  ;;  %v8981_v45 = vor.u32 %v12379_v43, %v8978_v44  ;;  %v12369_v4 = vld [vmem:[#allocation10 + $0x1bc] sm:$0xf] }
  0xe8   :  { %v8941_v6 = vor.u32 %v12369_v4, %v8938_v5  ;;  %v9498_v5 = vld [vmem:[#allocation10 + $0x62c] sm:$0xf0] }
  0xea   :  { %2311 = vmatpush.bf16.msrb.mxu0 %v9117_v51  ;;  %2325 = vmatpush.bf16.msrb.mxu1 %v9277_v53  ;;  %v9376_v51 = vld [vmem:[#allocation10 + $0x528] sm:$0xf]  ;;  %v9161_v53 = vor.u32 %v12424_v48, %v9158_v50  ;;  %v12469_v48 = vld [vmem:[#allocation10 + $0x4dc] sm:$0xf] }
  0xeb   :  { %2339 = vmatpush.bf16.msrb.mxu2 %v9437_v17  ;;  %2353 = vmatpush.bf16.msrb.mxu3 %v8801_v24  ;;  %v9377_v54 = vor.u32 %v12481_v52, %v9376_v51  ;;  %v9101_v17 = vor.u32 %v12409_v15, %v9098_v16 }
  0xee   :  { %2312 = vmatpush.bf16.msrb.mxu0 %v9097_v57  ;;  %2326 = vmatpush.bf16.msrb.mxu1 %v9257_v58  ;;  %v8961_v57 = vor.u32 %v12374_v55, %v8958_v56  ;;  %v12319_v58 = vld [vmem:[#allocation10 + $0x2c] sm:$0xf] }
  0xef   :  { %2340 = vmatpush.bf16.msrb.mxu2 %v9417_v27  ;;  %2354 = vmatpush.bf16.msrb.mxu3 %v8781_v37  ;;  %v9038_v37 = vld [vmem:[#allocation10 + $0x294] sm:$0xf0] }
  0xf2   :  { %2313 = vmatpush.bf16.msrb.mxu0 %v9077_v61  ;;  %2327 = vmatpush.bf16.msrb.mxu1 %v9237_v7  ;;  %v8741_v61 = vor.u32 %v12319_v58, %v8738_v59  ;;  %v12314_v7 = vld [vmem:[#allocation10 + $0x4] sm:$0xf] }
  0xf3   :  { %2341 = vmatpush.bf16.msrb.mxu2 %v9397_v42  ;;  %2355 = vmatpush.bf16.msrb.mxu3 %v8761_v49  ;;  %v8721_v0 = vor.u32 %v12314_v7, %v8718_v8  ;;  %v9338_v49 = vld [vmem:[#allocation10 + $0x4ec] sm:$0xf0]  ;;  %v12459_v7 = vld [vmem:[#allocation10 + $0x48c] sm:$0xf] }
  0xf6   :  { %2314 = vmatpush.bf16.msrb.mxu0 %v9057_v2  ;;  %2328 = vmatpush.bf16.msrb.mxu1 %v9217_v21  ;;  %v9141_v2 = vor.u32 %v12419_v60, %v9138_v62  ;;  %v8901_v21 = vor.u32 %v12359_v19, %v8898_v20  ;;  %v12464_v62 = vld [vmem:[#allocation10 + $0x4b4] sm:$0xf]  ;;  %v9478_v19 = vld [vmem:[#allocation10 + $0x604] sm:$0xf0]  ;;  %v9301_v20 = vor.u32 %v12459_v7, %v9298_v9 }
  0xf7   :  { %2342 = vmatpush.bf16.msrb.mxu2 %v9377_v54  ;;  %2356 = vmatpush.bf16.msrb.mxu3 %v8741_v61 }
  0xfa   :  { %2315 = vmatpush.bf16.msrb.mxu0 %v9037_v13  ;;  %2329 = vmatpush.bf16.msrb.mxu1 %v9197_v33  ;;  %v8918_v13 = vld [vmem:[#allocation10 + $0x1a4] sm:$0xf0] }
  0xfb   :  { %2343 = vmatpush.bf16.msrb.mxu2 %v9357_v3  ;;  %2357 = vmatpush.bf16.msrb.mxu3 %v8721_v0  ;;  %v8921_v14 = vor.u32 %v12364_v12, %v8918_v13  ;;  %v12509_v3 = vld [vmem:[#allocation10 + $0x61c] sm:$0xf] }
  0xfc   :  { %v9501_v12 = vor.u32 %v12509_v3, %v9498_v5  ;;  %v12439_v5 = vld [vmem:[#allocation10 + $0x3ec] sm:$0xf] }
  0xfe   :  { %2364 = vmatpush.bf16.msra.mxu0 %v9021_v18  ;;  %2378 = vmatpush.bf16.msra.mxu1 %v9181_v41  ;;  %v13751_v18 = vld [vmem:[#allocation8] sm:$0x1f]  ;;  %v9041_v41 = vor.u32 %v12394_v36, %v9038_v37  ;;  %v9258_v36 = vld [vmem:[#allocation10 + $0x44c] sm:$0xf0] }
  0xff   :  { %v387_v24 = vperm.slane %v13751_v18, 0  ;;  %v388_v35 = vperm.slane %v13751_v18, 1  ;;  %v389_v56 = vperm.slane %v13751_v18, 2 }
 0x102   :  { %2365 = vmatpush.bf16.msra.mxu0 %v9001_v30  ;;  %2379 = vmatpush.bf16.msra.mxu1 %v9161_v53  ;;  %v8881_v30 = vor.u32 %v12354_v28, %v8878_v29  ;;  %v12499_v28 = vld [vmem:[#allocation10 + $0x5cc] sm:$0xf]  ;;  %v9458_v29 = vld [vmem:[#allocation10 + $0x5dc] sm:$0xf0] }
 0x106   :  { %2366 = vmatpush.bf16.msra.mxu0 %v8981_v45  ;;  %2380 = vmatpush.bf16.msra.mxu1 %v9141_v2 }
 0x10a   :  { %2367 = vmatpush.bf16.msra.mxu0 %v8961_v57  ;;  %2381 = vmatpush.bf16.msra.mxu1 %v9121_v11  ;;  %v9341_v57 = vor.u32 %v12469_v48, %v9338_v49  ;;  %v390_v11 = vperm.slane %v13751_v18, 3  ;;  %v8844_v48 = vld [vmem:[#allocation10 + $0xf8] sm:$0xf] }
 0x10e   :  { %2368 = vmatpush.bf16.msra.mxu0 %v8941_v6  ;;  %2382 = vmatpush.bf16.msra.mxu1 %v9101_v17  ;;  %v9321_v6 = vor.u32 %v12464_v62, %v9318_v63  ;;  %v12504_v17 = vld [vmem:[#allocation10 + $0x5f4] sm:$0xf] }
 0x10f   :  { %v12392_v63 = vld [vmem:[#allocation10 + $0x270] sm:$0xf0] }
 0x112   :  { %2369 = vmatpush.bf16.msra.mxu0 %v8921_v14  ;;  %2383 = vmatpush.bf16.msra.mxu1 %v9081_v25 }
 0x116   :  { %2370 = vmatpush.bf16.msra.mxu0 %v8901_v21  ;;  %2384 = vmatpush.bf16.msra.mxu1 %v9061_v34  ;;  %v12352_v34 = vld [vmem:[#allocation10 + $0x130] sm:$0xf0] }
 0x11a   :  { %2371 = vmatpush.bf16.msra.mxu0 %v8881_v30  ;;  %2385 = vmatpush.bf16.msra.mxu1 %v9041_v41 }
 0x139   :  { %v822_v26 = vpop.f32.mrf.mxu0  ;;  %v836_v27 = vpop.f32.mrf.mxu1 }
 0x13a   :  { %v823_v33 = vadd.f32 %v822_v26, %v387_v24 }
 0x13c   :  { %v837_v38 = vadd.f32 %v836_v27, %v823_v33  ;;  %v9481_v27 = vor.u32 %v12504_v17, %v9478_v19  ;;  %v8864_v33 = vld [vmem:[#allocation10 + $0x120] sm:$0xf]  ;;  %v9004_v17 = vld [vmem:[#allocation10 + $0x238] sm:$0xf]  ;;  %v12387_v19 = vld [vmem:[#allocation10 + $0x248] sm:$0xf0] }
 0x13e   :  { %v963_v46 = vmul.f32 0.2, %v837_v38  ;;  %vm953_vm4 = vcmp.ge.f32.partialorder %v837_v38, 0.0 }
 0x140   :  { %v850_v39 = vpop.f32.mrf.mxu2  ;;  %v864_v40 = vpop.f32.mrf.mxu3  ;;  %v973_v52 = vsel %vm953_vm4, %v837_v38, %v963_v46  ;;  %v9438_v46 = vld [vmem:[#allocation10 + $0x5b4] sm:$0xf0] }
 0x141   :  { %v824_v42 = vpop.f32.mrf.mxu0  ;;  %v838_v43 = vpop.f32.mrf.mxu1  ;;  %v851_v45 = vadd.f32 %v850_v39, %v388_v35  ;;  %v391_v39 = vperm.slane %v13751_v18, 4  ;;  %v12489_v18 = vld [vmem:[#allocation10 + $0x57c] sm:$0xf] }
 0x142   :  { %v825_v44 = vadd.f32 %v824_v42, %v387_v24  ;;  %v9278_v24 = vld [vmem:[#allocation10 + $0x474] sm:$0xf0] }
 0x143   :  { %v865_v51 = vadd.f32 %v864_v40, %v851_v45  ;;  %v9281_v32 = vor.u32 %v12454_v23, %v9278_v24  ;;  %v9461_v40 = vor.u32 %v12499_v28, %v9458_v29  ;;  %v12494_v45 = vld [vmem:[#allocation10 + $0x5a4] sm:$0xf]  ;;  %v12337_v23 = vld [vmem:[#allocation10 + $0xb8] sm:$0xf0]  ;;  %v9005_v29 = vor.u32 %v12387_v19, %v9004_v17 }
 0x144   :  { %v839_v47 = vadd.f32 %v838_v43, %v825_v44  ;;  %v8865_v44 = vor.u32 %v12352_v34, %v8864_v33  ;;  %v9441_v62 = vor.u32 %v12494_v45, %v9438_v46  ;;  %v12434_v24 = vld [vmem:[#allocation10 + $0x3c4] sm:$0xf]  ;;  %v9378_v33 = vld [vmem:[#allocation10 + $0x53c] sm:$0xf0]  ;;  %v8984_v34 = vld [vmem:[#allocation10 + $0x210] sm:$0xf] }
 0x145   :  { %v964_v1 = vmul.f32 0.2, %v865_v51  ;;  %vm954_vm6 = vcmp.ge.f32.partialorder %v865_v51, 0.0  ;;  %v12474_v46 = vld [vmem:[#allocation10 + $0x504] sm:$0xf] }
 0x146   :  { %vm958_vm5 = vcmp.ge.f32.partialorder %v839_v47, 0.0  ;;  %v968_v50 = vmul.f32 0.2, %v839_v47 }
 0x147   :  { %v974_v0 = vsel %vm954_vm6, %v865_v51, %v964_v1  ;;  %v8824_v1 = vld [vmem:[#allocation10 + $0xd0] sm:$0xf] }
 0x148   :  { %v978_v53 = vsel %vm958_vm5, %v839_v47, %v968_v50  ;;  %v852_v54 = vpop.f32.mrf.mxu2  ;;  %v866_v55 = vpop.f32.mrf.mxu3 }
 0x149   :  { %v13756_v58 = vpack.c.bf16 %v978_v53, %v973_v52  ;;  %v853_v59 = vadd.f32 %v852_v54, %v388_v35  ;;  %v878_v60 = vpop.f32.mrf.mxu0  ;;  %v892_v61 = vpop.f32.mrf.mxu1  ;;  %v12449_v35 = vld [vmem:[#allocation10 + $0x43c] sm:$0xf]  ;;  %v12347_v52 = vld [vmem:[#allocation10 + $0x108] sm:$0xf0]  ;;  %v12444_v53 = vld [vmem:[#allocation10 + $0x414] sm:$0xf] }
 0x14a   :  { %v879_v4 = vadd.f32 %v878_v60, %v389_v56  ;;  %v9261_v47 = vor.u32 %v12449_v35, %v9258_v36  ;;  %v9238_v54 = vld [vmem:[#allocation10 + $0x424] sm:$0xf0]  ;;  %v12382_v35 = vld [vmem:[#allocation10 + $0x220] sm:$0xf0] }
 0x14b   :  { %v867_v2 = vadd.f32 %v866_v55, %v853_v59  ;;  %2288 = vmatmul.bf16.vlgmr.msra.gmra.mxu2 %v13756_v58  ;;  %v9024_v59 = vld [vmem:[#allocation10 + $0x260] sm:$0xf]  ;;  %v9241_v3 = vor.u32 %v12444_v53, %v9238_v54  ;;  %v8985_v45 = vor.u32 %v12382_v35, %v8984_v34  ;;  %v9284_v34 = vld [vmem:[#allocation10 + $0x468] sm:$0xf]  ;;  %v12457_v35 = vld [vmem:[#allocation10 + $0x478] sm:$0xf0] }
 0x14c   :  { %2392 = vmatpush.bf16.msra.mxu2 %v9341_v57  ;;  %v893_v14 = vadd.f32 %v892_v61, %v879_v4  ;;  %v9418_v57 = vld [vmem:[#allocation10 + $0x58c] sm:$0xf0]  ;;  %v12342_v4 = vld [vmem:[#allocation10 + $0xe0] sm:$0xf0] }
 0x14d   :  { %vm959_vm7 = vcmp.ge.f32.partialorder %v867_v2, 0.0  ;;  %v969_v8 = vmul.f32 0.2, %v867_v2 }
 0x14e   :  { %v965_v30 = vmul.f32 0.2, %v893_v14  ;;  %vm955_vm8 = vcmp.ge.f32.partialorder %v893_v14, 0.0 }
 0x14f   :  { %v979_v10 = vsel %vm959_vm7, %v867_v2, %v969_v8  ;;  %v8845_v2 = vor.u32 %v12347_v52, %v8844_v48  ;;  %v9218_v8 = vld [vmem:[#allocation10 + $0x3fc] sm:$0xf0]  ;;  %v8964_v48 = vld [vmem:[#allocation10 + $0x1e8] sm:$0xf] }
 0x150   :  { %v13760_v13 = vpack.c.bf16 %v979_v10, %v974_v0  ;;  %v906_v15 = vpop.f32.mrf.mxu2  ;;  %v920_v16 = vpop.f32.mrf.mxu3  ;;  %2393 = vmatpush.bf16.msra.mxu2 %v9321_v6  ;;  %v975_v41 = vsel %vm955_vm8, %v893_v14, %v965_v30  ;;  %v9421_v10 = vor.u32 %v12489_v18, %v9418_v57  ;;  %v9398_v14 = vld [vmem:[#allocation10 + $0x564] sm:$0xf0]  ;;  %v12479_v30 = vld [vmem:[#allocation10 + $0x52c] sm:$0xf]  ;;  %v8764_v18 = vld [vmem:[#allocation10 + $0x58] sm:$0xf] }
 0x151   :  { %v880_v21 = vpop.f32.mrf.mxu0  ;;  %v894_v22 = vpop.f32.mrf.mxu1  ;;  %v907_v26 = vadd.f32 %v906_v15, %v390_v11 }
 0x152   :  { %v881_v25 = vadd.f32 %v880_v21, %v389_v56  ;;  %2302 = vmatmul.bf16.vlgmr.msra.gmra.mxu3 %v13760_v13  ;;  %v8804_v21 = vld [vmem:[#allocation10 + $0xa8] sm:$0xf] }
 0x153   :  { %2406 = vmatpush.bf16.msra.mxu3 %v9501_v12  ;;  %v921_v38 = vadd.f32 %v920_v16, %v907_v26  ;;  %v12484_v12 = vld [vmem:[#allocation10 + $0x554] sm:$0xf]  ;;  %v8825_v16 = vor.u32 %v12342_v4, %v8824_v1 }
 0x154   :  { %v895_v31 = vadd.f32 %v894_v22, %v881_v25  ;;  %2394 = vmatpush.bf16.msra.mxu2 %v9301_v20  ;;  %v9221_v20 = vor.u32 %v12439_v5, %v9218_v8  ;;  %v9198_v25 = vld [vmem:[#allocation10 + $0x3d4] sm:$0xf0]  ;;  %v9401_v28 = vor.u32 %v12484_v12, %v9398_v14  ;;  %v8744_v8 = vld [vmem:[#allocation10 + $0x30] sm:$0xf] }
 0x155   :  { %v966_v60 = vmul.f32 0.2, %v921_v38  ;;  %vm956_vm10 = vcmp.ge.f32.partialorder %v921_v38, 0.0  ;;  %v9201_v36 = vor.u32 %v12434_v24, %v9198_v25  ;;  %v8924_v14 = vld [vmem:[#allocation10 + $0x198] sm:$0xf] }
 0x156   :  { %vm960_vm9 = vcmp.ge.f32.partialorder %v895_v31, 0.0  ;;  %v970_v37 = vmul.f32 0.2, %v895_v31  ;;  %v9124_v24 = vld [vmem:[#allocation10 + $0x328] sm:$0xf] }
 0x157   :  { %2407 = vmatpush.bf16.msra.mxu3 %v9481_v27  ;;  %v976_v9 = vsel %vm956_vm10, %v921_v38, %v966_v60  ;;  %v9164_v60 = vld [vmem:[#allocation10 + $0x378] sm:$0xf]  ;;  %v12417_v25 = vld [vmem:[#allocation10 + $0x338] sm:$0xf0] }
 0x158   :  { %v980_v42 = vsel %vm960_vm9, %v895_v31, %v970_v37  ;;  %v908_v43 = vpop.f32.mrf.mxu2  ;;  %2395 = vmatpush.bf16.msra.mxu2 %v9281_v32  ;;  %v922_v51 = vpop.f32.mrf.mxu3  ;;  %v8805_v32 = vor.u32 %v12337_v23, %v8804_v21  ;;  %v12462_v21 = vld [vmem:[#allocation10 + $0x4a0] sm:$0xf0]  ;;  %v12317_v23 = vld [vmem:[#allocation10 + $0x18] sm:$0xf0] }
 0x159   :  { %v13764_v49 = vpack.c.bf16 %v980_v42, %v975_v41  ;;  %v909_v50 = vadd.f32 %v908_v43, %v390_v11  ;;  %v9025_v11 = vor.u32 %v12392_v63, %v9024_v59  ;;  %v12332_v41 = vld [vmem:[#allocation10 + $0x90] sm:$0xf0]  ;;  %v9184_v42 = vld [vmem:[#allocation10 + $0x3a0] sm:$0xf]  ;;  %v12327_v59 = vld [vmem:[#allocation10 + $0x68] sm:$0xf0] }
 0x15a   :  { %v934_v55 = vpop.f32.mrf.mxu0  ;;  %v948_v56 = vpop.f32.mrf.mxu1  ;;  %v8765_v4 = vor.u32 %v12327_v59, %v8764_v18 }
 0x15b   :  { %v923_v61 = vadd.f32 %v922_v51, %v909_v50  ;;  %2408 = vmatpush.bf16.msra.mxu3 %v9461_v40  ;;  %2316 = vmatmul.bf16.vlgmr.msrb.gmra.mxu0 %v13764_v49  ;;  %v935_v7 = vadd.f32 %v934_v55, %v391_v39  ;;  %v8784_v40 = vld [vmem:[#allocation10 + $0x80] sm:$0xf]  ;;  %v12377_v50 = vld [vmem:[#allocation10 + $0x1f8] sm:$0xf0] }
 0x15c   :  { %2420 = vmatpush.bf16.msrb.mxu0 %v8865_v44  ;;  %2396 = vmatpush.bf16.msra.mxu2 %v9261_v47  ;;  %v9381_v44 = vor.u32 %v12479_v30, %v9378_v33  ;;  %v9358_v47 = vld [vmem:[#allocation10 + $0x514] sm:$0xf0]  ;;  %v8785_v53 = vor.u32 %v12332_v41, %v8784_v40  ;;  %v9344_v55 = vld [vmem:[#allocation10 + $0x4e0] sm:$0xf]  ;;  %v8965_v63 = vor.u32 %v12377_v50, %v8964_v48  ;;  %v8904_v30 = vld [vmem:[#allocation10 + $0x170] sm:$0xf] }
 0x15d   :  { %vm961_vm11 = vcmp.ge.f32.partialorder %v923_v61, 0.0  ;;  %v971_v6 = vmul.f32 0.2, %v923_v61  ;;  %v949_v22 = vadd.f32 %v948_v56, %v935_v7  ;;  %v12472_v56 = vld [vmem:[#allocation10 + $0x4f0] sm:$0xf0]  ;;  %v9125_v33 = vor.u32 %v12417_v25, %v9124_v24 }
 0x15e   :  { %v9345_v1 = vor.u32 %v12472_v56, %v9344_v55  ;;  %v12467_v7 = vld [vmem:[#allocation10 + $0x4c8] sm:$0xf0]  ;;  %v9484_v41 = vld [vmem:[#allocation10 + $0x5f8] sm:$0xf]  ;;  %v12350_v48 = vld [vmem:[#allocation10 + $0x124] sm:$0xf] }
 0x15f   :  { %v981_v0 = vsel %vm961_vm11, %v923_v61, %v971_v6  ;;  %2409 = vmatpush.bf16.msra.mxu3 %v9441_v62  ;;  %v967_v37 = vmul.f32 0.2, %v949_v22  ;;  %vm957_vm12 = vcmp.ge.f32.partialorder %v949_v22, 0.0  ;;  %v12427_v61 = vld [vmem:[#allocation10 + $0x388] sm:$0xf0]  ;;  %v9361_v62 = vor.u32 %v12474_v46, %v9358_v47 }
 0x160   :  { %v13767_v15 = vpack.c.bf16 %v981_v0, %v976_v9  ;;  %2421 = vmatpush.bf16.msrb.mxu0 %v8845_v2  ;;  %2397 = vmatpush.bf16.msra.mxu2 %v9241_v3  ;;  %v8944_v2 = vld [vmem:[#allocation10 + $0x1c0] sm:$0xf]  ;;  %v12372_v3 = vld [vmem:[#allocation10 + $0x1d0] sm:$0xf0]  ;;  %v9165_v5 = vor.u32 %v12427_v61, %v9164_v60  ;;  %v9324_v6 = vld [vmem:[#allocation10 + $0x4b8] sm:$0xf] }
 0x161   :  { %v977_v51 = vsel %vm957_vm12, %v949_v22, %v967_v37  ;;  %v12322_v9 = vld [vmem:[#allocation10 + $0x40] sm:$0xf0]  ;;  %v9144_v0 = vld [vmem:[#allocation10 + $0x350] sm:$0xf]  ;;  %v9325_v12 = vor.u32 %v12467_v7, %v9324_v6  ;;  %v8724_v22 = vld [vmem:[#allocation10 + $0x8] sm:$0xf] }
 0x162   :  { %v936_v26 = vpop.f32.mrf.mxu0  ;;  %2330 = vmatmul.bf16.vlgmr.msrb.gmra.mxu1 %v13767_v15  ;;  %2358 = vmatmul.bf16.vlgmr.msrb.gmra.mxu3 %v13756_v58  ;;  %v950_v31 = vpop.f32.mrf.mxu1  ;;  %v8745_v17 = vor.u32 %v12322_v9, %v8744_v8  ;;  %v9104_v37 = vld [vmem:[#allocation10 + $0x300] sm:$0xf]  ;;  %v12452_v47 = vld [vmem:[#allocation10 + $0x450] sm:$0xf0]  ;;  %v8866_v50 = vld [vmem:[#allocation10 + $0x134] sm:$0xf0] }
 0x163   :  { %v937_v27 = vadd.f32 %v936_v26, %v391_v39  ;;  %2410 = vmatpush.bf16.msra.mxu3 %v9421_v10  ;;  %2434 = vmatpush.bf16.msrb.mxu1 %v9025_v11  ;;  %v12432_v39 = vld [vmem:[#allocation10 + $0x3b0] sm:$0xf0]  ;;  %v12422_v10 = vld [vmem:[#allocation10 + $0x360] sm:$0xf0]  ;;  %v8945_v11 = vor.u32 %v12372_v3, %v8944_v2  ;;  %v9464_v55 = vld [vmem:[#allocation10 + $0x5d0] sm:$0xf]  ;;  %v8869_v59 = vor.u32 %v12350_v48, %v8866_v50 }
 0x164   :  { %2422 = vmatpush.bf16.msrb.mxu0 %v8825_v16  ;;  %2398 = vmatpush.bf16.msra.mxu2 %v9221_v20  ;;  %v9185_v54 = vor.u32 %v12432_v39, %v9184_v42  ;;  %v12367_v16 = vld [vmem:[#allocation10 + $0x1a8] sm:$0xf0]  ;;  %v9145_v19 = vor.u32 %v12422_v10, %v9144_v0  ;;  %v9304_v20 = vld [vmem:[#allocation10 + $0x490] sm:$0xf]  ;;  %v9285_v39 = vor.u32 %v12457_v35, %v9284_v34  ;;  %v12502_v56 = vld [vmem:[#allocation10 + $0x5e0] sm:$0xf0] }
 0x165   :  { %v951_v38 = vadd.f32 %v950_v31, %v937_v27  ;;  %v8925_v26 = vor.u32 %v12367_v16, %v8924_v14  ;;  %v9504_v27 = vld [vmem:[#allocation10 + $0x620] sm:$0xf]  ;;  %v12362_v31 = vld [vmem:[#allocation10 + $0x180] sm:$0xf0]  ;;  %v12507_v42 = vld [vmem:[#allocation10 + $0x608] sm:$0xf0]  ;;  %v9465_v2 = vor.u32 %v12502_v56, %v9464_v55 }
 0x166   :  { %v8905_v40 = vor.u32 %v12362_v31, %v8904_v30  ;;  %v9244_v60 = vld [vmem:[#allocation10 + $0x418] sm:$0xf]  ;;  %v9064_v3 = vld [vmem:[#allocation10 + $0x2b0] sm:$0xf]  ;;  %v12497_v6 = vld [vmem:[#allocation10 + $0x5b8] sm:$0xf0] }
 0x167   :  { %vm962_vm13 = vcmp.ge.f32.partialorder %v951_v38, 0.0  ;;  %v972_v43 = vmul.f32 0.2, %v951_v38  ;;  %2411 = vmatpush.bf16.msra.mxu3 %v9401_v28  ;;  %2435 = vmatpush.bf16.msrb.mxu1 %v9005_v29  ;;  %v12512_v28 = vld [vmem:[#allocation10 + $0x630] sm:$0xf0]  ;;  %v9305_v29 = vor.u32 %v12462_v21, %v9304_v20 }
 0x168   :  { %2423 = vmatpush.bf16.msrb.mxu0 %v8805_v32  ;;  %2399 = vmatpush.bf16.msra.mxu2 %v9201_v36  ;;  %v8725_v32 = vor.u32 %v12317_v23, %v8724_v22  ;;  %v9505_v36 = vor.u32 %v12512_v28, %v9504_v27  ;;  %v9224_v9 = vld [vmem:[#allocation10 + $0x3f0] sm:$0xf]  ;;  %v12442_v10 = vld [vmem:[#allocation10 + $0x400] sm:$0xf0]  ;;  %v9044_v16 = vld [vmem:[#allocation10 + $0x288] sm:$0xf] }
 0x169   :  { %v982_v52 = vsel %vm962_vm13, %v951_v38, %v972_v43  ;;  %v12412_v38 = vld [vmem:[#allocation10 + $0x310] sm:$0xf0]  ;;  %v8884_v43 = vld [vmem:[#allocation10 + $0x148] sm:$0xf]  ;;  %v12390_v21 = vld [vmem:[#allocation10 + $0x264] sm:$0xf]  ;;  %v9225_v23 = vor.u32 %v12442_v10, %v9224_v9 }
 0x16a   :  { %v13771_v57 = vpack.c.bf16 %v982_v52, %v977_v51  ;;  %v9105_v46 = vor.u32 %v12412_v38, %v9104_v37  ;;  %v9485_v51 = vor.u32 %v12507_v42, %v9484_v41  ;;  %v9084_v52 = vld [vmem:[#allocation10 + $0x2d8] sm:$0xf]  ;;  %v12492_v20 = vld [vmem:[#allocation10 + $0x590] sm:$0xf0]  ;;  %v9204_v25 = vld [vmem:[#allocation10 + $0x3c8] sm:$0xf] }
 0x16b   :  { %2412 = vmatpush.bf16.msra.mxu3 %v9381_v44  ;;  %2436 = vmatpush.bf16.msrb.mxu1 %v8985_v45  ;;  %v12357_v44 = vld [vmem:[#allocation10 + $0x158] sm:$0xf0]  ;;  %v9264_v45 = vld [vmem:[#allocation10 + $0x440] sm:$0xf]  ;;  %v9026_v22 = vld [vmem:[#allocation10 + $0x274] sm:$0xf0] }
 0x16c   :  { %2344 = vmatmul.bf16.vlgmr.msrb.gmra.mxu2 %v13771_v57  ;;  %2372 = vmatmul.bf16.vlgmr.msra.gmra.mxu0 %v13760_v13  ;;  %v9265_v18 = vor.u32 %v12452_v47, %v9264_v45  ;;  %v12437_v27 = vld [vmem:[#allocation10 + $0x3d8] sm:$0xf0]  ;;  %v12335_v28 = vld [vmem:[#allocation10 + $0xac] sm:$0xf]  ;;  %v9029_v31 = vor.u32 %v12390_v21, %v9026_v22  ;;  %v9404_v34 = vld [vmem:[#allocation10 + $0x558] sm:$0xf] }
 0x16d   :  { %2424 = vmatpush.bf16.msrb.mxu0 %v8785_v53  ;;  %2448 = vmatpush.bf16.msrb.mxu2 %v9185_v54  ;;  %v12407_v53 = vld [vmem:[#allocation10 + $0x2e8] sm:$0xf0]  ;;  %v8885_v54 = vor.u32 %v12357_v44, %v8884_v43  ;;  %v9006_v37 = vld [vmem:[#allocation10 + $0x24c] sm:$0xf0]  ;;  %v9205_v38 = vor.u32 %v12437_v27, %v9204_v25  ;;  %v12330_v42 = vld [vmem:[#allocation10 + $0x84] sm:$0xf] }
 0x16e   :  { %v9085_v61 = vor.u32 %v12407_v53, %v9084_v52  ;;  %v12487_v35 = vld [vmem:[#allocation10 + $0x568] sm:$0xf0]  ;;  %v12425_v45 = vld [vmem:[#allocation10 + $0x37c] sm:$0xf]  ;;  %v9384_v47 = vld [vmem:[#allocation10 + $0x530] sm:$0xf] }
 0x16f   :  { %2413 = vmatpush.bf16.msra.mxu3 %v9361_v62  ;;  %2437 = vmatpush.bf16.msrb.mxu1 %v8965_v63  ;;  %v12447_v62 = vld [vmem:[#allocation10 + $0x428] sm:$0xf0]  ;;  %v12345_v63 = vld [vmem:[#allocation10 + $0xfc] sm:$0xf]  ;;  %v9405_v43 = vor.u32 %v12487_v35, %v9404_v34  ;;  %v12482_v48 = vld [vmem:[#allocation10 + $0x540] sm:$0xf0] }
 0x170   :  { %v9245_v7 = vor.u32 %v12447_v62, %v9244_v60  ;;  %v12380_v50 = vld [vmem:[#allocation10 + $0x214] sm:$0xf]  ;;  %v8766_v55 = vld [vmem:[#allocation10 + $0x6c] sm:$0xf0]  ;;  %v9385_v56 = vor.u32 %v12482_v48, %v9384_v47  ;;  %v9146_v60 = vld [vmem:[#allocation10 + $0x364] sm:$0xf0] }
 0x171   :  { %2425 = vmatpush.bf16.msrb.mxu0 %v8765_v4  ;;  %2449 = vmatpush.bf16.msrb.mxu2 %v9165_v5  ;;  %v12402_v4 = vld [vmem:[#allocation10 + $0x2c0] sm:$0xf0]  ;;  %v9444_v5 = vld [vmem:[#allocation10 + $0x5a8] sm:$0xf]  ;;  %v12477_v62 = vld [vmem:[#allocation10 + $0x518] sm:$0xf0] }
 0x172   :  { %2386 = vmatmul.bf16.vlgmr.msra.gmra.mxu1 %v13764_v49  ;;  %2414 = vmatmul.bf16.vlgmr.msra.gmra.mxu3 %v13771_v57  ;;  %v9065_v0 = vor.u32 %v12402_v4, %v9064_v3  ;;  %v9445_v14 = vor.u32 %v12497_v6, %v9444_v5  ;;  %v12470_v3 = vld [vmem:[#allocation10 + $0x4e4] sm:$0xf]  ;;  %v9346_v4 = vld [vmem:[#allocation10 + $0x4f4] sm:$0xf0]  ;;  %v12320_v6 = vld [vmem:[#allocation10 + $0x34] sm:$0xf] }
 0x173   :  { %2462 = vmatpush.bf16.msrb.mxu3 %v9345_v1  ;;  %2438 = vmatpush.bf16.msrb.mxu1 %v8945_v11  ;;  %v8846_v1 = vld [vmem:[#allocation10 + $0x10c] sm:$0xf0]  ;;  %v12340_v11 = vld [vmem:[#allocation10 + $0xd4] sm:$0xf]  ;;  %v9126_v10 = vld [vmem:[#allocation10 + $0x33c] sm:$0xf0] }
 0x174   :  { %v8849_v8 = vor.u32 %v12345_v63, %v8846_v1  ;;  %v12375_v63 = vld [vmem:[#allocation10 + $0x1ec] sm:$0xf]  ;;  %v8966_v1 = vld [vmem:[#allocation10 + $0x1fc] sm:$0xf0]  ;;  %v9106_v25 = vld [vmem:[#allocation10 + $0x314] sm:$0xf0] }
 0x175   :  { %2426 = vmatpush.bf16.msrb.mxu0 %v8745_v17  ;;  %2450 = vmatpush.bf16.msrb.mxu2 %v9145_v19  ;;  %v12397_v17 = vld [vmem:[#allocation10 + $0x298] sm:$0xf0]  ;;  %v9424_v19 = vld [vmem:[#allocation10 + $0x580] sm:$0xf]  ;;  %v8969_v9 = vor.u32 %v12375_v63, %v8966_v1  ;;  %v12315_v21 = vld [vmem:[#allocation10 + $0xc] sm:$0xf] }
 0x176   :  { %v9425_v30 = vor.u32 %v12492_v20, %v9424_v19  ;;  %v9326_v19 = vld [vmem:[#allocation10 + $0x4cc] sm:$0xf0]  ;;  %v8726_v22 = vld [vmem:[#allocation10 + $0x1c] sm:$0xf0]  ;;  %v9506_v27 = vld [vmem:[#allocation10 + $0x634] sm:$0xf0] }
 0x177   :  { %2463 = vmatpush.bf16.msrb.mxu3 %v9325_v12  ;;  %2439 = vmatpush.bf16.msrb.mxu1 %v8925_v26  ;;  %v8826_v12 = vld [vmem:[#allocation10 + $0xe4] sm:$0xf0]  ;;  %v9045_v26 = vor.u32 %v12397_v17, %v9044_v16  ;;  %v12465_v17 = vld [vmem:[#allocation10 + $0x4bc] sm:$0xf]  ;;  %v12400_v48 = vld [vmem:[#allocation10 + $0x2b4] sm:$0xf] }
 0x178   :  { %v8829_v24 = vor.u32 %v12340_v11, %v8826_v12  ;;  %v9349_v11 = vor.u32 %v12470_v3, %v9346_v4  ;;  %v12370_v12 = vld [vmem:[#allocation10 + $0x1c4] sm:$0xf]  ;;  %v12395_v1 = vld [vmem:[#allocation10 + $0x28c] sm:$0xf]  ;;  %v9046_v3 = vld [vmem:[#allocation10 + $0x29c] sm:$0xf0] }
 0x179   :  { %2427 = vmatpush.bf16.msrb.mxu0 %v8725_v32  ;;  %2451 = vmatpush.bf16.msrb.mxu2 %v9125_v33  ;;  %v12430_v32 = vld [vmem:[#allocation10 + $0x3a4] sm:$0xf]  ;;  %v9186_v33 = vld [vmem:[#allocation10 + $0x3b4] sm:$0xf0]  ;;  %v12495_v4 = vld [vmem:[#allocation10 + $0x5ac] sm:$0xf] }
 0x17a   :  { %v9189_v41 = vor.u32 %v12430_v32, %v9186_v33  ;;  %v12460_v32 = vld [vmem:[#allocation10 + $0x494] sm:$0xf]  ;;  %v9306_v33 = vld [vmem:[#allocation10 + $0x4a4] sm:$0xf0] }
 0x17b   :  { %2464 = vmatpush.bf16.msrb.mxu3 %v9305_v29  ;;  %2440 = vmatpush.bf16.msrb.mxu1 %v8905_v40  ;;  %v8806_v29 = vld [vmem:[#allocation10 + $0xbc] sm:$0xf0] }
 0x17c   :  { %2400 = vmatmul.bf16.vlgmr.msra.gmra.mxu2 %v13767_v15  ;;  %2428 = vmatmul.bf16.vlgmr.msrb.gmra.mxu0 %v13756_v58  ;;  %v8809_v40 = vor.u32 %v12335_v28, %v8806_v29  ;;  %v9329_v28 = vor.u32 %v12465_v17, %v9326_v19  ;;  %v12365_v29 = vld [vmem:[#allocation10 + $0x19c] sm:$0xf]  ;;  %v12490_v19 = vld [vmem:[#allocation10 + $0x584] sm:$0xf] }
 0x17d   :  { %2476 = vmatpush.bf16.msra.mxu0 %v9505_v36  ;;  %2452 = vmatpush.bf16.msrb.mxu2 %v9105_v46  ;;  %v12385_v36 = vld [vmem:[#allocation10 + $0x23c] sm:$0xf]  ;;  %v9166_v46 = vld [vmem:[#allocation10 + $0x38c] sm:$0xf0] }
 0x17e   :  { %v9009_v44 = vor.u32 %v12385_v36, %v9006_v37  ;;  %v9169_v53 = vor.u32 %v12425_v45, %v9166_v46  ;;  %v12405_v36 = vld [vmem:[#allocation10 + $0x2dc] sm:$0xf]  ;;  %v9286_v45 = vld [vmem:[#allocation10 + $0x47c] sm:$0xf0] }
 0x17f   :  { %2465 = vmatpush.bf16.msrb.mxu3 %v9285_v39  ;;  %2441 = vmatpush.bf16.msrb.mxu1 %v8885_v54  ;;  %v8786_v39 = vld [vmem:[#allocation10 + $0x94] sm:$0xf0]  ;;  %v12325_v54 = vld [vmem:[#allocation10 + $0x5c] sm:$0xf] }
 0x180   :  { %v8789_v52 = vor.u32 %v12330_v42, %v8786_v39  ;;  %v9309_v42 = vor.u32 %v12460_v32, %v9306_v33  ;;  %v12360_v39 = vld [vmem:[#allocation10 + $0x174] sm:$0xf]  ;;  %v9406_v32 = vld [vmem:[#allocation10 + $0x56c] sm:$0xf0] }
 0x181   :  { %2477 = vmatpush.bf16.msra.mxu0 %v9485_v51  ;;  %2453 = vmatpush.bf16.msrb.mxu2 %v9085_v61  ;;  %v8986_v51 = vld [vmem:[#allocation10 + $0x224] sm:$0xf0] }
 0x182   :  { %2442 = vmatmul.bf16.vlgmr.msrb.gmra.mxu1 %v13760_v13  ;;  %v9364_v61 = vld [vmem:[#allocation10 + $0x508] sm:$0xf] }
 0x183   :  { %2466 = vmatpush.bf16.msrb.mxu3 %v9265_v18  ;;  %2490 = vmatpush.bf16.msra.mxu1 %v8869_v59  ;;  %v8989_v18 = vor.u32 %v12380_v50, %v8986_v51  ;;  %v12420_v59 = vld [vmem:[#allocation10 + $0x354] sm:$0xf]  ;;  %v9066_v51 = vld [vmem:[#allocation10 + $0x2c4] sm:$0xf0] }
 0x184   :  { %v9149_v5 = vor.u32 %v12420_v59, %v9146_v60  ;;  %v9266_v59 = vld [vmem:[#allocation10 + $0x454] sm:$0xf0]  ;;  %v8872_v60 = vld [vmem:[#allocation10 + $0x128] sm:$0xf] }
 0x185   :  { %2478 = vmatpush.bf16.msra.mxu0 %v9465_v2  ;;  %2454 = vmatpush.bf16.msrb.mxu2 %v9065_v0  ;;  %v8769_v2 = vor.u32 %v12325_v54, %v8766_v55  ;;  %v12415_v0 = vld [vmem:[#allocation10 + $0x32c] sm:$0xf] }
 0x186   :  { %v9129_v20 = vor.u32 %v12415_v0, %v9126_v10  ;;  %v12355_v55 = vld [vmem:[#allocation10 + $0x14c] sm:$0xf]  ;;  %v12445_v0 = vld [vmem:[#allocation10 + $0x41c] sm:$0xf]  ;;  %v9246_v10 = vld [vmem:[#allocation10 + $0x42c] sm:$0xf0] }
 0x187   :  { %2467 = vmatpush.bf16.msrb.mxu3 %v9245_v7  ;;  %2491 = vmatpush.bf16.msra.mxu1 %v8849_v8  ;;  %v8746_v7 = vld [vmem:[#allocation10 + $0x44] sm:$0xf0]  ;;  %v9365_v8 = vor.u32 %v12477_v62, %v9364_v61  ;;  %v12353_v61 = vld [vmem:[#allocation10 + $0x138] sm:$0xf0]  ;;  %v9069_v62 = vor.u32 %v12400_v48, %v9066_v51 }
 0x188   :  { %v8749_v16 = vor.u32 %v12320_v6, %v8746_v7  ;;  %v8873_v7 = vor.u32 %v12353_v61, %v8872_v60  ;;  %v9386_v48 = vld [vmem:[#allocation10 + $0x544] sm:$0xf0] }
 0x189   :  { %2479 = vmatpush.bf16.msra.mxu0 %v9445_v14  ;;  %2455 = vmatpush.bf16.msrb.mxu2 %v9045_v26  ;;  %v8946_v14 = vld [vmem:[#allocation10 + $0x1d4] sm:$0xf0]  ;;  %v12510_v26 = vld [vmem:[#allocation10 + $0x624] sm:$0xf] }
 0x18a   :  { %v9509_v35 = vor.u32 %v12510_v26, %v9506_v27  ;;  %v9226_v26 = vld [vmem:[#allocation10 + $0x404] sm:$0xf0]  ;;  %v8832_v27 = vld [vmem:[#allocation10 + $0xd8] sm:$0xf] }
 0x18b   :  { %2468 = vmatpush.bf16.msrb.mxu3 %v9225_v23  ;;  %2492 = vmatpush.bf16.msra.mxu1 %v8829_v24  ;;  %v12410_v23 = vld [vmem:[#allocation10 + $0x304] sm:$0xf]  ;;  %v8949_v24 = vor.u32 %v12370_v12, %v8946_v14  ;;  %v12348_v12 = vld [vmem:[#allocation10 + $0x110] sm:$0xf0]  ;;  %v9049_v14 = vor.u32 %v12395_v1, %v9046_v3  ;;  %v12373_v1 = vld [vmem:[#allocation10 + $0x1d8] sm:$0xf0] }
 0x18c   :  { %2456 = vmatmul.bf16.vlgmr.msrb.gmra.mxu2 %v13764_v49  ;;  %v9109_v34 = vor.u32 %v12410_v23, %v9106_v25  ;;  %v9012_v23 = vld [vmem:[#allocation10 + $0x240] sm:$0xf]  ;;  %v12440_v25 = vld [vmem:[#allocation10 + $0x3f4] sm:$0xf]  ;;  %v9352_v3 = vld [vmem:[#allocation10 + $0x4e8] sm:$0xf] }
 0x18d   :  { %2480 = vmatpush.bf16.msra.mxu0 %v9425_v30  ;;  %2504 = vmatpush.bf16.msra.mxu2 %v9029_v31  ;;  %v8926_v30 = vld [vmem:[#allocation10 + $0x1ac] sm:$0xf0]  ;;  %v8729_v31 = vor.u32 %v12315_v21, %v8726_v22  ;;  %v9249_v21 = vor.u32 %v12445_v0, %v9246_v10  ;;  %v9229_v33 = vor.u32 %v12440_v25, %v9226_v26  ;;  %v8912_v26 = vld [vmem:[#allocation10 + $0x178] sm:$0xf] }
 0x18e   :  { %v8929_v37 = vor.u32 %v12365_v29, %v8926_v30 }
 0x18f   :  { %2469 = vmatpush.bf16.msrb.mxu3 %v9205_v38  ;;  %2493 = vmatpush.bf16.msra.mxu1 %v8809_v40  ;;  %v9086_v38 = vld [vmem:[#allocation10 + $0x2ec] sm:$0xf0]  ;;  %v12505_v40 = vld [vmem:[#allocation10 + $0x5fc] sm:$0xf] }
 0x190   :  { %v9089_v46 = vor.u32 %v12405_v36, %v9086_v38  ;;  %v12383_v36 = vld [vmem:[#allocation10 + $0x228] sm:$0xf0]  ;;  %v9206_v38 = vld [vmem:[#allocation10 + $0x3dc] sm:$0xf0] }
 0x191   :  { %2481 = vmatpush.bf16.msra.mxu0 %v9405_v43  ;;  %2505 = vmatpush.bf16.msra.mxu2 %v9009_v44  ;;  %v8906_v43 = vld [vmem:[#allocation10 + $0x184] sm:$0xf0]  ;;  %v12455_v44 = vld [vmem:[#allocation10 + $0x46c] sm:$0xf] }
 0x192   :  { %2470 = vmatmul.bf16.vlgmr.msrb.gmra.mxu3 %v13767_v15  ;;  %v8909_v50 = vor.u32 %v12360_v39, %v8906_v43  ;;  %v9289_v54 = vor.u32 %v12455_v44, %v9286_v45  ;;  %v12433_v39 = vld [vmem:[#allocation10 + $0x3b8] sm:$0xf0] }
 0x193   :  { %2518 = vmatpush.bf16.msra.mxu3 %v9189_v41  ;;  %2494 = vmatpush.bf16.msra.mxu1 %v8789_v52  ;;  %v9486_v41 = vld [vmem:[#allocation10 + $0x60c] sm:$0xf0]  ;;  %v12500_v52 = vld [vmem:[#allocation10 + $0x5d4] sm:$0xf] }
 0x194   :  { %v9489_v47 = vor.u32 %v12505_v40, %v9486_v41  ;;  %v8812_v40 = vld [vmem:[#allocation10 + $0xb0] sm:$0xf]  ;;  %v12338_v41 = vld [vmem:[#allocation10 + $0xc0] sm:$0xf0] }
 0x195   :  { %2482 = vmatpush.bf16.msra.mxu0 %v9385_v56  ;;  %2506 = vmatpush.bf16.msra.mxu2 %v8989_v18  ;;  %v8886_v56 = vld [vmem:[#allocation10 + $0x15c] sm:$0xf0]  ;;  %v12450_v18 = vld [vmem:[#allocation10 + $0x444] sm:$0xf] }
 0x196   :  { %v9269_v6 = vor.u32 %v12450_v18, %v9266_v59  ;;  %v12475_v59 = vld [vmem:[#allocation10 + $0x50c] sm:$0xf] }
 0x197   :  { %2519 = vmatpush.bf16.msra.mxu3 %v9169_v53  ;;  %2495 = vmatpush.bf16.msra.mxu1 %v8769_v2  ;;  %v9466_v53 = vld [vmem:[#allocation10 + $0x5e4] sm:$0xf0]  ;;  %v8889_v2 = vor.u32 %v12355_v55, %v8886_v56  ;;  %v9172_v55 = vld [vmem:[#allocation10 + $0x380] sm:$0xf]  ;;  %v12428_v56 = vld [vmem:[#allocation10 + $0x390] sm:$0xf0] }
 0x198   :  { %v9469_v63 = vor.u32 %v12500_v52, %v9466_v53  ;;  %v12378_v52 = vld [vmem:[#allocation10 + $0x200] sm:$0xf0]  ;;  %v8792_v53 = vld [vmem:[#allocation10 + $0x88] sm:$0xf] }
 0x199   :  { %2483 = vmatpush.bf16.msra.mxu0 %v9365_v8  ;;  %2507 = vmatpush.bf16.msra.mxu2 %v8969_v9  ;;  %v9032_v8 = vld [vmem:[#allocation10 + $0x268] sm:$0xf]  ;;  %v12393_v9 = vld [vmem:[#allocation10 + $0x278] sm:$0xf0] }
 0x19a   :  { %v9033_v17 = vor.u32 %v12393_v9, %v9032_v8  ;;  %v12423_v8 = vld [vmem:[#allocation10 + $0x368] sm:$0xf0] }
 0x19b   :  { %2520 = vmatpush.bf16.msra.mxu3 %v9149_v5  ;;  %2496 = vmatpush.bf16.msra.mxu1 %v8749_v16  ;;  %v9446_v5 = vld [vmem:[#allocation10 + $0x5bc] sm:$0xf0] }
 0x19c   :  { %2484 = vmatmul.bf16.vlgmr.msra.gmra.mxu0 %v13771_v57  ;;  %v9449_v16 = vor.u32 %v12495_v4, %v9446_v5  ;;  %v12473_v4 = vld [vmem:[#allocation10 + $0x4f8] sm:$0xf0]  ;;  %v8772_v5 = vld [vmem:[#allocation10 + $0x60] sm:$0xf] }
 0x19d   :  { %2532 = vmatpush.bf16.msrb.mxu0 %v9349_v11  ;;  %2508 = vmatpush.bf16.msra.mxu2 %v8949_v24  ;;  %v8852_v11 = vld [vmem:[#allocation10 + $0x100] sm:$0xf]  ;;  %v12388_v24 = vld [vmem:[#allocation10 + $0x250] sm:$0xf0]  ;;  %v9353_v10 = vor.u32 %v12473_v4, %v9352_v3  ;;  %v12546_v4 = vld [vmem:[#allocation13 + $0x100] sm:$0xf0] }
 0x19e   :  { %v8853_v22 = vor.u32 %v12348_v12, %v8852_v11  ;;  %v9013_v30 = vor.u32 %v12388_v24, %v9012_v23  ;;  %v8932_v11 = vld [vmem:[#allocation10 + $0x1a0] sm:$0xf]  ;;  %v12368_v12 = vld [vmem:[#allocation10 + $0x1b0] sm:$0xf0]  ;;  %v12418_v23 = vld [vmem:[#allocation10 + $0x340] sm:$0xf0] }
 0x19f   :  { %2521 = vmatpush.bf16.msra.mxu3 %v9129_v20  ;;  %2497 = vmatpush.bf16.msra.mxu1 %v8729_v31  ;;  %v9426_v20 = vld [vmem:[#allocation10 + $0x594] sm:$0xf0]  ;;  %v12485_v31 = vld [vmem:[#allocation10 + $0x55c] sm:$0xf]  ;;  %v8933_v24 = vor.u32 %v12368_v12, %v8932_v11  ;;  %v9452_v11 = vld [vmem:[#allocation10 + $0x5b0] sm:$0xf] }
 0x1a0   :  { %v9429_v29 = vor.u32 %v12490_v19, %v9426_v20  ;;  %v9409_v43 = vor.u32 %v12485_v31, %v9406_v32  ;;  %v12468_v19 = vld [vmem:[#allocation10 + $0x4d0] sm:$0xf0]  ;;  %v8752_v20 = vld [vmem:[#allocation10 + $0x38] sm:$0xf]  ;;  %v12463_v31 = vld [vmem:[#allocation10 + $0x4a8] sm:$0xf0] }
 0x1a1   :  { %2533 = vmatpush.bf16.msrb.mxu0 %v9329_v28  ;;  %2509 = vmatpush.bf16.msra.mxu2 %v8929_v37  ;;  %v12343_v28 = vld [vmem:[#allocation10 + $0xe8] sm:$0xf0]  ;;  %v8732_v32 = vld [vmem:[#allocation10 + $0x10] sm:$0xf]  ;;  %v9636_v3 = vld [vmem:[#allocation13 + $0xf0] sm:$0xf] }
 0x1a2   :  { %2498 = vmatmul.bf16.vlgmr.msra.gmra.mxu1 %v13756_v58  ;;  %v12435_v37 = vld [vmem:[#allocation10 + $0x3cc] sm:$0xf]  ;;  %v9637_v12 = vor.u32 %v12546_v4, %v9636_v3  ;;  %v12621_v4 = vld [vmem:[#allocation13 + $0x358] sm:$0xf0] }
 0x1a3   :  { %2522 = vmatpush.bf16.msra.mxu3 %v9109_v34  ;;  %2546 = vmatpush.bf16.msrb.mxu1 %v9509_v35  ;;  %v8833_v34 = vor.u32 %v12343_v28, %v8832_v27  ;;  %v8992_v35 = vld [vmem:[#allocation10 + $0x218] sm:$0xf]  ;;  %v9209_v45 = vor.u32 %v12435_v37, %v9206_v38  ;;  %v12363_v27 = vld [vmem:[#allocation10 + $0x188] sm:$0xf0]  ;;  %v12513_v37 = vld [vmem:[#allocation10 + $0x638] sm:$0xf0] }
 0x1a4   :  { %v8993_v44 = vor.u32 %v12383_v36, %v8992_v35  ;;  %v12413_v35 = vld [vmem:[#allocation10 + $0x318] sm:$0xf0]  ;;  %v9512_v36 = vld [vmem:[#allocation10 + $0x628] sm:$0xf]  ;;  %v8913_v38 = vor.u32 %v12363_v27, %v8912_v26  ;;  %v9936_v3 = vld [vmem:[#allocation13 + $0x348] sm:$0xf] }
 0x1a5   :  { %2534 = vmatpush.bf16.msrb.mxu0 %v9309_v42  ;;  %2510 = vmatpush.bf16.msra.mxu2 %v8909_v50  ;;  %v9192_v42 = vld [vmem:[#allocation10 + $0x3a8] sm:$0xf]  ;;  %v8972_v50 = vld [vmem:[#allocation10 + $0x1f0] sm:$0xf]  ;;  %v12493_v27 = vld [vmem:[#allocation10 + $0x598] sm:$0xf0] }
 0x1a6   :  { %v9193_v51 = vor.u32 %v12433_v39, %v9192_v42  ;;  %v8973_v60 = vor.u32 %v12378_v52, %v8972_v50  ;;  %v9492_v50 = vld [vmem:[#allocation10 + $0x600] sm:$0xf] }
 0x1a7   :  { %2523 = vmatpush.bf16.msra.mxu3 %v9089_v46  ;;  %2547 = vmatpush.bf16.msrb.mxu1 %v9489_v47  ;;  %v8813_v46 = vor.u32 %v12338_v41, %v8812_v40  ;;  %v12480_v47 = vld [vmem:[#allocation10 + $0x534] sm:$0xf]  ;;  %v8892_v41 = vld [vmem:[#allocation10 + $0x150] sm:$0xf]  ;;  %v9656_v52 = vld [vmem:[#allocation13 + $0x118] sm:$0xf] }
 0x1a8   :  { %v9389_v18 = vor.u32 %v12480_v47, %v9386_v48  ;;  %v9092_v47 = vld [vmem:[#allocation10 + $0x2e0] sm:$0xf]  ;;  %v12408_v48 = vld [vmem:[#allocation10 + $0x2f0] sm:$0xf0] }
 0x1a9   :  { %2535 = vmatpush.bf16.msrb.mxu0 %v9289_v54  ;;  %2511 = vmatpush.bf16.msra.mxu2 %v8889_v2  ;;  %v12333_v54 = vld [vmem:[#allocation10 + $0x98] sm:$0xf0]  ;;  %v9173_v2 = vor.u32 %v12428_v56, %v9172_v55  ;;  %v9093_v56 = vor.u32 %v12408_v48, %v9092_v47  ;;  %v9392_v48 = vld [vmem:[#allocation10 + $0x538] sm:$0xf] }
 0x1aa   :  { %v8793_v61 = vor.u32 %v12333_v54, %v8792_v53  ;;  %v12551_v53 = vld [vmem:[#allocation13 + $0x128] sm:$0xf0] }
 0x1ab   :  { %2524 = vmatpush.bf16.msra.mxu3 %v9069_v62  ;;  %2548 = vmatpush.bf16.msrb.mxu1 %v9469_v63  ;;  %v9366_v62 = vld [vmem:[#allocation10 + $0x51c] sm:$0xf0]  ;;  %v8952_v63 = vld [vmem:[#allocation10 + $0x1c8] sm:$0xf] }
 0x1ac   :  { %2512 = vmatmul.bf16.vlgmr.msra.gmra.mxu2 %v13760_v13  ;;  %v9369_v9 = vor.u32 %v12475_v59, %v9366_v62  ;;  %v8953_v0 = vor.u32 %v12373_v1, %v8952_v63  ;;  %v12453_v59 = vld [vmem:[#allocation10 + $0x458] sm:$0xf0]  ;;  %v12403_v62 = vld [vmem:[#allocation10 + $0x2c8] sm:$0xf0]  ;;  %v9472_v63 = vld [vmem:[#allocation10 + $0x5d8] sm:$0xf]  ;;  %v9657_v1 = vor.u32 %v12551_v53, %v9656_v52 }
 0x1ad   :  { %2536 = vmatpush.bf16.msrb.mxu0 %v9269_v6  ;;  %2560 = vmatpush.bf16.msrb.mxu2 %v8873_v7  ;;  %v12328_v6 = vld [vmem:[#allocation10 + $0x70] sm:$0xf0]  ;;  %v9152_v7 = vld [vmem:[#allocation10 + $0x358] sm:$0xf] }
 0x1ae   :  { %v9956_v53 = vld [vmem:[#allocation13 + $0x370] sm:$0xf] }
 0x1af   :  { %2525 = vmatpush.bf16.msra.mxu3 %v9049_v14  ;;  %2549 = vmatpush.bf16.msrb.mxu1 %v9449_v16  ;;  %v8773_v14 = vor.u32 %v12328_v6, %v8772_v5  ;;  %v9153_v16 = vor.u32 %v12423_v8, %v9152_v7  ;;  %v9252_v7 = vld [vmem:[#allocation10 + $0x420] sm:$0xf]  ;;  %v12448_v8 = vld [vmem:[#allocation10 + $0x430] sm:$0xf0] }
 0x1b1   :  { %2537 = vmatpush.bf16.msrb.mxu0 %v9249_v21  ;;  %2561 = vmatpush.bf16.msrb.mxu2 %v8853_v22  ;;  %v12323_v21 = vld [vmem:[#allocation10 + $0x48] sm:$0xf0]  ;;  %v9132_v22 = vld [vmem:[#allocation10 + $0x330] sm:$0xf] }
 0x1b2   :  { %2526 = vmatmul.bf16.vlgmr.msra.gmra.mxu3 %v13764_v49  ;;  %v8753_v28 = vor.u32 %v12323_v21, %v8752_v20  ;;  %v9253_v20 = vor.u32 %v12448_v8, %v9252_v7  ;;  %v12571_v7 = vld [vmem:[#allocation13 + $0x1c8] sm:$0xf0]  ;;  %v9536_v8 = vld [vmem:[#allocation13 + $0x28] sm:$0xf] }
 0x1b3   :  { %2574 = vmatpush.bf16.msrb.mxu3 %v9033_v17  ;;  %2550 = vmatpush.bf16.msrb.mxu1 %v9429_v29  ;;  %v9332_v17 = vld [vmem:[#allocation10 + $0x4c0] sm:$0xf]  ;;  %v9133_v29 = vor.u32 %v12418_v23, %v9132_v22  ;;  %v9232_v23 = vld [vmem:[#allocation10 + $0x3f8] sm:$0xf] }
 0x1b4   :  { %v9333_v25 = vor.u32 %v12468_v19, %v9332_v17  ;;  %v12591_v17 = vld [vmem:[#allocation13 + $0x268] sm:$0xf0]  ;;  %v12541_v19 = vld [vmem:[#allocation13 + $0xd8] sm:$0xf0] }
 0x1b5   :  { %2538 = vmatpush.bf16.msrb.mxu0 %v9229_v33  ;;  %2562 = vmatpush.bf16.msrb.mxu2 %v8833_v34  ;;  %v12318_v33 = vld [vmem:[#allocation10 + $0x20] sm:$0xf0]  ;;  %v9112_v34 = vld [vmem:[#allocation10 + $0x308] sm:$0xf] }
 0x1b6   :  { %v8733_v42 = vor.u32 %v12318_v33, %v8732_v32  ;;  %v9113_v39 = vor.u32 %v12413_v35, %v9112_v34  ;;  %v9212_v33 = vld [vmem:[#allocation10 + $0x3d0] sm:$0xf]  ;;  %v12438_v35 = vld [vmem:[#allocation10 + $0x3e0] sm:$0xf0] }
 0x1b7   :  { %2575 = vmatpush.bf16.msrb.mxu3 %v9013_v30  ;;  %2551 = vmatpush.bf16.msrb.mxu1 %v9409_v43  ;;  %v9312_v30 = vld [vmem:[#allocation10 + $0x498] sm:$0xf]  ;;  %v12358_v43 = vld [vmem:[#allocation10 + $0x160] sm:$0xf0] }
 0x1b8   :  { %v9313_v40 = vor.u32 %v12463_v31, %v9312_v30  ;;  %v8893_v54 = vor.u32 %v12358_v43, %v8892_v41  ;;  %v9596_v30 = vld [vmem:[#allocation13 + $0xa0] sm:$0xf]  ;;  %v12536_v31 = vld [vmem:[#allocation13 + $0xb0] sm:$0xf0]  ;;  %v12631_v41 = vld [vmem:[#allocation13 + $0x3a8] sm:$0xf0] }
 0x1b9   :  { %2539 = vmatpush.bf16.msrb.mxu0 %v9209_v45  ;;  %2563 = vmatpush.bf16.msrb.mxu2 %v8813_v46  ;;  %v12458_v45 = vld [vmem:[#allocation10 + $0x480] sm:$0xf0]  ;;  %v9513_v46 = vor.u32 %v12513_v37, %v9512_v36  ;;  %v9412_v36 = vld [vmem:[#allocation10 + $0x560] sm:$0xf]  ;;  %v12488_v37 = vld [vmem:[#allocation10 + $0x570] sm:$0xf0] }
 0x1ba   :  { %v12581_v43 = vld [vmem:[#allocation13 + $0x218] sm:$0xf0]  ;;  %v9413_v47 = vor.u32 %v12488_v37, %v9412_v36  ;;  %v9676_v37 = vld [vmem:[#allocation13 + $0x140] sm:$0xf] }
 0x1bb   :  { %2576 = vmatpush.bf16.msrb.mxu3 %v8993_v44  ;;  %2552 = vmatpush.bf16.msrb.mxu1 %v9389_v18  ;;  %v9292_v44 = vld [vmem:[#allocation10 + $0x470] sm:$0xf]  ;;  %v9272_v18 = vld [vmem:[#allocation10 + $0x448] sm:$0xf] }
 0x1bc   :  { %2540 = vmatmul.bf16.vlgmr.msrb.gmra.mxu0 %v13767_v15  ;;  %v9293_v55 = vor.u32 %v12458_v45, %v9292_v44  ;;  %v9273_v5 = vor.u32 %v12453_v59, %v9272_v18  ;;  %v9576_v44 = vld [vmem:[#allocation13 + $0x78] sm:$0xf]  ;;  %v12531_v45 = vld [vmem:[#allocation13 + $0x88] sm:$0xf0]  ;;  %v9556_v59 = vld [vmem:[#allocation13 + $0x50] sm:$0xf] }
 0x1bd   :  { %2588 = vmatpush.bf16.msra.mxu0 %v9193_v51  ;;  %2564 = vmatpush.bf16.msrb.mxu2 %v8793_v61  ;;  %v12508_v51 = vld [vmem:[#allocation10 + $0x610] sm:$0xf0]  ;;  %v9072_v61 = vld [vmem:[#allocation10 + $0x2b8] sm:$0xf] }
 0x1be   :  { %v9073_v6 = vor.u32 %v12403_v62, %v9072_v61  ;;  %v9372_v62 = vld [vmem:[#allocation10 + $0x510] sm:$0xf] }
 0x1bf   :  { %2577 = vmatpush.bf16.msrb.mxu3 %v8973_v60  ;;  %2553 = vmatpush.bf16.msrb.mxu1 %v9369_v9  ;;  %v9493_v60 = vor.u32 %v12508_v51, %v9492_v50  ;;  %v12483_v50 = vld [vmem:[#allocation10 + $0x548] sm:$0xf0] }
 0x1c0   :  { %v9393_v61 = vor.u32 %v12483_v50, %v9392_v48  ;;  %v12544_v50 = vld [vmem:[#allocation13 + $0xf4] sm:$0xf] }
 0x1c1   :  { %2589 = vmatpush.bf16.msra.mxu0 %v9173_v2  ;;  %2565 = vmatpush.bf16.msrb.mxu2 %v8773_v14  ;;  %v12503_v2 = vld [vmem:[#allocation10 + $0x5e8] sm:$0xf0]  ;;  %v12498_v14 = vld [vmem:[#allocation10 + $0x5c0] sm:$0xf0] }
 0x1c2   :  { %2554 = vmatmul.bf16.vlgmr.msrb.gmra.mxu1 %v13771_v57  ;;  %v9473_v9 = vor.u32 %v12503_v2, %v9472_v63  ;;  %v9453_v22 = vor.u32 %v12498_v14, %v9452_v11  ;;  %v12478_v63 = vld [vmem:[#allocation10 + $0x520] sm:$0xf0] }
 0x1c3   :  { %2578 = vmatpush.bf16.msrb.mxu3 %v8953_v0  ;;  %2602 = vmatpush.bf16.msra.mxu1 %v9353_v10  ;;  %v9052_v0 = vld [vmem:[#allocation10 + $0x290] sm:$0xf]  ;;  %v12398_v10 = vld [vmem:[#allocation10 + $0x2a0] sm:$0xf0]  ;;  %v9373_v11 = vor.u32 %v12478_v63, %v9372_v62  ;;  %v9818_v62 = vld [vmem:[#allocation13 + $0x26c] sm:$0xf0] }
 0x1c4   :  { %v9053_v21 = vor.u32 %v12398_v10, %v9052_v0 }
 0x1c5   :  { %2590 = vmatpush.bf16.msra.mxu0 %v9153_v16  ;;  %2566 = vmatpush.bf16.msrb.mxu2 %v8753_v28  ;;  %v9816_v16 = vld [vmem:[#allocation13 + $0x258] sm:$0xf] }
 0x1c6   :  { %v9817_v26 = vor.u32 %v12591_v17, %v9816_v16  ;;  %v9916_v16 = vld [vmem:[#allocation13 + $0x320] sm:$0xf]  ;;  %v12616_v17 = vld [vmem:[#allocation13 + $0x330] sm:$0xf0] }
 0x1c7   :  { %2579 = vmatpush.bf16.msrb.mxu3 %v8933_v24  ;;  %2603 = vmatpush.bf16.msra.mxu1 %v9333_v25  ;;  %v12443_v24 = vld [vmem:[#allocation10 + $0x408] sm:$0xf0]  ;;  %v9432_v25 = vld [vmem:[#allocation10 + $0x588] sm:$0xf] }
 0x1c8   :  { %v9233_v32 = vor.u32 %v12443_v24, %v9232_v23  ;;  %v9433_v34 = vor.u32 %v12493_v27, %v9432_v25  ;;  %v9917_v23 = vor.u32 %v12616_v17, %v9916_v16  ;;  %v12611_v27 = vld [vmem:[#allocation13 + $0x308] sm:$0xf0] }
 0x1c9   :  { %2591 = vmatpush.bf16.msra.mxu0 %v9133_v29  ;;  %2567 = vmatpush.bf16.msrb.mxu2 %v8733_v42  ;;  %v9796_v29 = vld [vmem:[#allocation13 + $0x230] sm:$0xf]  ;;  %v9597_v42 = vor.u32 %v12536_v31, %v9596_v30  ;;  %v13799_v30 = vld [vmem:[#allocation11] sm:$0x1f] }
 0x1cb   :  { %2580 = vmatpush.bf16.msrb.mxu3 %v8913_v38  ;;  %2604 = vmatpush.bf16.msra.mxu1 %v9313_v40  ;;  %v9976_v40 = vld [vmem:[#allocation13 + $0x398] sm:$0xf] }
 0x1cc   :  { %2568 = vmatmul.bf16.vlgmr.msrb.gmra.mxu2 %v13756_v58  ;;  %v9616_v58 = vld [vmem:[#allocation13 + $0xc8] sm:$0xf]  ;;  %v9977_v51 = vor.u32 %v12631_v41, %v9976_v40  ;;  %v1230_v40 = vperm.slane %v13799_v30, 0  ;;  %v12549_v41 = vld [vmem:[#allocation13 + $0x11c] sm:$0xf] }
 0x1cd   :  { %2592 = vmatpush.bf16.msra.mxu0 %v9113_v39  ;;  %2616 = vmatpush.bf16.msra.mxu2 %v9513_v46  ;;  %v9617_v28 = vor.u32 %v12541_v19, %v9616_v58  ;;  %v9776_v39 = vld [vmem:[#allocation13 + $0x208] sm:$0xf]  ;;  %v9213_v46 = vor.u32 %v12438_v35, %v9212_v33  ;;  %v9716_v19 = vld [vmem:[#allocation13 + $0x190] sm:$0xf]  ;;  %v12606_v35 = vld [vmem:[#allocation13 + $0x2e0] sm:$0xf0] }
 0x1ce   :  { %v9777_v52 = vor.u32 %v12581_v43, %v9776_v39  ;;  %v2289_v10 = vpop.f32.mrf.mxu2  ;;  %v9856_v43 = vld [vmem:[#allocation13 + $0x2a8] sm:$0xf] }
 0x1cf   :  { %2581 = vmatpush.bf16.msrb.mxu3 %v8893_v54  ;;  %2605 = vmatpush.bf16.msra.mxu1 %v9293_v55  ;;  %v12626_v54 = vld [vmem:[#allocation13 + $0x380] sm:$0xf0]  ;;  %v9577_v55 = vor.u32 %v12531_v45, %v9576_v44  ;;  %v12601_v44 = vld [vmem:[#allocation13 + $0x2b8] sm:$0xf0] }
 0x1d1   :  { %2593 = vmatpush.bf16.msra.mxu0 %v9093_v56  ;;  %2617 = vmatpush.bf16.msra.mxu2 %v9493_v60  ;;  %v9756_v56 = vld [vmem:[#allocation13 + $0x1e0] sm:$0xf]  ;;  %v12526_v60 = vld [vmem:[#allocation13 + $0x60] sm:$0xf0] }
 0x1d2   :  { %2582 = vmatmul.bf16.vlgmr.msrb.gmra.mxu3 %v13760_v13  ;;  %v12586_v13 = vld [vmem:[#allocation13 + $0x240] sm:$0xf0] }
 0x1d3   :  { %3957 = vmatpush.bf16.msra.mxu3 %v9657_v1  ;;  %2606 = vmatpush.bf16.msra.mxu1 %v9273_v5  ;;  %v9797_v38 = vor.u32 %v12586_v13, %v9796_v29  ;;  %v9957_v1 = vor.u32 %v12626_v54, %v9956_v53  ;;  %v9557_v5 = vor.u32 %v12526_v60, %v9556_v59  ;;  %v9696_v29 = vld [vmem:[#allocation13 + $0x168] sm:$0xf]  ;;  %v12561_v13 = vld [vmem:[#allocation13 + $0x178] sm:$0xf0]  ;;  %v9836_v53 = vld [vmem:[#allocation13 + $0x280] sm:$0xf] }
 0x1d4   :  { %v9697_v33 = vor.u32 %v12561_v13, %v9696_v29  ;;  %v9778_v29 = vld [vmem:[#allocation13 + $0x21c] sm:$0xf0] }
 0x1d5   :  { %2594 = vmatpush.bf16.msra.mxu0 %v9073_v6  ;;  %2618 = vmatpush.bf16.msra.mxu2 %v9473_v9  ;;  %v13791_v18 = vpop.f32.mrf.mxu3  ;;  %v9736_v6 = vld [vmem:[#allocation13 + $0x1b8] sm:$0xf]  ;;  %v12521_v9 = vld [vmem:[#allocation13 + $0x38] sm:$0xf0] }
 0x1d6   :  { %v9737_v14 = vor.u32 %v12571_v7, %v9736_v6  ;;  %v9537_v58 = vor.u32 %v12521_v9, %v9536_v8  ;;  %v2291_v36 = vpop.f32.mrf.mxu2  ;;  %v10116_v9 = vld [vmem:[#allocation13 + $0x4b0] sm:$0xf] }
 0x1d7   :  { %3958 = vmatpush.bf16.msra.mxu3 %v9637_v12  ;;  %2607 = vmatpush.bf16.msra.mxu1 %v9253_v20  ;;  %v9937_v12 = vor.u32 %v12621_v4, %v9936_v3  ;;  %v12566_v20 = vld [vmem:[#allocation13 + $0x1a0] sm:$0xf0]  ;;  %v12539_v4 = vld [vmem:[#allocation13 + $0xcc] sm:$0xf] }
 0x1d8   :  { %v13794_v0 = vpop.f32.mrf.mxu0  ;;  %v9717_v25 = vor.u32 %v12566_v20, %v9716_v19 }
 0x1d9   :  { %2595 = vmatpush.bf16.msra.mxu0 %v9053_v21  ;;  %2619 = vmatpush.bf16.msra.mxu2 %v9453_v22  ;;  %v9516_v21 = vld [vmem:[#allocation13] sm:$0xf] }
 0x1db   :  { %3959 = vmatpush.bf16.msra.mxu3 %v9617_v28  ;;  %2608 = vmatpush.bf16.msra.mxu1 %v9233_v32 }
 0x1dc   :  { %2596 = vmatmul.bf16.vlgmr.msra.gmra.mxu0 %v13764_v49  ;;  %v12576_v49 = vld [vmem:[#allocation13 + $0x1f0] sm:$0xf0] }
 0x1dd   :  { %3971 = vmatpush.bf16.msrb.mxu0 %v9817_v26  ;;  %2620 = vmatpush.bf16.msra.mxu2 %v9433_v34  ;;  %v9757_v2 = vor.u32 %v12576_v49, %v9756_v56  ;;  %v13796_v22 = vpop.f32.mrf.mxu3  ;;  %v9896_v26 = vld [vmem:[#allocation13 + $0x2f8] sm:$0xf]  ;;  %v9876_v34 = vld [vmem:[#allocation13 + $0x2d0] sm:$0xf]  ;;  %v12671_v49 = vld [vmem:[#allocation13 + $0x4e8] sm:$0xf0] }
 0x1de   :  { %v9897_v31 = vor.u32 %v12611_v27, %v9896_v26  ;;  %v9877_v39 = vor.u32 %v12606_v35, %v9876_v34  ;;  %v10136_v56 = vld [vmem:[#allocation13 + $0x4d8] sm:$0xf]  ;;  %v9578_v34 = vld [vmem:[#allocation13 + $0x8c] sm:$0xf0] }
 0x1df   :  { %3960 = vmatpush.bf16.msra.mxu3 %v9597_v42  ;;  %2609 = vmatpush.bf16.msra.mxu1 %v9213_v46  ;;  %v2331_v24 = vpop.f32.mrf.mxu1  ;;  %v9658_v42 = vld [vmem:[#allocation13 + $0x12c] sm:$0xf0]  ;;  %v10137_v63 = vor.u32 %v12671_v49, %v10136_v56 }
 0x1e0   :  { %v2319_v32 = vpop.f32.mrf.mxu0  ;;  %v9661_v46 = vor.u32 %v12549_v41, %v9658_v42  ;;  %v12574_v42 = vld [vmem:[#allocation13 + $0x1e4] sm:$0xf] }
 0x1e1   :  { %3972 = vmatpush.bf16.msrb.mxu0 %v9797_v38  ;;  %2621 = vmatpush.bf16.msra.mxu2 %v9413_v47  ;;  %v12556_v38 = vld [vmem:[#allocation13 + $0x150] sm:$0xf0]  ;;  %v2290_v47 = vadd.f32 %v2289_v10, %v1230_v40 }
 0x1e2   :  { %2610 = vmatmul.bf16.vlgmr.msra.gmra.mxu1 %v13767_v15  ;;  %v12516_v15 = vld [vmem:[#allocation13 + $0x10] sm:$0xf0] }
 0x1e3   :  { %3985 = vmatpush.bf16.msrb.mxu1 %v9977_v51  ;;  %3961 = vmatpush.bf16.msra.mxu3 %v9577_v55  ;;  %v9517_v28 = vor.u32 %v12516_v15, %v9516_v21  ;;  %v9638_v51 = vld [vmem:[#allocation13 + $0x104] sm:$0xf0]  ;;  %v2304_v54 = vadd.f32 %v13791_v18, %v2290_v47  ;;  %v12596_v55 = vld [vmem:[#allocation13 + $0x290] sm:$0xf0] }
 0x1e4   :  { %v9641_v60 = vor.u32 %v12544_v50, %v9638_v51  ;;  %v9837_v6 = vor.u32 %v12596_v55, %v9836_v53  ;;  %v9558_v47 = vld [vmem:[#allocation13 + $0x64] sm:$0xf0]  ;;  %v10056_v53 = vld [vmem:[#allocation13 + $0x438] sm:$0xf] }
 0x1e5   :  { %3973 = vmatpush.bf16.msrb.mxu0 %v9777_v52  ;;  %2622 = vmatpush.bf16.msra.mxu2 %v9393_v61  ;;  %v13802_v45 = vpop.f32.mrf.mxu3  ;;  %v9857_v52 = vor.u32 %v12601_v44, %v9856_v43  ;;  %v12589_v61 = vld [vmem:[#allocation13 + $0x25c] sm:$0xf] }
 0x1e6   :  { %v9821_v8 = vor.u32 %v12589_v61, %v9818_v62 }
 0x1e7   :  { %3986 = vmatpush.bf16.msrb.mxu1 %v9957_v1  ;;  %3962 = vmatpush.bf16.msra.mxu3 %v9557_v5  ;;  %v2333_v48 = vpop.f32.mrf.mxu1  ;;  %v2292_v1 = vadd.f32 %v2291_v36, %v1230_v40  ;;  %v9618_v5 = vld [vmem:[#allocation13 + $0xdc] sm:$0xf0] }
 0x1e8   :  { %v9621_v10 = vor.u32 %v12539_v4, %v9618_v5  ;;  %v10036_v5 = vld [vmem:[#allocation13 + $0x410] sm:$0xf] }
 0x1e9   :  { %3974 = vmatpush.bf16.msrb.mxu0 %v9757_v2  ;;  %2623 = vmatpush.bf16.msra.mxu2 %v9373_v11  ;;  %v2318_v2 = vadd.f32 %v13794_v0, %v2304_v54  ;;  %v2373_v3 = vpop.f32.mrf.mxu0  ;;  %v2306_v18 = vadd.f32 %v13796_v22, %v2292_v1  ;;  %v12584_v11 = vld [vmem:[#allocation13 + $0x234] sm:$0xf]  ;;  %v9598_v0 = vld [vmem:[#allocation13 + $0xb4] sm:$0xf0]  ;;  %v10096_v22 = vld [vmem:[#allocation13 + $0x488] sm:$0xf] }
 0x1ea   :  { %v12651_v54 = vld [vmem:[#allocation13 + $0x448] sm:$0xf0]  ;;  %v9538_v1 = vld [vmem:[#allocation13 + $0x3c] sm:$0xf0] }
 0x1eb   :  { %3987 = vmatpush.bf16.msrb.mxu1 %v9937_v12  ;;  %3963 = vmatpush.bf16.msra.mxu3 %v9537_v58  ;;  %v2332_v7 = vadd.f32 %v2331_v24, %v2318_v2  ;;  %v9798_v12 = vld [vmem:[#allocation13 + $0x244] sm:$0xf0]  ;;  %v2320_v16 = vadd.f32 %v2319_v32, %v2306_v18  ;;  %v12534_v58 = vld [vmem:[#allocation13 + $0xa4] sm:$0xf]  ;;  %v12661_v24 = vld [vmem:[#allocation13 + $0x498] sm:$0xf0]  ;;  %v10057_v61 = vor.u32 %v12651_v54, %v10056_v53 }
 0x1ec   :  { %2624 = vmatmul.bf16.vlgmr.msra.gmra.mxu2 %v13771_v57  ;;  %v9677_v57 = vor.u32 %v12556_v38, %v9676_v37  ;;  %v9601_v27 = vor.u32 %v12534_v58, %v9598_v0  ;;  %v10097_v13 = vor.u32 %v12661_v24, %v10096_v22  ;;  %v10076_v38 = vld [vmem:[#allocation13 + $0x460] sm:$0xf]  ;;  %v10016_v0 = vld [vmem:[#allocation13 + $0x3e8] sm:$0xf]  ;;  %v12619_v54 = vld [vmem:[#allocation13 + $0x34c] sm:$0xf] }
 0x1ed   :  { %3975 = vmatpush.bf16.msrb.mxu0 %v9737_v14  ;;  %3999 = vmatpush.bf16.msrb.mxu2 %v10137_v63  ;;  %v12666_v14 = vld [vmem:[#allocation13 + $0x4c0] sm:$0xf0]  ;;  %v2361_v20 = vpop.f32.mrf.mxu3  ;;  %v2334_v21 = vadd.f32 %v2333_v48, %v2320_v16  ;;  %v12519_v63 = vld [vmem:[#allocation13 + $0x2c] sm:$0xf] }
 0x1ee   :  { %v10117_v19 = vor.u32 %v12666_v14, %v10116_v9  ;;  %v9541_v18 = vor.u32 %v12519_v63, %v9538_v1  ;;  %v9518_v14 = vld [vmem:[#allocation13 + $0x14] sm:$0xf0] }
 0x1ef   :  { %3988 = vmatpush.bf16.msrb.mxu1 %v9917_v23  ;;  %3964 = vmatpush.bf16.msra.mxu3 %v9517_v28  ;;  %v2345_v59 = vpop.f32.mrf.mxu2  ;;  %v2387_v15 = vpop.f32.mrf.mxu1  ;;  %v9801_v23 = vor.u32 %v12584_v11, %v9798_v12  ;;  %v12579_v28 = vld [vmem:[#allocation13 + $0x20c] sm:$0xf]  ;;  %v12514_v12 = vld [vmem:[#allocation13 + $0x4] sm:$0xf]  ;;  %v9918_v63 = vld [vmem:[#allocation13 + $0x334] sm:$0xf0] }
 0x1f0   :  { %v2346_v17 = vadd.f32 %v2345_v59, %v2332_v7  ;;  %v9781_v37 = vor.u32 %v12579_v28, %v9778_v29  ;;  %v12569_v59 = vld [vmem:[#allocation13 + $0x1bc] sm:$0xf]  ;;  %v12564_v7 = vld [vmem:[#allocation13 + $0x194] sm:$0xf] }
 0x1f1   :  { %3976 = vmatpush.bf16.msrb.mxu0 %v9717_v25  ;;  %4000 = vmatpush.bf16.msrb.mxu2 %v10117_v19  ;;  %v1231_v25 = vperm.slane %v13799_v30, 1  ;;  %v2375_v35 = vpop.f32.mrf.mxu0  ;;  %v12641_v19 = vld [vmem:[#allocation13 + $0x3f8] sm:$0xf0] }
 0x1f2   :  { %vm2630_vm14 = vcmp.ge.f32.partialorder %v2346_v17, 0.0  ;;  %v10017_v22 = vor.u32 %v12641_v19, %v10016_v0  ;;  %v9664_v19 = vld [vmem:[#allocation13 + $0x120] sm:$0xf] }
 0x1f3   :  { %3989 = vmatpush.bf16.msrb.mxu1 %v9897_v31  ;;  %v2640_v31 = vmul.f32 0.2, %v2346_v17  ;;  %v2360_v40 = vadd.f32 %v13802_v45, %v1231_v25 }
 0x1f5   :  { %3977 = vmatpush.bf16.msrb.mxu0 %v9697_v33  ;;  %v12529_v33 = vld [vmem:[#allocation13 + $0x7c] sm:$0xf]  ;;  %4001 = vmatpush.bf16.msrb.mxu2 %v10097_v13  ;;  %v2650_v43 = vsel %vm2630_vm14, %v2346_v17, %v2640_v31  ;;  %v2374_v50 = vadd.f32 %v2373_v3, %v2360_v40  ;;  %v2415_v45 = vpop.f32.mrf.mxu3  ;;  %v2362_v3 = vadd.f32 %v2361_v20, %v1231_v25  ;;  %v12554_v13 = vld [vmem:[#allocation13 + $0x144] sm:$0xf]  ;;  %v9996_v31 = vld [vmem:[#allocation13 + $0x3c0] sm:$0xf] }
 0x1f6   :  { %v9581_v41 = vor.u32 %v12529_v33, %v9578_v34  ;;  %v9678_v33 = vld [vmem:[#allocation13 + $0x154] sm:$0xf0] }
 0x1f7   :  { %3990 = vmatpush.bf16.msrb.mxu1 %v9877_v39  ;;  %v2347_v26 = vpop.f32.mrf.mxu2  ;;  %v9758_v39 = vld [vmem:[#allocation13 + $0x1f4] sm:$0xf0]  ;;  %v2388_v55 = vadd.f32 %v2387_v15, %v2374_v50  ;;  %v2389_v62 = vpop.f32.mrf.mxu1  ;;  %v12559_v15 = vld [vmem:[#allocation13 + $0x16c] sm:$0xf] }
 0x1f8   :  { %v2348_v32 = vadd.f32 %v2347_v26, %v2334_v21  ;;  %v9521_v21 = vor.u32 %v12514_v12, %v9518_v14  ;;  %v10298_v12 = vld [vmem:[#allocation13 + $0x62c] sm:$0xf0] }
 0x1f9   :  { %3978 = vmatpush.bf16.msrb.mxu0 %v9677_v57  ;;  %v12656_v57 = vld [vmem:[#allocation13 + $0x470] sm:$0xf0]  ;;  %v2429_v11 = vpop.f32.mrf.mxu0 }
 0x1fa   :  { %vm2635_vm15 = vcmp.ge.f32.partialorder %v2348_v32, 0.0  ;;  %v2645_v36 = vmul.f32 0.2, %v2348_v32  ;;  %v10077_v48 = vor.u32 %v12656_v57, %v10076_v38  ;;  %v9681_v57 = vor.u32 %v12554_v13, %v9678_v33 }
 0x1fb   :  { %3991 = vmatpush.bf16.msrb.mxu1 %v9857_v52  ;;  %v9761_v52 = vor.u32 %v12574_v42, %v9758_v39 }
 0x1fc   :  { %v2655_v44 = vsel %vm2635_vm15, %v2348_v32, %v2645_v36  ;;  %4002 = vmatpush.bf16.msrb.mxu2 %v10077_v48  ;;  %v12636_v32 = vld [vmem:[#allocation13 + $0x3d0] sm:$0xf0]  ;;  %v9978_v36 = vld [vmem:[#allocation13 + $0x3ac] sm:$0xf0] }
 0x1fd   :  { %4027 = vmatpush.bf16.msra.mxu0 %v9661_v46  ;;  %v12524_v46 = vld [vmem:[#allocation13 + $0x54] sm:$0xf]  ;;  %v13809_v51 = vpack.c.bf16 %v2655_v44, %v2650_v43  ;;  %v2417_v25 = vpop.f32.mrf.mxu3  ;;  %v9997_v34 = vor.u32 %v12636_v32, %v9996_v31  ;;  %v9644_v31 = vld [vmem:[#allocation13 + $0xf8] sm:$0xf]  ;;  %v12547_v32 = vld [vmem:[#allocation13 + $0x108] sm:$0xf0] }
 0x1fe   :  { %v9561_v49 = vor.u32 %v12524_v46, %v9558_v47  ;;  %v12624_v44 = vld [vmem:[#allocation13 + $0x374] sm:$0xf]  ;;  %v9958_v46 = vld [vmem:[#allocation13 + $0x384] sm:$0xf0] }
 0x1ff   :  { %3992 = vmatpush.bf16.msrb.mxu1 %v9837_v6  ;;  %v2401_v56 = vpop.f32.mrf.mxu2  ;;  %3965 = vmatmul.bf16.vlgmr.msra.gmra.mxu3 %v13809_v51  ;;  %v12646_v6 = vld [vmem:[#allocation13 + $0x420] sm:$0xf0]  ;;  %v9961_v50 = vor.u32 %v12624_v44, %v9958_v46 }
 0x200   :  { %v2402_v2 = vadd.f32 %v2401_v56, %v2388_v55  ;;  %4003 = vmatpush.bf16.msrb.mxu2 %v10057_v61  ;;  %v10037_v9 = vor.u32 %v12646_v6, %v10036_v5  ;;  %v9938_v55 = vld [vmem:[#allocation13 + $0x35c] sm:$0xf0] }
 0x201   :  { %4028 = vmatpush.bf16.msra.mxu0 %v9641_v60  ;;  %v9738_v60 = vld [vmem:[#allocation13 + $0x1cc] sm:$0xf0]  ;;  %v2431_v42 = vpop.f32.mrf.mxu0 }
 0x202   :  { %v9741_v4 = vor.u32 %v12569_v59, %v9738_v60  ;;  %v2416_v16 = vadd.f32 %v2415_v45, %v2402_v2 }
 0x203   :  { %4041 = vmatpush.bf16.msra.mxu1 %v9821_v8  ;;  %v9718_v8 = vld [vmem:[#allocation13 + $0x1a4] sm:$0xf0] }
 0x204   :  { %v9721_v58 = vor.u32 %v12564_v7, %v9718_v8  ;;  %4004 = vmatpush.bf16.msrb.mxu2 %v10037_v9  ;;  %vm2631_vm0 = vcmp.ge.f32.partialorder %v2416_v16, 0.0  ;;  %v2641_v26 = vmul.f32 0.2, %v2416_v16  ;;  %v12711_v7 = vld [vmem:[#allocation13 + $0x628] sm:$0xf0] }
 0x205   :  { %4029 = vmatpush.bf16.msra.mxu0 %v9621_v10  ;;  %v2376_v10 = vadd.f32 %v2375_v35, %v2362_v3  ;;  %v12629_v35 = vld [vmem:[#allocation13 + $0x39c] sm:$0xf] }
 0x206   :  { %v9981_v40 = vor.u32 %v12629_v35, %v9978_v36  ;;  %v12609_v8 = vld [vmem:[#allocation13 + $0x2fc] sm:$0xf]  ;;  %v10256_v36 = vld [vmem:[#allocation13 + $0x5c8] sm:$0xf] }
 0x207   :  { %4042 = vmatpush.bf16.msra.mxu1 %v9801_v23  ;;  %v2390_v17 = vadd.f32 %v2389_v62, %v2376_v10  ;;  %v2403_v20 = vpop.f32.mrf.mxu2  ;;  %v9698_v23 = vld [vmem:[#allocation13 + $0x17c] sm:$0xf0]  ;;  %v12614_v62 = vld [vmem:[#allocation13 + $0x324] sm:$0xf]  ;;  %v9898_v10 = vld [vmem:[#allocation13 + $0x30c] sm:$0xf0] }
 0x208   :  { %v9701_v29 = vor.u32 %v12559_v15, %v9698_v23  ;;  %4005 = vmatpush.bf16.msrb.mxu2 %v10017_v22  ;;  %v9921_v3 = vor.u32 %v12614_v62, %v9918_v63  ;;  %v10276_v15 = vld [vmem:[#allocation13 + $0x5f0] sm:$0xf]  ;;  %v12706_v23 = vld [vmem:[#allocation13 + $0x600] sm:$0xf0]  ;;  %v12604_v22 = vld [vmem:[#allocation13 + $0x2d4] sm:$0xf] }
 0x209   :  { %4030 = vmatpush.bf16.msra.mxu0 %v9601_v27  ;;  %v2404_v24 = vadd.f32 %v2403_v20, %v2390_v17  ;;  %v2443_v27 = vpop.f32.mrf.mxu1  ;;  %v12552_v20 = vld [vmem:[#allocation13 + $0x130] sm:$0xf0]  ;;  %v10216_v63 = vld [vmem:[#allocation13 + $0x578] sm:$0xf] }
 0x20a   :  { %v9665_v35 = vor.u32 %v12552_v20, %v9664_v19 }
 0x20b   :  { %4043 = vmatpush.bf16.msra.mxu1 %v9781_v37  ;;  %v2418_v28 = vadd.f32 %v2417_v25, %v2404_v24  ;;  %v1232_v37 = vperm.slane %v13799_v30, 2  ;;  %v10277_v24 = vor.u32 %v12706_v23, %v10276_v15  ;;  %v9878_v25 = vld [vmem:[#allocation13 + $0x2e4] sm:$0xf0]  ;;  %v12681_v23 = vld [vmem:[#allocation13 + $0x538] sm:$0xf0] }
 0x20c   :  { %4006 = vmatpush.bf16.msrb.mxu2 %v9997_v34  ;;  %v10176_v15 = vld [vmem:[#allocation13 + $0x528] sm:$0xf] }
 0x20d   :  { %4031 = vmatpush.bf16.msra.mxu0 %v9581_v41  ;;  %vm2636_vm1 = vcmp.ge.f32.partialorder %v2418_v28, 0.0  ;;  %v2646_v38 = vmul.f32 0.2, %v2418_v28  ;;  %v2651_v41 = vsel %vm2631_vm0, %v2416_v16, %v2641_v26  ;;  %v2430_v47 = vadd.f32 %v2429_v11, %v1232_v37  ;;  %v12709_v11 = vld [vmem:[#allocation13 + $0x61c] sm:$0xf] }
 0x20e   :  { %v2432_v59 = vadd.f32 %v2431_v42, %v1232_v37  ;;  %v9901_v16 = vor.u32 %v12609_v8, %v9898_v10  ;;  %v10301_v17 = vor.u32 %v12709_v11, %v10298_v12  ;;  %v12704_v26 = vld [vmem:[#allocation13 + $0x5f4] sm:$0xf]  ;;  %v12701_v37 = vld [vmem:[#allocation13 + $0x5d8] sm:$0xf0]  ;;  %v9858_v42 = vld [vmem:[#allocation13 + $0x2bc] sm:$0xf0] }
 0x20f   :  { %4044 = vmatpush.bf16.msra.mxu1 %v9761_v52  ;;  %v2656_v39 = vsel %vm2636_vm1, %v2418_v28, %v2646_v38  ;;  %v2457_v48 = vpop.f32.mrf.mxu2  ;;  %v2444_v52 = vadd.f32 %v2443_v27, %v2430_v47  ;;  %v10278_v27 = vld [vmem:[#allocation13 + $0x604] sm:$0xf0]  ;;  %v12599_v38 = vld [vmem:[#allocation13 + $0x2ac] sm:$0xf]  ;;  %v9624_v47 = vld [vmem:[#allocation13 + $0xd0] sm:$0xf] }
 0x210   :  { %v13814_v43 = vpack.c.bf16 %v2656_v39, %v2651_v41  ;;  %4055 = vmatpush.bf16.msra.mxu2 %v9981_v40  ;;  %v10281_v13 = vor.u32 %v12704_v26, %v10278_v27  ;;  %v10257_v41 = vor.u32 %v12701_v37, %v10256_v36  ;;  %v12699_v39 = vld [vmem:[#allocation13 + $0x5cc] sm:$0xf]  ;;  %v9861_v44 = vor.u32 %v12599_v38, %v9858_v42  ;;  %v12686_v10 = vld [vmem:[#allocation13 + $0x560] sm:$0xf0]  ;;  %v12684_v11 = vld [vmem:[#allocation13 + $0x554] sm:$0xf] }
 0x211   :  { %4032 = vmatpush.bf16.msra.mxu0 %v9561_v49  ;;  %v2445_v45 = vpop.f32.mrf.mxu1  ;;  %v2458_v56 = vadd.f32 %v2457_v48, %v2444_v52  ;;  %v9941_v49 = vor.u32 %v12619_v54, %v9938_v55  ;;  %v12542_v48 = vld [vmem:[#allocation13 + $0xe0] sm:$0xf0]  ;;  %v10236_v52 = vld [vmem:[#allocation13 + $0x5a0] sm:$0xf]  ;;  %v12527_v26 = vld [vmem:[#allocation13 + $0x68] sm:$0xf0]  ;;  %v10177_v27 = vor.u32 %v12681_v23, %v10176_v15 }
 0x212   :  { %3979 = vmatmul.bf16.vlgmr.msrb.gmra.mxu0 %v13814_v43  ;;  %v2446_v61 = vadd.f32 %v2445_v45, %v2432_v59  ;;  %v12594_v54 = vld [vmem:[#allocation13 + $0x284] sm:$0xf]  ;;  %v10238_v59 = vld [vmem:[#allocation13 + $0x5b4] sm:$0xf0]  ;;  %v9625_v62 = vor.u32 %v12542_v48, %v9624_v47  ;;  %v9584_v12 = vld [vmem:[#allocation13 + $0x80] sm:$0xf] }
 0x213   :  { %4045 = vmatpush.bf16.msra.mxu1 %v9741_v4  ;;  %v12676_v36 = vld [vmem:[#allocation13 + $0x510] sm:$0xf0]  ;;  %v12674_v37 = vld [vmem:[#allocation13 + $0x504] sm:$0xf]  ;;  %v10158_v42 = vld [vmem:[#allocation13 + $0x514] sm:$0xf0] }
 0x214   :  { %4056 = vmatpush.bf16.msra.mxu2 %v9961_v50  ;;  %v9645_v50 = vor.u32 %v12547_v32, %v9644_v31  ;;  %v9544_v31 = vld [vmem:[#allocation13 + $0x30] sm:$0xf]  ;;  %v12522_v32 = vld [vmem:[#allocation13 + $0x40] sm:$0xf0]  ;;  %v10144_v48 = vld [vmem:[#allocation13 + $0x4e0] sm:$0xf] }
 0x215   :  { %4033 = vmatpush.bf16.msra.mxu0 %v9541_v18  ;;  %v2471_v53 = vpop.f32.mrf.mxu3  ;;  %v10296_v18 = vld [vmem:[#allocation13 + $0x618] sm:$0xf] }
 0x216   :  { %v2472_v1 = vadd.f32 %v2471_v53, %v2458_v56  ;;  %v10297_v9 = vor.u32 %v12711_v7, %v10296_v18  ;;  %v12696_v53 = vld [vmem:[#allocation13 + $0x5b0] sm:$0xf0]  ;;  %v9838_v56 = vld [vmem:[#allocation13 + $0x294] sm:$0xf0] }
 0x217   :  { %4046 = vmatpush.bf16.msra.mxu1 %v9721_v58  ;;  %v2459_v2 = vpop.f32.mrf.mxu2  ;;  %v10237_v45 = vor.u32 %v12696_v53, %v10236_v52  ;;  %v9545_v52 = vor.u32 %v12522_v32, %v9544_v31  ;;  %v12672_v53 = vld [vmem:[#allocation13 + $0x4f0] sm:$0xf0]  ;;  %v10084_v31 = vld [vmem:[#allocation13 + $0x468] sm:$0xf]  ;;  %v12657_v32 = vld [vmem:[#allocation13 + $0x478] sm:$0xf0] }
 0x218   :  { %4057 = vmatpush.bf16.msra.mxu2 %v9941_v49  ;;  %v2460_v4 = vadd.f32 %v2459_v2, %v2446_v61  ;;  %4013 = vmatpush.bf16.msrb.mxu3 %v10297_v9  ;;  %v12694_v49 = vld [vmem:[#allocation13 + $0x5a4] sm:$0xf]  ;;  %v12689_v2 = vld [vmem:[#allocation13 + $0x57c] sm:$0xf]  ;;  %v10196_v9 = vld [vmem:[#allocation13 + $0x550] sm:$0xf] }
 0x219   :  { %4034 = vmatpush.bf16.msra.mxu0 %v9521_v21  ;;  %v2485_v60 = vpop.f32.mrf.mxu0  ;;  %v10241_v61 = vor.u32 %v12694_v49, %v10238_v59  ;;  %v10145_v49 = vor.u32 %v12672_v53, %v10144_v48 }
 0x21a   :  { %v2486_v5 = vadd.f32 %v2485_v60, %v2472_v1  ;;  %v9841_v60 = vor.u32 %v12594_v54, %v9838_v56  ;;  %v12691_v1 = vld [vmem:[#allocation13 + $0x588] sm:$0xf0]  ;;  %v12517_v56 = vld [vmem:[#allocation13 + $0x18] sm:$0xf0] }
 0x21b   :  { %4047 = vmatpush.bf16.msra.mxu1 %v9701_v29  ;;  %v9881_v29 = vor.u32 %v12604_v22, %v9878_v25  ;;  %v12679_v22 = vld [vmem:[#allocation13 + $0x52c] sm:$0xf]  ;;  %v9564_v25 = vld [vmem:[#allocation13 + $0x58] sm:$0xf] }
 0x21c   :  { %4058 = vmatpush.bf16.msra.mxu2 %v9921_v3  ;;  %vm2632_vm2 = vcmp.ge.f32.partialorder %v2486_v5, 0.0  ;;  %v2642_v58 = vmul.f32 0.2, %v2486_v5  ;;  %4014 = vmatpush.bf16.msrb.mxu3 %v10277_v24  ;;  %v9604_v3 = vld [vmem:[#allocation13 + $0xa8] sm:$0xf] }
 0x21d   :  { %v2473_v6 = vpop.f32.mrf.mxu3  ;;  %4083 = vmatpush.bf16.msrb.mxu0 %v10301_v17  ;;  %v10198_v17 = vld [vmem:[#allocation13 + $0x564] sm:$0xf0] }
 0x21e   :  { %v2474_v14 = vadd.f32 %v2473_v6, %v2460_v4  ;;  %v2652_v33 = vsel %vm2632_vm2, %v2486_v5, %v2642_v58  ;;  %v12537_v4 = vld [vmem:[#allocation13 + $0xb8] sm:$0xf0]  ;;  %v10217_v5 = vor.u32 %v12691_v1, %v10216_v63  ;;  %v10218_v6 = vld [vmem:[#allocation13 + $0x58c] sm:$0xf0]  ;;  %v1233_v58 = vperm.slane %v13799_v30, 3 }
 0x21f   :  { %4048 = vmatpush.bf16.msra.mxu1 %v9681_v57  ;;  %v10258_v57 = vld [vmem:[#allocation13 + $0x5dc] sm:$0xf0]  ;;  %v2499_v55 = vpop.f32.mrf.mxu1  ;;  %v10221_v18 = vor.u32 %v12689_v2, %v10218_v6  ;;  %v9605_v8 = vor.u32 %v12537_v4, %v9604_v3  ;;  %v12712_v1 = vld [vmem:[#allocation13 + $0x630] sm:$0xf0]  ;;  %v12667_v6 = vld [vmem:[#allocation13 + $0x4c8] sm:$0xf0] }
 0x220   :  { %4059 = vmatpush.bf16.msra.mxu2 %v9901_v16  ;;  %v10261_v46 = vor.u32 %v12699_v39, %v10258_v57  ;;  %4015 = vmatpush.bf16.msrb.mxu3 %v10257_v41  ;;  %v10197_v16 = vor.u32 %v12686_v10, %v10196_v9  ;;  %v12669_v39 = vld [vmem:[#allocation13 + $0x4dc] sm:$0xf]  ;;  %v10138_v57 = vld [vmem:[#allocation13 + $0x4ec] sm:$0xf0]  ;;  %v10304_v63 = vld [vmem:[#allocation13 + $0x620] sm:$0xf] }
 0x221   :  { %v2487_v0 = vpop.f32.mrf.mxu0  ;;  %4084 = vmatpush.bf16.msrb.mxu0 %v10281_v13  ;;  %v10141_v47 = vor.u32 %v12669_v39, %v10138_v57  ;;  %v10305_v9 = vor.u32 %v12712_v1, %v10304_v63  ;;  %v10284_v10 = vld [vmem:[#allocation13 + $0x5f8] sm:$0xf]  ;;  %v12649_v39 = vld [vmem:[#allocation13 + $0x43c] sm:$0xf]  ;;  %v10058_v57 = vld [vmem:[#allocation13 + $0x44c] sm:$0xf0] }
 0x222   :  { %v2488_v21 = vadd.f32 %v2487_v0, %v2474_v14  ;;  %4035 = vmatmul.bf16.vlgmr.msra.gmra.mxu0 %v13809_v51  ;;  %v12532_v14 = vld [vmem:[#allocation13 + $0x90] sm:$0xf0]  ;;  %v10201_v0 = vor.u32 %v12684_v11, %v10198_v17  ;;  %v12659_v11 = vld [vmem:[#allocation13 + $0x48c] sm:$0xf]  ;;  %v10061_v48 = vor.u32 %v12649_v39, %v10058_v57  ;;  %v1234_v39 = vperm.slane %v13799_v30, 4 }
 0x223   :  { %v12647_v63 = vld [vmem:[#allocation13 + $0x428] sm:$0xf0]  ;;  %v12665_v57 = vld [vmem:[#allocation13 + $0x4bc] sm:$0xf] }
 0x224   :  { %vm2637_vm3 = vcmp.ge.f32.partialorder %v2488_v21, 0.0  ;;  %v2647_v28 = vmul.f32 0.2, %v2488_v21  ;;  %4060 = vmatpush.bf16.msra.mxu2 %v9881_v29  ;;  %4016 = vmatpush.bf16.msrb.mxu3 %v10237_v45  ;;  %v2500_v29 = vadd.f32 %v2499_v55, %v1233_v58  ;;  %v9524_v45 = vld [vmem:[#allocation13 + $0x8] sm:$0xf] }
 0x225   :  { %4085 = vmatpush.bf16.msrb.mxu0 %v10261_v46  ;;  %v10161_v46 = vor.u32 %v12674_v37, %v10158_v42  ;;  %v9525_v4 = vor.u32 %v12517_v56, %v9524_v45  ;;  %v12587_v37 = vld [vmem:[#allocation13 + $0x248] sm:$0xf0]  ;;  %v12644_v56 = vld [vmem:[#allocation13 + $0x414] sm:$0xf] }
 0x226   :  { %v2657_v34 = vsel %vm2637_vm3, %v2488_v21, %v2647_v28  ;;  %v9585_v21 = vor.u32 %v12532_v14, %v9584_v12  ;;  %v10178_v28 = vld [vmem:[#allocation13 + $0x53c] sm:$0xf0] }
 0x227   :  { %v13819_v40 = vpack.c.bf16 %v2657_v34, %v2652_v33  ;;  %v2501_v19 = vpop.f32.mrf.mxu1  ;;  %v10181_v13 = vor.u32 %v12679_v22, %v10178_v28  ;;  %v9565_v34 = vor.u32 %v12527_v26, %v9564_v25  ;;  %v10098_v12 = vld [vmem:[#allocation13 + $0x49c] sm:$0xf0]  ;;  %v12592_v22 = vld [vmem:[#allocation13 + $0x270] sm:$0xf0]  ;;  %v12654_v26 = vld [vmem:[#allocation13 + $0x464] sm:$0xf] }
 0x228   :  { %4061 = vmatpush.bf16.msra.mxu2 %v9861_v44  ;;  %4017 = vmatpush.bf16.msrb.mxu3 %v10217_v5  ;;  %v2502_v44 = vadd.f32 %v2501_v19, %v1233_v58  ;;  %v10124_v5 = vld [vmem:[#allocation13 + $0x4b8] sm:$0xf]  ;;  %v10101_v17 = vor.u32 %v12659_v11, %v10098_v12  ;;  %v10104_v58 = vld [vmem:[#allocation13 + $0x490] sm:$0xf]  ;;  %v12642_v11 = vld [vmem:[#allocation13 + $0x400] sm:$0xf0] }
 0x229   :  { %3993 = vmatmul.bf16.vlgmr.msrb.gmra.mxu1 %v13819_v40  ;;  %4086 = vmatpush.bf16.msrb.mxu0 %v10241_v61  ;;  %v10118_v61 = vld [vmem:[#allocation13 + $0x4c4] sm:$0xf0] }
 0x22a   :  { %4097 = vmatpush.bf16.msrb.mxu1 %v9665_v35  ;;  %v10156_v35 = vld [vmem:[#allocation13 + $0x500] sm:$0xf] }
 0x22b   :  { %v10157_v41 = vor.u32 %v12676_v36, %v10156_v35  ;;  %v9804_v36 = vld [vmem:[#allocation13 + $0x238] sm:$0xf] }
 0x22c   :  { %4062 = vmatpush.bf16.msra.mxu2 %v9841_v60  ;;  %4018 = vmatpush.bf16.msrb.mxu3 %v10197_v16  ;;  %v12664_v60 = vld [vmem:[#allocation13 + $0x4b4] sm:$0xf]  ;;  %v12707_v16 = vld [vmem:[#allocation13 + $0x608] sm:$0xf0]  ;;  %v9805_v53 = vor.u32 %v12587_v37, %v9804_v36  ;;  %v9704_v36 = vld [vmem:[#allocation13 + $0x170] sm:$0xf] }
 0x22d   :  { %4087 = vmatpush.bf16.msrb.mxu0 %v10221_v18  ;;  %v10121_v2 = vor.u32 %v12664_v60, %v10118_v61  ;;  %v10285_v25 = vor.u32 %v12707_v16, %v10284_v10  ;;  %v10224_v60 = vld [vmem:[#allocation13 + $0x580] sm:$0xf]  ;;  %v12692_v61 = vld [vmem:[#allocation13 + $0x590] sm:$0xf0]  ;;  %v12562_v37 = vld [vmem:[#allocation13 + $0x180] sm:$0xf0] }
 0x22e   :  { %4098 = vmatpush.bf16.msrb.mxu1 %v9645_v50  ;;  %v9744_v16 = vld [vmem:[#allocation13 + $0x1c0] sm:$0xf] }
 0x22f   :  { %v2513_v7 = vpop.f32.mrf.mxu2 }
 0x230   :  { %4019 = vmatpush.bf16.msrb.mxu3 %v10177_v27  ;;  %v2514_v33 = vadd.f32 %v2513_v7, %v2500_v29  ;;  %v10078_v27 = vld [vmem:[#allocation13 + $0x474] sm:$0xf0]  ;;  %v12702_v29 = vld [vmem:[#allocation13 + $0x5e0] sm:$0xf0] }
 0x231   :  { %4088 = vmatpush.bf16.msrb.mxu0 %v10201_v0  ;;  %v12662_v0 = vld [vmem:[#allocation13 + $0x4a0] sm:$0xf0] }
 0x232   :  { %4099 = vmatpush.bf16.msrb.mxu1 %v9625_v62 }
 0x234   :  { %4020 = vmatpush.bf16.msrb.mxu3 %v10157_v41 }
 0x235   :  { %v2527_v20 = vpop.f32.mrf.mxu3  ;;  %4089 = vmatpush.bf16.msrb.mxu0 %v10181_v13  ;;  %v10081_v13 = vor.u32 %v12654_v26, %v10078_v27 }
 0x236   :  { %4100 = vmatpush.bf16.msrb.mxu1 %v9605_v8  ;;  %v2528_v54 = vadd.f32 %v2527_v20, %v2514_v33  ;;  %v10125_v8 = vor.u32 %v12667_v6, %v10124_v5  ;;  %v9824_v20 = vld [vmem:[#allocation13 + $0x260] sm:$0xf]  ;;  %v10225_v5 = vor.u32 %v12692_v61, %v10224_v60  ;;  %v12639_v6 = vld [vmem:[#allocation13 + $0x3ec] sm:$0xf] }
 0x237   :  { %v2515_v38 = vpop.f32.mrf.mxu2  ;;  %v9825_v35 = vor.u32 %v12592_v22, %v9824_v20  ;;  %v10004_v20 = vld [vmem:[#allocation13 + $0x3c8] sm:$0xf] }
 0x238   :  { %v2516_v55 = vadd.f32 %v2515_v38, %v2502_v44  ;;  %4069 = vmatpush.bf16.msra.mxu3 %v10141_v47  ;;  %v10085_v38 = vor.u32 %v12657_v32, %v10084_v31  ;;  %v10064_v44 = vld [vmem:[#allocation13 + $0x440] sm:$0xf]  ;;  %v12697_v47 = vld [vmem:[#allocation13 + $0x5b8] sm:$0xf0]  ;;  %v12670_v32 = vld [vmem:[#allocation13 + $0x4e4] sm:$0xf] }
 0x239   :  { %v2541_v24 = vpop.f32.mrf.mxu0  ;;  %4049 = vmatmul.bf16.vlgmr.msra.gmra.mxu1 %v13814_v43  ;;  %4090 = vmatpush.bf16.msrb.mxu0 %v10161_v46  ;;  %v10244_v46 = vld [vmem:[#allocation13 + $0x5a8] sm:$0xf]  ;;  %v12677_v31 = vld [vmem:[#allocation13 + $0x518] sm:$0xf0] }
 0x23a   :  { %4101 = vmatpush.bf16.msrb.mxu1 %v9585_v21  ;;  %v2542_v62 = vadd.f32 %v2541_v24, %v2528_v54  ;;  %v10105_v21 = vor.u32 %v12662_v0, %v10104_v58  ;;  %v10264_v24 = vld [vmem:[#allocation13 + $0x5d0] sm:$0xf]  ;;  %v10245_v45 = vor.u32 %v12697_v47, %v10244_v46  ;;  %v12634_v0 = vld [vmem:[#allocation13 + $0x3c4] sm:$0xf] }
 0x23b   :  { %v10265_v42 = vor.u32 %v12702_v29, %v10264_v24  ;;  %v9784_v54 = vld [vmem:[#allocation13 + $0x210] sm:$0xf]  ;;  %v12637_v24 = vld [vmem:[#allocation13 + $0x3d8] sm:$0xf0]  ;;  %v12567_v29 = vld [vmem:[#allocation13 + $0x1a8] sm:$0xf0] }
 0x23c   :  { %4070 = vmatpush.bf16.msra.mxu3 %v10121_v2 }
 0x23d   :  { %v2529_v59 = vpop.f32.mrf.mxu3  ;;  %4139 = vmatpush.bf16.msra.mxu0 %v10145_v49  ;;  %v10038_v49 = vld [vmem:[#allocation13 + $0x424] sm:$0xf0] }
 0x23e   :  { %4102 = vmatpush.bf16.msrb.mxu1 %v9565_v34  ;;  %v2530_v18 = vadd.f32 %v2529_v59, %v2516_v55  ;;  %v12582_v55 = vld [vmem:[#allocation13 + $0x220] sm:$0xf0]  ;;  %v10044_v59 = vld [vmem:[#allocation13 + $0x418] sm:$0xf] }
 0x23f   :  { %v2555_v50 = vpop.f32.mrf.mxu1  ;;  %v10045_v1 = vor.u32 %v12647_v63, %v10044_v59  ;;  %v9785_v2 = vor.u32 %v12582_v55, %v9784_v54  ;;  %v12550_v55 = vld [vmem:[#allocation13 + $0x124] sm:$0xf]  ;;  %v10106_v59 = vld [vmem:[#allocation13 + $0x4a4] sm:$0xf0]  ;;  %v9646_v63 = vld [vmem:[#allocation13 + $0x10c] sm:$0xf0] }
 0x240   :  { %v2556_v7 = vadd.f32 %v2555_v50, %v2542_v62  ;;  %4071 = vmatpush.bf16.msra.mxu3 %v10101_v17  ;;  %v12652_v50 = vld [vmem:[#allocation13 + $0x450] sm:$0xf0]  ;;  %v10041_v62 = vor.u32 %v12644_v56, %v10038_v49 }
 0x241   :  { %v2543_v3 = vpop.f32.mrf.mxu0  ;;  %4140 = vmatpush.bf16.msra.mxu0 %v10125_v8  ;;  %v10204_v8 = vld [vmem:[#allocation13 + $0x558] sm:$0xf]  ;;  %v12572_v17 = vld [vmem:[#allocation13 + $0x1d0] sm:$0xf0] }
 0x242   :  { %4103 = vmatpush.bf16.msrb.mxu1 %v9545_v52  ;;  %v2544_v14 = vadd.f32 %v2543_v3, %v2530_v18  ;;  %v2643_v15 = vmul.f32 0.2, %v2556_v7  ;;  %vm2633_vm4 = vcmp.ge.f32.partialorder %v2556_v7, 0.0  ;;  %v10065_v52 = vor.u32 %v12652_v50, %v10064_v44  ;;  %v9764_v3 = vld [vmem:[#allocation13 + $0x1e8] sm:$0xf] }
 0x243   :  { %v10018_v18 = vld [vmem:[#allocation13 + $0x3fc] sm:$0xf0]  ;;  %v9745_v26 = vor.u32 %v12572_v17, %v9744_v16  ;;  %v10126_v44 = vld [vmem:[#allocation13 + $0x4cc] sm:$0xf0]  ;;  %v9684_v50 = vld [vmem:[#allocation13 + $0x148] sm:$0xf] }
 0x244   :  { %v2653_v33 = vsel %vm2633_vm4, %v2556_v7, %v2643_v15  ;;  %4072 = vmatpush.bf16.msra.mxu3 %v10081_v13  ;;  %v10024_v7 = vld [vmem:[#allocation13 + $0x3f0] sm:$0xf]  ;;  %v10021_v10 = vor.u32 %v12639_v6, %v10018_v18  ;;  %v10164_v13 = vld [vmem:[#allocation13 + $0x508] sm:$0xf]  ;;  %v10129_v54 = vor.u32 %v12665_v57, %v10126_v44  ;;  %v12660_v49 = vld [vmem:[#allocation13 + $0x494] sm:$0xf] }
 0x245   :  { %4141 = vmatpush.bf16.msra.mxu0 %v10105_v21  ;;  %v10025_v12 = vor.u32 %v12642_v11, %v10024_v7  ;;  %v10184_v15 = vld [vmem:[#allocation13 + $0x530] sm:$0xf]  ;;  %v10109_v61 = vor.u32 %v12660_v49, %v10106_v59  ;;  %v9626_v11 = vld [vmem:[#allocation13 + $0xe4] sm:$0xf0]  ;;  %v12650_v16 = vld [vmem:[#allocation13 + $0x444] sm:$0xf] }
 0x246   :  { %4104 = vmatpush.bf16.msrb.mxu1 %v9525_v4  ;;  %v12577_v4 = vld [vmem:[#allocation13 + $0x1f8] sm:$0xf0]  ;;  %v10066_v17 = vld [vmem:[#allocation13 + $0x454] sm:$0xf0]  ;;  %v12635_v49 = vld [vmem:[#allocation13 + $0x3cc] sm:$0xf] }
 0x247   :  { %v2557_v19 = vpop.f32.mrf.mxu1  ;;  %v10006_v59 = vld [vmem:[#allocation13 + $0x3dc] sm:$0xf0] }
 0x248   :  { %v2558_v23 = vadd.f32 %v2557_v19, %v2544_v14  ;;  %4073 = vmatpush.bf16.msra.mxu3 %v10061_v48  ;;  %v9765_v14 = vor.u32 %v12577_v4, %v9764_v3  ;;  %v9998_v19 = vld [vmem:[#allocation13 + $0x3d4] sm:$0xf0]  ;;  %v9705_v48 = vor.u32 %v12562_v37, %v9704_v36  ;;  %v12655_v3 = vld [vmem:[#allocation13 + $0x46c] sm:$0xf]  ;;  %v10086_v4 = vld [vmem:[#allocation13 + $0x47c] sm:$0xf0] }
 0x249   :  { %4105 = vmatmul.bf16.vlgmr.msrb.gmra.mxu1 %v13809_v51  ;;  %4142 = vmatpush.bf16.msra.mxu0 %v10085_v38  ;;  %v10001_v22 = vor.u32 %v12634_v0, %v9998_v19  ;;  %v9986_v37 = vld [vmem:[#allocation13 + $0x3b4] sm:$0xf0] }
 0x24a   :  { %4153 = vmatpush.bf16.msra.mxu1 %v10305_v9  ;;  %vm2638_vm5 = vcmp.ge.f32.partialorder %v2558_v23, 0.0  ;;  %v2648_v28 = vmul.f32 0.2, %v2558_v23  ;;  %v12687_v9 = vld [vmem:[#allocation13 + $0x568] sm:$0xf0] }
 0x24b   :  { %v10205_v58 = vor.u32 %v12687_v9, %v10204_v8  ;;  %v10089_v9 = vor.u32 %v12655_v3, %v10086_v4  ;;  %v12520_v3 = vld [vmem:[#allocation13 + $0x34] sm:$0xf]  ;;  %v10009_v4 = vor.u32 %v12635_v49, %v10006_v59 }
 0x24c   :  { %v2658_v34 = vsel %vm2638_vm5, %v2558_v23, %v2648_v28  ;;  %4074 = vmatpush.bf16.msra.mxu3 %v10041_v62  ;;  %v12682_v23 = vld [vmem:[#allocation13 + $0x540] sm:$0xf0]  ;;  %v9724_v28 = vld [vmem:[#allocation13 + $0x198] sm:$0xf]  ;;  %v12545_v62 = vld [vmem:[#allocation13 + $0xfc] sm:$0xf] }
 0x24d   :  { %v13825_v41 = vpack.c.bf16 %v2658_v34, %v2653_v33  ;;  %4143 = vmatpush.bf16.msra.mxu0 %v10065_v52  ;;  %v10185_v27 = vor.u32 %v12682_v23, %v10184_v15  ;;  %v10146_v33 = vld [vmem:[#allocation13 + $0x4f4] sm:$0xf0]  ;;  %v9725_v34 = vor.u32 %v12567_v29, %v9724_v28  ;;  %v12557_v52 = vld [vmem:[#allocation13 + $0x158] sm:$0xf0]  ;;  %v9649_v7 = vor.u32 %v12545_v62, %v9646_v63  ;;  %v12535_v15 = vld [vmem:[#allocation13 + $0xac] sm:$0xf] }
 0x24e   :  { %4154 = vmatpush.bf16.msra.mxu1 %v10285_v25  ;;  %v10005_v25 = vor.u32 %v12637_v24, %v10004_v20  ;;  %v9685_v60 = vor.u32 %v12557_v52, %v9684_v50  ;;  %v9606_v23 = vld [vmem:[#allocation13 + $0xbc] sm:$0xf0]  ;;  %v12645_v24 = vld [vmem:[#allocation13 + $0x41c] sm:$0xf]  ;;  %v9964_v50 = vld [vmem:[#allocation13 + $0x378] sm:$0xf] }
 0x24f   :  { %4007 = vmatmul.bf16.vlgmr.msrb.gmra.mxu2 %v13825_v41  ;;  %v2569_v21 = vpop.f32.mrf.mxu2  ;;  %v12627_v52 = vld [vmem:[#allocation13 + $0x388] sm:$0xf0] }
 0x250   :  { %4111 = vmatpush.bf16.msrb.mxu2 %v9825_v35  ;;  %4075 = vmatpush.bf16.msra.mxu3 %v10021_v10  ;;  %v10165_v35 = vor.u32 %v12677_v31, %v10164_v13  ;;  %v2570_v56 = vadd.f32 %v2569_v21, %v1234_v39  ;;  %v12540_v10 = vld [vmem:[#allocation13 + $0xd4] sm:$0xf]  ;;  %v10069_v21 = vor.u32 %v12650_v16, %v10066_v17  ;;  %v12617_v16 = vld [vmem:[#allocation13 + $0x338] sm:$0xf0]  ;;  %v12515_v17 = vld [vmem:[#allocation13 + $0xc] sm:$0xf] }
 0x251   :  { %4144 = vmatpush.bf16.msra.mxu0 %v10045_v1  ;;  %v9629_v20 = vor.u32 %v12540_v10, %v9626_v11  ;;  %v9609_v13 = vor.u32 %v12535_v15, %v9606_v23  ;;  %v12632_v31 = vld [vmem:[#allocation13 + $0x3b0] sm:$0xf0]  ;;  %v10306_v15 = vld [vmem:[#allocation13 + $0x634] sm:$0xf0] }
 0x252   :  { %4155 = vmatpush.bf16.msra.mxu1 %v10265_v42  ;;  %v10149_v42 = vor.u32 %v12670_v32, %v10146_v33  ;;  %v12530_v32 = vld [vmem:[#allocation13 + $0x84] sm:$0xf]  ;;  %v12628_v10 = vld [vmem:[#allocation13 + $0x390] sm:$0xf0] }
 0x254   :  { %4112 = vmatpush.bf16.msrb.mxu2 %v9805_v53  ;;  %4076 = vmatpush.bf16.msra.mxu3 %v10001_v22 }
 0x255   :  { %4145 = vmatpush.bf16.msra.mxu0 %v10025_v12  ;;  %v2583_v38 = vpop.f32.mrf.mxu3 }
 0x256   :  { %4156 = vmatpush.bf16.msra.mxu1 %v10245_v45  ;;  %v9666_v45 = vld [vmem:[#allocation13 + $0x134] sm:$0xf0]  ;;  %v2584_v1 = vadd.f32 %v2583_v38, %v2570_v56  ;;  %v12640_v38 = vld [vmem:[#allocation13 + $0x3f4] sm:$0xf]  ;;  %v9966_v56 = vld [vmem:[#allocation13 + $0x38c] sm:$0xf0] }
 0x257   :  { %v2571_v47 = vpop.f32.mrf.mxu2  ;;  %v9669_v30 = vor.u32 %v12550_v55, %v9666_v45  ;;  %v9566_v55 = vld [vmem:[#allocation13 + $0x6c] sm:$0xf0]  ;;  %v12625_v45 = vld [vmem:[#allocation13 + $0x37c] sm:$0xf] }
 0x258   :  { %4113 = vmatpush.bf16.msrb.mxu2 %v9785_v2  ;;  %v2572_v2 = vadd.f32 %v2571_v47, %v1234_v39  ;;  %v9969_v63 = vor.u32 %v12625_v45, %v9966_v56  ;;  %v9864_v45 = vld [vmem:[#allocation13 + $0x2b0] sm:$0xf]  ;;  %v12602_v56 = vld [vmem:[#allocation13 + $0x2c0] sm:$0xf0] }
 0x259   :  { %4146 = vmatpush.bf16.msra.mxu0 %v10005_v25  ;;  %v2597_v46 = vpop.f32.mrf.mxu0  ;;  %v10046_v25 = vld [vmem:[#allocation13 + $0x42c] sm:$0xf0] }
 0x25a   :  { %4157 = vmatpush.bf16.msra.mxu1 %v10225_v5  ;;  %v2598_v18 = vadd.f32 %v2597_v46, %v2584_v1  ;;  %v10049_v33 = vor.u32 %v12645_v24, %v10046_v25  ;;  %v9944_v1 = vld [vmem:[#allocation13 + $0x350] sm:$0xf]  ;;  %v12623_v24 = vld [vmem:[#allocation13 + $0x368] sm:$0xf0] }
 0x25c   :  { %4114 = vmatpush.bf16.msrb.mxu2 %v9765_v14 }
 0x25d   :  { %v2585_v5 = vpop.f32.mrf.mxu3 }
 0x25e   :  { %4158 = vmatpush.bf16.msra.mxu1 %v10205_v58  ;;  %v2586_v12 = vadd.f32 %v2585_v5, %v2572_v2  ;;  %v12622_v2 = vld [vmem:[#allocation13 + $0x360] sm:$0xf0]  ;;  %v9546_v5 = vld [vmem:[#allocation13 + $0x44] sm:$0xf0] }
 0x25f   :  { %4063 = vmatmul.bf16.vlgmr.msra.gmra.mxu2 %v13819_v40  ;;  %v2611_v53 = vpop.f32.mrf.mxu1  ;;  %v9549_v11 = vor.u32 %v12520_v3, %v9546_v5  ;;  %v12608_v3 = vld [vmem:[#allocation13 + $0x2f0] sm:$0xf0]  ;;  %v12597_v5 = vld [vmem:[#allocation13 + $0x298] sm:$0xf0] }
 0x260   :  { %4115 = vmatpush.bf16.msrb.mxu2 %v9745_v26  ;;  %v2612_v14 = vadd.f32 %v2611_v53, %v2598_v18  ;;  %v12525_v53 = vld [vmem:[#allocation13 + $0x5c] sm:$0xf]  ;;  %v9946_v18 = vld [vmem:[#allocation13 + $0x364] sm:$0xf0] }
 0x261   :  { %v2599_v8 = vpop.f32.mrf.mxu0  ;;  %v9569_v62 = vor.u32 %v12525_v53, %v9566_v55  ;;  %v12613_v55 = vld [vmem:[#allocation13 + $0x318] sm:$0xf0] }
 0x262   :  { %4159 = vmatpush.bf16.msra.mxu1 %v10185_v27  ;;  %v2600_v0 = vadd.f32 %v2599_v8, %v2586_v12  ;;  %v9984_v27 = vld [vmem:[#allocation13 + $0x3a0] sm:$0xf]  ;;  %v9945_v8 = vor.u32 %v12622_v2, %v9944_v1  ;;  %v9865_v1 = vor.u32 %v12602_v56, %v9864_v45  ;;  %v12578_v45 = vld [vmem:[#allocation13 + $0x200] sm:$0xf0]  ;;  %v10152_v56 = vld [vmem:[#allocation13 + $0x4e8] sm:$0xf] }
 0x263   :  { %v9985_v44 = vor.u32 %v12632_v31, %v9984_v27  ;;  %v9904_v27 = vld [vmem:[#allocation13 + $0x300] sm:$0xf] }
 0x264   :  { %4116 = vmatpush.bf16.msrb.mxu2 %v9725_v34  ;;  %v9586_v34 = vld [vmem:[#allocation13 + $0x94] sm:$0xf0]  ;;  %v9892_v2 = vld [vmem:[#allocation13 + $0x2e0] sm:$0xf] }
 0x265   :  { %v9589_v47 = vor.u32 %v12530_v32, %v9586_v34  ;;  %v9906_v32 = vld [vmem:[#allocation13 + $0x314] sm:$0xf0]  ;;  %v10286_v34 = vld [vmem:[#allocation13 + $0x60c] sm:$0xf0] }
 0x266   :  { %4160 = vmatpush.bf16.msra.mxu1 %v10165_v35  ;;  %v12630_v35 = vld [vmem:[#allocation13 + $0x3a4] sm:$0xf] }
 0x267   :  { %v2613_v58 = vpop.f32.mrf.mxu1 }
 0x268   :  { %4117 = vmatpush.bf16.msrb.mxu2 %v9705_v48  ;;  %v2614_v22 = vadd.f32 %v2613_v58, %v2600_v0  ;;  %v9989_v48 = vor.u32 %v12630_v35, %v9986_v37  ;;  %v9526_v58 = vld [vmem:[#allocation13 + $0x1c] sm:$0xf0]  ;;  %v12615_v0 = vld [vmem:[#allocation13 + $0x32c] sm:$0xf]  ;;  %v12618_v37 = vld [vmem:[#allocation13 + $0x340] sm:$0xf0] }
 0x269   :  { %v9529_v25 = vor.u32 %v12515_v17, %v9526_v58  ;;  %v12593_v58 = vld [vmem:[#allocation13 + $0x278] sm:$0xf0] }
 0x26a   :  { %4209 = vmatpush.bf16.msrb.mxu1 %v10149_v42  ;;  %v10026_v42 = vld [vmem:[#allocation13 + $0x404] sm:$0xf0] }
 0x26c   :  { %4118 = vmatpush.bf16.msrb.mxu2 %v9685_v60  ;;  %v9965_v60 = vor.u32 %v12627_v52, %v9964_v50  ;;  %v12700_v50 = vld [vmem:[#allocation13 + $0x5d4] sm:$0xf]  ;;  %v10266_v52 = vld [vmem:[#allocation13 + $0x5e4] sm:$0xf0] }
 0x26d   :  { %v10269_v59 = vor.u32 %v12700_v50, %v10266_v52  ;;  %v9766_v50 = vld [vmem:[#allocation13 + $0x1fc] sm:$0xf0] }
 0x26e   :  { %4210 = vmatpush.bf16.msrb.mxu1 %v10129_v54  ;;  %v10029_v54 = vor.u32 %v12640_v38, %v10026_v42  ;;  %v9884_v38 = vld [vmem:[#allocation13 + $0x2d8] sm:$0xf]  ;;  %v12607_v42 = vld [vmem:[#allocation13 + $0x2e8] sm:$0xf0] }
 0x26f   :  { %v2625_v6 = vpop.f32.mrf.mxu2  ;;  %4119 = vmatmul.bf16.vlgmr.msrb.gmra.mxu2 %v13814_v43  ;;  %v9885_v53 = vor.u32 %v12607_v42, %v9884_v38  ;;  %v12680_v38 = vld [vmem:[#allocation13 + $0x534] sm:$0xf]  ;;  %v10186_v42 = vld [vmem:[#allocation13 + $0x544] sm:$0xf0] }
 0x270   :  { %4167 = vmatpush.bf16.msra.mxu2 %v9669_v30  ;;  %v2626_v19 = vadd.f32 %v2625_v6, %v2612_v14  ;;  %v9992_v30 = vld [vmem:[#allocation13 + $0x3a8] sm:$0xf]  ;;  %v12620_v6 = vld [vmem:[#allocation13 + $0x354] sm:$0xf] }
 0x271   :  { %v9949_v12 = vor.u32 %v12620_v6, %v9946_v18  ;;  %v9924_v14 = vld [vmem:[#allocation13 + $0x328] sm:$0xf]  ;;  %v12595_v6 = vld [vmem:[#allocation13 + $0x28c] sm:$0xf] }
 0x272   :  { %4211 = vmatpush.bf16.msrb.mxu1 %v10109_v61  ;;  %v2644_v28 = vmul.f32 0.2, %v2626_v19  ;;  %vm2634_vm6 = vcmp.ge.f32.partialorder %v2626_v19, 0.0  ;;  %v12633_v61 = vld [vmem:[#allocation13 + $0x3b8] sm:$0xf0]  ;;  %v9925_v23 = vor.u32 %v12617_v16, %v9924_v14 }
 0x273   :  { %v10226_v14 = vld [vmem:[#allocation13 + $0x594] sm:$0xf0]  ;;  %v9832_v16 = vld [vmem:[#allocation13 + $0x268] sm:$0xf] }
 0x274   :  { %4168 = vmatpush.bf16.msra.mxu2 %v9649_v7  ;;  %v2654_v39 = vsel %vm2634_vm6, %v2626_v19, %v2644_v28  ;;  %v9993_v7 = vor.u32 %v12633_v61, %v9992_v30  ;;  %v9926_v19 = vld [vmem:[#allocation13 + $0x33c] sm:$0xf0]  ;;  %v12612_v28 = vld [vmem:[#allocation13 + $0x310] sm:$0xf0]  ;;  %v9866_v61 = vld [vmem:[#allocation13 + $0x2c4] sm:$0xf0] }
 0x275   :  { %v9905_v35 = vor.u32 %v12612_v28, %v9904_v27  ;;  %v10206_v27 = vld [vmem:[#allocation13 + $0x56c] sm:$0xf0]  ;;  %v9812_v28 = vld [vmem:[#allocation13 + $0x240] sm:$0xf] }
 0x276   :  { %4212 = vmatpush.bf16.msrb.mxu1 %v10089_v9  ;;  %v9972_v9 = vld [vmem:[#allocation13 + $0x380] sm:$0xf] }
 0x277   :  { %v2627_v26 = vpop.f32.mrf.mxu2 }
 0x278   :  { %v2628_v29 = vadd.f32 %v2627_v26, %v2614_v22  ;;  %4169 = vmatpush.bf16.msra.mxu2 %v9629_v20  ;;  %v9973_v20 = vor.u32 %v12628_v10, %v9972_v9  ;;  %v9952_v22 = vld [vmem:[#allocation13 + $0x358] sm:$0xf]  ;;  %v9929_v26 = vor.u32 %v12615_v0, %v9926_v19  ;;  %v12590_v9 = vld [vmem:[#allocation13 + $0x264] sm:$0xf]  ;;  %v12603_v19 = vld [vmem:[#allocation13 + $0x2c8] sm:$0xf0] }
 0x279   :  { %v9953_v31 = vor.u32 %v12623_v24, %v9952_v22  ;;  %v9826_v10 = vld [vmem:[#allocation13 + $0x274] sm:$0xf0]  ;;  %v9806_v22 = vld [vmem:[#allocation13 + $0x24c] sm:$0xf0]  ;;  %v9833_v24 = vor.u32 %v12593_v58, %v9832_v16  ;;  %v9706_v16 = vld [vmem:[#allocation13 + $0x184] sm:$0xf0] }
 0x27a   :  { %4213 = vmatpush.bf16.msrb.mxu1 %v10069_v21  ;;  %vm2639_vm7 = vcmp.ge.f32.partialorder %v2628_v29, 0.0  ;;  %v2649_v36 = vmul.f32 0.2, %v2628_v29  ;;  %v12710_v21 = vld [vmem:[#allocation13 + $0x624] sm:$0xf] }
 0x27b   :  { %v9872_v0 = vld [vmem:[#allocation13 + $0x2b8] sm:$0xf] }
 0x27c   :  { %v2659_v57 = vsel %vm2639_vm7, %v2628_v29, %v2649_v36  ;;  %4170 = vmatpush.bf16.msra.mxu2 %v9609_v13  ;;  %v10309_v29 = vor.u32 %v12710_v21, %v10306_v15  ;;  %v12610_v13 = vld [vmem:[#allocation13 + $0x304] sm:$0xf]  ;;  %v9932_v36 = vld [vmem:[#allocation13 + $0x330] sm:$0xf] }
 0x27d   :  { %v13831_v46 = vpack.c.bf16 %v2659_v57, %v2654_v39  ;;  %v9909_v39 = vor.u32 %v12610_v13, %v9906_v32  ;;  %v9852_v13 = vld [vmem:[#allocation13 + $0x290] sm:$0xf] }
 0x27e   :  { %4214 = vmatpush.bf16.msrb.mxu1 %v10049_v33  ;;  %v12705_v33 = vld [vmem:[#allocation13 + $0x5fc] sm:$0xf] }
 0x27f   :  { %4021 = vmatmul.bf16.vlgmr.msrb.gmra.mxu3 %v13831_v46  ;;  %4091 = vmatmul.bf16.vlgmr.msrb.gmra.mxu0 %v13831_v46  ;;  %v10289_v57 = vor.u32 %v12705_v33, %v10286_v34  ;;  %v12580_v34 = vld [vmem:[#allocation13 + $0x214] sm:$0xf] }
 0x280   :  { %4125 = vmatpush.bf16.msrb.mxu3 %v9985_v44  ;;  %4161 = vmatmul.bf16.vlgmr.msra.gmra.mxu1 %v13831_v46  ;;  %v12605_v44 = vld [vmem:[#allocation13 + $0x2dc] sm:$0xf] }
 0x281   :  { %4171 = vmatpush.bf16.msra.mxu2 %v9589_v47  ;;  %4195 = vmatpush.bf16.msrb.mxu0 %v9989_v48  ;;  %v9933_v47 = vor.u32 %v12618_v37, %v9932_v36  ;;  %v9886_v48 = vld [vmem:[#allocation13 + $0x2ec] sm:$0xf0] }
 0x282   :  { %4215 = vmatpush.bf16.msrb.mxu1 %v10029_v54  ;;  %v9912_v54 = vld [vmem:[#allocation13 + $0x308] sm:$0xf]  ;;  %v9889_v49 = vor.u32 %v12605_v44, %v9886_v48  ;;  %v12575_v48 = vld [vmem:[#allocation13 + $0x1ec] sm:$0xf] }
 0x283   :  { %v9913_v30 = vor.u32 %v12613_v55, %v9912_v54  ;;  %v10166_v54 = vld [vmem:[#allocation13 + $0x51c] sm:$0xf0]  ;;  %v9772_v55 = vld [vmem:[#allocation13 + $0x1f0] sm:$0xf] }
 0x284   :  { %4126 = vmatpush.bf16.msrb.mxu3 %v9965_v60  ;;  %v12600_v60 = vld [vmem:[#allocation13 + $0x2b4] sm:$0xf] }
 0x285   :  { %4172 = vmatpush.bf16.msra.mxu2 %v9569_v62  ;;  %4196 = vmatpush.bf16.msrb.mxu0 %v9969_v63  ;;  %v12695_v62 = vld [vmem:[#allocation13 + $0x5ac] sm:$0xf]  ;;  %v10246_v63 = vld [vmem:[#allocation13 + $0x5bc] sm:$0xf0]  ;;  %v9869_v18 = vor.u32 %v12600_v60, %v9866_v61  ;;  %v9746_v61 = vld [vmem:[#allocation13 + $0x1d4] sm:$0xf0] }
 0x286   :  { %4216 = vmatpush.bf16.msrb.mxu1 %v10009_v4  ;;  %v9844_v4 = vld [vmem:[#allocation13 + $0x288] sm:$0xf] }
 0x287   :  { %v9845_v17 = vor.u32 %v12597_v5, %v9844_v4  ;;  %v12668_v4 = vld [vmem:[#allocation13 + $0x4d0] sm:$0xf0] }
 0x288   :  { %4127 = vmatpush.bf16.msrb.mxu3 %v9945_v8  ;;  %v9846_v8 = vld [vmem:[#allocation13 + $0x29c] sm:$0xf0] }
 0x289   :  { %4173 = vmatpush.bf16.msra.mxu2 %v9549_v11  ;;  %4197 = vmatpush.bf16.msrb.mxu0 %v9949_v12  ;;  %v9893_v11 = vor.u32 %v12608_v3, %v9892_v2  ;;  %v12690_v12 = vld [vmem:[#allocation13 + $0x584] sm:$0xf]  ;;  %v9849_v21 = vor.u32 %v12595_v6, %v9846_v8  ;;  %v12573_v2 = vld [vmem:[#allocation13 + $0x1d8] sm:$0xf0]  ;;  %v10132_v3 = vld [vmem:[#allocation13 + $0x4c0] sm:$0xf] }
 0x28a   :  { %4265 = vmatpush.bf16.msra.mxu1 %v9993_v7  ;;  %v10249_v7 = vor.u32 %v12695_v62, %v10246_v63  ;;  %v10229_v15 = vor.u32 %v12690_v12, %v10226_v14  ;;  %v9773_v62 = vor.u32 %v12578_v45, %v9772_v55  ;;  %v12565_v6 = vld [vmem:[#allocation13 + $0x19c] sm:$0xf]  ;;  %v10133_v8 = vor.u32 %v12668_v4, %v10132_v3  ;;  %v12560_v14 = vld [vmem:[#allocation13 + $0x174] sm:$0xf]  ;;  %v12538_v55 = vld [vmem:[#allocation13 + $0xc0] sm:$0xf0] }
 0x28b   :  { %v10012_v45 = vld [vmem:[#allocation13 + $0x3d0] sm:$0xf] }
 0x28c   :  { %4128 = vmatpush.bf16.msrb.mxu3 %v9925_v23  ;;  %v12585_v23 = vld [vmem:[#allocation13 + $0x23c] sm:$0xf]  ;;  %v9532_v4 = vld [vmem:[#allocation13 + $0x10] sm:$0xf] }
 0x28d   :  { %4174 = vmatpush.bf16.msra.mxu2 %v9529_v25  ;;  %4198 = vmatpush.bf16.msrb.mxu0 %v9929_v26  ;;  %v9873_v25 = vor.u32 %v12603_v19, %v9872_v0  ;;  %v12685_v26 = vld [vmem:[#allocation13 + $0x55c] sm:$0xf]  ;;  %v9809_v32 = vor.u32 %v12585_v23, %v9806_v22  ;;  %v9712_v0 = vld [vmem:[#allocation13 + $0x178] sm:$0xf]  ;;  %v12563_v19 = vld [vmem:[#allocation13 + $0x188] sm:$0xf0] }
 0x28e   :  { %4266 = vmatpush.bf16.msra.mxu1 %v9973_v20  ;;  %v9829_v20 = vor.u32 %v12590_v9, %v9826_v10  ;;  %v10209_v33 = vor.u32 %v12685_v26, %v10206_v27  ;;  %v12568_v9 = vld [vmem:[#allocation13 + $0x1b0] sm:$0xf0]  ;;  %v10112_v10 = vld [vmem:[#allocation13 + $0x498] sm:$0xf]  ;;  %v12555_v23 = vld [vmem:[#allocation13 + $0x14c] sm:$0xf] }
 0x28f   :  { %4077 = vmatmul.bf16.vlgmr.msra.gmra.mxu3 %v13825_v41  ;;  %4147 = vmatmul.bf16.vlgmr.msra.gmra.mxu0 %v13825_v41  ;;  %v9686_v22 = vld [vmem:[#allocation13 + $0x15c] sm:$0xf0]  ;;  %v9692_v26 = vld [vmem:[#allocation13 + $0x150] sm:$0xf]  ;;  %v9672_v27 = vld [vmem:[#allocation13 + $0x128] sm:$0xf] }
 0x290   :  { %4175 = vmatmul.bf16.vlgmr.msra.gmra.mxu2 %v13809_v51  ;;  %4129 = vmatpush.bf16.msrb.mxu3 %v9905_v35  ;;  %v9786_v35 = vld [vmem:[#allocation13 + $0x224] sm:$0xf0] }
 0x291   :  { %4223 = vmatpush.bf16.msrb.mxu2 %v10309_v29  ;;  %4217 = vmatmul.bf16.vlgmr.msrb.gmra.mxu1 %v13825_v41  ;;  %v12588_v29 = vld [vmem:[#allocation13 + $0x250] sm:$0xf0]  ;;  %v9789_v44 = vor.u32 %v12580_v34, %v9786_v35 }
 0x292   :  { %4267 = vmatpush.bf16.msra.mxu1 %v9953_v31  ;;  %4199 = vmatpush.bf16.msrb.mxu0 %v9909_v39  ;;  %v12598_v31 = vld [vmem:[#allocation13 + $0x2a0] sm:$0xf0]  ;;  %v9813_v36 = vor.u32 %v12588_v29, %v9812_v28  ;;  %v9792_v39 = vld [vmem:[#allocation13 + $0x218] sm:$0xf]  ;;  %v12553_v28 = vld [vmem:[#allocation13 + $0x138] sm:$0xf0] }
 0x293   :  { %v9853_v37 = vor.u32 %v12598_v31, %v9852_v13  ;;  %v12558_v29 = vld [vmem:[#allocation13 + $0x160] sm:$0xf0]  ;;  %v10072_v13 = vld [vmem:[#allocation13 + $0x448] sm:$0xf]  ;;  %v12653_v31 = vld [vmem:[#allocation13 + $0x458] sm:$0xf0] }
 0x294   :  { %4130 = vmatpush.bf16.msrb.mxu3 %v9885_v53  ;;  %v12675_v53 = vld [vmem:[#allocation13 + $0x50c] sm:$0xf]  ;;  %v9693_v34 = vor.u32 %v12558_v29, %v9692_v26  ;;  %v10073_v35 = vor.u32 %v12653_v31, %v10072_v13  ;;  %v12698_v26 = vld [vmem:[#allocation13 + $0x5c0] sm:$0xf0]  ;;  %v10776_v29 = vld [vmem:[#allocation16 + $0x398] sm:$0xf] }
 0x295   :  { %4224 = vmatpush.bf16.msrb.mxu2 %v10289_v57  ;;  %v12583_v57 = vld [vmem:[#allocation13 + $0x228] sm:$0xf0]  ;;  %v10169_v60 = vor.u32 %v12675_v53, %v10166_v54  ;;  %v9612_v54 = vld [vmem:[#allocation13 + $0xb0] sm:$0xf] }
 0x296   :  { %4268 = vmatpush.bf16.msra.mxu1 %v9933_v47  ;;  %4200 = vmatpush.bf16.msrb.mxu0 %v9889_v49  ;;  %v10189_v47 = vor.u32 %v12680_v38, %v10186_v42  ;;  %v9793_v52 = vor.u32 %v12583_v57, %v9792_v39  ;;  %v12673_v49 = vld [vmem:[#allocation13 + $0x4f8] sm:$0xf0]  ;;  %v10052_v38 = vld [vmem:[#allocation13 + $0x420] sm:$0xf]  ;;  %v12648_v42 = vld [vmem:[#allocation13 + $0x430] sm:$0xf0] }
 0x297   :  { %v10153_v63 = vor.u32 %v12673_v49, %v10152_v56  ;;  %v10053_v57 = vor.u32 %v12648_v42, %v10052_v38  ;;  %v12638_v56 = vld [vmem:[#allocation13 + $0x3e0] sm:$0xf0]  ;;  %v9613_v49 = vor.u32 %v12538_v55, %v9612_v54  ;;  %v12831_v31 = vld [vmem:[#allocation16 + $0x3a8] sm:$0xf0]  ;;  %v10756_v38 = vld [vmem:[#allocation16 + $0x370] sm:$0xf] }
 0x298   :  { %4131 = vmatpush.bf16.msrb.mxu3 %v9865_v1  ;;  %v9752_v1 = vld [vmem:[#allocation13 + $0x1c8] sm:$0xf]  ;;  %v12731_v54 = vld [vmem:[#allocation16 + $0x88] sm:$0xf0] }
 0x299   :  { %4225 = vmatpush.bf16.msrb.mxu2 %v10269_v59  ;;  %v9769_v59 = vor.u32 %v12575_v48, %v9766_v50  ;;  %v10032_v48 = vld [vmem:[#allocation13 + $0x3f8] sm:$0xf]  ;;  %v12643_v50 = vld [vmem:[#allocation13 + $0x408] sm:$0xf0] }
 0x29a   :  { %4269 = vmatpush.bf16.msra.mxu1 %v9913_v30  ;;  %4201 = vmatpush.bf16.msrb.mxu0 %v9869_v18  ;;  %v12570_v30 = vld [vmem:[#allocation13 + $0x1c4] sm:$0xf]  ;;  %v9726_v18 = vld [vmem:[#allocation13 + $0x1ac] sm:$0xf0]  ;;  %v10033_v53 = vor.u32 %v12643_v50, %v10032_v48  ;;  %v12826_v42 = vld [vmem:[#allocation16 + $0x380] sm:$0xf0] }
 0x29b   :  { %v9749_v5 = vor.u32 %v12570_v30, %v9746_v61  ;;  %v9729_v12 = vor.u32 %v12565_v6, %v9726_v18  ;;  %v12533_v30 = vld [vmem:[#allocation13 + $0x98] sm:$0xf0]  ;;  %v10312_v6 = vld [vmem:[#allocation13 + $0x628] sm:$0xf]  ;;  %v10212_v48 = vld [vmem:[#allocation13 + $0x560] sm:$0xf] }
 0x29c   :  { %4132 = vmatpush.bf16.msrb.mxu3 %v9845_v17  ;;  %v12713_v18 = vld [vmem:[#allocation13 + $0x638] sm:$0xf0] }
 0x29d   :  { %4226 = vmatpush.bf16.msrb.mxu2 %v10249_v7  ;;  %v9753_v7 = vor.u32 %v12573_v2, %v9752_v1  ;;  %v9552_v1 = vld [vmem:[#allocation13 + $0x38] sm:$0xf]  ;;  %v12523_v2 = vld [vmem:[#allocation13 + $0x48] sm:$0xf0] }
 0x29e   :  { %4270 = vmatpush.bf16.msra.mxu1 %v9893_v11  ;;  %4202 = vmatpush.bf16.msrb.mxu0 %v9849_v21  ;;  %v12663_v11 = vld [vmem:[#allocation13 + $0x4a8] sm:$0xf0]  ;;  %v12658_v21 = vld [vmem:[#allocation13 + $0x480] sm:$0xf0]  ;;  %v9553_v3 = vor.u32 %v12523_v2, %v9552_v1  ;;  %v10536_v2 = vld [vmem:[#allocation16 + $0x1b8] sm:$0xf] }
 0x29f   :  { %4133 = vmatmul.bf16.vlgmr.msrb.gmra.mxu3 %v13819_v40  ;;  %v10113_v58 = vor.u32 %v12663_v11, %v10112_v10  ;;  %v10292_v10 = vld [vmem:[#allocation13 + $0x600] sm:$0xf]  ;;  %v12708_v11 = vld [vmem:[#allocation13 + $0x610] sm:$0xf0]  ;;  %v12726_v1 = vld [vmem:[#allocation16 + $0x60] sm:$0xf0] }
 0x2a0   :  { %4181 = vmatpush.bf16.msra.mxu3 %v9829_v20  ;;  %v10092_v20 = vld [vmem:[#allocation13 + $0x470] sm:$0xf] }
 0x2a1   :  { %4227 = vmatpush.bf16.msrb.mxu2 %v10229_v15  ;;  %4203 = vmatmul.bf16.vlgmr.msrb.gmra.mxu0 %v13819_v40  ;;  %v9709_v15 = vor.u32 %v12560_v14, %v9706_v16  ;;  %v12746_v14 = vld [vmem:[#allocation16 + $0x100] sm:$0xf0]  ;;  %v10616_v16 = vld [vmem:[#allocation16 + $0x258] sm:$0xf] }
 0x2a2   :  { %4251 = vmatpush.bf16.msra.mxu0 %v9833_v24  ;;  %4271 = vmatpush.bf16.msra.mxu1 %v9873_v25  ;;  %v9713_v24 = vor.u32 %v12563_v19, %v9712_v0  ;;  %v10093_v25 = vor.u32 %v12658_v21, %v10092_v20  ;;  %v12791_v0 = vld [vmem:[#allocation16 + $0x268] sm:$0xf0]  ;;  %v10416_v19 = vld [vmem:[#allocation16 + $0xc8] sm:$0xf]  ;;  %v12741_v20 = vld [vmem:[#allocation16 + $0xd8] sm:$0xf0] }
 0x2a3   :  { %v10272_v21 = vld [vmem:[#allocation13 + $0x5d8] sm:$0xf] }
 0x2a4   :  { %4182 = vmatpush.bf16.msra.mxu3 %v9809_v32  ;;  %v9689_v32 = vor.u32 %v12555_v23, %v9686_v22  ;;  %v10617_v23 = vor.u32 %v12791_v0, %v10616_v16  ;;  %v10417_v22 = vor.u32 %v12741_v20, %v10416_v19  ;;  %v10516_v16 = vld [vmem:[#allocation16 + $0x190] sm:$0xf]  ;;  %v12811_v19 = vld [vmem:[#allocation16 + $0x308] sm:$0xf0] }
 0x2a5   :  { %4228 = vmatpush.bf16.msrb.mxu2 %v10209_v33  ;;  %v9673_v33 = vor.u32 %v12553_v28, %v9672_v27  ;;  %v10596_v27 = vld [vmem:[#allocation16 + $0x230] sm:$0xf]  ;;  %v12786_v28 = vld [vmem:[#allocation16 + $0x240] sm:$0xf0] }
 0x2a6   :  { %4252 = vmatpush.bf16.msra.mxu0 %v9813_v36  ;;  %4272 = vmatpush.bf16.msra.mxu1 %v9853_v37  ;;  %v9652_v36 = vld [vmem:[#allocation13 + $0x100] sm:$0xf]  ;;  %v12548_v37 = vld [vmem:[#allocation13 + $0x110] sm:$0xf0]  ;;  %v10597_v13 = vor.u32 %v12786_v28, %v10596_v27 }
 0x2a7   :  { %v9653_v39 = vor.u32 %v12548_v37, %v9652_v36  ;;  %v12781_v37 = vld [vmem:[#allocation16 + $0x218] sm:$0xf0]  ;;  %v10676_v27 = vld [vmem:[#allocation16 + $0x2d0] sm:$0xf] }
 0x2a8   :  { %4183 = vmatpush.bf16.msra.mxu3 %v9789_v44  ;;  %v9632_v44 = vld [vmem:[#allocation13 + $0xd8] sm:$0xf] }
 0x2a9   :  { %4229 = vmatpush.bf16.msrb.mxu2 %v10189_v47  ;;  %4273 = vmatmul.bf16.vlgmr.msra.gmra.mxu1 %v13819_v40  ;;  %v9732_v40 = vld [vmem:[#allocation13 + $0x1a0] sm:$0xf]  ;;  %v12543_v47 = vld [vmem:[#allocation13 + $0xe8] sm:$0xf0] }
 0x2aa   :  { %4253 = vmatpush.bf16.msra.mxu0 %v9793_v52  ;;  %v9733_v17 = vor.u32 %v12568_v9, %v9732_v40  ;;  %v9633_v52 = vor.u32 %v12543_v47, %v9632_v44  ;;  %v10456_v40 = vld [vmem:[#allocation16 + $0x118] sm:$0xf]  ;;  %v12751_v9 = vld [vmem:[#allocation16 + $0x128] sm:$0xf0]  ;;  %5648 = vmatpush.bf16.msrb.mxu1 %v10617_v23  ;;  %v10757_v47 = vor.u32 %v12826_v42, %v10756_v38  ;;  %v12716_v23 = vld [vmem:[#allocation16 + $0x10] sm:$0xf0] }
 0x2ab   :  { %v12749_v38 = vld [vmem:[#allocation16 + $0x11c] sm:$0xf]  ;;  %v10458_v42 = vld [vmem:[#allocation16 + $0x12c] sm:$0xf0] }
 0x2ac   :  { %4184 = vmatpush.bf16.msra.mxu3 %v9769_v59  ;;  %v10013_v59 = vor.u32 %v12638_v56, %v10012_v45  ;;  %v10556_v45 = vld [vmem:[#allocation16 + $0x1e0] sm:$0xf]  ;;  %v12776_v56 = vld [vmem:[#allocation16 + $0x1f0] sm:$0xf0] }
 0x2ad   :  { %4230 = vmatpush.bf16.msrb.mxu2 %v10169_v60  ;;  %v9592_v60 = vld [vmem:[#allocation13 + $0x88] sm:$0xf] }
 0x2ae   :  { %4254 = vmatpush.bf16.msra.mxu0 %v9773_v62  ;;  %v9593_v61 = vor.u32 %v12533_v30, %v9592_v60  ;;  %v9572_v62 = vld [vmem:[#allocation13 + $0x60] sm:$0xf]  ;;  %5649 = vmatpush.bf16.msrb.mxu1 %v10597_v13  ;;  %v10192_v30 = vld [vmem:[#allocation13 + $0x538] sm:$0xf] }
 0x2af   :  { %v12821_v60 = vld [vmem:[#allocation16 + $0x358] sm:$0xf0] }
 0x2b0   :  { %4231 = vmatmul.bf16.vlgmr.msrb.gmra.mxu2 %v13831_v46  ;;  %4185 = vmatpush.bf16.msra.mxu3 %v9749_v5  ;;  %v12518_v5 = vld [vmem:[#allocation13 + $0x20] sm:$0xf0] }
 0x2b1   :  { %4279 = vmatpush.bf16.msra.mxu2 %v10153_v63  ;;  %v12528_v63 = vld [vmem:[#allocation13 + $0x70] sm:$0xf0] }
 0x2b2   :  { %4255 = vmatpush.bf16.msra.mxu0 %v9753_v7  ;;  %v9533_v7 = vor.u32 %v12518_v5, %v9532_v4  ;;  %v12771_v4 = vld [vmem:[#allocation16 + $0x1c8] sm:$0xf0]  ;;  %v10716_v5 = vld [vmem:[#allocation16 + $0x320] sm:$0xf] }
 0x2b4   :  { %4186 = vmatpush.bf16.msra.mxu3 %v9729_v12  ;;  %v10457_v12 = vor.u32 %v12751_v9, %v10456_v40  ;;  %v10172_v40 = vld [vmem:[#allocation13 + $0x510] sm:$0xf]  ;;  %v13850_v9 = vpop.f32.mrf.mxu1 }
 0x2b5   :  { %4280 = vmatpush.bf16.msra.mxu2 %v10133_v8  ;;  %v10313_v8 = vor.u32 %v12713_v18, %v10312_v6  ;;  %v12816_v6 = vld [vmem:[#allocation16 + $0x330] sm:$0xf0]  ;;  %v13848_v18 = vpop.f32.mrf.mxu0 }
 0x2b6   :  { %4256 = vmatpush.bf16.msra.mxu0 %v9733_v17  ;;  %v10293_v17 = vor.u32 %v12708_v11, %v10292_v10  ;;  %v12678_v11 = vld [vmem:[#allocation13 + $0x520] sm:$0xf0] }
 0x2b8   :  { %4187 = vmatpush.bf16.msra.mxu3 %v9709_v15  ;;  %v12703_v15 = vld [vmem:[#allocation13 + $0x5e8] sm:$0xf0] }
 0x2b9   :  { %4281 = vmatpush.bf16.msra.mxu2 %v10113_v58 }
 0x2ba   :  { %4257 = vmatpush.bf16.msra.mxu0 %v9713_v24  ;;  %v10273_v24 = vor.u32 %v12703_v15, %v10272_v21  ;;  %v10173_v21 = vor.u32 %v12678_v11, %v10172_v40  ;;  %v10316_v15 = vld [vmem:[#allocation16] sm:$0xf]  ;;  %v12734_v11 = vld [vmem:[#allocation16 + $0xa4] sm:$0xf] }
 0x2bc   :  { %4188 = vmatpush.bf16.msra.mxu3 %v9689_v32  ;;  %v10777_v32 = vor.u32 %v12831_v31, %v10776_v29  ;;  %v12806_v29 = vld [vmem:[#allocation16 + $0x2e0] sm:$0xf0] }
 0x2bd   :  { %4282 = vmatpush.bf16.msra.mxu2 %v10093_v25  ;;  %v10252_v25 = vld [vmem:[#allocation13 + $0x5b0] sm:$0xf]  ;;  %v10677_v13 = vor.u32 %v12806_v29, %v10676_v27  ;;  %v13852_v31 = vpop.f32.mrf.mxu0 }
 0x2be   :  { %4258 = vmatpush.bf16.msra.mxu0 %v9693_v34  ;;  %v12736_v34 = vld [vmem:[#allocation16 + $0xb0] sm:$0xf0]  ;;  %v10253_v36 = vor.u32 %v12698_v26, %v10252_v25  ;;  %v10496_v25 = vld [vmem:[#allocation16 + $0x168] sm:$0xf]  ;;  %v12761_v26 = vld [vmem:[#allocation16 + $0x178] sm:$0xf0] }
 0x2bf   :  { %4189 = vmatmul.bf16.vlgmr.msra.gmra.mxu3 %v13814_v43  ;;  %v10497_v28 = vor.u32 %v12761_v26, %v10496_v25  ;;  %v12774_v25 = vld [vmem:[#allocation16 + $0x1e4] sm:$0xf]  ;;  %v10558_v26 = vld [vmem:[#allocation16 + $0x1f4] sm:$0xf0] }
 0x2c0   :  { %4237 = vmatpush.bf16.msrb.mxu3 %v9673_v33  ;;  %v10396_v33 = vld [vmem:[#allocation16 + $0xa0] sm:$0xf] }
 0x2c1   :  { %4283 = vmatpush.bf16.msra.mxu2 %v10073_v35  ;;  %4259 = vmatmul.bf16.vlgmr.msra.gmra.mxu0 %v13814_v43  ;;  %v9573_v43 = vor.u32 %v12528_v63, %v9572_v62  ;;  %v10576_v35 = vld [vmem:[#allocation16 + $0x208] sm:$0xf] }
 0x2c2   :  { %5634 = vmatpush.bf16.msrb.mxu0 %v10457_v12  ;;  %v10577_v44 = vor.u32 %v12781_v37, %v10576_v35  ;;  %v10336_v12 = vld [vmem:[#allocation16 + $0x28] sm:$0xf]  ;;  %v13854_v35 = vpop.f32.mrf.mxu1  ;;  %v12801_v37 = vld [vmem:[#allocation16 + $0x2b8] sm:$0xf0] }
 0x2c4   :  { %4238 = vmatpush.bf16.msrb.mxu3 %v9653_v39  ;;  %v10232_v39 = vld [vmem:[#allocation13 + $0x588] sm:$0xf]  ;;  %5650 = vmatpush.bf16.msrb.mxu1 %v10577_v44  ;;  %v13857_v44 = vld [vmem:[#allocation14] sm:$0x1f] }
 0x2c5   :  { %4284 = vmatpush.bf16.msra.mxu2 %v10053_v57  ;;  %v12693_v57 = vld [vmem:[#allocation13 + $0x598] sm:$0xf0] }
 0x2c6   :  { %v10233_v50 = vor.u32 %v12693_v57, %v10232_v39  ;;  %v10461_v57 = vor.u32 %v12749_v38, %v10458_v42  ;;  %v12724_v38 = vld [vmem:[#allocation16 + $0x54] sm:$0xf]  ;;  %v10358_v42 = vld [vmem:[#allocation16 + $0x64] sm:$0xf0] }
 0x2c8   :  { %4239 = vmatpush.bf16.msrb.mxu3 %v9633_v52  ;;  %v12688_v52 = vld [vmem:[#allocation13 + $0x570] sm:$0xf0] }
 0x2c9   :  { %4285 = vmatpush.bf16.msra.mxu2 %v10033_v53  ;;  %v10376_v53 = vld [vmem:[#allocation16 + $0x78] sm:$0xf]  ;;  %v10213_v63 = vor.u32 %v12688_v52, %v10212_v48  ;;  %v12796_v48 = vld [vmem:[#allocation16 + $0x290] sm:$0xf0] }
 0x2ca   :  { %v10377_v55 = vor.u32 %v12731_v54, %v10376_v53  ;;  %v12744_v52 = vld [vmem:[#allocation16 + $0xf4] sm:$0xf]  ;;  %v10438_v53 = vld [vmem:[#allocation16 + $0x104] sm:$0xf0]  ;;  %v12789_v54 = vld [vmem:[#allocation16 + $0x25c] sm:$0xf] }
 0x2cc   :  { %4240 = vmatpush.bf16.msrb.mxu3 %v9613_v49  ;;  %v10736_v49 = vld [vmem:[#allocation16 + $0x348] sm:$0xf] }
 0x2cd   :  { %4286 = vmatpush.bf16.msra.mxu2 %v10013_v59  ;;  %v10557_v59 = vor.u32 %v12776_v56, %v10556_v45  ;;  %v10737_v62 = vor.u32 %v12821_v60, %v10736_v49  ;;  %v10441_v45 = vor.u32 %v12744_v52, %v10438_v53  ;;  %v10618_v56 = vld [vmem:[#allocation16 + $0x26c] sm:$0xf0]  ;;  %v10936_v49 = vld [vmem:[#allocation16 + $0x4d8] sm:$0xf] }
 0x2ce   :  { %v10621_v60 = vor.u32 %v12789_v54, %v10618_v56  ;;  %v12719_v56 = vld [vmem:[#allocation16 + $0x2c] sm:$0xf] }
 0x2cf   :  { %5651 = vmatpush.bf16.msrb.mxu1 %v10557_v59  ;;  %v12871_v59 = vld [vmem:[#allocation16 + $0x4e8] sm:$0xf0] }
 0x2d0   :  { %4287 = vmatmul.bf16.vlgmr.msra.gmra.mxu2 %v13825_v41  ;;  %4241 = vmatpush.bf16.msrb.mxu3 %v9593_v61  ;;  %v10436_v41 = vld [vmem:[#allocation16 + $0xf0] sm:$0xf]  ;;  %v12683_v61 = vld [vmem:[#allocation13 + $0x548] sm:$0xf0] }
 0x2d1   :  { %v10437_v58 = vor.u32 %v12746_v14, %v10436_v41  ;;  %5662 = vmatpush.bf16.msrb.mxu2 %v10777_v32  ;;  %v10193_v10 = vor.u32 %v12683_v61, %v10192_v30  ;;  %v12721_v41 = vld [vmem:[#allocation16 + $0x38] sm:$0xf0]  ;;  %v10476_v32 = vld [vmem:[#allocation16 + $0x140] sm:$0xf]  ;;  %v10937_v30 = vor.u32 %v12871_v59, %v10936_v49  ;;  %v13860_v61 = vpop.f32.mrf.mxu0 }
 0x2d2   :  { %v10337_v14 = vor.u32 %v12721_v41, %v10336_v12  ;;  %v10398_v12 = vld [vmem:[#allocation16 + $0xb4] sm:$0xf0]  ;;  %v12779_v41 = vld [vmem:[#allocation16 + $0x20c] sm:$0xf]  ;;  %v10338_v59 = vld [vmem:[#allocation16 + $0x3c] sm:$0xf0] }
 0x2d3   :  { %5635 = vmatpush.bf16.msrb.mxu0 %v10437_v58  ;;  %v10696_v58 = vld [vmem:[#allocation16 + $0x2f8] sm:$0xf] }
 0x2d4   :  { %4242 = vmatpush.bf16.msrb.mxu3 %v9573_v43  ;;  %v10356_v43 = vld [vmem:[#allocation16 + $0x50] sm:$0xf]  ;;  %v10697_v20 = vor.u32 %v12811_v19, %v10696_v58  ;;  %v10896_v58 = vld [vmem:[#allocation16 + $0x488] sm:$0xf] }
 0x2d5   :  { %5663 = vmatpush.bf16.msrb.mxu2 %v10757_v47  ;;  %v10636_v47 = vld [vmem:[#allocation16 + $0x280] sm:$0xf] }
 0x2d7   :  { %5636 = vmatpush.bf16.msrb.mxu0 %v10417_v22  ;;  %v3966_v22 = vpop.f32.mrf.mxu3 }
 0x2d8   :  { %4243 = vmatpush.bf16.msrb.mxu3 %v9553_v3  ;;  %v10357_v3 = vor.u32 %v12726_v1, %v10356_v43  ;;  %v12784_v43 = vld [vmem:[#allocation16 + $0x234] sm:$0xf] }
 0x2d9   :  { %5664 = vmatpush.bf16.msrb.mxu2 %v10737_v62  ;;  %v12739_v62 = vld [vmem:[#allocation16 + $0xcc] sm:$0xf]  ;;  %v13867_v27 = vpop.f32.mrf.mxu0 }
 0x2dc   :  { %4244 = vmatpush.bf16.msrb.mxu3 %v9533_v7  ;;  %v10537_v7 = vor.u32 %v12771_v4, %v10536_v2  ;;  %v10598_v2 = vld [vmem:[#allocation16 + $0x244] sm:$0xf0]  ;;  %v12866_v4 = vld [vmem:[#allocation16 + $0x4c0] sm:$0xf0] }
 0x2de   :  { %5652 = vmatpush.bf16.msrb.mxu1 %v10537_v7 }
 0x2df   :  { %4245 = vmatmul.bf16.vlgmr.msrb.gmra.mxu3 %v13809_v51  ;;  %v10397_v51 = vor.u32 %v12736_v34, %v10396_v33  ;;  %v12756_v33 = vld [vmem:[#allocation16 + $0x150] sm:$0xf0]  ;;  %v10656_v34 = vld [vmem:[#allocation16 + $0x2a8] sm:$0xf] }
 0x2e0   :  { %4293 = vmatpush.bf16.msra.mxu3 %v10313_v8  ;;  %v10717_v8 = vor.u32 %v12816_v6, %v10716_v5  ;;  %v10657_v39 = vor.u32 %v12801_v37, %v10656_v34  ;;  %v13862_v6 = vpop.f32.mrf.mxu1  ;;  %v2908_v34 = vperm.slane %v13857_v44, 1 }
 0x2e1   :  { %5637 = vmatpush.bf16.msrb.mxu0 %v10397_v51  ;;  %v10477_v51 = vor.u32 %v12756_v33, %v10476_v32  ;;  %v10561_v32 = vor.u32 %v12774_v25, %v10558_v26  ;;  %v12856_v33 = vld [vmem:[#allocation16 + $0x470] sm:$0xf0]  ;;  %v12829_v26 = vld [vmem:[#allocation16 + $0x39c] sm:$0xf] }
 0x2e2   :  { %5665 = vmatpush.bf16.msrb.mxu2 %v10717_v8  ;;  %v10601_v8 = vor.u32 %v12784_v43, %v10598_v2  ;;  %v4037_v49 = vadd.f32 %v13860_v61, %v2908_v34  ;;  %v10341_v43 = vor.u32 %v12719_v56, %v10338_v59  ;;  %v10836_v2 = vld [vmem:[#allocation16 + $0x410] sm:$0xf]  ;;  %v10318_v61 = vld [vmem:[#allocation16 + $0x14] sm:$0xf0] }
 0x2e3   :  { %v10718_v59 = vld [vmem:[#allocation16 + $0x334] sm:$0xf0] }
 0x2e4   :  { %4294 = vmatpush.bf16.msra.mxu3 %v10293_v17  ;;  %v12766_v17 = vld [vmem:[#allocation16 + $0x1a0] sm:$0xf0] }
 0x2e5   :  { %5638 = vmatpush.bf16.msrb.mxu0 %v10377_v55  ;;  %v10517_v0 = vor.u32 %v12766_v17, %v10516_v16  ;;  %v3968_v55 = vpop.f32.mrf.mxu3  ;;  %v10401_v16 = vor.u32 %v12734_v11, %v10398_v12  ;;  %v10578_v17 = vld [vmem:[#allocation16 + $0x21c] sm:$0xf0] }
 0x2e6   :  { %5666 = vmatpush.bf16.msrb.mxu2 %v10697_v20  ;;  %v10498_v12 = vld [vmem:[#allocation16 + $0x17c] sm:$0xf0] }
 0x2e7   :  { %5653 = vmatpush.bf16.msrb.mxu1 %v10517_v0  ;;  %v12861_v0 = vld [vmem:[#allocation16 + $0x498] sm:$0xf0] }
 0x2e8   :  { %4295 = vmatpush.bf16.msra.mxu3 %v10273_v24  ;;  %v10317_v24 = vor.u32 %v12716_v23, %v10316_v15  ;;  %v10897_v15 = vor.u32 %v12861_v0, %v10896_v58 }
 0x2e9   :  { %5639 = vmatpush.bf16.msrb.mxu0 %v10357_v3  ;;  %v10916_v3 = vld [vmem:[#allocation16 + $0x4b0] sm:$0xf] }
 0x2ea   :  { %5667 = vmatpush.bf16.msrb.mxu2 %v10677_v13  ;;  %v10917_v40 = vor.u32 %v12866_v4, %v10916_v3  ;;  %v12846_v3 = vld [vmem:[#allocation16 + $0x420] sm:$0xf0] }
 0x2eb   :  { %5654 = vmatpush.bf16.msrb.mxu1 %v10497_v28 }
 0x2ec   :  { %4296 = vmatpush.bf16.msra.mxu3 %v10253_v36  ;;  %v4008_v36 = vpop.f32.mrf.mxu2 }
 0x2ed   :  { %5640 = vmatpush.bf16.msrb.mxu0 %v10337_v14 }
 0x2ee   :  { %5668 = vmatpush.bf16.msrb.mxu2 %v10657_v39  ;;  %v12769_v39 = vld [vmem:[#allocation16 + $0x1bc] sm:$0xf] }
 0x2ef   :  { %5655 = vmatpush.bf16.msrb.mxu1 %v10477_v51 }
 0x2f0   :  { %4297 = vmatpush.bf16.msra.mxu3 %v10233_v50  ;;  %v10637_v50 = vor.u32 %v12796_v48, %v10636_v47  ;;  %v10538_v47 = vld [vmem:[#allocation16 + $0x1cc] sm:$0xf0]  ;;  %v10856_v48 = vld [vmem:[#allocation16 + $0x438] sm:$0xf] }
 0x2f1   :  { %5641 = vmatpush.bf16.msrb.mxu0 %v10317_v24  ;;  %v10378_v24 = vld [vmem:[#allocation16 + $0x8c] sm:$0xf0]  ;;  %v10541_v54 = vor.u32 %v12769_v39, %v10538_v47 }
 0x2f2   :  { %5669 = vmatpush.bf16.msrb.mxu2 %v10637_v50  ;;  %v12851_v50 = vld [vmem:[#allocation16 + $0x448] sm:$0xf0] }
 0x2f3   :  { %5704 = vmatpush.bf16.msra.mxu1 %v10461_v57 }
 0x2f4   :  { %4298 = vmatpush.bf16.msra.mxu3 %v10213_v63  ;;  %v10418_v63 = vld [vmem:[#allocation16 + $0xdc] sm:$0xf0]  ;;  %v4010_v7 = vpop.f32.mrf.mxu2 }
 0x2f5   :  { %v10421_v1 = vor.u32 %v12739_v62, %v10418_v63 }
 0x2f6   :  { %5718 = vmatpush.bf16.msra.mxu2 %v10621_v60  ;;  %v10518_v60 = vld [vmem:[#allocation16 + $0x1a4] sm:$0xf0] }
 0x2f7   :  { %5705 = vmatpush.bf16.msra.mxu1 %v10441_v45 }
 0x2f8   :  { %4299 = vmatpush.bf16.msra.mxu3 %v10193_v10 }
 0x2fa   :  { %5719 = vmatpush.bf16.msra.mxu2 %v10601_v8  ;;  %v12714_v8 = vld [vmem:[#allocation16 + $0x4] sm:$0xf] }
 0x2fb   :  { %5706 = vmatpush.bf16.msra.mxu1 %v10421_v1  ;;  %v10321_v11 = vor.u32 %v12714_v8, %v10318_v61  ;;  %v12804_v8 = vld [vmem:[#allocation16 + $0x2d4] sm:$0xf]  ;;  %v10678_v61 = vld [vmem:[#allocation16 + $0x2e4] sm:$0xf0] }
 0x2fc   :  { %4300 = vmatpush.bf16.msra.mxu3 %v10173_v21  ;;  %v10581_v21 = vor.u32 %v12779_v41, %v10578_v17  ;;  %v4064_v37 = vpop.f32.mrf.mxu2  ;;  %v10816_v41 = vld [vmem:[#allocation16 + $0x3e8] sm:$0xf] }
 0x2fe   :  { %5720 = vmatpush.bf16.msra.mxu2 %v10581_v21  ;;  %v12754_v21 = vld [vmem:[#allocation16 + $0x144] sm:$0xf] }
 0x2ff   :  { %4301 = vmatmul.bf16.vlgmr.msra.gmra.mxu3 %v13831_v46  ;;  %v2907_v46 = vperm.slane %v13857_v44, 0  ;;  %5707 = vmatpush.bf16.msra.mxu1 %v10401_v16 }
 0x300   :  { %5676 = vmatpush.bf16.msrb.mxu3 %v10937_v30  ;;  %v4092_v30 = vpop.f32.mrf.mxu0 }
 0x301   :  { %v3967_v5 = vadd.f32 %v3966_v22, %v2907_v46  ;;  %v3969_v19 = vadd.f32 %v3968_v55, %v2907_v46  ;;  %v10857_v55 = vor.u32 %v12851_v50, %v10856_v48  ;;  %v12764_v46 = vld [vmem:[#allocation16 + $0x194] sm:$0xf]  ;;  %v10738_v48 = vld [vmem:[#allocation16 + $0x35c] sm:$0xf0] }
 0x302   :  { %v4022_v14 = vpop.f32.mrf.mxu3  ;;  %5721 = vmatpush.bf16.msra.mxu2 %v10561_v32  ;;  %v10521_v1 = vor.u32 %v12764_v46, %v10518_v60 }
 0x303   :  { %v3981_v10 = vadd.f32 %v13848_v18, %v3967_v5  ;;  %v3983_v23 = vadd.f32 %v13852_v31, %v3969_v19  ;;  %v12729_v18 = vld [vmem:[#allocation16 + $0x7c] sm:$0xf]  ;;  %v13871_v31 = vpop.f32.mrf.mxu1  ;;  %v10837_v5 = vor.u32 %v12846_v3, %v10836_v2 }
 0x304   :  { %5677 = vmatpush.bf16.msrb.mxu3 %v10917_v40  ;;  %v10381_v13 = vor.u32 %v12729_v18, %v10378_v24  ;;  %v12759_v40 = vld [vmem:[#allocation16 + $0x16c] sm:$0xf]  ;;  %v4066_v58 = vpop.f32.mrf.mxu2  ;;  %v12836_v18 = vld [vmem:[#allocation16 + $0x3d0] sm:$0xf0] }
 0x305   :  { %v3995_v20 = vadd.f32 %v13850_v9, %v3981_v10  ;;  %v3997_v28 = vadd.f32 %v13854_v35, %v3983_v23  ;;  %v10876_v9 = vld [vmem:[#allocation16 + $0x460] sm:$0xf]  ;;  %v10361_v35 = vor.u32 %v12724_v38, %v10358_v42  ;;  %v10501_v0 = vor.u32 %v12759_v40, %v10498_v12 }
 0x306   :  { %v10877_v51 = vor.u32 %v12856_v33, %v10876_v9  ;;  %5708 = vmatpush.bf16.msra.mxu1 %v10381_v13  ;;  %5722 = vmatpush.bf16.msra.mxu2 %v10541_v54 }
 0x307   :  { %v4009_v22 = vadd.f32 %v4008_v36, %v3995_v20  ;;  %v4011_v36 = vadd.f32 %v4010_v7, %v3997_v28  ;;  %v4051_v7 = vadd.f32 %v13862_v6, %v4037_v49  ;;  %v4039_v6 = vadd.f32 %v13867_v27, %v2908_v34  ;;  %v10778_v28 = vld [vmem:[#allocation16 + $0x3ac] sm:$0xf0]  ;;  %v12824_v34 = vld [vmem:[#allocation16 + $0x374] sm:$0xf]  ;;  %v12814_v49 = vld [vmem:[#allocation16 + $0x324] sm:$0xf] }
 0x308   :  { %5678 = vmatpush.bf16.msrb.mxu3 %v10897_v15  ;;  %v10478_v15 = vld [vmem:[#allocation16 + $0x154] sm:$0xf0]  ;;  %v4094_v13 = vpop.f32.mrf.mxu0  ;;  %v10781_v9 = vor.u32 %v12829_v26, %v10778_v28  ;;  %v10721_v60 = vor.u32 %v12814_v49, %v10718_v59  ;;  %v11076_v28 = vld [vmem:[#allocation16 + $0x5f0] sm:$0xf]  ;;  %v11036_v49 = vld [vmem:[#allocation16 + $0x5a0] sm:$0xf] }
 0x309   :  { %v4023_v29 = vadd.f32 %v4022_v14, %v4009_v22  ;;  %v12841_v14 = vld [vmem:[#allocation16 + $0x3f8] sm:$0xf0]  ;;  %v4065_v17 = vadd.f32 %v4064_v37, %v4051_v7  ;;  %v10481_v23 = vor.u32 %v12754_v21, %v10478_v15  ;;  %v10796_v22 = vld [vmem:[#allocation16 + $0x3c0] sm:$0xf]  ;;  %v4053_v24 = vadd.f32 %v13871_v31, %v4039_v6  ;;  %v12896_v59 = vld [vmem:[#allocation16 + $0x5b0] sm:$0xf0] }
 0x30a   :  { %v4024_v57 = vpop.f32.mrf.mxu3  ;;  %5709 = vmatpush.bf16.msra.mxu1 %v10361_v35  ;;  %5723 = vmatpush.bf16.msra.mxu2 %v10521_v1  ;;  %v10817_v19 = vor.u32 %v12841_v14, %v10816_v41  ;;  %v10797_v25 = vor.u32 %v12836_v18, %v10796_v22  ;;  %v12819_v35 = vld [vmem:[#allocation16 + $0x34c] sm:$0xf]  ;;  %v11096_v14 = vld [vmem:[#allocation16 + $0x618] sm:$0xf]  ;;  %v10658_v18 = vld [vmem:[#allocation16 + $0x2bc] sm:$0xf0] }
 0x30b   :  { %v4317_v52 = vmul.f32 0.2, %v4023_v29  ;;  %v4025_v53 = vadd.f32 %v4024_v57, %v4011_v36  ;;  %vm4307_vm8 = vcmp.ge.f32.partialorder %v4023_v29, 0.0  ;;  %v4106_v16 = vpop.f32.mrf.mxu1  ;;  %v2909_v36 = vperm.slane %v13857_v44, 2  ;;  %v12799_v22 = vld [vmem:[#allocation16 + $0x2ac] sm:$0xf] }
 0x30c   :  { %5679 = vmatpush.bf16.msrb.mxu3 %v10877_v51  ;;  %v10758_v51 = vld [vmem:[#allocation16 + $0x384] sm:$0xf0]  ;;  %v4120_v42 = vpop.f32.mrf.mxu2 }
 0x30d   :  { %vm4312_vm9 = vcmp.ge.f32.partialorder %v4025_v53, 0.0  ;;  %v4322_v45 = vmul.f32 0.2, %v4025_v53  ;;  %v4327_v62 = vsel %vm4307_vm8, %v4023_v29, %v4317_v52  ;;  %v4067_v29 = vadd.f32 %v4066_v58, %v4053_v24 }
 0x30e   :  { %5710 = vmatpush.bf16.msra.mxu1 %v10341_v43  ;;  %5724 = vmatpush.bf16.msra.mxu2 %v10501_v0  ;;  %v10761_v37 = vor.u32 %v12824_v34, %v10758_v51  ;;  %v4107_v47 = vadd.f32 %v4106_v16, %v2909_v36  ;;  %v10698_v43 = vld [vmem:[#allocation16 + $0x30c] sm:$0xf0]  ;;  %v12911_v16 = vld [vmem:[#allocation16 + $0x628] sm:$0xf0]  ;;  %v10464_v0 = vld [vmem:[#allocation16 + $0x120] sm:$0xf] }
 0x30f   :  { %v4332_v63 = vsel %vm4312_vm9, %v4025_v53, %v4322_v45  ;;  %v10741_v53 = vor.u32 %v12819_v35, %v10738_v48  ;;  %v11097_v6 = vor.u32 %v12911_v16, %v11096_v14  ;;  %v12901_v35 = vld [vmem:[#allocation16 + $0x5d8] sm:$0xf0]  ;;  %v11058_v48 = vld [vmem:[#allocation16 + $0x5dc] sm:$0xf0] }
 0x310   :  { %5680 = vmatpush.bf16.msrb.mxu3 %v10857_v55  ;;  %v13874_v4 = vpack.c.bf16 %v4332_v63, %v4327_v62  ;;  %v4121_v54 = vadd.f32 %v4120_v42, %v4107_v47  ;;  %v4148_v45 = vpop.f32.mrf.mxu0  ;;  %v12809_v63 = vld [vmem:[#allocation16 + $0x2fc] sm:$0xf]  ;;  %v12747_v42 = vld [vmem:[#allocation16 + $0x108] sm:$0xf0] }
 0x311   :  { %v10701_v3 = vor.u32 %v12809_v63, %v10698_v43  ;;  %5690 = vmatpush.bf16.msra.mxu0 %v11097_v6  ;;  %v12899_v47 = vld [vmem:[#allocation16 + $0x5cc] sm:$0xf]  ;;  %v12886_v6 = vld [vmem:[#allocation16 + $0x560] sm:$0xf0] }
 0x312   :  { %v4078_v10 = vpop.f32.mrf.mxu3  ;;  %5642 = vmatmul.bf16.vlgmr.msrb.gmra.mxu0 %v13874_v4  ;;  %5711 = vmatpush.bf16.msra.mxu1 %v10321_v11  ;;  %v10681_v11 = vor.u32 %v12804_v8, %v10678_v61  ;;  %v12889_v8 = vld [vmem:[#allocation16 + $0x57c] sm:$0xf] }
 0x313   :  { %v4079_v20 = vadd.f32 %v4078_v10, %v4065_v17  ;;  %5725 = vmatpush.bf16.msra.mxu2 %v10481_v23  ;;  %v4108_v38 = vpop.f32.mrf.mxu1  ;;  %v12909_v17 = vld [vmem:[#allocation16 + $0x61c] sm:$0xf] }
 0x314   :  { %5681 = vmatpush.bf16.msrb.mxu3 %v10837_v5  ;;  %v4122_v62 = vpop.f32.mrf.mxu2  ;;  %v4109_v1 = vadd.f32 %v4108_v38, %v2909_v36  ;;  %v12794_v36 = vld [vmem:[#allocation16 + $0x284] sm:$0xf]  ;;  %v10444_v38 = vld [vmem:[#allocation16 + $0xf8] sm:$0xf] }
 0x315   :  { %v4093_v32 = vadd.f32 %v4092_v30, %v4079_v20  ;;  %v11098_v20 = vld [vmem:[#allocation16 + $0x62c] sm:$0xf0] }
 0x316   :  { %v4123_v5 = vadd.f32 %v4122_v62, %v4109_v1  ;;  %v11101_v23 = vor.u32 %v12909_v17, %v11098_v20  ;;  %v11038_v62 = vld [vmem:[#allocation16 + $0x5b4] sm:$0xf0]  ;;  %v10404_v1 = vld [vmem:[#allocation16 + $0xa8] sm:$0xf]  ;;  %v10384_v17 = vld [vmem:[#allocation16 + $0x80] sm:$0xf] }
 0x317   :  { %v4318_v31 = vmul.f32 0.2, %v4093_v32  ;;  %vm4308_vm10 = vcmp.ge.f32.partialorder %v4093_v32, 0.0  ;;  %v12884_v20 = vld [vmem:[#allocation16 + $0x554] sm:$0xf] }
 0x318   :  { %5682 = vmatpush.bf16.msrb.mxu3 %v10817_v19  ;;  %v4150_v12 = vpop.f32.mrf.mxu0  ;;  %v12752_v19 = vld [vmem:[#allocation16 + $0x130] sm:$0xf0] }
 0x319   :  { %v4328_v50 = vsel %vm4308_vm10, %v4093_v32, %v4318_v31  ;;  %v12904_v32 = vld [vmem:[#allocation16 + $0x5f4] sm:$0xf]  ;;  %v10638_v31 = vld [vmem:[#allocation16 + $0x294] sm:$0xf0] }
 0x31a   :  { %v4080_v27 = vpop.f32.mrf.mxu3 }
 0x31b   :  { %v4081_v33 = vadd.f32 %v4080_v27, %v4067_v29  ;;  %v4162_v30 = vpop.f32.mrf.mxu1  ;;  %v10465_v29 = vor.u32 %v12752_v19, %v10464_v0  ;;  %v10996_v19 = vld [vmem:[#allocation16 + $0x550] sm:$0xf] }
 0x31c   :  { %5683 = vmatpush.bf16.msrb.mxu3 %v10797_v25  ;;  %v4176_v24 = vpop.f32.mrf.mxu2  ;;  %v10661_v25 = vor.u32 %v12799_v22, %v10658_v18 }
 0x31d   :  { %v4095_v39 = vadd.f32 %v4094_v13, %v4081_v33  ;;  %v12906_v13 = vld [vmem:[#allocation16 + $0x600] sm:$0xf0] }
 0x31e   :  { %v11077_v34 = vor.u32 %v12906_v13, %v11076_v28  ;;  %v12881_v13 = vld [vmem:[#allocation16 + $0x538] sm:$0xf0] }
 0x31f   :  { %vm4313_vm11 = vcmp.ge.f32.partialorder %v4095_v39, 0.0  ;;  %v4323_v57 = vmul.f32 0.2, %v4095_v39 }
 0x320   :  { %5732 = vmatpush.bf16.msra.mxu3 %v10781_v9  ;;  %v11078_v9 = vld [vmem:[#allocation16 + $0x604] sm:$0xf0]  ;;  %5691 = vmatpush.bf16.msra.mxu0 %v11077_v34  ;;  %v4204_v61 = vpop.f32.mrf.mxu0 }
 0x321   :  { %v4333_v52 = vsel %vm4313_vm11, %v4095_v39, %v4323_v57  ;;  %v11081_v51 = vor.u32 %v12904_v32, %v11078_v9  ;;  %v10641_v39 = vor.u32 %v12794_v36, %v10638_v31  ;;  %v11056_v57 = vld [vmem:[#allocation16 + $0x5c8] sm:$0xf]  ;;  %v12879_v32 = vld [vmem:[#allocation16 + $0x52c] sm:$0xf]  ;;  %v10344_v31 = vld [vmem:[#allocation16 + $0x30] sm:$0xf] }
 0x322   :  { %v13881_v55 = vpack.c.bf16 %v4333_v52, %v4328_v50  ;;  %v4134_v56 = vpop.f32.mrf.mxu3  ;;  %v10445_v50 = vor.u32 %v12747_v42, %v10444_v38  ;;  %v11057_v52 = vor.u32 %v12901_v35, %v11056_v57  ;;  %v10956_v35 = vld [vmem:[#allocation16 + $0x500] sm:$0xf] }
 0x323   :  { %v4135_v46 = vadd.f32 %v4134_v56, %v4121_v54  ;;  %v4164_v58 = vpop.f32.mrf.mxu1  ;;  %v2910_v54 = vperm.slane %v13857_v44, 3  ;;  %v12742_v56 = vld [vmem:[#allocation16 + $0xe0] sm:$0xf0] }
 0x324   :  { %5733 = vmatpush.bf16.msra.mxu3 %v10761_v37  ;;  %5656 = vmatmul.bf16.vlgmr.msrb.gmra.mxu1 %v13881_v55 }
 0x325   :  { %v4149_v2 = vadd.f32 %v4148_v45, %v4135_v46  ;;  %5760 = vmatpush.bf16.msrb.mxu1 %v11101_v23  ;;  %v10424_v45 = vld [vmem:[#allocation16 + $0xd0] sm:$0xf]  ;;  %5692 = vmatpush.bf16.msra.mxu0 %v11057_v52  ;;  %v12894_v46 = vld [vmem:[#allocation16 + $0x5a4] sm:$0xf]  ;;  %v10998_v23 = vld [vmem:[#allocation16 + $0x564] sm:$0xf0] }
 0x326   :  { %v10425_v63 = vor.u32 %v12742_v56, %v10424_v45  ;;  %v11041_v43 = vor.u32 %v12894_v46, %v11038_v62  ;;  %v11001_v18 = vor.u32 %v12884_v20, %v10998_v23  ;;  %v10324_v52 = vld [vmem:[#allocation16 + $0x8] sm:$0xf]  ;;  %v10958_v45 = vld [vmem:[#allocation16 + $0x514] sm:$0xf0]  ;;  %v12869_v56 = vld [vmem:[#allocation16 + $0x4dc] sm:$0xf] }
 0x327   :  { %v4163_v40 = vadd.f32 %v4162_v30, %v4149_v2  ;;  %v11037_v30 = vor.u32 %v12896_v59, %v11036_v49  ;;  %v12737_v2 = vld [vmem:[#allocation16 + $0xb8] sm:$0xf0]  ;;  %v10938_v49 = vld [vmem:[#allocation16 + $0x4ec] sm:$0xf0]  ;;  %v12787_v23 = vld [vmem:[#allocation16 + $0x248] sm:$0xf0] }
 0x328   :  { %5734 = vmatpush.bf16.msra.mxu3 %v10741_v53  ;;  %v11061_v53 = vor.u32 %v12899_v47, %v11058_v48  ;;  %v4206_v38 = vpop.f32.mrf.mxu0  ;;  %v12876_v47 = vld [vmem:[#allocation16 + $0x510] sm:$0xf0]  ;;  %v12874_v48 = vld [vmem:[#allocation16 + $0x504] sm:$0xf]  ;;  %v10941_v62 = vor.u32 %v12869_v56, %v10938_v49 }
 0x329   :  { %v4319_v21 = vmul.f32 0.2, %v4163_v40  ;;  %vm4309_vm12 = vcmp.ge.f32.partialorder %v4163_v40, 0.0  ;;  %5761 = vmatpush.bf16.msrb.mxu1 %v11081_v51  ;;  %5693 = vmatpush.bf16.msra.mxu0 %v11037_v30  ;;  %v10961_v30 = vor.u32 %v12874_v48, %v10958_v45  ;;  %v12897_v48 = vld [vmem:[#allocation16 + $0x5b8] sm:$0xf0] }
 0x32a   :  { %v4136_v7 = vpop.f32.mrf.mxu3  ;;  %v10864_v45 = vld [vmem:[#allocation16 + $0x440] sm:$0xf]  ;;  %v12852_v49 = vld [vmem:[#allocation16 + $0x450] sm:$0xf0] }
 0x32b   :  { %v4137_v10 = vadd.f32 %v4136_v7, %v4123_v5  ;;  %v4329_v27 = vsel %vm4309_vm12, %v4163_v40, %v4319_v21  ;;  %v11016_v5 = vld [vmem:[#allocation16 + $0x578] sm:$0xf]  ;;  %v12891_v7 = vld [vmem:[#allocation16 + $0x588] sm:$0xf0]  ;;  %v4218_v16 = vpop.f32.mrf.mxu1 }
 0x32c   :  { %5735 = vmatpush.bf16.msra.mxu3 %v10721_v60  ;;  %v4178_v60 = vpop.f32.mrf.mxu2 }
 0x32d   :  { %v4151_v41 = vadd.f32 %v4150_v12, %v4137_v10  ;;  %5762 = vmatpush.bf16.msrb.mxu1 %v11061_v53  ;;  %v11017_v10 = vor.u32 %v12891_v7, %v11016_v5  ;;  %v4179_v28 = vadd.f32 %v4178_v60, %v2910_v54  ;;  %v12717_v53 = vld [vmem:[#allocation16 + $0x18] sm:$0xf0]  ;;  %v11104_v60 = vld [vmem:[#allocation16 + $0x620] sm:$0xf] }
 0x32e   :  { %v10624_v5 = vld [vmem:[#allocation16 + $0x260] sm:$0xf] }
 0x32f   :  { %v4165_v15 = vadd.f32 %v4164_v58, %v4151_v41  ;;  %v10405_v41 = vor.u32 %v12737_v2, %v10404_v1  ;;  %v12732_v58 = vld [vmem:[#allocation16 + $0x90] sm:$0xf0]  ;;  %5694 = vmatpush.bf16.msra.mxu0 %v11017_v10  ;;  %v10924_v10 = vld [vmem:[#allocation16 + $0x4b8] sm:$0xf] }
 0x330   :  { %5736 = vmatpush.bf16.msra.mxu3 %v10701_v3  ;;  %v4177_v3 = vadd.f32 %v4176_v24, %v2910_v54  ;;  %v10385_v22 = vor.u32 %v12732_v58, %v10384_v17  ;;  %v10957_v54 = vor.u32 %v12876_v47, %v10956_v35 }
 0x331   :  { %vm4314_vm13 = vcmp.ge.f32.partialorder %v4165_v15, 0.0  ;;  %v4324_v26 = vmul.f32 0.2, %v4165_v15  ;;  %5763 = vmatpush.bf16.msrb.mxu1 %v11041_v43  ;;  %v12872_v43 = vld [vmem:[#allocation16 + $0x4f0] sm:$0xf0] }
 0x333   :  { %v4334_v33 = vsel %vm4314_vm13, %v4165_v15, %v4324_v26  ;;  %v10997_v15 = vor.u32 %v12886_v6, %v10996_v19  ;;  %v12727_v26 = vld [vmem:[#allocation16 + $0x68] sm:$0xf0] }
 0x334   :  { %5737 = vmatpush.bf16.msra.mxu3 %v10681_v11  ;;  %5712 = vmatmul.bf16.vlgmr.msra.gmra.mxu1 %v13874_v4  ;;  %v13885_v37 = vpack.c.bf16 %v4334_v33, %v4329_v27  ;;  %v11018_v11 = vld [vmem:[#allocation16 + $0x58c] sm:$0xf0]  ;;  %v4232_v21 = vpop.f32.mrf.mxu2  ;;  %v10978_v33 = vld [vmem:[#allocation16 + $0x53c] sm:$0xf0] }
 0x335   :  { %v11021_v14 = vor.u32 %v12889_v8, %v11018_v11  ;;  %5695 = vmatpush.bf16.msra.mxu0 %v10997_v15  ;;  %v10981_v36 = vor.u32 %v12879_v32, %v10978_v33  ;;  %v12792_v11 = vld [vmem:[#allocation16 + $0x270] sm:$0xf0]  ;;  %v10604_v15 = vld [vmem:[#allocation16 + $0x238] sm:$0xf]  ;;  %v10584_v33 = vld [vmem:[#allocation16 + $0x210] sm:$0xf] }
 0x336   :  { %5670 = vmatmul.bf16.vlgmr.msrb.gmra.mxu2 %v13885_v37  ;;  %v10625_v20 = vor.u32 %v12792_v11, %v10624_v5  ;;  %v12887_v11 = vld [vmem:[#allocation16 + $0x568] sm:$0xf0] }
 0x337   :  { %5774 = vmatpush.bf16.msrb.mxu2 %v10465_v29  ;;  %5764 = vmatpush.bf16.msrb.mxu1 %v11021_v14  ;;  %v10976_v29 = vld [vmem:[#allocation16 + $0x528] sm:$0xf] }
 0x338   :  { %5738 = vmatpush.bf16.msra.mxu3 %v10661_v25  ;;  %v10364_v25 = vld [vmem:[#allocation16 + $0x58] sm:$0xf]  ;;  %v10977_v27 = vor.u32 %v12881_v13, %v10976_v29  ;;  %v11064_v13 = vld [vmem:[#allocation16 + $0x5d0] sm:$0xf] }
 0x339   :  { %v10365_v51 = vor.u32 %v12727_v26, %v10364_v25  ;;  %v10904_v25 = vld [vmem:[#allocation16 + $0x490] sm:$0xf] }
 0x33a   :  { %5696 = vmatpush.bf16.msra.mxu0 %v10977_v27  ;;  %v12902_v27 = vld [vmem:[#allocation16 + $0x5e0] sm:$0xf0] }
 0x33b   :  { %5775 = vmatpush.bf16.msrb.mxu2 %v10445_v50  ;;  %5765 = vmatpush.bf16.msrb.mxu1 %v11001_v18  ;;  %v4220_v50 = vpop.f32.mrf.mxu1  ;;  %v12859_v18 = vld [vmem:[#allocation16 + $0x48c] sm:$0xf] }
 0x33c   :  { %5739 = vmatpush.bf16.msra.mxu3 %v10641_v39  ;;  %v12722_v39 = vld [vmem:[#allocation16 + $0x40] sm:$0xf0]  ;;  %v4234_v1 = vpop.f32.mrf.mxu2 }
 0x33d   :  { %v10345_v46 = vor.u32 %v12722_v39, %v10344_v31  ;;  %v12857_v31 = vld [vmem:[#allocation16 + $0x478] sm:$0xf0]  ;;  %v11065_v39 = vor.u32 %v12902_v27, %v11064_v13 }
 0x33e   :  { %5697 = vmatpush.bf16.msra.mxu0 %v10957_v54  ;;  %v10858_v54 = vld [vmem:[#allocation16 + $0x44c] sm:$0xf0]  ;;  %v12837_v13 = vld [vmem:[#allocation16 + $0x3d8] sm:$0xf0] }
 0x33f   :  { %5776 = vmatpush.bf16.msrb.mxu2 %v10425_v63  ;;  %5766 = vmatpush.bf16.msrb.mxu1 %v10981_v36  ;;  %v10944_v63 = vld [vmem:[#allocation16 + $0x4e0] sm:$0xf]  ;;  %v10878_v36 = vld [vmem:[#allocation16 + $0x474] sm:$0xf0] }
 0x340   :  { %v10945_v7 = vor.u32 %v12872_v43, %v10944_v63  ;;  %v10544_v63 = vld [vmem:[#allocation16 + $0x1c0] sm:$0xf]  ;;  %v12772_v43 = vld [vmem:[#allocation16 + $0x1d0] sm:$0xf0] }
 0x342   :  { %v4190_v40 = vpop.f32.mrf.mxu3  ;;  %5746 = vmatpush.bf16.msrb.mxu0 %v10941_v62  ;;  %v12892_v62 = vld [vmem:[#allocation16 + $0x590] sm:$0xf0] }
 0x343   :  { %v4191_v12 = vadd.f32 %v4190_v40, %v4177_v3  ;;  %5777 = vmatpush.bf16.msrb.mxu2 %v10405_v41  ;;  %v12912_v3 = vld [vmem:[#allocation16 + $0x630] sm:$0xf0]  ;;  %5767 = vmatpush.bf16.msrb.mxu1 %v10961_v30  ;;  %v10918_v40 = vld [vmem:[#allocation16 + $0x4c4] sm:$0xf0]  ;;  %v12867_v41 = vld [vmem:[#allocation16 + $0x4c8] sm:$0xf0] }
 0x344   :  { %v10925_v17 = vor.u32 %v12867_v41, %v10924_v10  ;;  %v11105_v58 = vor.u32 %v12912_v3, %v11104_v60  ;;  %v10865_v60 = vor.u32 %v12852_v49, %v10864_v45  ;;  %v10844_v3 = vld [vmem:[#allocation16 + $0x418] sm:$0xf]  ;;  %v10545_v10 = vor.u32 %v12772_v43, %v10544_v63  ;;  %v12767_v41 = vld [vmem:[#allocation16 + $0x1a8] sm:$0xf0]  ;;  %v10446_v49 = vld [vmem:[#allocation16 + $0x10c] sm:$0xf0] }
 0x345   :  { %v4205_v0 = vadd.f32 %v4204_v61, %v4191_v12  ;;  %v12864_v61 = vld [vmem:[#allocation16 + $0x4b4] sm:$0xf] }
 0x346   :  { %5726 = vmatmul.bf16.vlgmr.msra.gmra.mxu2 %v13881_v55  ;;  %v10921_v12 = vor.u32 %v12864_v61, %v10918_v40  ;;  %v11004_v61 = vld [vmem:[#allocation16 + $0x558] sm:$0xf] }
 0x347   :  { %v4219_v24 = vadd.f32 %v4218_v16, %v4205_v0  ;;  %5778 = vmatpush.bf16.msrb.mxu2 %v10385_v22  ;;  %5816 = vmatpush.bf16.msra.mxu1 %v10945_v7  ;;  %v10325_v16 = vor.u32 %v12717_v53, %v10324_v52  ;;  %v11084_v0 = vld [vmem:[#allocation16 + $0x5f8] sm:$0xf]  ;;  %v12777_v52 = vld [vmem:[#allocation16 + $0x1f8] sm:$0xf0]  ;;  %v12847_v7 = vld [vmem:[#allocation16 + $0x428] sm:$0xf0] }
 0x348   :  { %5747 = vmatpush.bf16.msrb.mxu0 %v10921_v12  ;;  %v12849_v53 = vld [vmem:[#allocation16 + $0x43c] sm:$0xf]  ;;  %v10845_v40 = vor.u32 %v12847_v7, %v10844_v3  ;;  %v10524_v12 = vld [vmem:[#allocation16 + $0x198] sm:$0xf] }
 0x349   :  { %v4233_v42 = vadd.f32 %v4232_v21, %v4219_v24  ;;  %v12907_v21 = vld [vmem:[#allocation16 + $0x608] sm:$0xf0]  ;;  %v10898_v24 = vld [vmem:[#allocation16 + $0x49c] sm:$0xf0]  ;;  %v10861_v56 = vor.u32 %v12849_v53, %v10858_v54  ;;  %v12865_v53 = vld [vmem:[#allocation16 + $0x4bc] sm:$0xf] }
 0x34a   :  { %v4192_v9 = vpop.f32.mrf.mxu3  ;;  %v10901_v26 = vor.u32 %v12859_v18, %v10898_v24  ;;  %v11085_v29 = vor.u32 %v12907_v21, %v11084_v0  ;;  %v12842_v0 = vld [vmem:[#allocation16 + $0x400] sm:$0xf0]  ;;  %v10525_v21 = vor.u32 %v12767_v41, %v10524_v12  ;;  %v10926_v54 = vld [vmem:[#allocation16 + $0x4cc] sm:$0xf0]  ;;  %v12735_v12 = vld [vmem:[#allocation16 + $0xac] sm:$0xf] }
 0x34b   :  { %v4193_v34 = vadd.f32 %v4192_v9, %v4179_v28  ;;  %5779 = vmatpush.bf16.msrb.mxu2 %v10365_v51  ;;  %v4320_v2 = vmul.f32 0.2, %v4233_v42  ;;  %vm4310_vm14 = vcmp.ge.f32.partialorder %v4233_v42, 0.0  ;;  %5817 = vmatpush.bf16.msra.mxu1 %v10925_v17  ;;  %v12862_v28 = vld [vmem:[#allocation16 + $0x4a0] sm:$0xf0]  ;;  %v10605_v9 = vor.u32 %v12787_v23, %v10604_v15 }
 0x34c   :  { %v10905_v32 = vor.u32 %v12862_v28, %v10904_v25  ;;  %5748 = vmatpush.bf16.msrb.mxu0 %v10901_v26  ;;  %v12854_v51 = vld [vmem:[#allocation16 + $0x464] sm:$0xf]  ;;  %v10824_v17 = vld [vmem:[#allocation16 + $0x3f0] sm:$0xf]  ;;  %v10798_v26 = vld [vmem:[#allocation16 + $0x3d4] sm:$0xf0] }
 0x34d   :  { %v4207_v57 = vadd.f32 %v4206_v38, %v4193_v34  ;;  %v4330_v19 = vsel %vm4310_vm14, %v4233_v42, %v4320_v2  ;;  %v12782_v34 = vld [vmem:[#allocation16 + $0x220] sm:$0xf0]  ;;  %v10884_v38 = vld [vmem:[#allocation16 + $0x468] sm:$0xf]  ;;  %v10881_v42 = vor.u32 %v12854_v51, %v10878_v36  ;;  %v10504_v23 = vld [vmem:[#allocation16 + $0x170] sm:$0xf] }
 0x34e   :  { %v10885_v35 = vor.u32 %v12857_v31, %v10884_v38  ;;  %v10585_v47 = vor.u32 %v12782_v34, %v10584_v33  ;;  %v10838_v2 = vld [vmem:[#allocation16 + $0x424] sm:$0xf0]  ;;  %v12882_v15 = vld [vmem:[#allocation16 + $0x540] sm:$0xf0]  ;;  %v12877_v34 = vld [vmem:[#allocation16 + $0x518] sm:$0xf0] }
 0x34f   :  { %v4221_v59 = vadd.f32 %v4220_v50, %v4207_v57  ;;  %5780 = vmatpush.bf16.msrb.mxu2 %v10345_v46  ;;  %5818 = vmatpush.bf16.msra.mxu1 %v10905_v32  ;;  %v11044_v57 = vld [vmem:[#allocation16 + $0x5a8] sm:$0xf]  ;;  %v11024_v46 = vld [vmem:[#allocation16 + $0x580] sm:$0xf]  ;;  %v12762_v18 = vld [vmem:[#allocation16 + $0x180] sm:$0xf0] }
 0x350   :  { %v10564_v50 = vld [vmem:[#allocation16 + $0x1e8] sm:$0xf]  ;;  %5749 = vmatpush.bf16.msrb.mxu0 %v10881_v42  ;;  %v12834_v25 = vld [vmem:[#allocation16 + $0x3c4] sm:$0xf]  ;;  %v10505_v27 = vor.u32 %v12762_v18, %v10504_v23  ;;  %v12757_v36 = vld [vmem:[#allocation16 + $0x158] sm:$0xf0] }
 0x351   :  { %v4235_v8 = vadd.f32 %v4234_v1, %v4221_v59  ;;  %v11045_v59 = vor.u32 %v12897_v48, %v11044_v57  ;;  %v10565_v30 = vor.u32 %v12777_v52, %v10564_v50  ;;  %v12844_v1 = vld [vmem:[#allocation16 + $0x414] sm:$0xf]  ;;  %v10804_v28 = vld [vmem:[#allocation16 + $0x3c8] sm:$0xf]  ;;  %v12870_v38 = vld [vmem:[#allocation16 + $0x4e4] sm:$0xf] }
 0x352   :  { %v10841_v5 = vor.u32 %v12844_v1, %v10838_v2  ;;  %v10964_v33 = vld [vmem:[#allocation16 + $0x508] sm:$0xf]  ;;  %v10946_v42 = vld [vmem:[#allocation16 + $0x4f4] sm:$0xf0]  ;;  %v2911_v31 = vperm.slane %v13857_v44, 4  ;;  %v10929_v44 = vor.u32 %v12865_v53, %v10926_v54 }
 0x353   :  { %vm4315_vm15 = vcmp.ge.f32.partialorder %v4235_v8, 0.0  ;;  %v4325_v14 = vmul.f32 0.2, %v4235_v8  ;;  %5781 = vmatpush.bf16.msrb.mxu2 %v10325_v16  ;;  %5819 = vmatpush.bf16.msra.mxu1 %v10885_v35  ;;  %v10818_v16 = vld [vmem:[#allocation16 + $0x3fc] sm:$0xf0]  ;;  %v4260_v35 = vpop.f32.mrf.mxu0  ;;  %v10949_v50 = vor.u32 %v12870_v38, %v10946_v42  ;;  %v4288_v3 = vpop.f32.mrf.mxu2 }
 0x354   :  { %5750 = vmatpush.bf16.msrb.mxu0 %v10861_v56  ;;  %v10484_v51 = vld [vmem:[#allocation16 + $0x148] sm:$0xf]  ;;  %v10466_v57 = vld [vmem:[#allocation16 + $0x134] sm:$0xf0]  ;;  %v12745_v56 = vld [vmem:[#allocation16 + $0xfc] sm:$0xf] }
 0x355   :  { %v4335_v6 = vsel %vm4315_vm15, %v4235_v8, %v4325_v14  ;;  %v11025_v8 = vor.u32 %v12892_v62, %v11024_v46  ;;  %v12839_v14 = vld [vmem:[#allocation16 + $0x3ec] sm:$0xf]  ;;  %v10485_v48 = vor.u32 %v12757_v36, %v10484_v51  ;;  %v10906_v62 = vld [vmem:[#allocation16 + $0x4a4] sm:$0xf0]  ;;  %v12740_v1 = vld [vmem:[#allocation16 + $0xd4] sm:$0xf] }
 0x356   :  { %v13890_v22 = vpack.c.bf16 %v4335_v6, %v4330_v19  ;;  %5782 = vmatmul.bf16.vlgmr.msrb.gmra.mxu2 %v13874_v4  ;;  %v11005_v19 = vor.u32 %v12887_v11, %v11004_v61  ;;  %v10984_v6 = vld [vmem:[#allocation16 + $0x530] sm:$0xf]  ;;  %v10426_v2 = vld [vmem:[#allocation16 + $0xe4] sm:$0xf0]  ;;  %v12855_v61 = vld [vmem:[#allocation16 + $0x46c] sm:$0xf] }
 0x357   :  { %5830 = vmatpush.bf16.msra.mxu2 %v11105_v58  ;;  %5820 = vmatpush.bf16.msra.mxu1 %v10865_v60  ;;  %v10821_v58 = vor.u32 %v12839_v14, %v10818_v16  ;;  %v10985_v32 = vor.u32 %v12882_v15, %v10984_v6  ;;  %v10449_v60 = vor.u32 %v12745_v56, %v10446_v49  ;;  %v10406_v41 = vld [vmem:[#allocation16 + $0xbc] sm:$0xf0]  ;;  %v10386_v15 = vld [vmem:[#allocation16 + $0x94] sm:$0xf0]  ;;  %v12832_v36 = vld [vmem:[#allocation16 + $0x3b0] sm:$0xf0] }
 0x358   :  { %5684 = vmatmul.bf16.vlgmr.msrb.gmra.mxu3 %v13890_v22  ;;  %5751 = vmatpush.bf16.msrb.mxu0 %v10841_v5  ;;  %v12830_v38 = vld [vmem:[#allocation16 + $0x3a4] sm:$0xf]  ;;  %v10764_v54 = vld [vmem:[#allocation16 + $0x378] sm:$0xf] }
 0x359   :  { %5788 = vmatpush.bf16.msrb.mxu3 %v10625_v20  ;;  %v10825_v20 = vor.u32 %v12842_v0, %v10824_v17  ;;  %v12850_v0 = vld [vmem:[#allocation16 + $0x444] sm:$0xf] }
 0x35b   :  { %5831 = vmatpush.bf16.msra.mxu2 %v11085_v29  ;;  %5821 = vmatpush.bf16.msra.mxu1 %v10845_v40  ;;  %v10801_v29 = vor.u32 %v12834_v25, %v10798_v26  ;;  %v4262_v7 = vpop.f32.mrf.mxu0  ;;  %v10886_v40 = vld [vmem:[#allocation16 + $0x47c] sm:$0xf0]  ;;  %v12845_v26 = vld [vmem:[#allocation16 + $0x41c] sm:$0xf] }
 0x35c   :  { %5752 = vmatpush.bf16.msrb.mxu0 %v10821_v58  ;;  %v10889_v16 = vor.u32 %v12855_v61, %v10886_v40  ;;  %v10409_v58 = vor.u32 %v12735_v12, %v10406_v41  ;;  %v10744_v40 = vld [vmem:[#allocation16 + $0x350] sm:$0xf]  ;;  %v12820_v41 = vld [vmem:[#allocation16 + $0x354] sm:$0xf] }
 0x35d   :  { %5789 = vmatpush.bf16.msrb.mxu3 %v10605_v9  ;;  %v10805_v9 = vor.u32 %v12837_v13, %v10804_v28  ;;  %v10846_v28 = vld [vmem:[#allocation16 + $0x42c] sm:$0xf0]  ;;  %v12725_v13 = vld [vmem:[#allocation16 + $0x5c] sm:$0xf] }
 0x35e   :  { %v10849_v51 = vor.u32 %v12845_v26, %v10846_v28  ;;  %v10752_v26 = vld [vmem:[#allocation16 + $0x358] sm:$0xf]  ;;  %v12823_v28 = vld [vmem:[#allocation16 + $0x368] sm:$0xf0] }
 0x35f   :  { %5832 = vmatpush.bf16.msra.mxu2 %v11065_v39  ;;  %5822 = vmatpush.bf16.msra.mxu1 %v10825_v20  ;;  %v12750_v39 = vld [vmem:[#allocation16 + $0x124] sm:$0xf] }
 0x360   :  { %5753 = vmatpush.bf16.msrb.mxu0 %v10801_v29  ;;  %v10469_v52 = vor.u32 %v12750_v39, %v10466_v57  ;;  %v12840_v39 = vld [vmem:[#allocation16 + $0x3f4] sm:$0xf] }
 0x361   :  { %5790 = vmatpush.bf16.msrb.mxu3 %v10585_v47  ;;  %v10965_v47 = vor.u32 %v12877_v34, %v10964_v33 }
 0x362   :  { %v4246_v24 = vpop.f32.mrf.mxu3 }
 0x363   :  { %5833 = vmatpush.bf16.msra.mxu2 %v11045_v59  ;;  %5823 = vmatpush.bf16.msra.mxu1 %v10805_v9  ;;  %v4247_v45 = vadd.f32 %v4246_v24, %v2911_v31  ;;  %v4274_v59 = vpop.f32.mrf.mxu1  ;;  %v4290_v24 = vpop.f32.mrf.mxu2 }
 0x365   :  { %5791 = vmatpush.bf16.msrb.mxu3 %v10565_v30  ;;  %v12860_v30 = vld [vmem:[#allocation16 + $0x494] sm:$0xf]  ;;  %v4261_v63 = vadd.f32 %v4260_v35, %v4247_v45  ;;  %v10826_v35 = vld [vmem:[#allocation16 + $0x404] sm:$0xf0] }
 0x366   :  { %v10909_v5 = vor.u32 %v12860_v30, %v10906_v62  ;;  %v10829_v49 = vor.u32 %v12840_v39, %v10826_v35  ;;  %v12835_v30 = vld [vmem:[#allocation16 + $0x3cc] sm:$0xf]  ;;  %v10806_v62 = vld [vmem:[#allocation16 + $0x3dc] sm:$0xf0] }
 0x367   :  { %5834 = vmatpush.bf16.msra.mxu2 %v11025_v8  ;;  %v10429_v8 = vor.u32 %v12740_v1, %v10426_v2  ;;  %v4275_v11 = vadd.f32 %v4274_v59, %v4261_v63  ;;  %v12827_v59 = vld [vmem:[#allocation16 + $0x388] sm:$0xf0]  ;;  %v10792_v1 = vld [vmem:[#allocation16 + $0x3a8] sm:$0xf]  ;;  %v12833_v2 = vld [vmem:[#allocation16 + $0x3b8] sm:$0xf0]  ;;  %v10809_v61 = vor.u32 %v12835_v30, %v10806_v62 }
 0x368   :  { %5740 = vmatmul.bf16.vlgmr.msra.gmra.mxu3 %v13885_v37  ;;  %v12715_v63 = vld [vmem:[#allocation16 + $0xc] sm:$0xf]  ;;  %v10793_v12 = vor.u32 %v12833_v2, %v10792_v1  ;;  %v11046_v35 = vld [vmem:[#allocation16 + $0x5bc] sm:$0xf0]  ;;  %v10664_v62 = vld [vmem:[#allocation16 + $0x2b0] sm:$0xf] }
 0x369   :  { %5792 = vmatpush.bf16.msrb.mxu3 %v10545_v10  ;;  %v4289_v6 = vadd.f32 %v4288_v3, %v4275_v11  ;;  %v10765_v3 = vor.u32 %v12827_v59, %v10764_v54  ;;  %v10686_v54 = vld [vmem:[#allocation16 + $0x2ec] sm:$0xf0]  ;;  %v12813_v59 = vld [vmem:[#allocation16 + $0x318] sm:$0xf0]  ;;  %v12800_v1 = vld [vmem:[#allocation16 + $0x2b4] sm:$0xf] }
 0x36a   :  { %v4248_v46 = vpop.f32.mrf.mxu3  ;;  %v10666_v2 = vld [vmem:[#allocation16 + $0x2c4] sm:$0xf0] }
 0x36b   :  { %5835 = vmatpush.bf16.msra.mxu2 %v11005_v19  ;;  %v4249_v43 = vadd.f32 %v4248_v46, %v2911_v31  ;;  %v4276_v17 = vpop.f32.mrf.mxu1  ;;  %v10866_v19 = vld [vmem:[#allocation16 + $0x454] sm:$0xf0]  ;;  %v12825_v46 = vld [vmem:[#allocation16 + $0x37c] sm:$0xf] }
 0x36c   :  { %v10869_v18 = vor.u32 %v12850_v0, %v10866_v19  ;;  %v10786_v31 = vld [vmem:[#allocation16 + $0x3b4] sm:$0xf0]  ;;  %v12905_v19 = vld [vmem:[#allocation16 + $0x5fc] sm:$0xf] }
 0x36d   :  { %5793 = vmatpush.bf16.msrb.mxu3 %v10525_v21  ;;  %v4263_v10 = vadd.f32 %v4262_v7, %v4249_v43  ;;  %v12730_v21 = vld [vmem:[#allocation16 + $0x84] sm:$0xf]  ;;  %v10789_v56 = vor.u32 %v12830_v38, %v10786_v31  ;;  %v10326_v43 = vld [vmem:[#allocation16 + $0x1c] sm:$0xf0]  ;;  %v11106_v7 = vld [vmem:[#allocation16 + $0x634] sm:$0xf0] }
 0x36e   :  { %v10389_v25 = vor.u32 %v12730_v21, %v10386_v15  ;;  %v10329_v11 = vor.u32 %v12715_v63, %v10326_v43  ;;  %v10724_v21 = vld [vmem:[#allocation16 + $0x328] sm:$0xf]  ;;  %v12817_v15 = vld [vmem:[#allocation16 + $0x338] sm:$0xf0]  ;;  %v12818_v31 = vld [vmem:[#allocation16 + $0x340] sm:$0xf0] }
 0x36f   :  { %5836 = vmatpush.bf16.msra.mxu2 %v10985_v32  ;;  %v4277_v20 = vadd.f32 %v4276_v17, %v4263_v10  ;;  %v10366_v32 = vld [vmem:[#allocation16 + $0x6c] sm:$0xf0]  ;;  %v12822_v10 = vld [vmem:[#allocation16 + $0x360] sm:$0xf0]  ;;  %v10772_v17 = vld [vmem:[#allocation16 + $0x380] sm:$0xf] }
 0x370   :  { %v10369_v42 = vor.u32 %v12725_v13, %v10366_v32  ;;  %v10745_v0 = vor.u32 %v12822_v10, %v10744_v40  ;;  %v12900_v13 = vld [vmem:[#allocation16 + $0x5d4] sm:$0xf]  ;;  %v11066_v32 = vld [vmem:[#allocation16 + $0x5e4] sm:$0xf0]  ;;  %v12802_v63 = vld [vmem:[#allocation16 + $0x2c0] sm:$0xf0] }
 0x371   :  { %5794 = vmatpush.bf16.msrb.mxu3 %v10505_v27  ;;  %v4291_v29 = vadd.f32 %v4290_v24, %v4277_v20  ;;  %v10784_v27 = vld [vmem:[#allocation16 + $0x3a0] sm:$0xf]  ;;  %v11069_v38 = vor.u32 %v12900_v13, %v11066_v32  ;;  %v11006_v40 = vld [vmem:[#allocation16 + $0x56c] sm:$0xf0]  ;;  %v10644_v10 = vld [vmem:[#allocation16 + $0x288] sm:$0xf] }
 0x372   :  { %v10785_v53 = vor.u32 %v12832_v36, %v10784_v27  ;;  %v10726_v24 = vld [vmem:[#allocation16 + $0x33c] sm:$0xf0]  ;;  %v10706_v36 = vld [vmem:[#allocation16 + $0x314] sm:$0xf0]  ;;  %v10606_v13 = vld [vmem:[#allocation16 + $0x24c] sm:$0xf0] }
 0x373   :  { %5837 = vmatpush.bf16.msra.mxu2 %v10965_v47  ;;  %v12720_v47 = vld [vmem:[#allocation16 + $0x34] sm:$0xf]  ;;  %v10704_v27 = vld [vmem:[#allocation16 + $0x300] sm:$0xf] }
 0x374   :  { %v10612_v32 = vld [vmem:[#allocation16 + $0x240] sm:$0xf] }
 0x375   :  { %5795 = vmatpush.bf16.msrb.mxu3 %v10485_v48  ;;  %v10346_v48 = vld [vmem:[#allocation16 + $0x44] sm:$0xf0] }
 0x377   :  { %5886 = vmatpush.bf16.msrb.mxu2 %v10949_v50 }
 0x378   :  { %5796 = vmatmul.bf16.vlgmr.msrb.gmra.mxu3 %v13881_v55 }
 0x379   :  { %5844 = vmatpush.bf16.msra.mxu3 %v10469_v52 }
 0x37b   :  { %5887 = vmatpush.bf16.msrb.mxu2 %v10929_v44  ;;  %v10766_v44 = vld [vmem:[#allocation16 + $0x38c] sm:$0xf0] }
 0x37d   :  { %5845 = vmatpush.bf16.msra.mxu3 %v10449_v60  ;;  %v10349_v60 = vor.u32 %v12720_v47, %v10346_v48  ;;  %v10684_v48 = vld [vmem:[#allocation16 + $0x2d8] sm:$0xf] }
 0x37f   :  { %5888 = vmatpush.bf16.msrb.mxu2 %v10909_v5  ;;  %v12910_v5 = vld [vmem:[#allocation16 + $0x624] sm:$0xf] }
 0x381   :  { %5846 = vmatpush.bf16.msra.mxu3 %v10429_v8  ;;  %v10769_v8 = vor.u32 %v12825_v46, %v10766_v44  ;;  %v12890_v44 = vld [vmem:[#allocation16 + $0x584] sm:$0xf] }
 0x382   :  { %v4302_v14 = vpop.f32.mrf.mxu3 }
 0x383   :  { %v4303_v23 = vadd.f32 %v4302_v14, %v4289_v6  ;;  %5889 = vmatpush.bf16.msrb.mxu2 %v10889_v16  ;;  %v10746_v14 = vld [vmem:[#allocation16 + $0x364] sm:$0xf0]  ;;  %v11109_v16 = vor.u32 %v12910_v5, %v11106_v7  ;;  %v11086_v6 = vld [vmem:[#allocation16 + $0x60c] sm:$0xf0]  ;;  %v10692_v5 = vld [vmem:[#allocation16 + $0x2e0] sm:$0xf] }
 0x384   :  { %v10749_v20 = vor.u32 %v12820_v41, %v10746_v14  ;;  %v12808_v7 = vld [vmem:[#allocation16 + $0x2f0] sm:$0xf0]  ;;  %v12795_v41 = vld [vmem:[#allocation16 + $0x28c] sm:$0xf]  ;;  %v10646_v14 = vld [vmem:[#allocation16 + $0x29c] sm:$0xf0] }
 0x385   :  { %5847 = vmatpush.bf16.msra.mxu3 %v10409_v58  ;;  %v4321_v33 = vmul.f32 0.2, %v4303_v23  ;;  %vm4311_vm0 = vcmp.ge.f32.partialorder %v4303_v23, 0.0  ;;  %v12828_v58 = vld [vmem:[#allocation16 + $0x390] sm:$0xf0] }
 0x387   :  { %5890 = vmatpush.bf16.msrb.mxu2 %v10869_v18  ;;  %v4331_v50 = vsel %vm4311_vm0, %v4303_v23, %v4321_v33  ;;  %v10773_v23 = vor.u32 %v12828_v58, %v10772_v17  ;;  %v12815_v18 = vld [vmem:[#allocation16 + $0x32c] sm:$0xf]  ;;  %v12812_v33 = vld [vmem:[#allocation16 + $0x310] sm:$0xf0]  ;;  %v12790_v17 = vld [vmem:[#allocation16 + $0x264] sm:$0xf] }
 0x388   :  { %v10705_v39 = vor.u32 %v12812_v33, %v10704_v27  ;;  %v10626_v58 = vld [vmem:[#allocation16 + $0x274] sm:$0xf0]  ;;  %v12788_v27 = vld [vmem:[#allocation16 + $0x250] sm:$0xf0]  ;;  %v10652_v33 = vld [vmem:[#allocation16 + $0x290] sm:$0xf] }
 0x389   :  { %5848 = vmatpush.bf16.msra.mxu3 %v10389_v25  ;;  %v11089_v25 = vor.u32 %v12905_v19, %v11086_v6  ;;  %v12793_v6 = vld [vmem:[#allocation16 + $0x278] sm:$0xf0] }
 0x38a   :  { %v4304_v9 = vpop.f32.mrf.mxu3 }
 0x38b   :  { %v4305_v34 = vadd.f32 %v4304_v9, %v4291_v29  ;;  %5891 = vmatpush.bf16.msrb.mxu2 %v10849_v51  ;;  %v10725_v29 = vor.u32 %v12817_v15, %v10724_v21  ;;  %v10729_v9 = vor.u32 %v12815_v18, %v10726_v24  ;;  %v12810_v51 = vld [vmem:[#allocation16 + $0x304] sm:$0xf]  ;;  %v12803_v21 = vld [vmem:[#allocation16 + $0x2c8] sm:$0xf0]  ;;  %v10986_v18 = vld [vmem:[#allocation16 + $0x544] sm:$0xf0]  ;;  %v10649_v24 = vor.u32 %v12795_v41, %v10646_v14 }
 0x38c   :  { %v10709_v47 = vor.u32 %v12810_v51, %v10706_v36  ;;  %v12875_v51 = vld [vmem:[#allocation16 + $0x50c] sm:$0xf]  ;;  %v10966_v36 = vld [vmem:[#allocation16 + $0x51c] sm:$0xf0]  ;;  %v10526_v41 = vld [vmem:[#allocation16 + $0x1ac] sm:$0xf0] }
 0x38d   :  { %vm4316_vm1 = vcmp.ge.f32.partialorder %v4305_v34, 0.0  ;;  %v4326_v57 = vmul.f32 0.2, %v4305_v34  ;;  %5849 = vmatpush.bf16.msra.mxu3 %v10369_v42  ;;  %v10732_v42 = vld [vmem:[#allocation16 + $0x330] sm:$0xf] }
 0x38e   :  { %v10532_v14 = vld [vmem:[#allocation16 + $0x1a0] sm:$0xf] }
 0x38f   :  { %v4336_v52 = vsel %vm4316_vm1, %v4305_v34, %v4326_v57  ;;  %5892 = vmatpush.bf16.msrb.mxu2 %v10829_v49  ;;  %v10753_v34 = vor.u32 %v12823_v28, %v10752_v26  ;;  %v12895_v57 = vld [vmem:[#allocation16 + $0x5ac] sm:$0xf]  ;;  %v10712_v49 = vld [vmem:[#allocation16 + $0x308] sm:$0xf] }
 0x390   :  { %v13897_v45 = vpack.c.bf16 %v4336_v52, %v4331_v50  ;;  %v12807_v50 = vld [vmem:[#allocation16 + $0x2e8] sm:$0xf0]  ;;  %v10733_v52 = vor.u32 %v12818_v31, %v10732_v42  ;;  %v10713_v43 = vor.u32 %v12813_v59, %v10712_v49  ;;  %v10952_v42 = vld [vmem:[#allocation16 + $0x4e8] sm:$0xf]  ;;  %v12873_v31 = vld [vmem:[#allocation16 + $0x4f8] sm:$0xf0] }
 0x391   :  { %5850 = vmatpush.bf16.msra.mxu3 %v10349_v60  ;;  %v10685_v46 = vor.u32 %v12807_v50, %v10684_v48  ;;  %v11026_v60 = vld [vmem:[#allocation16 + $0x594] sm:$0xf0]  ;;  %v10969_v48 = vor.u32 %v12875_v51, %v10966_v36  ;;  %v12868_v49 = vld [vmem:[#allocation16 + $0x4d0] sm:$0xf0] }
 0x392   :  { %5698 = vmatmul.bf16.vlgmr.msra.gmra.mxu0 %v13897_v45  ;;  %5768 = vmatmul.bf16.vlgmr.msrb.gmra.mxu1 %v13897_v45  ;;  %v10592_v50 = vld [vmem:[#allocation16 + $0x218] sm:$0xf] }
 0x393   :  { %5802 = vmatpush.bf16.msra.mxu0 %v10785_v53  ;;  %5838 = vmatmul.bf16.vlgmr.msra.gmra.mxu2 %v13897_v45  ;;  %v12805_v53 = vld [vmem:[#allocation16 + $0x2dc] sm:$0xf]  ;;  %v10832_v36 = vld [vmem:[#allocation16 + $0x3f8] sm:$0xf] }
 0x394   :  { %5872 = vmatpush.bf16.msrb.mxu1 %v10789_v56  ;;  %5893 = vmatpush.bf16.msrb.mxu2 %v10809_v61  ;;  %v11049_v56 = vor.u32 %v12895_v57, %v11046_v35  ;;  %v10689_v30 = vor.u32 %v12805_v53, %v10686_v54  ;;  %v12885_v61 = vld [vmem:[#allocation16 + $0x55c] sm:$0xf]  ;;  %v12780_v35 = vld [vmem:[#allocation16 + $0x214] sm:$0xf]  ;;  %v10953_v53 = vor.u32 %v12873_v31, %v10952_v42 }
 0x395   :  { %5851 = vmatpush.bf16.msra.mxu3 %v10329_v11  ;;  %v10669_v11 = vor.u32 %v12800_v1, %v10666_v2  ;;  %v11009_v19 = vor.u32 %v12885_v61, %v11006_v40  ;;  %v12863_v1 = vld [vmem:[#allocation16 + $0x4a8] sm:$0xf0] }
 0x397   :  { %5803 = vmatpush.bf16.msra.mxu0 %v10765_v3  ;;  %v11029_v3 = vor.u32 %v12890_v44, %v11026_v60  ;;  %v10566_v44 = vld [vmem:[#allocation16 + $0x1fc] sm:$0xf0]  ;;  %v10572_v60 = vld [vmem:[#allocation16 + $0x1f0] sm:$0xf] }
 0x398   :  { %5873 = vmatpush.bf16.msrb.mxu1 %v10769_v8  ;;  %5942 = vmatpush.bf16.msra.mxu2 %v10793_v12  ;;  %v10665_v8 = vor.u32 %v12802_v63, %v10664_v62  ;;  %v12797_v12 = vld [vmem:[#allocation16 + $0x298] sm:$0xf0] }
 0x399   :  { %5900 = vmatpush.bf16.msrb.mxu3 %v11109_v16  ;;  %v10693_v16 = vor.u32 %v12808_v7, %v10692_v5  ;;  %v10645_v15 = vor.u32 %v12797_v12, %v10644_v10  ;;  %v10546_v5 = vld [vmem:[#allocation16 + $0x1d4] sm:$0xf0]  ;;  %v10552_v7 = vld [vmem:[#allocation16 + $0x1c8] sm:$0xf]  ;;  %v10892_v10 = vld [vmem:[#allocation16 + $0x470] sm:$0xf] }
 0x39a   :  { %5852 = vmatmul.bf16.vlgmr.msra.gmra.mxu3 %v13874_v4  ;;  %v12765_v12 = vld [vmem:[#allocation16 + $0x19c] sm:$0xf] }
 0x39b   :  { %5804 = vmatpush.bf16.msra.mxu0 %v10745_v0  ;;  %v10632_v0 = vld [vmem:[#allocation16 + $0x268] sm:$0xf] }
 0x39c   :  { %5874 = vmatpush.bf16.msrb.mxu1 %v10749_v20  ;;  %5943 = vmatpush.bf16.msra.mxu2 %v10773_v23  ;;  %v10672_v20 = vld [vmem:[#allocation16 + $0x2b8] sm:$0xf]  ;;  %v12880_v23 = vld [vmem:[#allocation16 + $0x534] sm:$0xf]  ;;  %v10633_v26 = vor.u32 %v12793_v6, %v10632_v0  ;;  %v10872_v0 = vld [vmem:[#allocation16 + $0x448] sm:$0xf] }
 0x39d   :  { %5901 = vmatpush.bf16.msrb.mxu3 %v11089_v25  ;;  %v10629_v25 = vor.u32 %v12790_v17, %v10626_v58  ;;  %v10673_v28 = vor.u32 %v12803_v21, %v10672_v20  ;;  %v10529_v58 = vor.u32 %v12765_v12, %v10526_v41  ;;  %v12760_v20 = vld [vmem:[#allocation16 + $0x174] sm:$0xf]  ;;  %v10506_v21 = vld [vmem:[#allocation16 + $0x184] sm:$0xf0]  ;;  %v11536_v12 = vld [vmem:[#allocation19 + $0x348] sm:$0xf] }
 0x39e   :  { %v13022_v41 = vld [vmem:[#allocation19 + $0x360] sm:$0xf0] }
 0x39f   :  { %5805 = vmatpush.bf16.msra.mxu0 %v10725_v29  ;;  %v12785_v29 = vld [vmem:[#allocation16 + $0x23c] sm:$0xf] }
 0x3a0   :  { %5875 = vmatpush.bf16.msrb.mxu1 %v10729_v9  ;;  %5944 = vmatpush.bf16.msra.mxu2 %v10753_v34  ;;  %v10989_v9 = vor.u32 %v12880_v23, %v10986_v18  ;;  %v12798_v34 = vld [vmem:[#allocation16 + $0x2a0] sm:$0xf0]  ;;  %v12763_v23 = vld [vmem:[#allocation16 + $0x188] sm:$0xf0] }
 0x3a1   :  { %5902 = vmatpush.bf16.msrb.mxu3 %v11069_v38  ;;  %v10609_v38 = vor.u32 %v12785_v29, %v10606_v13  ;;  %v10653_v57 = vor.u32 %v12798_v34, %v10652_v33  ;;  %v12755_v29 = vld [vmem:[#allocation16 + $0x14c] sm:$0xf]  ;;  %v10486_v13 = vld [vmem:[#allocation16 + $0x15c] sm:$0xf0]  ;;  %v12753_v33 = vld [vmem:[#allocation16 + $0x138] sm:$0xf0] }
 0x3a2   :  { %5754 = vmatmul.bf16.vlgmr.msrb.gmra.mxu0 %v13890_v22  ;;  %5824 = vmatmul.bf16.vlgmr.msra.gmra.mxu1 %v13890_v22  ;;  %v10489_v51 = vor.u32 %v12755_v29, %v10486_v13  ;;  %v11228_v13 = vld [vmem:[#allocation19 + $0xe0] sm:$0xf] }
 0x3a3   :  { %5806 = vmatpush.bf16.msra.mxu0 %v10705_v39  ;;  %5894 = vmatmul.bf16.vlgmr.msrb.gmra.mxu2 %v13890_v22  ;;  %v10613_v39 = vor.u32 %v12788_v27, %v10612_v32  ;;  %v10492_v32 = vld [vmem:[#allocation16 + $0x150] sm:$0xf]  ;;  %v10472_v27 = vld [vmem:[#allocation16 + $0x128] sm:$0xf] }
 0x3a4   :  { %5876 = vmatpush.bf16.msrb.mxu1 %v10709_v47  ;;  %5945 = vmatpush.bf16.msra.mxu2 %v10733_v52  ;;  %v10586_v47 = vld [vmem:[#allocation16 + $0x224] sm:$0xf0]  ;;  %v12783_v52 = vld [vmem:[#allocation16 + $0x228] sm:$0xf0]  ;;  %v10473_v31 = vor.u32 %v12753_v33, %v10472_v27  ;;  %v13008_v33 = vld [vmem:[#allocation19 + $0x2f0] sm:$0xf0] }
 0x3a5   :  { %5903 = vmatpush.bf16.msrb.mxu3 %v11049_v56  ;;  %v10589_v54 = vor.u32 %v12780_v35, %v10586_v47  ;;  %v10932_v56 = vld [vmem:[#allocation16 + $0x4c0] sm:$0xf]  ;;  %v10593_v59 = vor.u32 %v12783_v52, %v10592_v50  ;;  %v10812_v47 = vld [vmem:[#allocation16 + $0x3d0] sm:$0xf]  ;;  %v10432_v52 = vld [vmem:[#allocation16 + $0xd8] sm:$0xf] }
 0x3a6   :  { %v10933_v62 = vor.u32 %v12868_v49, %v10932_v56  ;;  %v10412_v49 = vld [vmem:[#allocation16 + $0xb0] sm:$0xf] }
 0x3a7   :  { %5807 = vmatpush.bf16.msra.mxu0 %v10685_v46  ;;  %v12775_v46 = vld [vmem:[#allocation16 + $0x1ec] sm:$0xf] }
 0x3a8   :  { %5877 = vmatpush.bf16.msrb.mxu1 %v10689_v30  ;;  %5946 = vmatpush.bf16.msra.mxu2 %v10713_v43  ;;  %v12778_v30 = vld [vmem:[#allocation16 + $0x200] sm:$0xf0]  ;;  %v10569_v63 = vor.u32 %v12775_v46, %v10566_v44  ;;  %v10912_v43 = vld [vmem:[#allocation16 + $0x498] sm:$0xf]  ;;  %v10392_v44 = vld [vmem:[#allocation16 + $0x88] sm:$0xf] }
 0x3a9   :  { %5904 = vmatpush.bf16.msrb.mxu3 %v11029_v3  ;;  %v10573_v2 = vor.u32 %v12778_v30, %v10572_v60  ;;  %v12770_v3 = vld [vmem:[#allocation16 + $0x1c4] sm:$0xf]  ;;  %v10913_v61 = vor.u32 %v12863_v1, %v10912_v43  ;;  %v12733_v60 = vld [vmem:[#allocation16 + $0x98] sm:$0xf0]  ;;  %v10352_v1 = vld [vmem:[#allocation16 + $0x38] sm:$0xf] }
 0x3aa   :  { %v10549_v40 = vor.u32 %v12770_v3, %v10546_v5  ;;  %v10393_v30 = vor.u32 %v12733_v60, %v10392_v44  ;;  %v12966_v3 = vld [vmem:[#allocation19 + $0x1a0] sm:$0xf0]  ;;  %v12931_v44 = vld [vmem:[#allocation19 + $0x88] sm:$0xf0] }
 0x3ab   :  { %5808 = vmatpush.bf16.msra.mxu0 %v10665_v8  ;;  %v12773_v8 = vld [vmem:[#allocation16 + $0x1d8] sm:$0xf0] }
 0x3ac   :  { %5878 = vmatpush.bf16.msrb.mxu1 %v10669_v11  ;;  %5947 = vmatpush.bf16.msra.mxu2 %v10693_v16  ;;  %v12858_v11 = vld [vmem:[#allocation16 + $0x480] sm:$0xf0]  ;;  %v12768_v16 = vld [vmem:[#allocation16 + $0x1b0] sm:$0xf0] }
 0x3ad   :  { %5905 = vmatpush.bf16.msrb.mxu3 %v11009_v19  ;;  %v10893_v17 = vor.u32 %v12858_v11, %v10892_v10  ;;  %v12853_v19 = vld [vmem:[#allocation16 + $0x458] sm:$0xf0]  ;;  %v10533_v6 = vor.u32 %v12768_v16, %v10532_v14  ;;  %v11112_v10 = vld [vmem:[#allocation16 + $0x628] sm:$0xf]  ;;  %v11537_v16 = vor.u32 %v13022_v41, %v11536_v12 }
 0x3ae   :  { %v10873_v18 = vor.u32 %v12853_v19, %v10872_v0  ;;  %v12913_v11 = vld [vmem:[#allocation16 + $0x638] sm:$0xf0]  ;;  %v12908_v0 = vld [vmem:[#allocation16 + $0x610] sm:$0xf0]  ;;  %v13050_v41 = vld [vmem:[#allocation19 + $0x440] sm:$0xf0] }
 0x3af   :  { %5809 = vmatpush.bf16.msra.mxu0 %v10645_v15  ;;  %v10512_v15 = vld [vmem:[#allocation16 + $0x178] sm:$0xf]  ;;  %v11256_v19 = vld [vmem:[#allocation19 + $0x118] sm:$0xf] }
 0x3b0   :  { %5879 = vmatpush.bf16.msrb.mxu1 %v10649_v24  ;;  %5948 = vmatpush.bf16.msra.mxu2 %v10673_v28  ;;  %v10509_v24 = vor.u32 %v12760_v20, %v10506_v21  ;;  %v10513_v28 = vor.u32 %v12763_v23, %v10512_v15  ;;  %v11508_v21 = vld [vmem:[#allocation19 + $0x310] sm:$0xf]  ;;  %v13015_v15 = vld [vmem:[#allocation19 + $0x328] sm:$0xf0]  ;;  %v11760_v23 = vld [vmem:[#allocation19 + $0x508] sm:$0xf] }
 0x3b1   :  { %5906 = vmatpush.bf16.msrb.mxu3 %v10989_v9  ;;  %v12758_v9 = vld [vmem:[#allocation16 + $0x160] sm:$0xf0] }
 0x3b2   :  { %5810 = vmatmul.bf16.vlgmr.msra.gmra.mxu0 %v13885_v37  ;;  %v10493_v42 = vor.u32 %v12758_v9, %v10492_v32  ;;  %v12945_v32 = vld [vmem:[#allocation19 + $0xf8] sm:$0xf0]  ;;  %v11480_v9 = vld [vmem:[#allocation19 + $0x2d8] sm:$0xf] }
 0x3b3   :  { %5858 = vmatpush.bf16.msrb.mxu0 %v10629_v25  ;;  %5880 = vmatmul.bf16.vlgmr.msrb.gmra.mxu1 %v13885_v37  ;;  %v10852_v25 = vld [vmem:[#allocation16 + $0x420] sm:$0xf]  ;;  %v11229_v27 = vor.u32 %v12945_v32, %v11228_v13  ;;  %v11340_v32 = vld [vmem:[#allocation19 + $0x1c0] sm:$0xf] }
 0x3b4   :  { %5928 = vmatpush.bf16.msra.mxu1 %v10633_v26  ;;  %5949 = vmatpush.bf16.msra.mxu2 %v10653_v57  ;;  %v12848_v26 = vld [vmem:[#allocation16 + $0x430] sm:$0xf0] }
 0x3b5   :  { %5907 = vmatpush.bf16.msrb.mxu3 %v10969_v48  ;;  %v10853_v34 = vor.u32 %v12848_v26, %v10852_v25  ;;  %v12748_v57 = vld [vmem:[#allocation16 + $0x110] sm:$0xf0]  ;;  %v12838_v48 = vld [vmem:[#allocation16 + $0x3e0] sm:$0xf0]  ;;  %v11509_v25 = vor.u32 %v13015_v15, %v11508_v21  ;;  %v13078_v26 = vld [vmem:[#allocation19 + $0x520] sm:$0xf0] }
 0x3b6   :  { %v11761_v29 = vor.u32 %v13078_v26, %v11760_v23  ;;  %v12980_v21 = vld [vmem:[#allocation19 + $0x210] sm:$0xf0]  ;;  %v11620_v15 = vld [vmem:[#allocation19 + $0x3f0] sm:$0xf]  ;;  %v5643_v23 = vpop.f32.mrf.mxu0 }
 0x3b7   :  { %5859 = vmatpush.bf16.msrb.mxu0 %v10609_v38  ;;  %5950 = vmatmul.bf16.vlgmr.msra.gmra.mxu2 %v13885_v37  ;;  %v10553_v37 = vor.u32 %v12773_v8, %v10552_v7  ;;  %v12843_v38 = vld [vmem:[#allocation16 + $0x408] sm:$0xf0]  ;;  %v10332_v8 = vld [vmem:[#allocation16 + $0x10] sm:$0xf] }
 0x3b8   :  { %5929 = vmatpush.bf16.msra.mxu1 %v10613_v39  ;;  %5908 = vmatmul.bf16.vlgmr.msrb.gmra.mxu3 %v13897_v45  ;;  %v10452_v39 = vld [vmem:[#allocation16 + $0x100] sm:$0xf]  ;;  %v10833_v35 = vor.u32 %v12843_v38, %v10832_v36  ;;  %v11481_v36 = vor.u32 %v13008_v33, %v11480_v9 }
 0x3b9   :  { %5956 = vmatpush.bf16.msra.mxu3 %v10953_v53  ;;  %v10453_v50 = vor.u32 %v12748_v57, %v10452_v39  ;;  %v12743_v53 = vld [vmem:[#allocation16 + $0xe8] sm:$0xf0]  ;;  %7809 = vmatpush.bf16.msrb.mxu2 %v11537_v16  ;;  %v12898_v39 = vld [vmem:[#allocation16 + $0x5c0] sm:$0xf0]  ;;  %v10992_v16 = vld [vmem:[#allocation16 + $0x538] sm:$0xf] }
 0x3ba   :  { %v10433_v56 = vor.u32 %v12743_v53, %v10432_v52  ;;  %v11200_v57 = vld [vmem:[#allocation19 + $0xa8] sm:$0xf]  ;;  %v11704_v52 = vld [vmem:[#allocation19 + $0x498] sm:$0xf]  ;;  %v12973_v9 = vld [vmem:[#allocation19 + $0x1d8] sm:$0xf0] }
 0x3bb   :  { %5860 = vmatpush.bf16.msrb.mxu0 %v10589_v54  ;;  %v10813_v54 = vor.u32 %v12838_v48, %v10812_v47  ;;  %v11452_v48 = vld [vmem:[#allocation19 + $0x2a0] sm:$0xf]  ;;  %v11341_v33 = vor.u32 %v12973_v9, %v11340_v32  ;;  %v13113_v32 = vld [vmem:[#allocation19 + $0x638] sm:$0xf0] }
 0x3bc   :  { %5930 = vmatpush.bf16.msra.mxu1 %v10593_v59  ;;  %v12738_v59 = vld [vmem:[#allocation16 + $0xc0] sm:$0xf0] }
 0x3bd   :  { %5957 = vmatpush.bf16.msra.mxu3 %v10933_v62  ;;  %v10413_v46 = vor.u32 %v12738_v59, %v10412_v49  ;;  %v10372_v62 = vld [vmem:[#allocation16 + $0x60] sm:$0xf]  ;;  %7810 = vmatpush.bf16.msrb.mxu2 %v11509_v25  ;;  %v12893_v59 = vld [vmem:[#allocation16 + $0x598] sm:$0xf0] }
 0x3bf   :  { %5861 = vmatpush.bf16.msrb.mxu0 %v10569_v63  ;;  %v12728_v63 = vld [vmem:[#allocation16 + $0x70] sm:$0xf0] }
 0x3c0   :  { %5931 = vmatpush.bf16.msra.mxu1 %v10573_v2  ;;  %v10373_v43 = vor.u32 %v12728_v63, %v10372_v62  ;;  %v12723_v2 = vld [vmem:[#allocation16 + $0x48] sm:$0xf0]  ;;  %v11676_v63 = vld [vmem:[#allocation19 + $0x460] sm:$0xf] }
 0x3c1   :  { %5958 = vmatpush.bf16.msra.mxu3 %v10913_v61  ;;  %v10353_v7 = vor.u32 %v12723_v2, %v10352_v1  ;;  %v12718_v61 = vld [vmem:[#allocation16 + $0x20] sm:$0xf0]  ;;  %7811 = vmatpush.bf16.msrb.mxu2 %v11481_v36  ;;  %v12994_v62 = vld [vmem:[#allocation19 + $0x280] sm:$0xf0]  ;;  %v13914_v2 = vpop.f32.mrf.mxu1  ;;  %v11314_v36 = vld [vmem:[#allocation19 + $0x1a4] sm:$0xf0] }
 0x3c2   :  { %v10333_v14 = vor.u32 %v12718_v61, %v10332_v8  ;;  %v13057_v1 = vld [vmem:[#allocation19 + $0x478] sm:$0xf0]  ;;  %v11144_v8 = vld [vmem:[#allocation19 + $0x38] sm:$0xf]  ;;  %v12924_v61 = vld [vmem:[#allocation19 + $0x50] sm:$0xf0] }
 0x3c3   :  { %5862 = vmatpush.bf16.msrb.mxu0 %v10549_v40  ;;  %v11284_v40 = vld [vmem:[#allocation19 + $0x150] sm:$0xf] }
 0x3c4   :  { %5932 = vmatpush.bf16.msra.mxu1 %v10553_v37 }
 0x3c5   :  { %5959 = vmatpush.bf16.msra.mxu3 %v10893_v17  ;;  %v11113_v17 = vor.u32 %v12913_v11, %v11112_v10  ;;  %v11396_v10 = vld [vmem:[#allocation19 + $0x230] sm:$0xf]  ;;  %v12987_v11 = vld [vmem:[#allocation19 + $0x248] sm:$0xf0] }
 0x3c6   :  { %v11397_v12 = vor.u32 %v12987_v11, %v11396_v10 }
 0x3c7   :  { %5863 = vmatpush.bf16.msrb.mxu0 %v10529_v58  ;;  %v11092_v58 = vld [vmem:[#allocation16 + $0x600] sm:$0xf] }
 0x3c8   :  { %5933 = vmatpush.bf16.msra.mxu1 %v10533_v6  ;;  %v12952_v6 = vld [vmem:[#allocation19 + $0x130] sm:$0xf0] }
 0x3c9   :  { %5960 = vmatpush.bf16.msra.mxu3 %v10873_v18  ;;  %v11257_v20 = vor.u32 %v12952_v6, %v11256_v19  ;;  %v11072_v18 = vld [vmem:[#allocation16 + $0x5d8] sm:$0xf]  ;;  %v12917_v19 = vld [vmem:[#allocation19 + $0x18] sm:$0xf0]  ;;  %v13918_v13 = vpop.f32.mrf.mxu1 }
 0x3cb   :  { %5864 = vmatpush.bf16.msrb.mxu0 %v10509_v24  ;;  %v12903_v24 = vld [vmem:[#allocation16 + $0x5e8] sm:$0xf0] }
 0x3cc   :  { %5934 = vmatpush.bf16.msra.mxu1 %v10513_v28  ;;  %v11093_v28 = vor.u32 %v12908_v0, %v11092_v58  ;;  %v12883_v58 = vld [vmem:[#allocation16 + $0x548] sm:$0xf0]  ;;  %v11116_v0 = vld [vmem:[#allocation19] sm:$0xf] }
 0x3cd   :  { %5961 = vmatpush.bf16.msra.mxu3 %v10853_v34  ;;  %v11732_v34 = vld [vmem:[#allocation19 + $0x4d0] sm:$0xf]  ;;  %v11117_v6 = vor.u32 %v12917_v19, %v11116_v0  ;;  %v10993_v25 = vor.u32 %v12883_v58, %v10992_v16  ;;  %v11482_v16 = vld [vmem:[#allocation19 + $0x2f4] sm:$0xf0]  ;;  %v13120_v58 = vld [vmem:[#allocation19 + $0x670] sm:$0xf0] }
 0x3cf   :  { %5865 = vmatpush.bf16.msrb.mxu0 %v10489_v51  ;;  %v13071_v51 = vld [vmem:[#allocation19 + $0x4e8] sm:$0xf0] }
 0x3d0   :  { %5935 = vmatpush.bf16.msra.mxu1 %v10493_v42  ;;  %v11733_v38 = vor.u32 %v13071_v51, %v11732_v34  ;;  %v11073_v42 = vor.u32 %v12903_v24, %v11072_v18  ;;  %v13043_v24 = vld [vmem:[#allocation19 + $0x408] sm:$0xf0]  ;;  %v13036_v34 = vld [vmem:[#allocation19 + $0x3d0] sm:$0xf0] }
 0x3d1   :  { %5962 = vmatpush.bf16.msra.mxu3 %v10833_v35  ;;  %v12938_v35 = vld [vmem:[#allocation19 + $0xc0] sm:$0xf0]  ;;  %v11621_v26 = vor.u32 %v13043_v24, %v11620_v15  ;;  %v12963_v51 = vld [vmem:[#allocation19 + $0x18c] sm:$0xf] }
 0x3d2   :  { %5866 = vmatmul.bf16.vlgmr.msrb.gmra.mxu0 %v13881_v55  ;;  %v11201_v47 = vor.u32 %v12938_v35, %v11200_v57  ;;  %v11317_v57 = vor.u32 %v12963_v51, %v11314_v36  ;;  %v13924_v35 = vld [vmem:[#allocation17] sm:$0x1f]  ;;  %v12935_v15 = vld [vmem:[#allocation19 + $0xac] sm:$0xf]  ;;  %v11174_v51 = vld [vmem:[#allocation19 + $0x8c] sm:$0xf0] }
 0x3d3   :  { %5914 = vmatpush.bf16.msra.mxu0 %v10473_v31  ;;  %5936 = vmatmul.bf16.vlgmr.msra.gmra.mxu1 %v13881_v55  ;;  %v11312_v55 = vld [vmem:[#allocation19 + $0x188] sm:$0xf]  ;;  %v12991_v36 = vld [vmem:[#allocation19 + $0x26c] sm:$0xf] }
 0x3d4   :  { %v11313_v5 = vor.u32 %v12966_v3, %v11312_v55  ;;  %v11052_v31 = vld [vmem:[#allocation16 + $0x5b0] sm:$0xf]  ;;  %v11012_v3 = vld [vmem:[#allocation16 + $0x560] sm:$0xf] }
 0x3d5   :  { %5963 = vmatpush.bf16.msra.mxu3 %v10813_v54  ;;  %v13064_v54 = vld [vmem:[#allocation19 + $0x4b0] sm:$0xf0] }
 0x3d6   :  { %7795 = vmatpush.bf16.msrb.mxu1 %v11313_v5  ;;  %v11705_v49 = vor.u32 %v13064_v54, %v11704_v52  ;;  %v11677_v5 = vor.u32 %v13057_v1, %v11676_v63  ;;  %v12956_v52 = vld [vmem:[#allocation19 + $0x154] sm:$0xf]  ;;  %v13019_v54 = vld [vmem:[#allocation19 + $0x34c] sm:$0xf]  ;;  %v11258_v63 = vld [vmem:[#allocation19 + $0x134] sm:$0xf0]  ;;  %v13928_v1 = vpop.f32.mrf.mxu1 }
 0x3d7   :  { %5915 = vmatpush.bf16.msra.mxu0 %v10453_v50  ;;  %v13001_v50 = vld [vmem:[#allocation19 + $0x2b8] sm:$0xf0] }
 0x3d8   :  { %5964 = vmatmul.bf16.vlgmr.msra.gmra.mxu3 %v13890_v22  ;;  %v12959_v22 = vld [vmem:[#allocation19 + $0x168] sm:$0xf0]  ;;  %v11453_v53 = vor.u32 %v13001_v50, %v11452_v48  ;;  %v13029_v48 = vld [vmem:[#allocation19 + $0x398] sm:$0xf0] }
 0x3d9   :  { %v11285_v37 = vor.u32 %v12959_v22, %v11284_v40  ;;  %7823 = vmatpush.bf16.msrb.mxu3 %v11761_v29  ;;  %v13916_v40 = vpop.f32.mrf.mxu2  ;;  %v11145_v22 = vor.u32 %v12924_v61, %v11144_v8  ;;  %v12878_v29 = vld [vmem:[#allocation16 + $0x520] sm:$0xf0] }
 0x3da   :  { %7812 = vmatpush.bf16.msrb.mxu2 %v11453_v53  ;;  %v11286_v53 = vld [vmem:[#allocation19 + $0x16c] sm:$0xf0] }
 0x3db   :  { %5916 = vmatpush.bf16.msra.mxu0 %v10433_v56  ;;  %7796 = vmatpush.bf16.msrb.mxu1 %v11285_v37  ;;  %v11032_v56 = vld [vmem:[#allocation16 + $0x588] sm:$0xf]  ;;  %v11648_v37 = vld [vmem:[#allocation19 + $0x428] sm:$0xf] }
 0x3dc   :  { %v11033_v55 = vor.u32 %v12893_v59, %v11032_v56  ;;  %v11538_v56 = vld [vmem:[#allocation19 + $0x364] sm:$0xf0]  ;;  %v13134_v59 = vld [vmem:[#allocation19 + $0x6e0] sm:$0xf0] }
 0x3dd   :  { %7824 = vmatpush.bf16.msrb.mxu3 %v11733_v38 }
 0x3de   :  { %v13936_v9 = vpop.f32.mrf.mxu1 }
 0x3df   :  { %5917 = vmatpush.bf16.msra.mxu0 %v10413_v46  ;;  %7797 = vmatpush.bf16.msrb.mxu1 %v11257_v20  ;;  %v11172_v46 = vld [vmem:[#allocation19 + $0x70] sm:$0xf]  ;;  %v11368_v20 = vld [vmem:[#allocation19 + $0x1f8] sm:$0xf] }
 0x3e0   :  { %v11173_v60 = vor.u32 %v12931_v44, %v11172_v46  ;;  %v11369_v18 = vor.u32 %v12980_v21, %v11368_v20  ;;  %v5645_v46 = vpop.f32.mrf.mxu0  ;;  %v11541_v44 = vor.u32 %v13019_v54, %v11538_v56  ;;  %v12921_v56 = vld [vmem:[#allocation19 + $0x3c] sm:$0xf] }
 0x3e1   :  { %7825 = vmatpush.bf16.msrb.mxu3 %v11705_v49  ;;  %v13920_v38 = vpop.f32.mrf.mxu2  ;;  %v11984_v49 = vld [vmem:[#allocation19 + $0x6c8] sm:$0xf] }
 0x3e3   :  { %5918 = vmatpush.bf16.msra.mxu0 %v10393_v30  ;;  %7798 = vmatpush.bf16.msrb.mxu1 %v11229_v27  ;;  %v11424_v30 = vld [vmem:[#allocation19 + $0x268] sm:$0xf]  ;;  %v11592_v27 = vld [vmem:[#allocation19 + $0x3b8] sm:$0xf] }
 0x3e5   :  { %7826 = vmatpush.bf16.msrb.mxu3 %v11677_v5  ;;  %v11956_v5 = vld [vmem:[#allocation19 + $0x690] sm:$0xf] }
 0x3e7   :  { %5919 = vmatpush.bf16.msra.mxu0 %v10373_v43  ;;  %7799 = vmatpush.bf16.msrb.mxu1 %v11201_v47  ;;  %v11425_v43 = vor.u32 %v12994_v62, %v11424_v30  ;;  %v11564_v47 = vld [vmem:[#allocation19 + $0x380] sm:$0xf]  ;;  %v4584_v30 = vperm.slane %v13924_v35, 0  ;;  %v12949_v62 = vld [vmem:[#allocation19 + $0x11c] sm:$0xf] }
 0x3e8   :  { %v11565_v50 = vor.u32 %v13029_v48, %v11564_v47  ;;  %v11872_v47 = vld [vmem:[#allocation19 + $0x5e8] sm:$0xf]  ;;  %v13106_v48 = vld [vmem:[#allocation19 + $0x600] sm:$0xf0] }
 0x3e9   :  { %7813 = vmatpush.bf16.msrb.mxu2 %v11425_v43  ;;  %v13012_v43 = vld [vmem:[#allocation19 + $0x314] sm:$0xf]  ;;  %v13930_v10 = vpop.f32.mrf.mxu2  ;;  %v5646_v20 = vadd.f32 %v5645_v46, %v4584_v30 }
 0x3eb   :  { %5920 = vmatpush.bf16.msra.mxu0 %v10353_v7  ;;  %7800 = vmatpush.bf16.msrb.mxu1 %v11173_v60  ;;  %v12888_v7 = vld [vmem:[#allocation16 + $0x570] sm:$0xf0]  ;;  %v11985_v60 = vor.u32 %v13134_v59, %v11984_v49  ;;  %v5660_v24 = vadd.f32 %v13918_v13, %v5646_v20  ;;  %v11146_v49 = vld [vmem:[#allocation19 + $0x54] sm:$0xf0]  ;;  %v12984_v59 = vld [vmem:[#allocation19 + $0x234] sm:$0xf] }
 0x3ec   :  { %v11342_v20 = vld [vmem:[#allocation19 + $0x1dc] sm:$0xf0] }
 0x3ed   :  { %7814 = vmatpush.bf16.msrb.mxu2 %v11397_v12  ;;  %v13005_v12 = vld [vmem:[#allocation19 + $0x2dc] sm:$0xf] }
 0x3ee   :  { %v11485_v19 = vor.u32 %v13005_v12, %v11482_v16  ;;  %v11816_v12 = vld [vmem:[#allocation19 + $0x578] sm:$0xf] }
 0x3ef   :  { %5921 = vmatpush.bf16.msra.mxu0 %v10333_v14  ;;  %v11013_v14 = vor.u32 %v12888_v7, %v11012_v3  ;;  %7801 = vmatpush.bf16.msrb.mxu1 %v11145_v22  ;;  %v11510_v3 = vld [vmem:[#allocation19 + $0x32c] sm:$0xf0]  ;;  %v13127_v7 = vld [vmem:[#allocation19 + $0x6a8] sm:$0xf0]  ;;  %v5644_v22 = vadd.f32 %v5643_v23, %v4584_v30  ;;  %v11202_v23 = vld [vmem:[#allocation19 + $0xc4] sm:$0xf0] }
 0x3f0   :  { %v11513_v8 = vor.u32 %v13012_v43, %v11510_v3  ;;  %v11957_v61 = vor.u32 %v13127_v7, %v11956_v5 }
 0x3f1   :  { %7815 = vmatpush.bf16.msrb.mxu2 %v11369_v18  ;;  %v12998_v18 = vld [vmem:[#allocation19 + $0x2a4] sm:$0xf]  ;;  %v13939_v13 = vpop.f32.mrf.mxu2 }
 0x3f2   :  { %5922 = vmatmul.bf16.vlgmr.msra.gmra.mxu0 %v13874_v4  ;;  %v11053_v4 = vor.u32 %v12898_v39, %v11052_v31  ;;  %v11593_v39 = vor.u32 %v13036_v34, %v11592_v27  ;;  %v5674_v27 = vadd.f32 %v13920_v38, %v5660_v24  ;;  %v12928_v34 = vld [vmem:[#allocation19 + $0x74] sm:$0xf]  ;;  %v4585_v38 = vperm.slane %v13924_v35, 1 }
 0x3f3   :  { %5970 = vmatpush.bf16.msrb.mxu0 %v11113_v17  ;;  %v11649_v17 = vor.u32 %v13050_v41, %v11648_v37  ;;  %7802 = vmatpush.bf16.msrb.mxu1 %v11117_v6  ;;  %v11230_v37 = vld [vmem:[#allocation19 + $0xfc] sm:$0xf0]  ;;  %v5658_v41 = vadd.f32 %v13914_v2, %v5644_v22 }
 0x3f4   :  { %v5714_v7 = vadd.f32 %v13928_v1, %v4585_v38  ;;  %v11118_v22 = vld [vmem:[#allocation19 + $0x1c] sm:$0xf0] }
 0x3f5   :  { %7827 = vmatpush.bf16.msrb.mxu3 %v11649_v17  ;;  %7816 = vmatpush.bf16.msrb.mxu2 %v11341_v33  ;;  %v11928_v17 = vld [vmem:[#allocation19 + $0x658] sm:$0xf]  ;;  %v5672_v21 = vadd.f32 %v13916_v40, %v5658_v41  ;;  %v13092_v41 = vld [vmem:[#allocation19 + $0x590] sm:$0xf0] }
 0x3f6   :  { %v11929_v6 = vor.u32 %v13120_v58, %v11928_v17  ;;  %v11817_v58 = vor.u32 %v13092_v41, %v11816_v12 }
 0x3f7   :  { %5971 = vmatpush.bf16.msrb.mxu0 %v11093_v28  ;;  %v10972_v28 = vld [vmem:[#allocation16 + $0x510] sm:$0xf] }
 0x3f8   :  { %v10973_v31 = vor.u32 %v12878_v29, %v10972_v28  ;;  %v11900_v29 = vld [vmem:[#allocation19 + $0x620] sm:$0xf] }
 0x3f9   :  { %7828 = vmatpush.bf16.msrb.mxu3 %v11621_v26  ;;  %7865 = vmatpush.bf16.msra.mxu2 %v11317_v57  ;;  %v11454_v26 = vld [vmem:[#allocation19 + $0x2bc] sm:$0xf0]  ;;  %v11901_v33 = vor.u32 %v13113_v32, %v11900_v29  ;;  %v11426_v57 = vld [vmem:[#allocation19 + $0x284] sm:$0xf0] }
 0x3fa   :  { %v11457_v28 = vor.u32 %v12998_v18, %v11454_v26  ;;  %v5716_v18 = vadd.f32 %v13936_v9, %v4585_v38 }
 0x3fb   :  { %5972 = vmatpush.bf16.msrb.mxu0 %v11073_v42  ;;  %v13922_v42 = vpop.f32.mrf.mxu3 }
 0x3fc   :  { %v5686_v2 = vadd.f32 %v13922_v42, %v5672_v21 }
 0x3fd   :  { %7829 = vmatpush.bf16.msrb.mxu3 %v11593_v39  ;;  %v11177_v39 = vor.u32 %v12928_v34, %v11174_v51 }
 0x3ff   :  { %5973 = vmatpush.bf16.msrb.mxu0 %v11053_v4  ;;  %v11289_v4 = vor.u32 %v12956_v52, %v11286_v53  ;;  %v11429_v52 = vor.u32 %v12991_v36, %v11426_v57  ;;  %v11873_v53 = vor.u32 %v13106_v48, %v11872_v47  ;;  %v4586_v36 = vperm.slane %v13924_v35, 2  ;;  %v13061_v47 = vld [vmem:[#allocation19 + $0x49c] sm:$0xf] }
 0x401   :  { %7830 = vmatpush.bf16.msrb.mxu3 %v11565_v50  ;;  %7866 = vmatpush.bf16.msra.mxu2 %v11289_v4 }
 0x403   :  { %5974 = vmatpush.bf16.msrb.mxu0 %v11033_v55  ;;  %v11261_v55 = vor.u32 %v12949_v62, %v11258_v63  ;;  %v5687_v11 = vpop.f32.mrf.mxu3  ;;  %v11844_v62 = vld [vmem:[#allocation19 + $0x5b0] sm:$0xf]  ;;  %v13099_v63 = vld [vmem:[#allocation19 + $0x5c8] sm:$0xf0] }
 0x404   :  { %v5688_v42 = vadd.f32 %v5687_v11, %v5674_v27  ;;  %v11845_v5 = vor.u32 %v13099_v63, %v11844_v62  ;;  %v12977_v11 = vld [vmem:[#allocation19 + $0x1fc] sm:$0xf]  ;;  %v13047_v62 = vld [vmem:[#allocation19 + $0x42c] sm:$0xf]  ;;  %v11650_v63 = vld [vmem:[#allocation19 + $0x444] sm:$0xf0] }
 0x405   :  { %7879 = vmatpush.bf16.msra.mxu3 %v11541_v44  ;;  %7867 = vmatpush.bf16.msra.mxu2 %v11261_v55  ;;  %v11149_v44 = vor.u32 %v12921_v56, %v11146_v49  ;;  %v11678_v56 = vld [vmem:[#allocation19 + $0x47c] sm:$0xf0] }
 0x407   :  { %5975 = vmatpush.bf16.msrb.mxu0 %v11013_v14 }
 0x409   :  { %7880 = vmatpush.bf16.msra.mxu3 %v11513_v8 }
 0x40b   :  { %5976 = vmatpush.bf16.msrb.mxu0 %v10993_v25  ;;  %v11205_v25 = vor.u32 %v12935_v15, %v11202_v23  ;;  %v11788_v15 = vld [vmem:[#allocation19 + $0x540] sm:$0xf]  ;;  %v13085_v23 = vld [vmem:[#allocation19 + $0x558] sm:$0xf0] }
 0x40d   :  { %7881 = vmatpush.bf16.msra.mxu3 %v11485_v19 }
 0x40f   :  { %5977 = vmatpush.bf16.msrb.mxu0 %v10973_v31  ;;  %v5699_v0 = vpop.f32.mrf.mxu0  ;;  %v5741_v31 = vpop.f32.mrf.mxu3 }
 0x410   :  { %v5700_v40 = vadd.f32 %v5699_v0, %v5686_v2  ;;  %v5769_v55 = vpop.f32.mrf.mxu1  ;;  %v5783_v0 = vpop.f32.mrf.mxu2  ;;  %v13075_v2 = vld [vmem:[#allocation19 + $0x50c] sm:$0xf] }
 0x411   :  { %7882 = vmatpush.bf16.msra.mxu3 %v11457_v28  ;;  %v5730_v28 = vadd.f32 %v13939_v13, %v5716_v18  ;;  %v11706_v13 = vld [vmem:[#allocation19 + $0x4b4] sm:$0xf0] }
 0x412   :  { %5978 = vmatmul.bf16.vlgmr.msrb.gmra.mxu0 %v13897_v45  ;;  %v12942_v45 = vld [vmem:[#allocation19 + $0xe4] sm:$0xf]  ;;  %vm5984_vm2 = vcmp.ge.f32.partialorder %v5700_v40, 0.0  ;;  %v5994_v54 = vmul.f32 0.2, %v5700_v40  ;;  %v11709_v48 = vor.u32 %v13061_v47, %v11706_v13 }
 0x413   :  { %7837 = vmatpush.bf16.msra.mxu0 %v11985_v60  ;;  %v11233_v14 = vor.u32 %v12942_v45, %v11230_v37  ;;  %v11398_v60 = vld [vmem:[#allocation19 + $0x24c] sm:$0xf0]  ;;  %v11370_v37 = vld [vmem:[#allocation19 + $0x214] sm:$0xf0]  ;;  %v13176_v13 = vld [vmem:[#allocation19 + $0x830] sm:$0xf0] }
 0x414   :  { %v11401_v30 = vor.u32 %v12984_v59, %v11398_v60  ;;  %v6004_v43 = vsel %vm5984_vm2, %v5700_v40, %v5994_v54  ;;  %v11373_v17 = vor.u32 %v12977_v11, %v11370_v37  ;;  %v13068_v40 = vld [vmem:[#allocation19 + $0x4d4] sm:$0xf]  ;;  %v11622_v11 = vld [vmem:[#allocation19 + $0x40c] sm:$0xf0]  ;;  %v12152_v47 = vld [vmem:[#allocation19 + $0x818] sm:$0xf] }
 0x415   :  { %7868 = vmatpush.bf16.msra.mxu2 %v11233_v14  ;;  %7883 = vmatpush.bf16.msra.mxu3 %v11429_v52  ;;  %v5728_v14 = vadd.f32 %v13930_v10, %v5714_v7  ;;  %v11789_v10 = vor.u32 %v13085_v23, %v11788_v15  ;;  %v11594_v15 = vld [vmem:[#allocation19 + $0x3d4] sm:$0xf0] }
 0x417   :  { %7838 = vmatpush.bf16.msra.mxu0 %v11957_v61  ;;  %v5701_v50 = vpop.f32.mrf.mxu0  ;;  %v12914_v61 = vld [vmem:[#allocation19 + $0x4] sm:$0xf]  ;;  %v5743_v1 = vpop.f32.mrf.mxu3  ;;  %v5742_v19 = vadd.f32 %v5741_v31, %v5728_v14  ;;  %v12208_v14 = vld [vmem:[#allocation19 + $0x888] sm:$0xf] }
 0x418   :  { %v5702_v4 = vadd.f32 %v5701_v50, %v5688_v42  ;;  %v11121_v45 = vor.u32 %v12914_v61, %v11118_v22  ;;  %v5771_v29 = vpop.f32.mrf.mxu1  ;;  %v5744_v32 = vadd.f32 %v5743_v1, %v5730_v28  ;;  %v5785_v42 = vpop.f32.mrf.mxu2  ;;  %v5784_v50 = vadd.f32 %v5783_v0, %v4586_v36  ;;  %v13040_v61 = vld [vmem:[#allocation19 + $0x3f4] sm:$0xf]  ;;  %v12210_v1 = vld [vmem:[#allocation19 + $0x8a4] sm:$0xf0] }
 0x419   :  { %7869 = vmatpush.bf16.msra.mxu2 %v11205_v25  ;;  %7884 = vmatpush.bf16.msra.mxu3 %v11401_v30  ;;  %v11762_v25 = vld [vmem:[#allocation19 + $0x524] sm:$0xf0]  ;;  %v11625_v12 = vor.u32 %v13040_v61, %v11622_v11  ;;  %v13180_v28 = vld [vmem:[#allocation19 + $0x854] sm:$0xf]  ;;  %v13159_v61 = vld [vmem:[#allocation19 + $0x7ac] sm:$0xf] }
 0x41a   :  { %vm5989_vm3 = vcmp.ge.f32.partialorder %v5702_v4, 0.0  ;;  %v5999_v46 = vmul.f32 0.2, %v5702_v4  ;;  %v11765_v26 = vor.u32 %v13075_v2, %v11762_v25  ;;  %v12180_v25 = vld [vmem:[#allocation19 + $0x850] sm:$0xf] }
 0x41b   :  { %7839 = vmatpush.bf16.msra.mxu0 %v11929_v6  ;;  %v12970_v6 = vld [vmem:[#allocation19 + $0x1c4] sm:$0xf] }
 0x41c   :  { %v6009_v3 = vsel %vm5989_vm3, %v5702_v4, %v5999_v46  ;;  %v11345_v21 = vor.u32 %v12970_v6, %v11342_v20  ;;  %v13054_v4 = vld [vmem:[#allocation19 + $0x464] sm:$0xf]  ;;  %v11320_v6 = vld [vmem:[#allocation19 + $0x190] sm:$0xf] }
 0x41d   :  { %7870 = vmatpush.bf16.msra.mxu2 %v11177_v39  ;;  %v13944_v8 = vpack.c.bf16 %v6009_v3, %v6004_v43  ;;  %7885 = vmatpush.bf16.msra.mxu3 %v11373_v17  ;;  %v5786_v3 = vadd.f32 %v5785_v42, %v4586_v36  ;;  %v13187_v17 = vld [vmem:[#allocation19 + $0x88c] sm:$0xf] }
 0x41e   :  { %v12213_v20 = vor.u32 %v13187_v17, %v12210_v1  ;;  %v11208_v17 = vld [vmem:[#allocation19 + $0xb0] sm:$0xf] }
 0x41f   :  { %7840 = vmatpush.bf16.msra.mxu0 %v11901_v33  ;;  %v5755_v16 = vpop.f32.mrf.mxu0  ;;  %7803 = vmatmul.bf16.vlgmr.msrb.gmra.mxu1 %v13944_v8  ;;  %v11734_v33 = vld [vmem:[#allocation19 + $0x4ec] sm:$0xf0]  ;;  %v5797_v31 = vpop.f32.mrf.mxu3 }
 0x420   :  { %v5756_v24 = vadd.f32 %v5755_v16, %v5742_v19  ;;  %v11737_v51 = vor.u32 %v13068_v40, %v11734_v33  ;;  %v5825_v49 = vpop.f32.mrf.mxu1  ;;  %v5839_v30 = vpop.f32.mrf.mxu2  ;;  %v13190_v16 = vld [vmem:[#allocation19 + $0x8a0] sm:$0xf0]  ;;  %v12068_v1 = vld [vmem:[#allocation19 + $0x770] sm:$0xf] }
 0x421   :  { %7871 = vmatpush.bf16.msra.mxu2 %v11149_v44  ;;  %7886 = vmatpush.bf16.msra.mxu3 %v11345_v21  ;;  %v11681_v44 = vor.u32 %v13054_v4, %v11678_v56  ;;  %v12209_v0 = vor.u32 %v13190_v16, %v12208_v14  ;;  %v13033_v21 = vld [vmem:[#allocation19 + $0x3bc] sm:$0xf]  ;;  %v13026_v33 = vld [vmem:[#allocation19 + $0x384] sm:$0xf]  ;;  %v12124_v56 = vld [vmem:[#allocation19 + $0x7e0] sm:$0xf] }
 0x422   :  { %v5770_v27 = vadd.f32 %v5769_v55, %v5756_v24  ;;  %v11653_v55 = vor.u32 %v13047_v62, %v11650_v63  ;;  %v12967_v24 = vld [vmem:[#allocation19 + $0x1a8] sm:$0xf0]  ;;  %v12953_v4 = vld [vmem:[#allocation19 + $0x138] sm:$0xf0] }
 0x423   :  { %7841 = vmatpush.bf16.msra.mxu0 %v11873_v53  ;;  %v5798_v53 = vadd.f32 %v5797_v31, %v5784_v50  ;;  %7851 = vmatpush.bf16.msra.mxu1 %v12209_v0  ;;  %v11321_v36 = vor.u32 %v12967_v24, %v11320_v6  ;;  %v11292_v31 = vld [vmem:[#allocation19 + $0x158] sm:$0xf]  ;;  %v13152_v6 = vld [vmem:[#allocation19 + $0x774] sm:$0xf] }
 0x424   :  { %v5995_v39 = vmul.f32 0.2, %v5770_v27  ;;  %vm5985_vm4 = vcmp.ge.f32.partialorder %v5770_v27, 0.0  ;;  %v12154_v50 = vld [vmem:[#allocation19 + $0x834] sm:$0xf0] }
 0x425   :  { %7872 = vmatpush.bf16.msra.mxu2 %v11121_v45 }
 0x426   :  { %v6005_v38 = vsel %vm5985_vm4, %v5770_v27, %v5995_v39  ;;  %v12182_v27 = vld [vmem:[#allocation19 + $0x86c] sm:$0xf0]  ;;  %v12960_v39 = vld [vmem:[#allocation19 + $0x170] sm:$0xf0] }
 0x427   :  { %7842 = vmatpush.bf16.msra.mxu0 %v11845_v5  ;;  %v5757_v34 = vpop.f32.mrf.mxu0  ;;  %v5799_v43 = vpop.f32.mrf.mxu3  ;;  %v12185_v40 = vor.u32 %v13180_v28, %v12182_v27  ;;  %v13148_v28 = vld [vmem:[#allocation19 + $0x750] sm:$0xf0] }
 0x428   :  { %v5758_v9 = vadd.f32 %v5757_v34, %v5744_v32  ;;  %v5800_v7 = vadd.f32 %v5799_v43, %v5786_v3  ;;  %v5827_v41 = vpop.f32.mrf.mxu1  ;;  %v5841_v19 = vpop.f32.mrf.mxu2  ;;  %v12946_v3 = vld [vmem:[#allocation19 + $0x100] sm:$0xf0] }
 0x42a   :  { %v5772_v57 = vadd.f32 %v5771_v29, %v5758_v9  ;;  %v11566_v9 = vld [vmem:[#allocation19 + $0x39c] sm:$0xf0] }
 0x42b   :  { %7843 = vmatpush.bf16.msra.mxu0 %v11817_v58 }
 0x42c   :  { %vm5990_vm5 = vcmp.ge.f32.partialorder %v5772_v57, 0.0  ;;  %v6000_v52 = vmul.f32 0.2, %v5772_v57 }
 0x42e   :  { %v6010_v54 = vsel %vm5990_vm5, %v5772_v57, %v6000_v52  ;;  %v11569_v57 = vor.u32 %v13026_v33, %v11566_v9  ;;  %v12153_v52 = vor.u32 %v13176_v13, %v12152_v47  ;;  %v11152_v9 = vld [vmem:[#allocation19 + $0x40] sm:$0xf]  ;;  %v13141_v13 = vld [vmem:[#allocation19 + $0x718] sm:$0xf0] }
 0x42f   :  { %7844 = vmatpush.bf16.msra.mxu0 %v11789_v10  ;;  %v13951_v59 = vpack.c.bf16 %v6010_v54, %v6005_v38  ;;  %v5811_v46 = vpop.f32.mrf.mxu0  ;;  %v11597_v10 = vor.u32 %v13033_v21, %v11594_v15  ;;  %v5853_v2 = vpop.f32.mrf.mxu3  ;;  %v11293_v38 = vor.u32 %v12960_v39, %v11292_v31  ;;  %v11264_v54 = vld [vmem:[#allocation19 + $0x120] sm:$0xf]  ;;  %v12070_v15 = vld [vmem:[#allocation19 + $0x78c] sm:$0xf0]  ;;  %v12925_v31 = vld [vmem:[#allocation19 + $0x58] sm:$0xf0] }
 0x430   :  { %v5812_v60 = vadd.f32 %v5811_v46, %v5798_v53  ;;  %v13166_v46 = vld [vmem:[#allocation19 + $0x7e4] sm:$0xf]  ;;  %v11265_v43 = vor.u32 %v12953_v4, %v11264_v54  ;;  %v5895_v0 = vpop.f32.mrf.mxu2  ;;  %v12012_v47 = vld [vmem:[#allocation19 + $0x700] sm:$0xf]  ;;  %v11986_v54 = vld [vmem:[#allocation19 + $0x6e4] sm:$0xf0] }
 0x431   :  { %7817 = vmatmul.bf16.vlgmr.msrb.gmra.mxu2 %v13951_v59 }
 0x432   :  { %v5826_v5 = vadd.f32 %v5825_v49, %v5812_v60  ;;  %7921 = vmatpush.bf16.msrb.mxu2 %v12213_v20  ;;  %v13169_v49 = vld [vmem:[#allocation19 + $0x7f8] sm:$0xf0] }
 0x433   :  { %7893 = vmatpush.bf16.msrb.mxu0 %v11765_v26  ;;  %v13183_v26 = vld [vmem:[#allocation19 + $0x868] sm:$0xf0]  ;;  %v12125_v60 = vor.u32 %v13169_v49, %v12124_v56 }
 0x434   :  { %v5840_v45 = vadd.f32 %v5839_v30, %v5826_v5  ;;  %v12181_v32 = vor.u32 %v13183_v26, %v12180_v25  ;;  %v12126_v30 = vld [vmem:[#allocation19 + $0x7fc] sm:$0xf0]  ;;  %v12096_v5 = vld [vmem:[#allocation19 + $0x7a8] sm:$0xf]  ;;  %v12040_v26 = vld [vmem:[#allocation19 + $0x738] sm:$0xf] }
 0x435   :  { %v12129_v63 = vor.u32 %v13166_v46, %v12126_v30  ;;  %v12041_v27 = vor.u32 %v13148_v28, %v12040_v26  ;;  %v11992_v46 = vld [vmem:[#allocation19 + $0x6d0] sm:$0xf]  ;;  %v11153_v30 = vor.u32 %v12925_v31, %v11152_v9  ;;  %v13009_v9 = vld [vmem:[#allocation19 + $0x2f8] sm:$0xf0] }
 0x436   :  { %vm5986_vm6 = vcmp.ge.f32.partialorder %v5840_v45, 0.0  ;;  %v5996_v23 = vmul.f32 0.2, %v5840_v45  ;;  %7852 = vmatpush.bf16.msra.mxu1 %v12181_v32  ;;  %7922 = vmatpush.bf16.msrb.mxu2 %v12185_v40  ;;  %v12042_v40 = vld [vmem:[#allocation19 + $0x754] sm:$0xf0] }
 0x437   :  { %7894 = vmatpush.bf16.msrb.mxu0 %v11737_v51  ;;  %v5813_v22 = vpop.f32.mrf.mxu0  ;;  %v5855_v62 = vpop.f32.mrf.mxu3 }
 0x438   :  { %v5814_v37 = vadd.f32 %v5813_v22, %v5800_v7  ;;  %v6006_v34 = vsel %vm5986_vm6, %v5840_v45, %v5996_v23  ;;  %v13162_v7 = vld [vmem:[#allocation19 + $0x7c0] sm:$0xf0]  ;;  %v12098_v45 = vld [vmem:[#allocation19 + $0x7c4] sm:$0xf0]  ;;  %v5897_v4 = vpop.f32.mrf.mxu2 }
 0x439   :  { %v12097_v11 = vor.u32 %v13162_v7, %v12096_v5  ;;  %v13191_v7 = vld [vmem:[#allocation19 + $0x8a8] sm:$0xf0] }
 0x43a   :  { %v5828_v58 = vadd.f32 %v5827_v41, %v5814_v37  ;;  %7853 = vmatpush.bf16.msra.mxu1 %v12153_v52  ;;  %v5881_v37 = vpop.f32.mrf.mxu1  ;;  %v12101_v41 = vor.u32 %v13159_v61, %v12098_v45  ;;  %v12013_v52 = vor.u32 %v13141_v13, %v12012_v47  ;;  %v11544_v61 = vld [vmem:[#allocation19 + $0x350] sm:$0xf]  ;;  %v12132_v13 = vld [vmem:[#allocation19 + $0x7e8] sm:$0xf] }
 0x43b   :  { %7895 = vmatpush.bf16.msrb.mxu0 %v11709_v48  ;;  %v13173_v48 = vld [vmem:[#allocation19 + $0x81c] sm:$0xf]  ;;  %v11958_v45 = vld [vmem:[#allocation19 + $0x6ac] sm:$0xf0] }
 0x43c   :  { %v5842_v18 = vadd.f32 %v5841_v19, %v5828_v58  ;;  %v12157_v53 = vor.u32 %v13173_v48, %v12154_v50  ;;  %v12939_v58 = vld [vmem:[#allocation19 + $0xc8] sm:$0xf0]  ;;  %v13138_v48 = vld [vmem:[#allocation19 + $0x704] sm:$0xf] }
 0x43d   :  { %v13155_v19 = vld [vmem:[#allocation19 + $0x788] sm:$0xf0]  ;;  %v11209_v24 = vor.u32 %v12939_v58, %v11208_v17 }
 0x43e   :  { %vm5991_vm7 = vcmp.ge.f32.partialorder %v5842_v18, 0.0  ;;  %v6001_v29 = vmul.f32 0.2, %v5842_v18  ;;  %7923 = vmatpush.bf16.msrb.mxu2 %v12157_v53  ;;  %7854 = vmatpush.bf16.msra.mxu1 %v12125_v60  ;;  %v12069_v21 = vor.u32 %v13155_v19, %v12068_v1  ;;  %v12014_v53 = vld [vmem:[#allocation19 + $0x71c] sm:$0xf0] }
 0x43f   :  { %7896 = vmatpush.bf16.msrb.mxu0 %v11681_v44  ;;  %v4587_v44 = vperm.slane %v13924_v35, 3  ;;  %v5909_v23 = vpop.f32.mrf.mxu3  ;;  %v12017_v56 = vor.u32 %v13138_v48, %v12014_v53  ;;  %v12188_v1 = vld [vmem:[#allocation19 + $0x858] sm:$0xf]  ;;  %v13184_v19 = vld [vmem:[#allocation19 + $0x870] sm:$0xf0] }
 0x440   :  { %v6011_v51 = vsel %vm5991_vm7, %v5842_v18, %v6001_v29  ;;  %v12073_v18 = vor.u32 %v13152_v6, %v12070_v15  ;;  %v13145_v29 = vld [vmem:[#allocation19 + $0x73c] sm:$0xf]  ;;  %v11516_v15 = vld [vmem:[#allocation19 + $0x318] sm:$0xf]  ;;  %v13170_v48 = vld [vmem:[#allocation19 + $0x800] sm:$0xf0] }
 0x441   :  { %v13955_v42 = vpack.c.bf16 %v6011_v51, %v6006_v34  ;;  %7873 = vmatmul.bf16.vlgmr.msra.gmra.mxu2 %v13944_v8  ;;  %v5854_v22 = vadd.f32 %v5853_v2, %v4587_v44  ;;  %v12932_v2 = vld [vmem:[#allocation19 + $0x90] sm:$0xf0]  ;;  %v5856_v32 = vadd.f32 %v5855_v62, %v4587_v44  ;;  %v12045_v34 = vor.u32 %v13145_v29, %v12042_v40  ;;  %v13135_v44 = vld [vmem:[#allocation19 + $0x6e8] sm:$0xf0]  ;;  %v11124_v62 = vld [vmem:[#allocation19 + $0x8] sm:$0xf] }
 0x442   :  { %7924 = vmatpush.bf16.msrb.mxu2 %v12129_v63  ;;  %7855 = vmatpush.bf16.msra.mxu1 %v12097_v11  ;;  %v5883_v39 = vpop.f32.mrf.mxu1  ;;  %v12918_v63 = vld [vmem:[#allocation19 + $0x20] sm:$0xf0]  ;;  %v13124_v11 = vld [vmem:[#allocation19 + $0x694] sm:$0xf]  ;;  %v12189_v29 = vor.u32 %v13184_v19, %v12188_v1  ;;  %v11874_v53 = vld [vmem:[#allocation19 + $0x604] sm:$0xf0] }
 0x443   :  { %7897 = vmatpush.bf16.msrb.mxu0 %v11653_v55  ;;  %7831 = vmatmul.bf16.vlgmr.msrb.gmra.mxu3 %v13955_v42  ;;  %v11236_v55 = vld [vmem:[#allocation19 + $0xe8] sm:$0xf]  ;;  %v11125_v17 = vor.u32 %v12918_v63, %v11124_v62  ;;  %v13096_v63 = vld [vmem:[#allocation19 + $0x5b4] sm:$0xf]  ;;  %v13093_v1 = vld [vmem:[#allocation19 + $0x598] sm:$0xf0] }
 0x444   :  { %7935 = vmatpush.bf16.msrb.mxu3 %v11321_v36  ;;  %v11237_v16 = vor.u32 %v12946_v3, %v11236_v55  ;;  %v11993_v55 = vor.u32 %v13135_v44, %v11992_v46  ;;  %v12133_v44 = vor.u32 %v13170_v48, %v12132_v13 }
 0x446   :  { %7925 = vmatpush.bf16.msrb.mxu2 %v12101_v41  ;;  %7856 = vmatpush.bf16.msra.mxu1 %v12069_v21  ;;  %v11961_v41 = vor.u32 %v13124_v11, %v11958_v45  ;;  %v12076_v45 = vld [vmem:[#allocation19 + $0x778] sm:$0xf] }
 0x447   :  { %7898 = vmatpush.bf16.msrb.mxu0 %v11625_v12  ;;  %v5911_v3 = vpop.f32.mrf.mxu3 }
 0x448   :  { %7936 = vmatpush.bf16.msrb.mxu3 %v11293_v38  ;;  %v13131_v38 = vld [vmem:[#allocation19 + $0x6cc] sm:$0xf] }
 0x449   :  { %v11989_v49 = vor.u32 %v13131_v38, %v11986_v54  ;;  %v11880_v38 = vld [vmem:[#allocation19 + $0x5f0] sm:$0xf]  ;;  %v11460_v54 = vld [vmem:[#allocation19 + $0x2a8] sm:$0xf] }
 0x44a   :  { %7926 = vmatpush.bf16.msrb.mxu2 %v12073_v18  ;;  %7857 = vmatpush.bf16.msra.mxu1 %v12041_v27  ;;  %v13117_v18 = vld [vmem:[#allocation19 + $0x65c] sm:$0xf] }
 0x44b   :  { %7899 = vmatpush.bf16.msrb.mxu0 %v11597_v10  ;;  %v11180_v10 = vld [vmem:[#allocation19 + $0x78] sm:$0xf]  ;;  %v13177_v27 = vld [vmem:[#allocation19 + $0x838] sm:$0xf0] }
 0x44c   :  { %7937 = vmatpush.bf16.msrb.mxu3 %v11265_v43  ;;  %v11181_v36 = vor.u32 %v12932_v2, %v11180_v10  ;;  %v12216_v43 = vld [vmem:[#allocation19 + $0x890] sm:$0xf]  ;;  %v11930_v10 = vld [vmem:[#allocation19 + $0x674] sm:$0xf0]  ;;  %v11936_v2 = vld [vmem:[#allocation19 + $0x660] sm:$0xf] }
 0x44d   :  { %v11933_v26 = vor.u32 %v13117_v18, %v11930_v10  ;;  %v11790_v18 = vld [vmem:[#allocation19 + $0x55c] sm:$0xf0]  ;;  %v11796_v10 = vld [vmem:[#allocation19 + $0x548] sm:$0xf] }
 0x44e   :  { %7927 = vmatpush.bf16.msrb.mxu2 %v12045_v34  ;;  %7858 = vmatpush.bf16.msra.mxu1 %v12013_v52  ;;  %v11902_v34 = vld [vmem:[#allocation19 + $0x63c] sm:$0xf0]  ;;  %v13103_v52 = vld [vmem:[#allocation19 + $0x5ec] sm:$0xf] }
 0x44f   :  { %7900 = vmatpush.bf16.msrb.mxu0 %v11569_v57  ;;  %v5867_v12 = vpop.f32.mrf.mxu0 }
 0x450   :  { %v5868_v14 = vadd.f32 %v5867_v12, %v5854_v22  ;;  %7938 = vmatpush.bf16.msrb.mxu3 %v11237_v16  ;;  %v13023_v12 = vld [vmem:[#allocation19 + $0x368] sm:$0xf0]  ;;  %v5937_v13 = vpop.f32.mrf.mxu1 }
 0x451   :  { %v11545_v21 = vor.u32 %v13023_v12, %v11544_v61  ;;  %v13100_v61 = vld [vmem:[#allocation19 + $0x5d0] sm:$0xf0] }
 0x452   :  { %v5882_v20 = vadd.f32 %v5881_v37, %v5868_v14  ;;  %7928 = vmatpush.bf16.msrb.mxu2 %v12017_v56  ;;  %7907 = vmatpush.bf16.msrb.mxu1 %v11989_v49  ;;  %v11964_v37 = vld [vmem:[#allocation19 + $0x698] sm:$0xf]  ;;  %v13128_v14 = vld [vmem:[#allocation19 + $0x6b0] sm:$0xf0]  ;;  %v11877_v56 = vor.u32 %v13103_v52, %v11874_v53  ;;  %v13107_v49 = vld [vmem:[#allocation19 + $0x608] sm:$0xf0] }
 0x453   :  { %7887 = vmatmul.bf16.vlgmr.msra.gmra.mxu3 %v13951_v59  ;;  %v11965_v58 = vor.u32 %v13128_v14, %v11964_v37  ;;  %v11881_v46 = vor.u32 %v13107_v49, %v11880_v38  ;;  %v13156_v37 = vld [vmem:[#allocation19 + $0x790] sm:$0xf0]  ;;  %v11818_v14 = vld [vmem:[#allocation19 + $0x594] sm:$0xf0]  ;;  %v13125_v38 = vld [vmem:[#allocation19 + $0x69c] sm:$0xf] }
 0x454   :  { %v5896_v25 = vadd.f32 %v5895_v0, %v5882_v20  ;;  %7939 = vmatpush.bf16.msrb.mxu3 %v11209_v24  ;;  %v12217_v0 = vor.u32 %v13191_v7, %v12216_v43  ;;  %v11846_v43 = vld [vmem:[#allocation19 + $0x5cc] sm:$0xf0]  ;;  %v11294_v49 = vld [vmem:[#allocation19 + $0x174] sm:$0xf0] }
 0x455   :  { %v11849_v7 = vor.u32 %v13096_v63, %v11846_v43 }
 0x456   :  { %v5910_v57 = vadd.f32 %v5909_v23, %v5896_v25  ;;  %7977 = vmatpush.bf16.msra.mxu2 %v11993_v55  ;;  %v13016_v23 = vld [vmem:[#allocation19 + $0x330] sm:$0xf0]  ;;  %7908 = vmatpush.bf16.msrb.mxu1 %v11961_v41  ;;  %v13121_v25 = vld [vmem:[#allocation19 + $0x678] sm:$0xf0]  ;;  %v11852_v55 = vld [vmem:[#allocation19 + $0x5b8] sm:$0xf] }
 0x457   :  { %v5869_v33 = vpop.f32.mrf.mxu0  ;;  %v11937_v28 = vor.u32 %v13121_v25, %v11936_v2  ;;  %v11517_v40 = vor.u32 %v13016_v23, %v11516_v15  ;;  %v13089_v41 = vld [vmem:[#allocation19 + $0x57c] sm:$0xf]  ;;  %v13082_v23 = vld [vmem:[#allocation19 + $0x544] sm:$0xf]  ;;  %v11376_v25 = vld [vmem:[#allocation19 + $0x200] sm:$0xf] }
 0x458   :  { %v5870_v51 = vadd.f32 %v5869_v33, %v5856_v32  ;;  %7940 = vmatpush.bf16.msrb.mxu3 %v11181_v36  ;;  %v5997_v5 = vmul.f32 0.2, %v5910_v57  ;;  %vm5987_vm8 = vcmp.ge.f32.partialorder %v5910_v57, 0.0  ;;  %v12160_v32 = vld [vmem:[#allocation19 + $0x820] sm:$0xf] }
 0x459   :  { %v13110_v33 = vld [vmem:[#allocation19 + $0x624] sm:$0xf]  ;;  %v11488_v36 = vld [vmem:[#allocation19 + $0x2e0] sm:$0xf]  ;;  %v12161_v47 = vor.u32 %v13177_v27, %v12160_v32 }
 0x45a   :  { %v5884_v50 = vadd.f32 %v5883_v39, %v5870_v51  ;;  %v6007_v6 = vsel %vm5987_vm8, %v5910_v57, %v5997_v5  ;;  %7978 = vmatpush.bf16.msra.mxu2 %v11965_v58  ;;  %7909 = vmatpush.bf16.msrb.mxu1 %v11933_v26  ;;  %v11908_v51 = vld [vmem:[#allocation19 + $0x628] sm:$0xf]  ;;  %v11905_v31 = vor.u32 %v13110_v33, %v11902_v34  ;;  %v13114_v39 = vld [vmem:[#allocation19 + $0x640] sm:$0xf0]  ;;  %v12995_v5 = vld [vmem:[#allocation19 + $0x288] sm:$0xf0] }
 0x45b   :  { %v11909_v57 = vor.u32 %v13114_v39, %v11908_v51  ;;  %v12988_v58 = vld [vmem:[#allocation19 + $0x250] sm:$0xf0]  ;;  %v12981_v26 = vld [vmem:[#allocation19 + $0x218] sm:$0xf0]  ;;  %v12020_v33 = vld [vmem:[#allocation19 + $0x708] sm:$0xf] }
 0x45c   :  { %v5898_v60 = vadd.f32 %v5897_v4, %v5884_v50  ;;  %7941 = vmatpush.bf16.msrb.mxu3 %v11153_v30  ;;  %v11489_v50 = vor.u32 %v13009_v9, %v11488_v36  ;;  %v13002_v4 = vld [vmem:[#allocation19 + $0x2c0] sm:$0xf0]  ;;  %v13163_v30 = vld [vmem:[#allocation19 + $0x7c8] sm:$0xf0]  ;;  %v11348_v51 = vld [vmem:[#allocation19 + $0x1c8] sm:$0xf] }
 0x45d   :  { %v11461_v62 = vor.u32 %v13002_v4, %v11460_v54  ;;  %v13142_v34 = vld [vmem:[#allocation19 + $0x720] sm:$0xf0]  ;;  %v13132_v9 = vld [vmem:[#allocation19 + $0x6d4] sm:$0xf]  ;;  %v4588_v39 = vperm.slane %v13924_v35, 4 }
 0x45e   :  { %v5912_v22 = vadd.f32 %v5911_v3, %v5898_v60  ;;  %7979 = vmatpush.bf16.msra.mxu2 %v11937_v28  ;;  %7910 = vmatpush.bf16.msrb.mxu1 %v11905_v31  ;;  %v12104_v60 = vld [vmem:[#allocation19 + $0x7b0] sm:$0xf]  ;;  %v11793_v28 = vor.u32 %v13082_v23, %v11790_v18  ;;  %v12974_v36 = vld [vmem:[#allocation19 + $0x1e0] sm:$0xf0]  ;;  %v12021_v48 = vor.u32 %v13142_v34, %v12020_v33  ;;  %v11966_v54 = vld [vmem:[#allocation19 + $0x6b4] sm:$0xf0] }
 0x45f   :  { %v11432_v3 = vld [vmem:[#allocation19 + $0x270] sm:$0xf]  ;;  %v12105_v11 = vor.u32 %v13163_v30, %v12104_v60  ;;  %v11969_v35 = vor.u32 %v13125_v38, %v11966_v54  ;;  %v13118_v30 = vld [vmem:[#allocation19 + $0x664] sm:$0xf]  ;;  %v11740_v54 = vld [vmem:[#allocation19 + $0x4d8] sm:$0xf] }
 0x460   :  { %vm5992_vm9 = vcmp.ge.f32.partialorder %v5912_v22, 0.0  ;;  %v6002_v16 = vmul.f32 0.2, %v5912_v22  ;;  %7942 = vmatpush.bf16.msrb.mxu3 %v11125_v17  ;;  %v11433_v12 = vor.u32 %v12995_v5, %v11432_v3  ;;  %v11404_v17 = vld [vmem:[#allocation19 + $0x238] sm:$0xf]  ;;  %v5965_v5 = vpop.f32.mrf.mxu3 }
 0x461   :  { %v11405_v15 = vor.u32 %v12988_v58, %v11404_v17  ;;  %v11994_v31 = vld [vmem:[#allocation19 + $0x6ec] sm:$0xf0]  ;;  %v11266_v3 = vld [vmem:[#allocation19 + $0x13c] sm:$0xf0] }
 0x462   :  { %v6012_v20 = vsel %vm5992_vm9, %v5912_v22, %v6002_v16  ;;  %7980 = vmatpush.bf16.msra.mxu2 %v11909_v57  ;;  %7911 = vmatpush.bf16.msrb.mxu1 %v11877_v56  ;;  %v11853_v22 = vor.u32 %v13100_v61, %v11852_v55  ;;  %v11824_v16 = vld [vmem:[#allocation19 + $0x580] sm:$0xf]  ;;  %v12964_v57 = vld [vmem:[#allocation19 + $0x194] sm:$0xf]  ;;  %v11997_v52 = vor.u32 %v13132_v9, %v11994_v31  ;;  %v12957_v56 = vld [vmem:[#allocation19 + $0x15c] sm:$0xf]  ;;  %v5939_v61 = vpop.f32.mrf.mxu1 }
 0x463   :  { %v13961_v24 = vpack.c.bf16 %v6012_v20, %v6007_v6  ;;  %7943 = vmatmul.bf16.vlgmr.msrb.gmra.mxu3 %v13944_v8  ;;  %v11825_v19 = vor.u32 %v13093_v1, %v11824_v16  ;;  %v12077_v6 = vor.u32 %v13156_v37, %v12076_v45  ;;  %v12048_v20 = vld [vmem:[#allocation19 + $0x740] sm:$0xf]  ;;  %v11297_v60 = vor.u32 %v12957_v56, %v11294_v49  ;;  %v12950_v55 = vld [vmem:[#allocation19 + $0x124] sm:$0xf]  ;;  %v11910_v45 = vld [vmem:[#allocation19 + $0x644] sm:$0xf0] }
 0x464   :  { %7991 = vmatpush.bf16.msra.mxu3 %v12217_v0  ;;  %v11821_v0 = vor.u32 %v13089_v41, %v11818_v14  ;;  %v12943_v41 = vld [vmem:[#allocation19 + $0xec] sm:$0xf]  ;;  %v11238_v14 = vld [vmem:[#allocation19 + $0x104] sm:$0xf0]  ;;  %v13104_v1 = vld [vmem:[#allocation19 + $0x5f4] sm:$0xf] }
 0x465   :  { %7845 = vmatmul.bf16.vlgmr.msra.gmra.mxu0 %v13961_v24  ;;  %v13076_v9 = vld [vmem:[#allocation19 + $0x514] sm:$0xf] }
 0x466   :  { %7949 = vmatpush.bf16.msra.mxu0 %v11545_v21  ;;  %7981 = vmatpush.bf16.msra.mxu2 %v11881_v46  ;;  %v13149_v21 = vld [vmem:[#allocation19 + $0x758] sm:$0xf0]  ;;  %v5951_v46 = vpop.f32.mrf.mxu2 }
 0x467   :  { %7912 = vmatpush.bf16.msrb.mxu1 %v11849_v7  ;;  %v12049_v27 = vor.u32 %v13149_v21, %v12048_v20  ;;  %v12936_v21 = vld [vmem:[#allocation19 + $0xb4] sm:$0xf] }
 0x468   :  { %7992 = vmatpush.bf16.msra.mxu3 %v12189_v29  ;;  %v13086_v29 = vld [vmem:[#allocation19 + $0x560] sm:$0xf0] }
 0x469   :  { %v11797_v32 = vor.u32 %v13086_v29, %v11796_v10  ;;  %v5967_v10 = vpop.f32.mrf.mxu3  ;;  %v12929_v29 = vld [vmem:[#allocation19 + $0x7c] sm:$0xf] }
 0x46a   :  { %7950 = vmatpush.bf16.msra.mxu0 %v11517_v40  ;;  %7982 = vmatpush.bf16.msra.mxu2 %v11853_v22  ;;  %v11377_v40 = vor.u32 %v12981_v26, %v11376_v25  ;;  %v11269_v22 = vor.u32 %v12950_v55, %v11266_v3  ;;  %v13097_v25 = vld [vmem:[#allocation19 + $0x5bc] sm:$0xf]  ;;  %v11854_v26 = vld [vmem:[#allocation19 + $0x5d4] sm:$0xf0]  ;;  %v13080_v3 = vld [vmem:[#allocation19 + $0x530] sm:$0xf0] }
 0x46b   :  { %7913 = vmatpush.bf16.msrb.mxu1 %v11821_v0  ;;  %v11241_v0 = vor.u32 %v12943_v41, %v11238_v14  ;;  %v11776_v55 = vld [vmem:[#allocation19 + $0x518] sm:$0xf]  ;;  %v13062_v14 = vld [vmem:[#allocation19 + $0x4a4] sm:$0xf] }
 0x46c   :  { %7993 = vmatpush.bf16.msra.mxu3 %v12161_v47  ;;  %v11322_v47 = vld [vmem:[#allocation19 + $0x1ac] sm:$0xf0]  ;;  %v11777_v41 = vor.u32 %v13080_v3, %v11776_v55  ;;  %v13034_v55 = vld [vmem:[#allocation19 + $0x3c4] sm:$0xf]  ;;  %v11602_v3 = vld [vmem:[#allocation19 + $0x3dc] sm:$0xf0] }
 0x46d   :  { %v11325_v53 = vor.u32 %v12964_v57, %v11322_v47  ;;  %v13090_v57 = vld [vmem:[#allocation19 + $0x584] sm:$0xf] }
 0x46e   :  { %7951 = vmatpush.bf16.msra.mxu0 %v11489_v50  ;;  %7983 = vmatpush.bf16.msra.mxu2 %v11825_v19  ;;  %v11349_v50 = vor.u32 %v12974_v36, %v11348_v51  ;;  %v5953_v58 = vpop.f32.mrf.mxu2  ;;  %v11882_v19 = vld [vmem:[#allocation19 + $0x60c] sm:$0xf0]  ;;  %v11857_v51 = vor.u32 %v13097_v25, %v11854_v26  ;;  %v13079_v36 = vld [vmem:[#allocation19 + $0x528] sm:$0xf0]  ;;  %v11720_v25 = vld [vmem:[#allocation19 + $0x4a8] sm:$0xf] }
 0x46f   :  { %v5923_v2 = vpop.f32.mrf.mxu0  ;;  %7914 = vmatpush.bf16.msrb.mxu1 %v11793_v28  ;;  %v11885_v18 = vor.u32 %v13104_v1, %v11882_v19  ;;  %v13181_v19 = vld [vmem:[#allocation19 + $0x85c] sm:$0xf]  ;;  %v13066_v26 = vld [vmem:[#allocation19 + $0x4c0] sm:$0xf0] }
 0x470   :  { %7994 = vmatpush.bf16.msra.mxu3 %v12133_v44  ;;  %v5924_v4 = vadd.f32 %v5923_v2, %v4588_v39 }
 0x472   :  { %7952 = vmatpush.bf16.msra.mxu0 %v11461_v62  ;;  %7984 = vmatpush.bf16.msra.mxu2 %v11797_v32  ;;  %v11938_v62 = vld [vmem:[#allocation19 + $0x67c] sm:$0xf0]  ;;  %v5938_v63 = vadd.f32 %v5937_v13, %v5924_v4  ;;  %v11182_v32 = vld [vmem:[#allocation19 + $0x94] sm:$0xf0] }
 0x473   :  { %v11941_v7 = vor.u32 %v13118_v30, %v11938_v62  ;;  %v11185_v31 = vor.u32 %v12929_v29, %v11182_v32  ;;  %v11826_v13 = vld [vmem:[#allocation19 + $0x59c] sm:$0xf0]  ;;  %v13083_v30 = vld [vmem:[#allocation19 + $0x54c] sm:$0xf]  ;;  %v11798_v62 = vld [vmem:[#allocation19 + $0x564] sm:$0xf0] }
 0x474   :  { %7995 = vmatpush.bf16.msra.mxu3 %v12105_v11  ;;  %v13111_v11 = vld [vmem:[#allocation19 + $0x62c] sm:$0xf]  ;;  %v11829_v49 = vor.u32 %v13090_v57, %v11826_v13  ;;  %v13174_v29 = vld [vmem:[#allocation19 + $0x824] sm:$0xf]  ;;  %v12162_v32 = vld [vmem:[#allocation19 + $0x83c] sm:$0xf0] }
 0x475   :  { %7901 = vmatmul.bf16.vlgmr.msrb.gmra.mxu0 %v13955_v42  ;;  %v11913_v17 = vor.u32 %v13111_v11, %v11910_v45  ;;  %v11801_v11 = vor.u32 %v13083_v30, %v11798_v62  ;;  %v11712_v45 = vld [vmem:[#allocation19 + $0x4a0] sm:$0xf]  ;;  %v12134_v13 = vld [vmem:[#allocation19 + $0x804] sm:$0xf0] }
 0x476   :  { %7953 = vmatpush.bf16.msra.mxu0 %v11433_v12  ;;  %v5952_v12 = vadd.f32 %v5951_v46, %v5938_v63  ;;  %v13072_v46 = vld [vmem:[#allocation19 + $0x4f0] sm:$0xf0]  ;;  %v12915_v63 = vld [vmem:[#allocation19 + $0xc] sm:$0xf]  ;;  %v11600_v62 = vld [vmem:[#allocation19 + $0x3c0] sm:$0xf] }
 0x477   :  { %v5925_v44 = vpop.f32.mrf.mxu0 }
 0x478   :  { %7996 = vmatpush.bf16.msra.mxu3 %v12077_v6  ;;  %v5926_v43 = vadd.f32 %v5925_v44, %v4588_v39  ;;  %v5966_v6 = vadd.f32 %v5965_v5, %v5952_v12  ;;  %v11770_v39 = vld [vmem:[#allocation19 + $0x52c] sm:$0xf0]  ;;  %v13069_v44 = vld [vmem:[#allocation19 + $0x4dc] sm:$0xf]  ;;  %v11741_v5 = vor.u32 %v13072_v46, %v11740_v54  ;;  %v11630_v54 = vld [vmem:[#allocation19 + $0x414] sm:$0xf0] }
 0x479   :  { %v11773_v56 = vor.u32 %v13076_v9, %v11770_v39  ;;  %v12165_v9 = vor.u32 %v13174_v29, %v12162_v32  ;;  %v13059_v39 = vld [vmem:[#allocation19 + $0x488] sm:$0xf0]  ;;  %v13052_v46 = vld [vmem:[#allocation19 + $0x450] sm:$0xf0]  ;;  %v11518_v29 = vld [vmem:[#allocation19 + $0x334] sm:$0xf0] }
 0x47a   :  { %7954 = vmatpush.bf16.msra.mxu0 %v11405_v15  ;;  %v5940_v37 = vadd.f32 %v5939_v61, %v5926_v43  ;;  %v11210_v15 = vld [vmem:[#allocation19 + $0xcc] sm:$0xf0]  ;;  %v11126_v43 = vld [vmem:[#allocation19 + $0x24] sm:$0xf0]  ;;  %v11524_v32 = vld [vmem:[#allocation19 + $0x320] sm:$0xf] }
 0x47b   :  { %v11213_v2 = vor.u32 %v12936_v21, %v11210_v15  ;;  %v12218_v61 = vld [vmem:[#allocation19 + $0x8ac] sm:$0xf0]  ;;  %v11129_v12 = vor.u32 %v12915_v63, %v11126_v43  ;;  %v11684_v21 = vld [vmem:[#allocation19 + $0x468] sm:$0xf]  ;;  %v13058_v15 = vld [vmem:[#allocation19 + $0x480] sm:$0xf0] }
 0x47c   :  { %7997 = vmatpush.bf16.msra.mxu3 %v12049_v27  ;;  %v5954_v20 = vadd.f32 %v5953_v58, %v5940_v37  ;;  %v13065_v37 = vld [vmem:[#allocation19 + $0x4b8] sm:$0xf0]  ;;  %v11748_v58 = vld [vmem:[#allocation19 + $0x4e0] sm:$0xf] }
 0x47d   :  { %v11713_v1 = vor.u32 %v13065_v37, %v11712_v45  ;;  %v13037_v63 = vld [vmem:[#allocation19 + $0x3d8] sm:$0xf0]  ;;  %v12078_v45 = vld [vmem:[#allocation19 + $0x794] sm:$0xf0]  ;;  %v11572_v37 = vld [vmem:[#allocation19 + $0x388] sm:$0xf] }
 0x47e   :  { %7955 = vmatpush.bf16.msra.mxu0 %v11377_v40  ;;  %v5968_v28 = vadd.f32 %v5967_v10, %v5954_v20  ;;  %v11768_v40 = vld [vmem:[#allocation19 + $0x510] sm:$0xf]  ;;  %v11686_v10 = vld [vmem:[#allocation19 + $0x484] sm:$0xf0] }
 0x47f   :  { %v11769_v38 = vor.u32 %v13079_v36, %v11768_v40  ;;  %v11656_v40 = vld [vmem:[#allocation19 + $0x430] sm:$0xf] }
 0x480   :  { %7998 = vmatpush.bf16.msra.mxu3 %v12021_v48  ;;  %v12922_v48 = vld [vmem:[#allocation19 + $0x44] sm:$0xf]  ;;  %v11658_v36 = vld [vmem:[#allocation19 + $0x44c] sm:$0xf0] }
 0x482   :  { %7956 = vmatpush.bf16.msra.mxu0 %v11349_v50  ;;  %v11154_v50 = vld [vmem:[#allocation19 + $0x5c] sm:$0xf0] }
 0x484   :  { %8047 = vmatpush.bf16.msrb.mxu3 %v11997_v52 }
 0x485   :  { %7957 = vmatmul.bf16.vlgmr.msra.gmra.mxu0 %v13951_v59 }
 0x486   :  { %8005 = vmatpush.bf16.msrb.mxu0 %v11325_v53 }
 0x488   :  { %8048 = vmatpush.bf16.msrb.mxu3 %v11969_v35  ;;  %v11742_v35 = vld [vmem:[#allocation19 + $0x4f4] sm:$0xf0] }
 0x48a   :  { %8006 = vmatpush.bf16.msrb.mxu0 %v11297_v60  ;;  %v11157_v60 = vor.u32 %v12922_v48, %v11154_v50  ;;  %v11628_v50 = vld [vmem:[#allocation19 + $0x3f8] sm:$0xf] }
 0x48c   :  { %8049 = vmatpush.bf16.msrb.mxu3 %v11941_v7  ;;  %v13188_v7 = vld [vmem:[#allocation19 + $0x894] sm:$0xf] }
 0x48e   :  { %8007 = vmatpush.bf16.msrb.mxu0 %v11269_v22  ;;  %v11745_v22 = vor.u32 %v13069_v44, %v11742_v35  ;;  %v13160_v35 = vld [vmem:[#allocation19 + $0x7b4] sm:$0xf] }
 0x48f   :  { %v5979_v16 = vpop.f32.mrf.mxu0 }
 0x490   :  { %v5980_v23 = vadd.f32 %v5979_v16, %v5966_v6  ;;  %8050 = vmatpush.bf16.msrb.mxu3 %v11913_v17  ;;  %v11714_v16 = vld [vmem:[#allocation19 + $0x4bc] sm:$0xf0]  ;;  %v12221_v17 = vor.u32 %v13188_v7, %v12218_v61  ;;  %v12190_v6 = vld [vmem:[#allocation19 + $0x874] sm:$0xf0]  ;;  %v13045_v61 = vld [vmem:[#allocation19 + $0x418] sm:$0xf0] }
 0x491   :  { %v11717_v20 = vor.u32 %v13062_v14, %v11714_v16  ;;  %v11636_v7 = vld [vmem:[#allocation19 + $0x400] sm:$0xf]  ;;  %v13027_v14 = vld [vmem:[#allocation19 + $0x38c] sm:$0xf]  ;;  %v11574_v16 = vld [vmem:[#allocation19 + $0x3a4] sm:$0xf0] }
 0x492   :  { %8008 = vmatpush.bf16.msrb.mxu0 %v11241_v0  ;;  %v5998_v33 = vmul.f32 0.2, %v5980_v23  ;;  %vm5988_vm10 = vcmp.ge.f32.partialorder %v5980_v23, 0.0  ;;  %v13073_v0 = vld [vmem:[#allocation19 + $0x4f8] sm:$0xf0] }
 0x494   :  { %8051 = vmatpush.bf16.msrb.mxu3 %v11885_v18  ;;  %v6008_v52 = vsel %vm5988_vm10, %v5980_v23, %v5998_v33  ;;  %v11749_v23 = vor.u32 %v13073_v0, %v11748_v58  ;;  %v13055_v18 = vld [vmem:[#allocation19 + $0x46c] sm:$0xf]  ;;  %v13020_v58 = vld [vmem:[#allocation19 + $0x354] sm:$0xf]  ;;  %v11546_v0 = vld [vmem:[#allocation19 + $0x36c] sm:$0xf0] }
 0x495   :  { %v13051_v33 = vld [vmem:[#allocation19 + $0x448] sm:$0xf0] }
 0x496   :  { %8009 = vmatpush.bf16.msrb.mxu0 %v11213_v2  ;;  %v12193_v2 = vor.u32 %v13181_v19, %v12190_v6  ;;  %v11657_v57 = vor.u32 %v13051_v33, %v11656_v40  ;;  %v13024_v6 = vld [vmem:[#allocation19 + $0x370] sm:$0xf0]  ;;  %v11580_v33 = vld [vmem:[#allocation19 + $0x390] sm:$0xf] }
 0x497   :  { %v5981_v27 = vpop.f32.mrf.mxu0 }
 0x498   :  { %v5982_v34 = vadd.f32 %v5981_v27, %v5968_v28  ;;  %8052 = vmatpush.bf16.msrb.mxu3 %v11857_v51  ;;  %v11685_v28 = vor.u32 %v13058_v15, %v11684_v21  ;;  %v11689_v27 = vor.u32 %v13055_v18, %v11686_v10  ;;  %v13048_v51 = vld [vmem:[#allocation19 + $0x434] sm:$0xf]  ;;  %v13038_v21 = vld [vmem:[#allocation19 + $0x3e0] sm:$0xf0]  ;;  %v12050_v18 = vld [vmem:[#allocation19 + $0x75c] sm:$0xf0]  ;;  %v11577_v10 = vor.u32 %v13027_v14, %v11574_v16 }
 0x499   :  { %v11661_v48 = vor.u32 %v13048_v51, %v11658_v36  ;;  %v13139_v51 = vld [vmem:[#allocation19 + $0x70c] sm:$0xf]  ;;  %v12022_v36 = vld [vmem:[#allocation19 + $0x724] sm:$0xf0]  ;;  %v11434_v14 = vld [vmem:[#allocation19 + $0x28c] sm:$0xf0] }
 0x49a   :  { %vm5993_vm11 = vcmp.ge.f32.partialorder %v5982_v34, 0.0  ;;  %v6003_v47 = vmul.f32 0.2, %v5982_v34  ;;  %8010 = vmatpush.bf16.msrb.mxu0 %v11185_v31  ;;  %v11692_v31 = vld [vmem:[#allocation19 + $0x470] sm:$0xf] }
 0x49c   :  { %v6013_v53 = vsel %vm5993_vm11, %v5982_v34, %v6003_v47  ;;  %8053 = vmatpush.bf16.msrb.mxu3 %v11829_v49  ;;  %v11721_v34 = vor.u32 %v13066_v26, %v11720_v25  ;;  %v13167_v47 = vld [vmem:[#allocation19 + $0x7ec] sm:$0xf]  ;;  %v11664_v49 = vld [vmem:[#allocation19 + $0x438] sm:$0xf]  ;;  %v13013_v25 = vld [vmem:[#allocation19 + $0x31c] sm:$0xf] }
 0x49d   :  { %v13968_v4 = vpack.c.bf16 %v6013_v53, %v6008_v52  ;;  %v13044_v52 = vld [vmem:[#allocation19 + $0x410] sm:$0xf0]  ;;  %v11693_v53 = vor.u32 %v13059_v39, %v11692_v31  ;;  %v11665_v43 = vor.u32 %v13052_v46, %v11664_v49  ;;  %v11554_v31 = vld [vmem:[#allocation19 + $0x374] sm:$0xf0]  ;;  %v11521_v39 = vor.u32 %v13013_v25, %v11518_v29  ;;  %v13014_v46 = vld [vmem:[#allocation19 + $0x324] sm:$0xf] }
 0x49e   :  { %8011 = vmatpush.bf16.msrb.mxu0 %v11157_v60  ;;  %v11629_v44 = vor.u32 %v13044_v52, %v11628_v50  ;;  %v12106_v60 = vld [vmem:[#allocation19 + $0x7cc] sm:$0xf0]  ;;  %v13006_v50 = vld [vmem:[#allocation19 + $0x2e4] sm:$0xf]  ;;  %v11490_v52 = vld [vmem:[#allocation19 + $0x2fc] sm:$0xf0] }
 0x49f   :  { %7859 = vmatmul.bf16.vlgmr.msra.gmra.mxu1 %v13968_v4  ;;  %7929 = vmatmul.bf16.vlgmr.msrb.gmra.mxu2 %v13968_v4  ;;  %v12989_v25 = vld [vmem:[#allocation19 + $0x258] sm:$0xf0]  ;;  %v11442_v29 = vld [vmem:[#allocation19 + $0x294] sm:$0xf0] }
 0x4a0   :  { %7963 = vmatpush.bf16.msra.mxu1 %v11769_v38  ;;  %7999 = vmatmul.bf16.vlgmr.msra.gmra.mxu3 %v13968_v4  ;;  %v13041_v38 = vld [vmem:[#allocation19 + $0x3fc] sm:$0xf] }
 0x4a1   :  { %8033 = vmatpush.bf16.msrb.mxu2 %v11773_v56  ;;  %8054 = vmatpush.bf16.msrb.mxu3 %v11801_v11  ;;  %v12137_v56 = vor.u32 %v13167_v47, %v12134_v13  ;;  %v11633_v30 = vor.u32 %v13041_v38, %v11630_v54  ;;  %v13153_v11 = vld [vmem:[#allocation19 + $0x77c] sm:$0xf]  ;;  %v13136_v47 = vld [vmem:[#allocation19 + $0x6f0] sm:$0xf0]  ;;  %v11496_v54 = vld [vmem:[#allocation19 + $0x2e8] sm:$0xf] }
 0x4a2   :  { %8012 = vmatpush.bf16.msrb.mxu0 %v11129_v12  ;;  %v11605_v12 = vor.u32 %v13034_v55, %v11602_v3  ;;  %v12081_v19 = vor.u32 %v13153_v11, %v12078_v45  ;;  %v11468_v3 = vld [vmem:[#allocation19 + $0x2b0] sm:$0xf]  ;;  %v11944_v45 = vld [vmem:[#allocation19 + $0x668] sm:$0xf] }
 0x4a4   :  { %7964 = vmatpush.bf16.msra.mxu1 %v11741_v5  ;;  %v12109_v5 = vor.u32 %v13160_v35, %v12106_v60  ;;  %v11493_v35 = vor.u32 %v13006_v50, %v11490_v52  ;;  %v11972_v60 = vld [vmem:[#allocation19 + $0x6a0] sm:$0xf]  ;;  %v13101_v50 = vld [vmem:[#allocation19 + $0x5d8] sm:$0xf0]  ;;  %v12971_v52 = vld [vmem:[#allocation19 + $0x1cc] sm:$0xf] }
 0x4a5   :  { %8034 = vmatpush.bf16.msrb.mxu2 %v11745_v22  ;;  %8103 = vmatpush.bf16.msra.mxu3 %v11777_v41  ;;  %v11601_v22 = vor.u32 %v13037_v63, %v11600_v62  ;;  %v13030_v41 = vld [vmem:[#allocation19 + $0x3a0] sm:$0xf0]  ;;  %v12999_v63 = vld [vmem:[#allocation19 + $0x2ac] sm:$0xf] }
 0x4a6   :  { %8061 = vmatpush.bf16.msra.mxu0 %v12221_v17  ;;  %v11637_v17 = vor.u32 %v13045_v61, %v11636_v7  ;;  %v11573_v15 = vor.u32 %v13030_v41, %v11572_v37  ;;  %v13007_v61 = vld [vmem:[#allocation19 + $0x2ec] sm:$0xf]  ;;  %v13122_v37 = vld [vmem:[#allocation19 + $0x680] sm:$0xf0]  ;;  %v12992_v41 = vld [vmem:[#allocation19 + $0x274] sm:$0xf] }
 0x4a7   :  { %8013 = vmatmul.bf16.vlgmr.msrb.gmra.mxu0 %v13944_v8 }
 0x4a8   :  { %7965 = vmatpush.bf16.msra.mxu1 %v11713_v1  ;;  %v11552_v1 = vld [vmem:[#allocation19 + $0x358] sm:$0xf] }
 0x4a9   :  { %8035 = vmatpush.bf16.msrb.mxu2 %v11717_v20  ;;  %8104 = vmatpush.bf16.msra.mxu3 %v11749_v23  ;;  %v11608_v20 = vld [vmem:[#allocation19 + $0x3c8] sm:$0xf]  ;;  %v13146_v23 = vld [vmem:[#allocation19 + $0x744] sm:$0xf]  ;;  %v11553_v26 = vor.u32 %v13024_v6, %v11552_v1  ;;  %v13000_v1 = vld [vmem:[#allocation19 + $0x2b4] sm:$0xf]  ;;  %v11437_v6 = vor.u32 %v12992_v41, %v11434_v14 }
 0x4aa   :  { %8062 = vmatpush.bf16.msra.mxu0 %v12193_v2  ;;  %v11549_v2 = vor.u32 %v13020_v58, %v11546_v0  ;;  %v12053_v40 = vor.u32 %v13146_v23, %v12050_v18  ;;  %v12996_v58 = vld [vmem:[#allocation19 + $0x290] sm:$0xf0]  ;;  %v11945_v0 = vor.u32 %v13122_v37, %v11944_v45  ;;  %v12985_v23 = vld [vmem:[#allocation19 + $0x23c] sm:$0xf]  ;;  %v11406_v18 = vld [vmem:[#allocation19 + $0x254] sm:$0xf0] }
 0x4ab   :  { %v12961_v45 = vld [vmem:[#allocation19 + $0x178] sm:$0xf0]  ;;  %v12958_v37 = vld [vmem:[#allocation19 + $0x164] sm:$0xf]  ;;  %v12972_v14 = vld [vmem:[#allocation19 + $0x1d4] sm:$0xf] }
 0x4ac   :  { %7966 = vmatpush.bf16.msra.mxu1 %v11685_v28  ;;  %v11609_v28 = vor.u32 %v13038_v21, %v11608_v20  ;;  %v11916_v20 = vld [vmem:[#allocation19 + $0x630] sm:$0xf]  ;;  %v13115_v21 = vld [vmem:[#allocation19 + $0x648] sm:$0xf0] }
 0x4ad   :  { %8036 = vmatpush.bf16.msrb.mxu2 %v11689_v27  ;;  %8105 = vmatpush.bf16.msra.mxu3 %v11721_v34  ;;  %v13017_v27 = vld [vmem:[#allocation19 + $0x338] sm:$0xf0]  ;;  %v13031_v34 = vld [vmem:[#allocation19 + $0x3a8] sm:$0xf0] }
 0x4ae   :  { %8063 = vmatpush.bf16.msra.mxu0 %v12165_v9  ;;  %v13021_v9 = vld [vmem:[#allocation19 + $0x35c] sm:$0xf]  ;;  %v11525_v13 = vor.u32 %v13017_v27, %v11524_v32  ;;  %v11409_v32 = vor.u32 %v12985_v23, %v11406_v18  ;;  %v11888_v27 = vld [vmem:[#allocation19 + $0x5f8] sm:$0xf]  ;;  %v11272_v23 = vld [vmem:[#allocation19 + $0x128] sm:$0xf] }
 0x4af   :  { %7915 = vmatmul.bf16.vlgmr.msrb.gmra.mxu1 %v13961_v24  ;;  %7985 = vmatmul.bf16.vlgmr.msra.gmra.mxu2 %v13961_v24  ;;  %v11557_v38 = vor.u32 %v13021_v9, %v11554_v31  ;;  %v11384_v9 = vld [vmem:[#allocation19 + $0x208] sm:$0xf]  ;;  %v12982_v31 = vld [vmem:[#allocation19 + $0x220] sm:$0xf0] }
 0x4b0   :  { %7967 = vmatpush.bf16.msra.mxu1 %v11657_v57  ;;  %8055 = vmatmul.bf16.vlgmr.msrb.gmra.mxu3 %v13961_v24  ;;  %v12000_v57 = vld [vmem:[#allocation19 + $0x6d8] sm:$0xf]  ;;  %v12954_v18 = vld [vmem:[#allocation19 + $0x140] sm:$0xf0] }
 0x4b1   :  { %8037 = vmatpush.bf16.msrb.mxu2 %v11661_v48  ;;  %8106 = vmatpush.bf16.msra.mxu3 %v11693_v53  ;;  %v11581_v48 = vor.u32 %v13031_v34, %v11580_v33  ;;  %v12025_v53 = vor.u32 %v13139_v51, %v12022_v36  ;;  %v12001_v49 = vor.u32 %v13136_v47, %v12000_v57  ;;  %v12978_v34 = vld [vmem:[#allocation19 + $0x204] sm:$0xf]  ;;  %v11378_v51 = vld [vmem:[#allocation19 + $0x21c] sm:$0xf0] }
 0x4b2   :  { %8064 = vmatpush.bf16.msra.mxu0 %v12137_v56  ;;  %v13010_v56 = vld [vmem:[#allocation19 + $0x300] sm:$0xf0]  ;;  %v11414_v47 = vld [vmem:[#allocation19 + $0x25c] sm:$0xf0] }
 0x4b3   :  { %v11497_v62 = vor.u32 %v13010_v56, %v11496_v54  ;;  %v12986_v57 = vld [vmem:[#allocation19 + $0x244] sm:$0xf]  ;;  %v11356_v54 = vld [vmem:[#allocation19 + $0x1d0] sm:$0xf]  ;;  %v12975_v56 = vld [vmem:[#allocation19 + $0x1e8] sm:$0xf0] }
 0x4b4   :  { %7968 = vmatpush.bf16.msra.mxu1 %v11629_v44  ;;  %v11526_v44 = vld [vmem:[#allocation19 + $0x33c] sm:$0xf0] }
 0x4b5   :  { %8038 = vmatpush.bf16.msrb.mxu2 %v11633_v30  ;;  %8107 = vmatpush.bf16.msra.mxu3 %v11665_v43  ;;  %v13129_v30 = vld [vmem:[#allocation19 + $0x6b8] sm:$0xf0]  ;;  %v11462_v43 = vld [vmem:[#allocation19 + $0x2c4] sm:$0xf0]  ;;  %v11529_v55 = vor.u32 %v13014_v46, %v11526_v44  ;;  %v11328_v46 = vld [vmem:[#allocation19 + $0x198] sm:$0xf] }
 0x4b6   :  { %8065 = vmatpush.bf16.msra.mxu0 %v12109_v5  ;;  %v13003_v5 = vld [vmem:[#allocation19 + $0x2c8] sm:$0xf0]  ;;  %v11973_v7 = vor.u32 %v13129_v30, %v11972_v60  ;;  %v11465_v11 = vor.u32 %v12999_v63, %v11462_v43  ;;  %v12968_v44 = vld [vmem:[#allocation19 + $0x1b0] sm:$0xf0]  ;;  %v11330_v30 = vld [vmem:[#allocation19 + $0x1b4] sm:$0xf0] }
 0x4b7   :  { %v11386_v63 = vld [vmem:[#allocation19 + $0x224] sm:$0xf0] }
 0x4b8   :  { %7969 = vmatpush.bf16.msra.mxu1 %v11601_v22  ;;  %v11498_v22 = vld [vmem:[#allocation19 + $0x304] sm:$0xf0] }
 0x4b9   :  { %8039 = vmatpush.bf16.msrb.mxu2 %v11605_v12  ;;  %8108 = vmatpush.bf16.msra.mxu3 %v11637_v17  ;;  %v11469_v12 = vor.u32 %v13003_v5, %v11468_v3  ;;  %v11501_v16 = vor.u32 %v13007_v61, %v11498_v22  ;;  %v11440_v17 = vld [vmem:[#allocation19 + $0x278] sm:$0xf]  ;;  %v13094_v3 = vld [vmem:[#allocation19 + $0x5a0] sm:$0xf0]  ;;  %v11357_v5 = vor.u32 %v12975_v56, %v11356_v54  ;;  %v11300_v61 = vld [vmem:[#allocation19 + $0x160] sm:$0xf] }
 0x4ba   :  { %8066 = vmatpush.bf16.msra.mxu0 %v12081_v19  ;;  %v11470_v19 = vld [vmem:[#allocation19 + $0x2cc] sm:$0xf0]  ;;  %v12940_v54 = vld [vmem:[#allocation19 + $0xd0] sm:$0xf0] }
 0x4bc   :  { %7970 = vmatpush.bf16.msra.mxu1 %v11573_v15  ;;  %v11441_v15 = vor.u32 %v12996_v58, %v11440_v17  ;;  %v11804_v17 = vld [vmem:[#allocation19 + $0x550] sm:$0xf]  ;;  %v13087_v58 = vld [vmem:[#allocation19 + $0x568] sm:$0xf0] }
 0x4bd   :  { %8040 = vmatpush.bf16.msrb.mxu2 %v11577_v10  ;;  %8109 = vmatpush.bf16.msra.mxu3 %v11609_v28  ;;  %v11473_v10 = vor.u32 %v13000_v1, %v11470_v19  ;;  %v12993_v28 = vld [vmem:[#allocation19 + $0x27c] sm:$0xf]  ;;  %v11301_v19 = vor.u32 %v12961_v45, %v11300_v61  ;;  %v11190_v61 = vld [vmem:[#allocation19 + $0x9c] sm:$0xf0] }
 0x4be   :  { %8067 = vmatpush.bf16.msra.mxu0 %v12053_v40  ;;  %v13108_v40 = vld [vmem:[#allocation19 + $0x610] sm:$0xf0]  ;;  %v11445_v36 = vor.u32 %v12993_v28, %v11442_v29  ;;  %v12969_v1 = vld [vmem:[#allocation19 + $0x1b8] sm:$0xf0]  ;;  %v11308_v29 = vld [vmem:[#allocation19 + $0x168] sm:$0xf] }
 0x4bf   :  { %7971 = vmatmul.bf16.vlgmr.msra.gmra.mxu1 %v13955_v42  ;;  %v12941_v45 = vld [vmem:[#allocation19 + $0xd8] sm:$0xf0] }
 0x4c0   :  { %8019 = vmatpush.bf16.msrb.mxu1 %v11549_v2  ;;  %8041 = vmatmul.bf16.vlgmr.msrb.gmra.mxu2 %v13955_v42  ;;  %v11412_v2 = vld [vmem:[#allocation19 + $0x240] sm:$0xf] }
 0x4c1   :  { %8089 = vmatpush.bf16.msra.mxu2 %v11553_v26  ;;  %8110 = vmatpush.bf16.msra.mxu3 %v11581_v48  ;;  %v11917_v26 = vor.u32 %v13115_v21, %v11916_v20  ;;  %v11413_v33 = vor.u32 %v12989_v25, %v11412_v2  ;;  %v11860_v48 = vld [vmem:[#allocation19 + $0x5c0] sm:$0xf]  ;;  %v11778_v20 = vld [vmem:[#allocation19 + $0x534] sm:$0xf0]  ;;  %v12951_v25 = vld [vmem:[#allocation19 + $0x12c] sm:$0xf] }
 0x4c2   :  { %8068 = vmatpush.bf16.msra.mxu0 %v12025_v53  ;;  %v11385_v53 = vor.u32 %v12982_v31, %v11384_v9  ;;  %v11861_v60 = vor.u32 %v13101_v50, %v11860_v48  ;;  %v12944_v31 = vld [vmem:[#allocation19 + $0xf4] sm:$0xf]  ;;  %v13063_v50 = vld [vmem:[#allocation19 + $0x4ac] sm:$0xf] }
 0x4c4   :  { %8020 = vmatpush.bf16.msrb.mxu1 %v11521_v39  ;;  %8111 = vmatmul.bf16.vlgmr.msra.gmra.mxu3 %v13955_v42  ;;  %v11889_v39 = vor.u32 %v13108_v40, %v11888_v27  ;;  %v11273_v27 = vor.u32 %v12954_v18, %v11272_v23  ;;  %v13070_v40 = vld [vmem:[#allocation19 + $0x4e4] sm:$0xf]  ;;  %v11638_v23 = vld [vmem:[#allocation19 + $0x41c] sm:$0xf0]  ;;  %v11132_v18 = vld [vmem:[#allocation19 + $0x10] sm:$0xf] }
 0x4c5   :  { %8090 = vmatpush.bf16.msra.mxu2 %v11525_v13  ;;  %8159 = vmatpush.bf16.msrb.mxu3 %v11557_v38  ;;  %v11381_v13 = vor.u32 %v12978_v34, %v11378_v51  ;;  %v11350_v38 = vld [vmem:[#allocation19 + $0x1e4] sm:$0xf0]  ;;  %v11244_v51 = vld [vmem:[#allocation19 + $0xf0] sm:$0xf] }
 0x4c6   :  { %8117 = vmatpush.bf16.msrb.mxu0 %v12001_v49  ;;  %v11417_v49 = vor.u32 %v12986_v57, %v11414_v47  ;;  %v11353_v43 = vor.u32 %v12971_v52, %v11350_v38  ;;  %v11280_v47 = vld [vmem:[#allocation19 + $0x130] sm:$0xf]  ;;  %v11722_v52 = vld [vmem:[#allocation19 + $0x4c4] sm:$0xf0]  ;;  %v11216_v38 = vld [vmem:[#allocation19 + $0xb8] sm:$0xf] }
 0x4c7   :  { %8069 = vmatmul.bf16.vlgmr.msra.gmra.mxu0 %v13968_v4 }
 0x4c8   :  { %8021 = vmatpush.bf16.msrb.mxu1 %v11493_v35  ;;  %v12965_v35 = vld [vmem:[#allocation19 + $0x19c] sm:$0xf] }
 0x4c9   :  { %8091 = vmatpush.bf16.msra.mxu2 %v11497_v62  ;;  %8160 = vmatpush.bf16.msrb.mxu3 %v11529_v55  ;;  %v12979_v62 = vld [vmem:[#allocation19 + $0x20c] sm:$0xf]  ;;  %v11832_v55 = vld [vmem:[#allocation19 + $0x588] sm:$0xf]  ;;  %v11333_v22 = vor.u32 %v12965_v35, %v11330_v30  ;;  %v11252_v35 = vld [vmem:[#allocation19 + $0xf8] sm:$0xf]  ;;  %v11217_v30 = vor.u32 %v12940_v54, %v11216_v38 }
 0x4ca   :  { %8118 = vmatpush.bf16.msrb.mxu0 %v11973_v7  ;;  %v11329_v7 = vor.u32 %v12968_v44, %v11328_v46  ;;  %v11833_v41 = vor.u32 %v13094_v3, %v11832_v55  ;;  %v11218_v46 = vld [vmem:[#allocation19 + $0xd4] sm:$0xf0]  ;;  %v11725_v44 = vor.u32 %v13063_v50, %v11722_v52  ;;  %v11188_v55 = vld [vmem:[#allocation19 + $0x80] sm:$0xf]  ;;  %v12933_v3 = vld [vmem:[#allocation19 + $0x98] sm:$0xf0] }
 0x4cb   :  { %v13185_v50 = vld [vmem:[#allocation19 + $0x878] sm:$0xf0]  ;;  %v13182_v52 = vld [vmem:[#allocation19 + $0x864] sm:$0xf]  ;;  %v11140_v54 = vld [vmem:[#allocation19 + $0x18] sm:$0xf] }
 0x4cc   :  { %8022 = vmatpush.bf16.msrb.mxu1 %v11465_v11  ;;  %v11389_v11 = vor.u32 %v12979_v62, %v11386_v63  ;;  %v13056_v62 = vld [vmem:[#allocation19 + $0x474] sm:$0xf]  ;;  %v11694_v63 = vld [vmem:[#allocation19 + $0x48c] sm:$0xf0] }
 0x4cd   :  { %8092 = vmatpush.bf16.msra.mxu2 %v11469_v12  ;;  %8161 = vmatpush.bf16.msrb.mxu3 %v11501_v16  ;;  %v11302_v12 = vld [vmem:[#allocation19 + $0x17c] sm:$0xf0]  ;;  %v11358_v16 = vld [vmem:[#allocation19 + $0x1ec] sm:$0xf0] }
 0x4ce   :  { %8119 = vmatpush.bf16.msrb.mxu0 %v11945_v0  ;;  %v11336_v0 = vld [vmem:[#allocation19 + $0x1a0] sm:$0xf]  ;;  %v11305_v21 = vor.u32 %v12958_v37, %v11302_v12  ;;  %v11189_v37 = vor.u32 %v12933_v3, %v11188_v55  ;;  %v13049_v12 = vld [vmem:[#allocation19 + $0x43c] sm:$0xf]  ;;  %v12168_v55 = vld [vmem:[#allocation19 + $0x828] sm:$0xf] }
 0x4cf   :  { %v11337_v2 = vor.u32 %v12969_v1, %v11336_v0  ;;  %v12923_v0 = vld [vmem:[#allocation19 + $0x4c] sm:$0xf]  ;;  %v11162_v1 = vld [vmem:[#allocation19 + $0x64] sm:$0xf0]  ;;  %v13178_v3 = vld [vmem:[#allocation19 + $0x840] sm:$0xf0] }
 0x4d0   :  { %8023 = vmatpush.bf16.msrb.mxu1 %v11437_v6  ;;  %v13077_v6 = vld [vmem:[#allocation19 + $0x51c] sm:$0xf] }
 0x4d1   :  { %8093 = vmatpush.bf16.msra.mxu2 %v11441_v15  ;;  %8162 = vmatpush.bf16.msrb.mxu3 %v11473_v10  ;;  %v11361_v15 = vor.u32 %v12972_v14, %v11358_v16  ;;  %v11805_v10 = vor.u32 %v13087_v58, %v11804_v17  ;;  %v11781_v28 = vor.u32 %v13077_v6, %v11778_v20  ;;  %v11160_v16 = vld [vmem:[#allocation19 + $0x48] sm:$0xf]  ;;  %v12926_v17 = vld [vmem:[#allocation19 + $0x60] sm:$0xf0] }
 0x4d2   :  { %8120 = vmatpush.bf16.msrb.mxu0 %v11917_v26  ;;  %v11274_v26 = vld [vmem:[#allocation19 + $0x144] sm:$0xf0]  ;;  %v12934_v20 = vld [vmem:[#allocation19 + $0xa0] sm:$0xf0] }
 0x4d3   :  { %v11277_v34 = vor.u32 %v12951_v25, %v11274_v26  ;;  %v11196_v6 = vld [vmem:[#allocation19 + $0x88] sm:$0xf]  ;;  %v12916_v25 = vld [vmem:[#allocation19 + $0x14] sm:$0xf]  ;;  %v11134_v26 = vld [vmem:[#allocation19 + $0x2c] sm:$0xf0] }
 0x4d4   :  { %8024 = vmatpush.bf16.msrb.mxu1 %v11409_v32  ;;  %v12962_v32 = vld [vmem:[#allocation19 + $0x180] sm:$0xf0] }
 0x4d5   :  { %8094 = vmatpush.bf16.msra.mxu2 %v11413_v33  ;;  %8163 = vmatpush.bf16.msrb.mxu3 %v11445_v36  ;;  %v11750_v33 = vld [vmem:[#allocation19 + $0x4fc] sm:$0xf0]  ;;  %v12947_v36 = vld [vmem:[#allocation19 + $0x108] sm:$0xf0]  ;;  %v11309_v9 = vor.u32 %v12962_v32, %v11308_v29  ;;  %v12224_v29 = vld [vmem:[#allocation19 + $0x898] sm:$0xf] }
 0x4d6   :  { %8121 = vmatpush.bf16.msrb.mxu0 %v11889_v39  ;;  %v11246_v39 = vld [vmem:[#allocation19 + $0x10c] sm:$0xf0]  ;;  %v11753_v57 = vor.u32 %v13070_v40, %v11750_v33  ;;  %v11245_v48 = vor.u32 %v12947_v36, %v11244_v51  ;;  %v13192_v32 = vld [vmem:[#allocation19 + $0x8b0] sm:$0xf0]  ;;  %v12226_v33 = vld [vmem:[#allocation19 + $0x8b4] sm:$0xf0] }
 0x4d7   :  { %v12927_v51 = vld [vmem:[#allocation19 + $0x68] sm:$0xf0] }
 0x4d8   :  { %8025 = vmatpush.bf16.msrb.mxu1 %v11381_v13  ;;  %v12955_v13 = vld [vmem:[#allocation19 + $0x148] sm:$0xf0] }
 0x4d9   :  { %8095 = vmatpush.bf16.msra.mxu2 %v11385_v53  ;;  %8164 = vmatpush.bf16.msrb.mxu3 %v11417_v49  ;;  %v11249_v53 = vor.u32 %v12944_v31, %v11246_v39  ;;  %v11281_v56 = vor.u32 %v12955_v13, %v11280_v47  ;;  %v12937_v49 = vld [vmem:[#allocation19 + $0xbc] sm:$0xf]  ;;  %v11610_v31 = vld [vmem:[#allocation19 + $0x3e4] sm:$0xf0]  ;;  %v11137_v39 = vor.u32 %v12916_v25, %v11134_v26  ;;  %v12196_v47 = vld [vmem:[#allocation19 + $0x860] sm:$0xf] }
 0x4da   :  { %8122 = vmatpush.bf16.msrb.mxu0 %v11861_v60  ;;  %v12948_v60 = vld [vmem:[#allocation19 + $0x110] sm:$0xf0] }
 0x4db   :  { %v13164_v25 = vld [vmem:[#allocation19 + $0x7d0] sm:$0xf0] }
 0x4dc   :  { %8026 = vmatpush.bf16.msrb.mxu1 %v11353_v43  ;;  %v11221_v43 = vor.u32 %v12937_v49, %v11218_v46  ;;  %v13028_v49 = vld [vmem:[#allocation19 + $0x394] sm:$0xf]  ;;  %v11582_v46 = vld [vmem:[#allocation19 + $0x3ac] sm:$0xf0] }
 0x4dd   :  { %8096 = vmatpush.bf16.msra.mxu2 %v11357_v5  ;;  %8165 = vmatpush.bf16.msrb.mxu3 %v11389_v11  ;;  %v11253_v5 = vor.u32 %v12948_v60, %v11252_v35  ;;  %v11224_v11 = vld [vmem:[#allocation19 + $0xc0] sm:$0xf]  ;;  %v13193_v35 = vld [vmem:[#allocation19 + $0x8b8] sm:$0xf0]  ;;  %v12197_v60 = vor.u32 %v13185_v50, %v12196_v47  ;;  %v13154_v47 = vld [vmem:[#allocation19 + $0x784] sm:$0xf] }
 0x4de   :  { %8123 = vmatpush.bf16.msrb.mxu0 %v11833_v41  ;;  %v11666_v41 = vld [vmem:[#allocation19 + $0x454] sm:$0xf0]  ;;  %v11225_v58 = vor.u32 %v12941_v45, %v11224_v11  ;;  %v12204_v45 = vld [vmem:[#allocation19 + $0x868] sm:$0xf]  ;;  %v12120_v50 = vld [vmem:[#allocation19 + $0x7c0] sm:$0xf] }
 0x4df   :  { %8027 = vmatmul.bf16.vlgmr.msrb.gmra.mxu1 %v13951_v59 }
 0x4e0   :  { %8075 = vmatpush.bf16.msra.mxu1 %v11329_v7  ;;  %8097 = vmatmul.bf16.vlgmr.msra.gmra.mxu2 %v13951_v59  ;;  %v12930_v7 = vld [vmem:[#allocation19 + $0x84] sm:$0xf] }
 0x4e1   :  { %8145 = vmatpush.bf16.msrb.mxu2 %v11333_v22  ;;  %8166 = vmatpush.bf16.msrb.mxu3 %v11361_v15  ;;  %v11697_v22 = vor.u32 %v13056_v62, %v11694_v63  ;;  %v11193_v14 = vor.u32 %v12930_v7, %v11190_v61  ;;  %v13042_v15 = vld [vmem:[#allocation19 + $0x404] sm:$0xf]  ;;  %v13025_v62 = vld [vmem:[#allocation19 + $0x378] sm:$0xf0]  ;;  %v13175_v61 = vld [vmem:[#allocation19 + $0x82c] sm:$0xf] }
 0x4e2   :  { %8124 = vmatpush.bf16.msrb.mxu0 %v11805_v10  ;;  %v11165_v10 = vor.u32 %v12923_v0, %v11162_v1  ;;  %v11641_v40 = vor.u32 %v13042_v15, %v11638_v23  ;;  %v13168_v1 = vld [vmem:[#allocation19 + $0x7f4] sm:$0xf]  ;;  %v11504_v23 = vld [vmem:[#allocation19 + $0x2f0] sm:$0xf] }
 0x4e4   :  { %8076 = vmatpush.bf16.msra.mxu1 %v11301_v19  ;;  %8167 = vmatmul.bf16.vlgmr.msrb.gmra.mxu3 %v13951_v59  ;;  %v11669_v19 = vor.u32 %v13049_v12, %v11666_v41  ;;  %v12169_v12 = vor.u32 %v13178_v3, %v12168_v55  ;;  %v11532_v41 = vld [vmem:[#allocation19 + $0x328] sm:$0xf]  ;;  %v13993_v55 = vld [vmem:[#allocation20] sm:$0xff] }
 0x4e5   :  { %8146 = vmatpush.bf16.msrb.mxu2 %v11305_v21  ;;  %8215 = vmatpush.bf16.msra.mxu3 %v11337_v2  ;;  %v11161_v21 = vor.u32 %v12926_v17, %v11160_v16  ;;  %v12919_v2 = vld [vmem:[#allocation19 + $0x28] sm:$0xf0]  ;;  %v12140_v17 = vld [vmem:[#allocation19 + $0x7f0] sm:$0xf] }
 0x4e6   :  { %8173 = vmatpush.bf16.msra.mxu0 %v11781_v28  ;;  %v11197_v28 = vor.u32 %v12934_v20, %v11196_v6  ;;  %v11133_v36 = vor.u32 %v12919_v2, %v11132_v18  ;;  %v12176_v20 = vld [vmem:[#allocation19 + $0x830] sm:$0xf]  ;;  %v13011_v18 = vld [vmem:[#allocation19 + $0x308] sm:$0xf0]  ;;  %v12112_v2 = vld [vmem:[#allocation19 + $0x7b8] sm:$0xf] }
 0x4e7   :  { %8125 = vmatmul.bf16.vlgmr.msrb.gmra.mxu0 %v13961_v24 }
 0x4e8   :  { %8077 = vmatpush.bf16.msra.mxu1 %v11273_v27  ;;  %v13189_v27 = vld [vmem:[#allocation19 + $0x89c] sm:$0xf] }
 0x4e9   :  { %8147 = vmatpush.bf16.msrb.mxu2 %v11277_v34  ;;  %8216 = vmatpush.bf16.msra.mxu3 %v11309_v9  ;;  %v11168_v34 = vld [vmem:[#allocation19 + $0x50] sm:$0xf]  ;;  %v13035_v9 = vld [vmem:[#allocation19 + $0x3cc] sm:$0xf]  ;;  %v12229_v13 = vor.u32 %v13189_v27, %v12226_v33  ;;  %v11505_v27 = vor.u32 %v13011_v18, %v11504_v23  ;;  %v13991_v33 = vpop.f32.mrf.mxu3  ;;  %v6341_v18 = vperm.slane %v13993_v55, 0 }
 0x4ea   :  { %8174 = vmatpush.bf16.msra.mxu0 %v11753_v57  ;;  %v12225_v57 = vor.u32 %v13192_v32, %v12224_v29  ;;  %v11613_v38 = vor.u32 %v13035_v9, %v11610_v31  ;;  %v12114_v29 = vld [vmem:[#allocation19 + $0x7d4] sm:$0xf0]  ;;  %v13989_v32 = vpop.f32.mrf.mxu2  ;;  %v12084_v31 = vld [vmem:[#allocation19 + $0x780] sm:$0xf]  ;;  %v12983_v23 = vld [vmem:[#allocation19 + $0x228] sm:$0xf0] }
 0x4ec   :  { %8078 = vmatpush.bf16.msra.mxu1 %v11245_v48  ;;  %v11169_v48 = vor.u32 %v12927_v51, %v11168_v34  ;;  %v12113_v34 = vor.u32 %v13164_v25, %v12112_v2  ;;  %v11476_v51 = vld [vmem:[#allocation19 + $0x2b8] sm:$0xf] }
 0x4ed   :  { %8148 = vmatpush.bf16.msrb.mxu2 %v11249_v53  ;;  %8217 = vmatpush.bf16.msra.mxu3 %v11281_v56  ;;  %v12198_v53 = vld [vmem:[#allocation19 + $0x87c] sm:$0xf0]  ;;  %v12920_v56 = vld [vmem:[#allocation19 + $0x30] sm:$0xf0] }
 0x4ee   :  { %8175 = vmatpush.bf16.msra.mxu0 %v11725_v44  ;;  %v12232_v44 = vld [vmem:[#allocation19 + $0x8a0] sm:$0xf]  ;;  %v12201_v63 = vor.u32 %v13182_v52, %v12198_v53  ;;  %v13165_v52 = vld [vmem:[#allocation19 + $0x7d8] sm:$0xf0] }
 0x4ef   :  { %v12233_v7 = vor.u32 %v13193_v35, %v12232_v44  ;;  %v12121_v44 = vor.u32 %v13165_v52, %v12120_v50  ;;  %v13147_v35 = vld [vmem:[#allocation19 + $0x74c] sm:$0xf]  ;;  %v11946_v50 = vld [vmem:[#allocation19 + $0x684] sm:$0xf0] }
 0x4f0   :  { %8079 = vmatpush.bf16.msra.mxu1 %v11217_v30  ;;  %v11560_v30 = vld [vmem:[#allocation19 + $0x360] sm:$0xf] }
 0x4f1   :  { %8149 = vmatpush.bf16.msrb.mxu2 %v11221_v43  ;;  %8218 = vmatpush.bf16.msra.mxu3 %v11253_v5  ;;  %v11141_v43 = vor.u32 %v12920_v56, %v11140_v54  ;;  %v11585_v5 = vor.u32 %v13028_v49, %v11582_v46  ;;  %v11561_v11 = vor.u32 %v13025_v62, %v11560_v30  ;;  %v12997_v54 = vld [vmem:[#allocation19 + $0x298] sm:$0xf0]  ;;  %v12056_v49 = vld [vmem:[#allocation19 + $0x748] sm:$0xf]  ;;  %v13150_v46 = vld [vmem:[#allocation19 + $0x760] sm:$0xf0]  ;;  %v7804_v30 = vpop.f32.mrf.mxu1 }
 0x4f2   :  { %8176 = vmatpush.bf16.msra.mxu0 %v11697_v22  ;;  %v12170_v22 = vld [vmem:[#allocation19 + $0x844] sm:$0xf0]  ;;  %v12057_v3 = vor.u32 %v13150_v46, %v12056_v49 }
 0x4f3   :  { %v12173_v16 = vor.u32 %v13175_v61, %v12170_v22  ;;  %v12028_v61 = vld [vmem:[#allocation19 + $0x710] sm:$0xf]  ;;  %v13995_v22 = vpop.f32.mrf.mxu2 }
 0x4f4   :  { %8080 = vmatpush.bf16.msra.mxu1 %v11189_v37  ;;  %v13186_v37 = vld [vmem:[#allocation19 + $0x880] sm:$0xf0] }
 0x4f5   :  { %8150 = vmatpush.bf16.msrb.mxu2 %v11193_v14  ;;  %8219 = vmatpush.bf16.msra.mxu3 %v11225_v58  ;;  %v13018_v14 = vld [vmem:[#allocation19 + $0x340] sm:$0xf0]  ;;  %v13171_v58 = vld [vmem:[#allocation19 + $0x808] sm:$0xf0]  ;;  %v12205_v0 = vor.u32 %v13186_v37, %v12204_v45  ;;  %v13140_v37 = vld [vmem:[#allocation19 + $0x714] sm:$0xf] }
 0x4f6   :  { %8177 = vmatpush.bf16.msra.mxu0 %v11669_v19  ;;  %v12142_v19 = vld [vmem:[#allocation19 + $0x80c] sm:$0xf0]  ;;  %v11533_v6 = vor.u32 %v13018_v14, %v11532_v41  ;;  %v12141_v15 = vor.u32 %v13171_v58, %v12140_v17  ;;  %v13143_v45 = vld [vmem:[#allocation19 + $0x728] sm:$0xf0]  ;;  %v13997_v41 = vpop.f32.mrf.mxu3  ;;  %v12002_v17 = vld [vmem:[#allocation19 + $0x6f4] sm:$0xf0] }
 0x4f7   :  { %v12008_v58 = vld [vmem:[#allocation19 + $0x6e0] sm:$0xf] }
 0x4f8   :  { %8081 = vmatpush.bf16.msra.mxu1 %v11161_v21  ;;  %v13179_v21 = vld [vmem:[#allocation19 + $0x848] sm:$0xf0] }
 0x4f9   :  { %8151 = vmatpush.bf16.msrb.mxu2 %v11165_v10  ;;  %8220 = vmatpush.bf16.msra.mxu3 %v11197_v28  ;;  %v12145_v10 = vor.u32 %v13168_v1, %v12142_v19  ;;  %v12177_v26 = vor.u32 %v13179_v21, %v12176_v20  ;;  %v13161_v28 = vld [vmem:[#allocation19 + $0x7bc] sm:$0xf]  ;;  %v13151_v20 = vld [vmem:[#allocation19 + $0x768] sm:$0xf0]  ;;  %v12029_v21 = vor.u32 %v13143_v45, %v12028_v61  ;;  %v11890_v45 = vld [vmem:[#allocation19 + $0x614] sm:$0xf0] }
 0x4fa   :  { %8178 = vmatpush.bf16.msra.mxu0 %v11641_v40  ;;  %v12148_v40 = vld [vmem:[#allocation19 + $0x7f8] sm:$0xf]  ;;  %v12117_v9 = vor.u32 %v13161_v28, %v12114_v29  ;;  %v13137_v19 = vld [vmem:[#allocation19 + $0x6f8] sm:$0xf0]  ;;  %v13126_v28 = vld [vmem:[#allocation19 + $0x6a4] sm:$0xf] }
 0x4fb   :  { %v12009_v25 = vor.u32 %v13137_v19, %v12008_v58  ;;  %v11974_v29 = vld [vmem:[#allocation19 + $0x6bc] sm:$0xf0]  ;;  %v14000_v52 = vpop.f32.mrf.mxu2 }
 0x4fc   :  { %8082 = vmatpush.bf16.msra.mxu1 %v11133_v36  ;;  %v13004_v36 = vld [vmem:[#allocation19 + $0x2d0] sm:$0xf0] }
 0x4fd   :  { %8152 = vmatpush.bf16.msrb.mxu2 %v11137_v39  ;;  %8221 = vmatpush.bf16.msra.mxu3 %v11169_v48  ;;  %v13157_v39 = vld [vmem:[#allocation19 + $0x798] sm:$0xf0]  ;;  %v11477_v48 = vor.u32 %v13004_v36, %v11476_v51  ;;  %v13144_v51 = vld [vmem:[#allocation19 + $0x730] sm:$0xf0]  ;;  %v11364_v36 = vld [vmem:[#allocation19 + $0x1d8] sm:$0xf] }
 0x4fe   :  { %8179 = vmatpush.bf16.msra.mxu0 %v11613_v38  ;;  %v12085_v53 = vor.u32 %v13157_v39, %v12084_v31  ;;  %v11448_v38 = vld [vmem:[#allocation19 + $0x280] sm:$0xf]  ;;  %v7806_v31 = vpop.f32.mrf.mxu1  ;;  %v11977_v39 = vor.u32 %v13126_v28, %v11974_v29  ;;  %v14004_v49 = vpop.f32.mrf.mxu3  ;;  %v11840_v28 = vld [vmem:[#allocation19 + $0x590] sm:$0xf]  ;;  %v13095_v29 = vld [vmem:[#allocation19 + $0x5a8] sm:$0xf0] }
 0x4ff   :  { %8083 = vmatmul.bf16.vlgmr.msra.gmra.mxu1 %v13944_v8  ;;  %v11449_v62 = vor.u32 %v12997_v54, %v11448_v38  ;;  %v11952_v38 = vld [vmem:[#allocation19 + $0x670] sm:$0xf]  ;;  %v13123_v54 = vld [vmem:[#allocation19 + $0x688] sm:$0xf0] }
 0x500   :  { %8131 = vmatpush.bf16.msrb.mxu1 %v12225_v57  ;;  %8153 = vmatmul.bf16.vlgmr.msrb.gmra.mxu2 %v13944_v8 }
 0x501   :  { %8201 = vmatpush.bf16.msra.mxu2 %v12229_v13  ;;  %8222 = vmatpush.bf16.msra.mxu3 %v11141_v43  ;;  %v12086_v13 = vld [vmem:[#allocation19 + $0x79c] sm:$0xf0]  ;;  %v13158_v43 = vld [vmem:[#allocation19 + $0x7a0] sm:$0xf0] }
 0x502   :  { %8180 = vmatpush.bf16.msra.mxu0 %v11585_v5  ;;  %v12089_v56 = vor.u32 %v13154_v47, %v12086_v13  ;;  %v11420_v5 = vld [vmem:[#allocation19 + $0x248] sm:$0xf] }
 0x504   :  { %8132 = vmatpush.bf16.msrb.mxu1 %v12197_v60  ;;  %8223 = vmatmul.bf16.vlgmr.msra.gmra.mxu3 %v13944_v8  ;;  %v13172_v8 = vld [vmem:[#allocation19 + $0x810] sm:$0xf0]  ;;  %v12058_v60 = vld [vmem:[#allocation19 + $0x764] sm:$0xf0] }
 0x505   :  { %8202 = vmatpush.bf16.msra.mxu2 %v12201_v63  ;;  %8271 = vmatpush.bf16.msrb.mxu3 %v12233_v7  ;;  %v12149_v57 = vor.u32 %v13172_v8, %v12148_v40  ;;  %v12092_v63 = vld [vmem:[#allocation19 + $0x788] sm:$0xf]  ;;  %v12990_v7 = vld [vmem:[#allocation19 + $0x260] sm:$0xf0] }
 0x506   :  { %8229 = vmatpush.bf16.msrb.mxu0 %v11561_v11  ;;  %v12061_v11 = vor.u32 %v13147_v35, %v12058_v60  ;;  %v12093_v14 = vor.u32 %v13158_v43, %v12092_v63  ;;  %v11421_v1 = vor.u32 %v12990_v7, %v11420_v5  ;;  %v13130_v8 = vld [vmem:[#allocation19 + $0x6c0] sm:$0xf0]  ;;  %v11953_v60 = vor.u32 %v13123_v54, %v11952_v38  ;;  %v11924_v63 = vld [vmem:[#allocation19 + $0x638] sm:$0xf]  ;;  %v13116_v43 = vld [vmem:[#allocation19 + $0x650] sm:$0xf0] }
 0x507   :  { %8181 = vmatmul.bf16.vlgmr.msra.gmra.mxu0 %v13955_v42  ;;  %v7807_v7 = vadd.f32 %v7806_v31, %v6341_v18 }
 0x508   :  { %8133 = vmatpush.bf16.msrb.mxu1 %v12169_v12  ;;  %v12030_v12 = vld [vmem:[#allocation19 + $0x72c] sm:$0xf0] }
 0x509   :  { %8203 = vmatpush.bf16.msra.mxu2 %v12173_v16  ;;  %8272 = vmatpush.bf16.msrb.mxu3 %v12205_v0  ;;  %v13133_v16 = vld [vmem:[#allocation19 + $0x6dc] sm:$0xf]  ;;  %v7846_v0 = vpop.f32.mrf.mxu0 }
 0x50a   :  { %8230 = vmatpush.bf16.msrb.mxu0 %v11533_v6  ;;  %v12064_v6 = vld [vmem:[#allocation19 + $0x750] sm:$0xf]  ;;  %v12005_v2 = vor.u32 %v13133_v16, %v12002_v17  ;;  %v7876_v17 = vpop.f32.mrf.mxu2 }
 0x50c   :  { %8134 = vmatpush.bf16.msrb.mxu1 %v12141_v15  ;;  %v11392_v15 = vld [vmem:[#allocation19 + $0x210] sm:$0xf] }
 0x50d   :  { %8204 = vmatpush.bf16.msra.mxu2 %v12145_v10  ;;  %8273 = vmatpush.bf16.msrb.mxu3 %v12177_v26  ;;  %v12033_v10 = vor.u32 %v13140_v37, %v12030_v12  ;;  %v12065_v26 = vor.u32 %v13151_v20, %v12064_v6  ;;  %v11393_v40 = vor.u32 %v12983_v23, %v11392_v15  ;;  %v11896_v37 = vld [vmem:[#allocation19 + $0x600] sm:$0xf]  ;;  %v13109_v12 = vld [vmem:[#allocation19 + $0x618] sm:$0xf0]  ;;  %v13102_v15 = vld [vmem:[#allocation19 + $0x5e0] sm:$0xf0] }
 0x50e   :  { %8231 = vmatpush.bf16.msrb.mxu0 %v11505_v27  ;;  %v11980_v27 = vld [vmem:[#allocation19 + $0x6a8] sm:$0xf]  ;;  %v11897_v19 = vor.u32 %v13109_v12, %v11896_v37  ;;  %v11862_v6 = vld [vmem:[#allocation19 + $0x5dc] sm:$0xf0]  ;;  %v6342_v23 = vperm.slane %v13993_v55, 1 }
 0x50f   :  { %v11981_v47 = vor.u32 %v13130_v8, %v11980_v27 }
 0x510   :  { %8135 = vmatpush.bf16.msrb.mxu1 %v12113_v34  ;;  %v12036_v34 = vld [vmem:[#allocation19 + $0x718] sm:$0xf]  ;;  %v7875_v27 = vadd.f32 %v14000_v52, %v6342_v23 }
 0x511   :  { %8205 = vmatpush.bf16.msra.mxu2 %v12117_v9  ;;  %8274 = vmatpush.bf16.msrb.mxu3 %v12149_v57  ;;  %v12976_v9 = vld [vmem:[#allocation19 + $0x1f0] sm:$0xf0]  ;;  %v7805_v57 = vadd.f32 %v7804_v30, %v6341_v18  ;;  %v12037_v13 = vor.u32 %v13144_v51, %v12036_v34  ;;  %v7848_v46 = vpop.f32.mrf.mxu0 }
 0x512   :  { %8232 = vmatpush.bf16.msrb.mxu0 %v11477_v48  ;;  %v13119_v48 = vld [vmem:[#allocation19 + $0x66c] sm:$0xf]  ;;  %v13112_v30 = vld [vmem:[#allocation19 + $0x634] sm:$0xf]  ;;  %v7889_v31 = vadd.f32 %v14004_v49, %v7875_v27  ;;  %v11644_v27 = vld [vmem:[#allocation19 + $0x408] sm:$0xf] }
 0x513   :  { %v13084_v51 = vld [vmem:[#allocation19 + $0x554] sm:$0xf] }
 0x514   :  { %8136 = vmatpush.bf16.msrb.mxu1 %v12085_v53  ;;  %v11365_v53 = vor.u32 %v12976_v9, %v11364_v36  ;;  %v11806_v36 = vld [vmem:[#allocation19 + $0x56c] sm:$0xf0] }
 0x515   :  { %8206 = vmatpush.bf16.msra.mxu2 %v12089_v56  ;;  %8275 = vmatpush.bf16.msrb.mxu3 %v12121_v44  ;;  %v7819_v56 = vadd.f32 %v13989_v32, %v7805_v57  ;;  %v11949_v44 = vor.u32 %v13119_v48, %v11946_v50  ;;  %v11841_v57 = vor.u32 %v13095_v29, %v11840_v28  ;;  %v11784_v50 = vld [vmem:[#allocation19 + $0x520] sm:$0xf] }
 0x516   :  { %8233 = vmatpush.bf16.msrb.mxu0 %v11449_v62  ;;  %v11918_v62 = vld [vmem:[#allocation19 + $0x64c] sm:$0xf0] }
 0x517   :  { %v7833_v35 = vadd.f32 %v13991_v33, %v7819_v56  ;;  %v11921_v5 = vor.u32 %v13112_v30, %v11918_v62  ;;  %v11925_v33 = vor.u32 %v13116_v43, %v11924_v63  ;;  %v13074_v30 = vld [vmem:[#allocation19 + $0x500] sm:$0xf0]  ;;  %v7877_v62 = vadd.f32 %v7876_v17, %v6342_v23  ;;  %v11672_v23 = vld [vmem:[#allocation19 + $0x440] sm:$0xf] }
 0x518   :  { %8137 = vmatpush.bf16.msrb.mxu1 %v12057_v3 }
 0x519   :  { %8207 = vmatpush.bf16.msra.mxu2 %v12061_v11  ;;  %8276 = vmatpush.bf16.msrb.mxu3 %v12093_v14  ;;  %v7847_v3 = vadd.f32 %v7846_v0, %v7833_v35  ;;  %v13105_v11 = vld [vmem:[#allocation19 + $0x5fc] sm:$0xf]  ;;  %v7821_v14 = vadd.f32 %v13995_v22, %v7807_v7  ;;  %v7890_v0 = vpop.f32.mrf.mxu3  ;;  %v7902_v20 = vpop.f32.mrf.mxu0 }
 0x51a   :  { %8234 = vmatpush.bf16.msrb.mxu0 %v11421_v1  ;;  %v11893_v58 = vor.u32 %v13105_v11, %v11890_v45  ;;  %v7903_v54 = vadd.f32 %v7902_v20, %v7889_v31  ;;  %v11728_v11 = vld [vmem:[#allocation19 + $0x4b0] sm:$0xf]  ;;  %v13067_v45 = vld [vmem:[#allocation19 + $0x4c8] sm:$0xf0] }
 0x51b   :  { %v11616_v31 = vld [vmem:[#allocation19 + $0x3d0] sm:$0xf] }
 0x51c   :  { %8138 = vmatpush.bf16.msrb.mxu1 %v12029_v21  ;;  %v7860_v32 = vpop.f32.mrf.mxu1  ;;  %v11868_v21 = vld [vmem:[#allocation19 + $0x5c8] sm:$0xf] }
 0x51d   :  { %8208 = vmatpush.bf16.msra.mxu2 %v12033_v10  ;;  %8277 = vmatpush.bf16.msrb.mxu3 %v12065_v26  ;;  %v7861_v61 = vadd.f32 %v7860_v32, %v7847_v3  ;;  %v11834_v26 = vld [vmem:[#allocation19 + $0x5a4] sm:$0xf0]  ;;  %v7891_v3 = vadd.f32 %v7890_v0, %v7877_v62 }
 0x51e   :  { %8235 = vmatpush.bf16.msrb.mxu0 %v11393_v40 }
 0x51f   :  { %8139 = vmatmul.bf16.vlgmr.msrb.gmra.mxu1 %v13968_v4  ;;  %v8285_v16 = vsub.f32 0.0, %v7861_v61 }
 0x520   :  { %8187 = vmatpush.bf16.msra.mxu1 %v12005_v2  ;;  %8209 = vmatmul.bf16.vlgmr.msra.gmra.mxu2 %v13968_v4 }
 0x521   :  { %8257 = vmatpush.bf16.msrb.mxu2 %v12009_v25  ;;  %8278 = vmatpush.bf16.msrb.mxu3 %v12037_v13  ;;  %v8299_v1 = vmul.f32 1.442695, %v8285_v16  ;;  %v11869_v25 = vor.u32 %v13102_v15, %v11868_v21  ;;  %v13088_v13 = vld [vmem:[#allocation19 + $0x570] sm:$0xf0]  ;;  %v7944_v38 = vpop.f32.mrf.mxu3  ;;  %v7904_v52 = vpop.f32.mrf.mxu0  ;;  %v6343_v16 = vperm.slane %v13993_v55, 2 }
 0x522   :  { %8236 = vmatpush.bf16.msrb.mxu0 %v11365_v53  ;;  %v7930_v8 = vpop.f32.mrf.mxu2  ;;  %v13081_v53 = vld [vmem:[#allocation19 + $0x538] sm:$0xf0]  ;;  %v7905_v37 = vadd.f32 %v7904_v52, %v7891_v3 }
 0x523   :  { %13218 = vpow2.f32 %v8299_v1  ;;  %v11785_v49 = vor.u32 %v13081_v53, %v11784_v50  ;;  %v11700_v1 = vld [vmem:[#allocation19 + $0x478] sm:$0xf] }
 0x524   :  { %8188 = vmatpush.bf16.msra.mxu1 %v11977_v39  ;;  %8279 = vmatmul.bf16.vlgmr.msrb.gmra.mxu3 %v13968_v4  ;;  %v7835_v4 = vadd.f32 %v13997_v41, %v7821_v14  ;;  %v7862_v22 = vpop.f32.mrf.mxu1  ;;  %v13091_v41 = vld [vmem:[#allocation19 + $0x58c] sm:$0xf] }
 0x525   :  { %8258 = vmatpush.bf16.msrb.mxu2 %v11981_v47  ;;  %8237 = vmatmul.bf16.vlgmr.msrb.gmra.mxu0 %v13951_v59  ;;  %v13098_v59 = vld [vmem:[#allocation19 + $0x5c4] sm:$0xf]  ;;  %v11837_v34 = vor.u32 %v13091_v41, %v11834_v26  ;;  %v11812_v47 = vld [vmem:[#allocation19 + $0x558] sm:$0xf] }
 0x526   :  { %v7849_v18 = vadd.f32 %v7848_v46, %v7835_v4  ;;  %v11865_v10 = vor.u32 %v13098_v59, %v11862_v6  ;;  %v11809_v46 = vor.u32 %v13084_v51, %v11806_v36  ;;  %v11813_v35 = vor.u32 %v13088_v13, %v11812_v47 }
 0x527   :  { %v7945_v6 = vadd.f32 %v7944_v38, %v6343_v16 }
 0x528   :  { %8189 = vmatpush.bf16.msra.mxu1 %v11949_v44  ;;  %v7863_v2 = vadd.f32 %v7862_v22, %v7849_v18  ;;  %v13053_v18 = vld [vmem:[#allocation19 + $0x458] sm:$0xf0] }
 0x529   :  { %8259 = vmatpush.bf16.msrb.mxu2 %v11953_v60  ;;  %v13219_v9 = vpop.eup %13218  ;;  %v11756_v60 = vld [vmem:[#allocation19 + $0x4e8] sm:$0xf]  ;;  %v7946_v4 = vpop.f32.mrf.mxu3  ;;  %v11673_v28 = vor.u32 %v13053_v18, %v11672_v23 }
 0x52a   :  { %v8292_v40 = vsub.f32 0.0, %v7863_v2  ;;  %v8327_v48 = vadd.f32 1.0, %v13219_v9  ;;  %v7958_v0 = vpop.f32.mrf.mxu0  ;;  %v7947_v51 = vadd.f32 %v7946_v4, %v6343_v16 }
 0x52b   :  { %v7959_v22 = vadd.f32 %v7958_v0, %v7945_v6 }
 0x52c   :  { %8190 = vmatpush.bf16.msra.mxu1 %v11921_v5  ;;  %v8313_v39 = vmul.f32 1.442695, %v8292_v40  ;;  %v7916_v56 = vpop.f32.mrf.mxu1  ;;  %v11757_v5 = vor.u32 %v13074_v30, %v11756_v60  ;;  %v13046_v40 = vld [vmem:[#allocation19 + $0x420] sm:$0xf0] }
 0x52d   :  { %8260 = vmatpush.bf16.msrb.mxu2 %v11925_v33  ;;  %v7917_v44 = vadd.f32 %v7916_v56, %v7903_v54  ;;  %v7932_v33 = vpop.f32.mrf.mxu2  ;;  %v11645_v9 = vor.u32 %v13046_v40, %v11644_v27 }
 0x52e   :  { %13220 = vpow2.f32 %v8313_v39  ;;  %v13039_v39 = vld [vmem:[#allocation19 + $0x3e8] sm:$0xf0] }
 0x52f   :  { %13222 = vrcp.f32 %v8327_v48  ;;  %v7931_v63 = vadd.f32 %v7930_v8, %v7917_v44  ;;  %v11617_v52 = vor.u32 %v13039_v39, %v11616_v31  ;;  %v13032_v44 = vld [vmem:[#allocation19 + $0x3b0] sm:$0xf0] }
 0x530   :  { %8191 = vmatpush.bf16.msra.mxu1 %v11893_v58  ;;  %v11729_v58 = vor.u32 %v13067_v45, %v11728_v11 }
 0x531   :  { %8261 = vmatpush.bf16.msrb.mxu2 %v11897_v19  ;;  %v8286_v32 = vsub.f32 0.0, %v7931_v63  ;;  %v13060_v19 = vld [vmem:[#allocation19 + $0x490] sm:$0xf0]  ;;  %v8000_v29 = vpop.f32.mrf.mxu3 }
 0x532   :  { %v11701_v21 = vor.u32 %v13060_v19, %v11700_v1 }
 0x533   :  { %v8301_v12 = vmul.f32 1.442695, %v8286_v32 }
 0x534   :  { %8192 = vmatpush.bf16.msra.mxu1 %v11865_v10  ;;  %v13221_v43 = vpop.eup %13220  ;;  %v7918_v14 = vpop.f32.mrf.mxu1 }
 0x535   :  { %8262 = vmatpush.bf16.msrb.mxu2 %v11869_v25  ;;  %v13223_v7 = vpop.eup %13222  ;;  %v8334_v61 = vadd.f32 1.0, %v13221_v43  ;;  %v7919_v17 = vadd.f32 %v7918_v14, %v7905_v37  ;;  %v7986_v25 = vpop.f32.mrf.mxu2 }
 0x536   :  { %8355 = vst [vmem:[#allocation22] sm:$0xff] %v13223_v7  ;;  %v6344_v7 = vperm.slane %v13993_v55, 3 }
 0x537   :  { %13224 = vrcp.f32 %v8334_v61  ;;  %v7933_v59 = vadd.f32 %v7932_v33, %v7919_v17 }
 0x538   :  { %8193 = vmatpush.bf16.msra.mxu1 %v11837_v34  ;;  %13226 = vpow2.f32 %v8301_v12  ;;  %v7960_v34 = vpop.f32.mrf.mxu0 }
 0x539   :  { %8263 = vmatpush.bf16.msrb.mxu2 %v11841_v57  ;;  %v8293_v20 = vsub.f32 0.0, %v7933_v59  ;;  %v7961_v47 = vadd.f32 %v7960_v34, %v7947_v51  ;;  %v6345_v34 = vperm.slane %v13993_v55, 4 }
 0x53b   :  { %v8315_v10 = vmul.f32 1.442695, %v8293_v20 }
 0x53c   :  { %8194 = vmatpush.bf16.msra.mxu1 %v11809_v46  ;;  %v7972_v41 = vpop.f32.mrf.mxu1  ;;  %v11588_v46 = vld [vmem:[#allocation19 + $0x398] sm:$0xf] }
 0x53d   :  { %8264 = vmatpush.bf16.msrb.mxu2 %v11813_v35  ;;  %v13225_v15 = vpop.eup %13224  ;;  %13228 = vpow2.f32 %v8315_v10  ;;  %v7973_v26 = vadd.f32 %v7972_v41, %v7959_v22  ;;  %v7988_v56 = vpop.f32.mrf.mxu2  ;;  %v11589_v30 = vor.u32 %v13032_v44, %v11588_v46 }
 0x53e   :  { %8362 = vst [vmem:[#allocation22 + $0x38] sm:$0xff] %v13225_v15 }
 0x53f   :  { %8195 = vmatmul.bf16.vlgmr.msra.gmra.mxu1 %v13961_v24  ;;  %v7987_v8 = vadd.f32 %v7986_v25, %v7973_v26 }
 0x540   :  { %8243 = vmatpush.bf16.msrb.mxu1 %v11785_v49  ;;  %8265 = vmatmul.bf16.vlgmr.msrb.gmra.mxu2 %v13961_v24  ;;  %v13227_v24 = vpop.eup %13226  ;;  %v8002_v49 = vpop.f32.mrf.mxu3 }
 0x541   :  { %v8328_v2 = vadd.f32 1.0, %v13227_v24  ;;  %v8001_v36 = vadd.f32 %v8000_v29, %v7987_v8  ;;  %v8014_v62 = vpop.f32.mrf.mxu0 }
 0x542   :  { %v8015_v37 = vadd.f32 %v8014_v62, %v6344_v7 }
 0x543   :  { %13230 = vrcp.f32 %v8328_v2  ;;  %v13229_v57 = vpop.eup %13228  ;;  %v8287_v13 = vsub.f32 0.0, %v8001_v36 }
 0x544   :  { %8244 = vmatpush.bf16.msrb.mxu1 %v11757_v5  ;;  %v8335_v50 = vadd.f32 1.0, %v13229_v57  ;;  %v7974_v53 = vpop.f32.mrf.mxu1 }
 0x545   :  { %v8303_v38 = vmul.f32 1.442695, %v8287_v13  ;;  %v7975_v54 = vadd.f32 %v7974_v53, %v7961_v47  ;;  %v8042_v12 = vpop.f32.mrf.mxu2 }
 0x546   :  { %13232 = vrcp.f32 %v8335_v50 }
 0x547   :  { %13234 = vpow2.f32 %v8303_v38  ;;  %v7989_v35 = vadd.f32 %v7988_v56, %v7975_v54 }
 0x548   :  { %8245 = vmatpush.bf16.msrb.mxu1 %v11729_v58  ;;  %v8056_v17 = vpop.f32.mrf.mxu3 }
 0x549   :  { %v13231_v48 = vpop.eup %13230  ;;  %v8003_v60 = vadd.f32 %v8002_v49, %v7989_v35  ;;  %v8016_v33 = vpop.f32.mrf.mxu0 }
 0x54a   :  { %8356 = vst [vmem:[#allocation22 + $0x8] sm:$0xff] %v13231_v48  ;;  %v8017_v19 = vadd.f32 %v8016_v33, %v6344_v7 }
 0x54b   :  { %v8294_v63 = vsub.f32 0.0, %v8003_v60 }
 0x54c   :  { %8246 = vmatpush.bf16.msrb.mxu1 %v11701_v21  ;;  %v13233_v43 = vpop.eup %13232 }
 0x54d   :  { %v13235_v3 = vpop.eup %13234  ;;  %8363 = vst [vmem:[#allocation22 + $0x40] sm:$0xff] %v13233_v43  ;;  %v8317_v32 = vmul.f32 1.442695, %v8294_v63  ;;  %v8044_v21 = vpop.f32.mrf.mxu2 }
 0x54e   :  { %v8329_v5 = vadd.f32 1.0, %v13235_v3 }
 0x54f   :  { %13236 = vpow2.f32 %v8317_v32 }
 0x550   :  { %8247 = vmatpush.bf16.msrb.mxu1 %v11673_v28  ;;  %13238 = vrcp.f32 %v8329_v5  ;;  %v8058_v18 = vpop.f32.mrf.mxu3  ;;  %v6346_v5 = vperm.slane %v13993_v55, 5 }
 0x551   :  { %v8070_v4 = vpop.f32.mrf.mxu0 }
 0x554   :  { %8248 = vmatpush.bf16.msrb.mxu1 %v11645_v9 }
 0x555   :  { %v13237_v61 = vpop.eup %13236 }
 0x556   :  { %v13239_v11 = vpop.eup %13238  ;;  %v8336_v45 = vadd.f32 1.0, %v13237_v61 }
 0x557   :  { %8357 = vst [vmem:[#allocation22 + $0x10] sm:$0xff] %v13239_v11 }
 0x558   :  { %8249 = vmatpush.bf16.msrb.mxu1 %v11617_v52  ;;  %13240 = vrcp.f32 %v8336_v45  ;;  %v8112_v31 = vpop.f32.mrf.mxu3 }
 0x559   :  { %v8072_v22 = vpop.f32.mrf.mxu0 }
 0x55c   :  { %8250 = vmatpush.bf16.msrb.mxu1 %v11589_v30  ;;  %v8028_v14 = vpop.f32.mrf.mxu1 }
 0x55d   :  { %v8029_v16 = vadd.f32 %v8028_v14, %v8015_v37 }
 0x55e   :  { %v13241_v0 = vpop.eup %13240 }
 0x55f   :  { %8251 = vmatmul.bf16.vlgmr.msrb.gmra.mxu1 %v13955_v42  ;;  %v8043_v58 = vadd.f32 %v8042_v12, %v8029_v16  ;;  %8364 = vst [vmem:[#allocation22 + $0x48] sm:$0xff] %v13241_v0 }
 0x560   :  { %v8114_v52 = vpop.f32.mrf.mxu3 }
 0x561   :  { %v8057_v1 = vadd.f32 %v8056_v17, %v8043_v58 }
 0x563   :  { %v8071_v42 = vadd.f32 %v8070_v4, %v8057_v1  ;;  %v8098_v36 = vpop.f32.mrf.mxu2 }
 0x564   :  { %v8030_v59 = vpop.f32.mrf.mxu1  ;;  %v8126_v13 = vpop.f32.mrf.mxu0 }
 0x565   :  { %v8288_v6 = vsub.f32 0.0, %v8071_v42  ;;  %v8031_v20 = vadd.f32 %v8030_v59, %v8017_v19 }
 0x567   :  { %v8305_v15 = vmul.f32 1.442695, %v8288_v6  ;;  %v8045_v23 = vadd.f32 %v8044_v21, %v8031_v20 }
 0x568   :  { %v8168_v33 = vpop.f32.mrf.mxu3 }
 0x569   :  { %13242 = vpow2.f32 %v8305_v15  ;;  %v8059_v24 = vadd.f32 %v8058_v18, %v8045_v23 }
 0x56b   :  { %v8073_v10 = vadd.f32 %v8072_v22, %v8059_v24  ;;  %v8100_v48 = vpop.f32.mrf.mxu2 }
 0x56c   :  { %v8128_v35 = vpop.f32.mrf.mxu0 }
 0x56d   :  { %v8295_v2 = vsub.f32 0.0, %v8073_v10 }
 0x56f   :  { %v13243_v25 = vpop.eup %13242  ;;  %v8319_v41 = vmul.f32 1.442695, %v8295_v2 }
 0x570   :  { %v8330_v26 = vadd.f32 1.0, %v13243_v25  ;;  %v8170_v19 = vpop.f32.mrf.mxu3 }
 0x571   :  { %13244 = vpow2.f32 %v8319_v41 }
 0x572   :  { %13246 = vrcp.f32 %v8330_v26 }
 0x577   :  { %v13245_v28 = vpop.eup %13244 }
 0x578   :  { %v13247_v29 = vpop.eup %13246  ;;  %v8337_v27 = vadd.f32 1.0, %v13245_v28  ;;  %v6347_v28 = vperm.slane %v13993_v55, 6 }
 0x579   :  { %8358 = vst [vmem:[#allocation22 + $0x18] sm:$0xff] %v13247_v29 }
 0x57a   :  { %13248 = vrcp.f32 %v8337_v27 }
 0x57c   :  { %v8084_v8 = vpop.f32.mrf.mxu1 }
 0x57d   :  { %v8085_v51 = vadd.f32 %v8084_v8, %v6345_v34 }
 0x57f   :  { %v8099_v9 = vadd.f32 %v8098_v36, %v8085_v51 }
 0x580   :  { %v13249_v40 = vpop.eup %13248 }
 0x581   :  { %8365 = vst [vmem:[#allocation22 + $0x50] sm:$0xff] %v13249_v40  ;;  %v8113_v47 = vadd.f32 %v8112_v31, %v8099_v9 }
 0x583   :  { %v8127_v53 = vadd.f32 %v8126_v13, %v8113_v47  ;;  %v8154_v62 = vpop.f32.mrf.mxu2 }
 0x584   :  { %v8086_v39 = vpop.f32.mrf.mxu1  ;;  %v8155_v7 = vadd.f32 %v8154_v62, %v6346_v5  ;;  %v8182_v14 = vpop.f32.mrf.mxu0 }
 0x585   :  { %v8087_v57 = vadd.f32 %v8086_v39, %v6345_v34 }
 0x586   :  { %v8169_v12 = vadd.f32 %v8168_v33, %v8155_v7 }
 0x587   :  { %v8101_v50 = vadd.f32 %v8100_v48, %v8087_v57  ;;  %v8224_v10 = vpop.f32.mrf.mxu3 }
 0x588   :  { %v8183_v16 = vadd.f32 %v8182_v14, %v8169_v12  ;;  %v8225_v51 = vadd.f32 %v8224_v10, %v6347_v28 }
 0x589   :  { %v8115_v46 = vadd.f32 %v8114_v52, %v8101_v50 }
 0x58b   :  { %v8129_v49 = vadd.f32 %v8128_v35, %v8115_v46  ;;  %v8156_v11 = vpop.f32.mrf.mxu2 }
 0x58c   :  { %v8157_v17 = vadd.f32 %v8156_v11, %v6346_v5  ;;  %v8184_v20 = vpop.f32.mrf.mxu0 }
 0x58e   :  { %v8171_v42 = vadd.f32 %v8170_v19, %v8157_v17 }
 0x58f   :  { %v8226_v27 = vpop.f32.mrf.mxu3 }
 0x590   :  { %v8185_v21 = vadd.f32 %v8184_v20, %v8171_v42  ;;  %v8227_v50 = vadd.f32 %v8226_v27, %v6347_v28 }
 0x59c   :  { %v8140_v38 = vpop.f32.mrf.mxu1 }
 0x59d   :  { %v8141_v54 = vadd.f32 %v8140_v38, %v8127_v53 }
 0x59f   :  { %v8289_v56 = vsub.f32 0.0, %v8141_v54 }
 0x5a1   :  { %v8307_v44 = vmul.f32 1.442695, %v8289_v56 }
 0x5a2   :  { %v8238_v40 = vpop.f32.mrf.mxu0 }
 0x5a3   :  { %13250 = vpow2.f32 %v8307_v44  ;;  %v8210_v58 = vpop.f32.mrf.mxu2  ;;  %v8239_v36 = vadd.f32 %v8238_v40, %v8225_v51 }
 0x5a4   :  { %v8142_v60 = vpop.f32.mrf.mxu1 }
 0x5a5   :  { %v8143_v30 = vadd.f32 %v8142_v60, %v8129_v49 }
 0x5a7   :  { %v8296_v63 = vsub.f32 0.0, %v8143_v30  ;;  %v8280_v57 = vpop.f32.mrf.mxu3 }
 0x5a9   :  { %v13251_v43 = vpop.eup %13250  ;;  %v8321_v3 = vmul.f32 1.442695, %v8296_v63 }
 0x5aa   :  { %v8331_v32 = vadd.f32 1.0, %v13251_v43  ;;  %v8240_v48 = vpop.f32.mrf.mxu0 }
 0x5ab   :  { %13252 = vpow2.f32 %v8321_v3  ;;  %v8212_v24 = vpop.f32.mrf.mxu2  ;;  %v8241_v55 = vadd.f32 %v8240_v48, %v8227_v50 }
 0x5ac   :  { %13254 = vrcp.f32 %v8331_v32 }
 0x5af   :  { %v8282_v35 = vpop.f32.mrf.mxu3 }
 0x5b1   :  { %v13253_v61 = vpop.eup %13252 }
 0x5b2   :  { %v13255_v45 = vpop.eup %13254  ;;  %v8338_v37 = vadd.f32 1.0, %v13253_v61 }
 0x5b3   :  { %8359 = vst [vmem:[#allocation22 + $0x20] sm:$0xff] %v13255_v45 }
 0x5b4   :  { %13256 = vrcp.f32 %v8338_v37 }
 0x5ba   :  { %v13257_v0 = vpop.eup %13256 }
 0x5bb   :  { %8366 = vst [vmem:[#allocation22 + $0x58] sm:$0xff] %v13257_v0 }
 0x5bc   :  { %v8196_v4 = vpop.f32.mrf.mxu1 }
 0x5bd   :  { %v8197_v1 = vadd.f32 %v8196_v4, %v8183_v16 }
 0x5bf   :  { %v8211_v59 = vadd.f32 %v8210_v58, %v8197_v1 }
 0x5c1   :  { %v8290_v6 = vsub.f32 0.0, %v8211_v59 }
 0x5c3   :  { %v8309_v15 = vmul.f32 1.442695, %v8290_v6  ;;  %v8266_v9 = vpop.f32.mrf.mxu2 }
 0x5c4   :  { %v8198_v23 = vpop.f32.mrf.mxu1 }
 0x5c5   :  { %13258 = vpow2.f32 %v8309_v15  ;;  %v8199_v18 = vadd.f32 %v8198_v23, %v8185_v21 }
 0x5c7   :  { %v8213_v22 = vadd.f32 %v8212_v24, %v8199_v18 }
 0x5c9   :  { %v8297_v2 = vsub.f32 0.0, %v8213_v22 }
 0x5cb   :  { %v13259_v25 = vpop.eup %13258  ;;  %v8323_v41 = vmul.f32 1.442695, %v8297_v2  ;;  %v8268_v46 = vpop.f32.mrf.mxu2 }
 0x5cc   :  { %v8332_v26 = vadd.f32 1.0, %v13259_v25 }
 0x5cd   :  { %13260 = vpow2.f32 %v8323_v41 }
 0x5ce   :  { %13262 = vrcp.f32 %v8332_v26 }
 0x5d3   :  { %v13261_v29 = vpop.eup %13260 }
 0x5d4   :  { %v13263_v8 = vpop.eup %13262  ;;  %v8339_v34 = vadd.f32 1.0, %v13261_v29 }
 0x5d5   :  { %8360 = vst [vmem:[#allocation22 + $0x28] sm:$0xff] %v13263_v8 }
 0x5d6   :  { %13264 = vrcp.f32 %v8339_v34 }
 0x5dc   :  { %v8252_v31 = vpop.f32.mrf.mxu1  ;;  %v13265_v47 = vpop.eup %13264 }
 0x5dd   :  { %v8253_v39 = vadd.f32 %v8252_v31, %v8239_v36  ;;  %8367 = vst [vmem:[#allocation22 + $0x60] sm:$0xff] %v13265_v47 }
 0x5df   :  { %v8267_v13 = vadd.f32 %v8266_v9, %v8253_v39 }
 0x5e1   :  { %v8281_v53 = vadd.f32 %v8280_v57, %v8267_v13 }
 0x5e3   :  { %v8291_v38 = vsub.f32 0.0, %v8281_v53 }
 0x5e4   :  { %v8254_v54 = vpop.f32.mrf.mxu1 }
 0x5e5   :  { %v8311_v52 = vmul.f32 1.442695, %v8291_v38  ;;  %v8255_v56 = vadd.f32 %v8254_v54, %v8241_v55 }
 0x5e7   :  { %13266 = vpow2.f32 %v8311_v52  ;;  %v8269_v44 = vadd.f32 %v8268_v46, %v8255_v56 }
 0x5e9   :  { %v8283_v49 = vadd.f32 %v8282_v35, %v8269_v44 }
 0x5eb   :  { %v8298_v60 = vsub.f32 0.0, %v8283_v49 }
 0x5ed   :  { %v13267_v30 = vpop.eup %13266  ;;  %v8325_v62 = vmul.f32 1.442695, %v8298_v60 }
 0x5ee   :  { %v8333_v63 = vadd.f32 1.0, %v13267_v30 }
 0x5ef   :  { %13268 = vpow2.f32 %v8325_v62 }
 0x5f0   :  { %13270 = vrcp.f32 %v8333_v63 }
 0x5f5   :  { %v13269_v43 = vpop.eup %13268 }
 0x5f6   :  { %v13271_v3 = vpop.eup %13270  ;;  %v8340_v32 = vadd.f32 1.0, %v13269_v43 }
 0x5f7   :  { %8361 = vst [vmem:[#allocation22 + $0x30] sm:$0xff] %v13271_v3 }
 0x5f8   :  { %13272 = vrcp.f32 %v8340_v32 }
 0x5fe   :  { %v13273_v5 = vpop.eup %13272 }
 0x5ff   :  { %8368 = vst [vmem:[#allocation22 + $0x68] sm:$0xff] %v13273_v5 }
 0x600   :  { %8381 = dma.vmem_to_hbm [thread:$0]  %s8374_s23, 1792, %s8376_s25, [#allocation4], %s13621_s26, %s13621_s26, %s13622_s3  }
 0x601   :  { %13600 = dma.done.wait [#allocation4], 1792  }
 0x602   :  { %13601 = vsyncadd [#allocation4], 4294965504 }
 0x603   :  { %8386 = vsyncpa [#allocation3], 1 }
 0x604   :  { %8387 = vsyncpa [#allocation6], 1 }
 0x605   :  { %8388 = vsyncpa [#allocation9], 1 }
 0x606   :  { %8389 = vsyncpa [#allocation12], 1 }
 0x607   :  { %8390 = vsyncpa [#allocation15], 1 }
 0x608   :  { %8391 = vsyncpa [#allocation18], 1 }
 0x609   :  { %8392 = vsyncpa [#allocation21], 1 }
 0x60a   :  { %8393 = vsyncpa [#allocation4], 1 }

</bundles_post_ra>
